<compile_context>
chip_gen: v7x
topology: tpu7x:2x2x1
jax: 0.10.0
libtpu: 0.0.40
codegen_flags: <defaults>
</compile_context>

<pallas_src>
import functools

import jax
import jax.numpy as jnp
import numpy as np
from jax.experimental import pallas as pl
from jax.experimental.pallas import tpu as pltpu


# -----------------------------------------------------------------------------
# In-kernel helpers (pure jnp on VMEM-resident values)
# -----------------------------------------------------------------------------
def _conv_bias_relu(x, w_flat, b, k):
    """SAME-padding KxK conv + bias + ReLU for one image tile.

    x      : (H, W, Cin)        activation (value, lives in VMEM/vregs)
    w_flat : (K*K*Cin, Cout)    folded conv+BN weights, flattened in glue
    b      : (1, Cout)          folded bias
    returns: (H, W, Cout)
    """
    H, W, Cin = x.shape
    P = k // 2
    # Zero-pad in VMEM (no HBM jnp.pad): rows (major axis) first, then cols (sublane).
    zr = jnp.zeros((P, W, Cin), x.dtype)
    xp = jnp.concatenate([zr, x, zr], axis=0)
    zc = jnp.zeros((H + 2 * P, P, Cin), x.dtype)
    xp = jnp.concatenate([zc, xp, zc], axis=1)

    # im2col: gather the k*k shifted taps once -> (H*W, K*K*Cin), then ONE MXU matmul
    # with contraction dim K*K*Cin instead of K*K tiny matmuls of contraction Cin.
    taps = [xp[dy:dy + H, dx:dx + W, :] for dy in range(k) for dx in range(k)]
    cols = jnp.concatenate(taps, axis=-1).reshape(H * W, k * k * Cin)

    y = jnp.dot(cols, w_flat, preferred_element_type=jnp.float32)
    y = jnp.maximum(y + b, 0.0)                      # bias + ReLU (f32 epilogue)
    return y.reshape(H, W, w_flat.shape[1])


def _maxpool2x2(x):
    """2x2 max-pool, stride 2, on a (H, W, C) value kept in VMEM."""
    H, W, C = x.shape
    x = jnp.max(x.reshape(H // 2, 2, W, C), axis=1)       # pool along H (major dim)
    x = jnp.max(x.reshape(H // 2, W // 2, 2, C), axis=2)  # pool along W
    return x


# -----------------------------------------------------------------------------
# Fused encoder kernel: inc (DoubleConv) -> down1 (pool+DoubleConv) -> down2
# -----------------------------------------------------------------------------
def _encoder_fused_kernel(x_ref,
                          w1a, b1a, w1b, b1b,
                          w2a, b2a, w2b, b2b,
                          w3a, b3a, w3b, b3b,
                          x1_ref, x2_ref, x3_ref, *, k):
    x = x_ref[...]                                   # (H, W, Cin)

    # inc = DoubleConv(in_channels, ch1)
    h = _conv_bias_relu(x, w1a[...], b1a[...], k)
    x1 = _conv_bias_relu(h, w1b[...], b1b[...], k)
    x1_ref[...] = x1.astype(x1_ref.dtype)

    # down1 = MaxPool2d(2) + DoubleConv(ch1, ch2)
    p = _maxpool2x2(x1)
    h = _conv_bias_relu(p, w2a[...], b2a[...], k)
    x2 = _conv_bias_relu(h, w2b[...], b2b[...], k)
    x2_ref[...] = x2.astype(x2_ref.dtype)

    # down2 = MaxPool2d(2) + DoubleConv(ch2, ch3)
    p = _maxpool2x2(x2)
    h = _conv_bias_relu(p, w3a[...], b3a[...], k)
    x3 = _conv_bias_relu(h, w3b[...], b3b[...], k)
    x3_ref[...] = x3.astype(x3_ref.dtype)


# -----------------------------------------------------------------------------
# Parameter construction (deterministic), BN folded into conv (eval mode)
# -----------------------------------------------------------------------------
def adjusted_out_channels(base_channels, old_kernel, new_kernel):
    scale = old_kernel ** 2 / new_kernel ** 2
    return int(base_channels * scale)


def _make_conv_bn_params(key, cin, cout, k):
    kw, kb, kg, kbe, km, kv = jax.random.split(key, 6)
    std = (2.0 / (cin * k * k)) ** 0.5
    w = jax.random.normal(kw, (k, k, cin, cout), jnp.float32) * std      # HWIO
    b = jax.random.normal(kb, (cout,), jnp.float32) * 0.01
    gamma = 1.0 + 0.1 * jax.random.normal(kg, (cout,), jnp.float32)
    beta = 0.1 * jax.random.normal(kbe, (cout,), jnp.float32)
    run_mean = 0.1 * jax.random.normal(km, (cout,), jnp.float32)
    run_var = 1.0 + 0.1 * jax.random.uniform(kv, (cout,), jnp.float32)
    eps = 1e-5
    scale = gamma / jnp.sqrt(run_var + eps)
    w_folded = w * scale[None, None, None, :]
    b_folded = (b - run_mean) * scale + beta
    return w_folded, b_folded                       # HWIO weights, (Cout,) bias


def make_encoder_params(key, in_channels, kernel_size=3):
    ch1 = adjusted_out_channels(32, 3, kernel_size)
    ch2 = adjusted_out_channels(ch1 * 2, 3, kernel_size)
    ch3 = adjusted_out_channels(ch2 * 2, 3, kernel_size)
    keys = jax.random.split(key, 6)
    return {
        "inc_a":   _make_conv_bn_params(keys[0], in_channels, ch1, kernel_size),
        "inc_b":   _make_conv_bn_params(keys[1], ch1, ch1, kernel_size),
        "down1_a": _make_conv_bn_params(keys[2], ch1, ch2, kernel_size),
        "down1_b": _make_conv_bn_params(keys[3], ch2, ch2, kernel_size),
        "down2_a": _make_conv_bn_params(keys[4], ch2, ch3, kernel_size),
        "down2_b": _make_conv_bn_params(keys[5], ch3, ch3, kernel_size),
    }


# -----------------------------------------------------------------------------
# Forward pass (mirrors EncoderSmallDynamic.forward)
# -----------------------------------------------------------------------------
def _flatten_conv(w_hwio, bias):
    """Glue: (K,K,Cin,Cout) -> (K*K*Cin, Cout), bias -> (1, Cout)."""
    K, _, Cin, Cout = w_hwio.shape
    return w_hwio.reshape(K * K * Cin, Cout), bias.reshape(1, Cout)


@functools.partial(jax.jit, static_argnames=("kernel_size",))
def encoder_small_dynamic_forward(x_nchw, params, kernel_size=3):
    N, Cin, H, W = x_nchw.shape
    K = kernel_size

    # NCHW -> NHWC (glue)
    x = jnp.transpose(x_nchw, (0, 2, 3, 1)).astype(jnp.float32)

    flat = []
    for name in ("inc_a", "inc_b", "down1_a", "down1_b", "down2_a", "down2_b"):
        wf, bf = _flatten_conv(*params[name])
        flat += [wf, bf]

    ch1 = params["inc_a"][0].shape[-1]
    ch2 = params["down1_a"][0].shape[-1]
    ch3 = params["down2_a"][0].shape[-1]
    H2, W2, H4, W4 = H // 2, W // 2, H // 4, W // 4

    def _const2d(a):
        return pl.BlockSpec(a.shape, lambda n: (0, 0))

    in_specs = [pl.BlockSpec((None, H, W, Cin), lambda n: (n, 0, 0, 0))]
    in_specs += [_const2d(a) for a in flat]

    out_shape = (
        jax.ShapeDtypeStruct((N, H, W, ch1), jnp.float32),
        jax.ShapeDtypeStruct((N, H2, W2, ch2), jnp.float32),
        jax.ShapeDtypeStruct((N, H4, W4, ch3), jnp.float32),
    )
    out_specs = (
        pl.BlockSpec((None, H, W, ch1), lambda n: (n, 0, 0, 0)),
        pl.BlockSpec((None, H2, W2, ch2), lambda n: (n, 0, 0, 0)),
        pl.BlockSpec((None, H4, W4, ch3), lambda n: (n, 0, 0, 0)),
    )

    x1, x2, x3 = pl.pallas_call(
        functools.partial(_encoder_fused_kernel, k=K),
        out_shape=out_shape,
        grid=(N,),
        in_specs=in_specs,
        out_specs=out_specs,
        compiler_params=pltpu.CompilerParams(
            dimension_semantics=("parallel",)),
    )(x, *flat)

    # NHWC -> NCHW to match the PyTorch return convention (glue)
    to_nchw = lambda t: jnp.transpose(t, (0, 3, 1, 2))
    return to_nchw(x1), to_nchw(x2), to_nchw(x3)


# -----------------------------------------------------------------------------
# Pure-JAX reference (correctness check of the Pallas path)
# -----------------------------------------------------------------------------
def _ref_conv_bn_relu(x_nhwc, w_hwio, bias):
    y = jax.lax.conv_general_dilated(
        x_nhwc, w_hwio, window_strides=(1, 1), padding="SAME",
        dimension_numbers=("NHWC", "HWIO", "NHWC"),
        precision=jax.lax.Precision.HIGHEST)
    return jnp.maximum(y + bias[None, None, None, :], 0.0)


def _ref_maxpool2(x):
    return jax.lax.reduce_window(x, -jnp.inf, jax.lax.max,
                                 (1, 2, 2, 1), (1, 2, 2, 1), "VALID")


def _ref_forward(x_nchw, params):
    x = jnp.transpose(x_nchw, (0, 2, 3, 1)).astype(jnp.float32)
    h = _ref_conv_bn_relu(x, *params["inc_a"])
    x1 = _ref_conv_bn_relu(h, *params["inc_b"])
    p = _ref_maxpool2(x1)
    h = _ref_conv_bn_relu(p, *params["down1_a"])
    x2 = _ref_conv_bn_relu(h, *params["down1_b"])
    p = _ref_maxpool2(x2)
    h = _ref_conv_bn_relu(p, *params["down2_a"])
    x3 = _ref_conv_bn_relu(h, *params["down2_b"])
    to_nchw = lambda t: jnp.transpose(t, (0, 3, 1, 2))
    return to_nchw(x1), to_nchw(x2), to_nchw(x3)


# -----------------------------------------------------------------------------
if __name__ == "__main__":
    key = jax.random.PRNGKey(0)
    k_x, k_p = jax.random.split(key)

    N, C_IN, H, W = 2, 4, 16, 16                 # small NCHW input
    KS = 3                                       # EncoderSmallDynamic default kernel_size
    x = jax.random.normal(k_x, (N, C_IN, H, W), jnp.float32)
    params = make_encoder_params(k_p, C_IN, kernel_size=KS)

    ch1 = adjusted_out_channels(32, 3, KS)       # 32
    ch2 = adjusted_out_channels(ch1 * 2, 3, KS)  # 64
    ch3 = adjusted_out_channels(ch2 * 2, 3, KS)  # 128

    x1, x2, x3 = encoder_small_dynamic_forward(x, params, kernel_size=KS)
    jax.block_until_ready((x1, x2, x3))

    assert x1.shape == (N, ch1, H, W), x1.shape
    assert x2.shape == (N, ch2, H // 2, W // 2), x2.shape
    assert x3.shape == (N, ch3, H // 4, W // 4), x3.shape

    r1, r2, r3 = _ref_forward(x, params)
    np.testing.assert_allclose(np.asarray(x1), np.asarray(r1), rtol=1e-2, atol=1e-2)
    np.testing.assert_allclose(np.asarray(x2), np.asarray(r2), rtol=1e-2, atol=1e-2)
    np.testing.assert_allclose(np.asarray(x3), np.asarray(r3), rtol=1e-2, atol=1e-2)

    print("KERNEL_OK")
</pallas_src>

<mosaic_0001>
module attributes {stable_mosaic.version = 11 : i64} {
  func.func @_encoder_fused_kernel(%arg0: i32, %arg1: memref<1x16x16x4xf32, #tpu.memory_space<vmem>>, %arg2: memref<36x32xf32, #tpu.memory_space<vmem>>, %arg3: memref<1x32xf32, #tpu.memory_space<vmem>>, %arg4: memref<288x32xf32, #tpu.memory_space<vmem>>, %arg5: memref<1x32xf32, #tpu.memory_space<vmem>>, %arg6: memref<288x64xf32, #tpu.memory_space<vmem>>, %arg7: memref<1x64xf32, #tpu.memory_space<vmem>>, %arg8: memref<576x64xf32, #tpu.memory_space<vmem>>, %arg9: memref<1x64xf32, #tpu.memory_space<vmem>>, %arg10: memref<576x128xf32, #tpu.memory_space<vmem>>, %arg11: memref<1x128xf32, #tpu.memory_space<vmem>>, %arg12: memref<1152x128xf32, #tpu.memory_space<vmem>>, %arg13: memref<1x128xf32, #tpu.memory_space<vmem>>, %arg14: memref<1x16x16x32xf32, #tpu.memory_space<vmem>>, %arg15: memref<1x8x8x64xf32, #tpu.memory_space<vmem>>, %arg16: memref<1x4x4x128xf32, #tpu.memory_space<vmem>>) attributes {dimension_semantics = [#tpu.dimension_semantics<parallel>], iteration_bounds = array<i64: 2>, scalar_prefetch = 0 : i64, scratch_operands = 0 : i64, tpu.core_type = #tpu.core_type<tc>, window_params = [{transform_indices = @transform_0, window_bounds = array<i64: 1, 16, 16, 4>}, {pipeline_mode = #tpu.pipeline_mode<synchronous>, transform_indices = @transform_1, window_bounds = array<i64: 36, 32>}, {pipeline_mode = #tpu.pipeline_mode<synchronous>, transform_indices = @transform_2, window_bounds = array<i64: 1, 32>}, {pipeline_mode = #tpu.pipeline_mode<synchronous>, transform_indices = @transform_3, window_bounds = array<i64: 288, 32>}, {pipeline_mode = #tpu.pipeline_mode<synchronous>, transform_indices = @transform_4, window_bounds = array<i64: 1, 32>}, {pipeline_mode = #tpu.pipeline_mode<synchronous>, transform_indices = @transform_5, window_bounds = array<i64: 288, 64>}, {pipeline_mode = #tpu.pipeline_mode<synchronous>, transform_indices = @transform_6, window_bounds = array<i64: 1, 64>}, {pipeline_mode = #tpu.pipeline_mode<synchronous>, transform_indices = @transform_7, window_bounds = array<i64: 576, 64>}, {pipeline_mode = #tpu.pipeline_mode<synchronous>, transform_indices = @transform_8, window_bounds = array<i64: 1, 64>}, {pipeline_mode = #tpu.pipeline_mode<synchronous>, transform_indices = @transform_9, window_bounds = array<i64: 576, 128>}, {pipeline_mode = #tpu.pipeline_mode<synchronous>, transform_indices = @transform_10, window_bounds = array<i64: 1, 128>}, {pipeline_mode = #tpu.pipeline_mode<synchronous>, transform_indices = @transform_11, window_bounds = array<i64: 1152, 128>}, {pipeline_mode = #tpu.pipeline_mode<synchronous>, transform_indices = @transform_12, window_bounds = array<i64: 1, 128>}, {transform_indices = @transform_13, window_bounds = array<i64: 1, 16, 16, 32>}, {transform_indices = @transform_14, window_bounds = array<i64: 1, 8, 8, 64>}, {transform_indices = @transform_15, window_bounds = array<i64: 1, 4, 4, 128>}]} {
    %c0 = arith.constant 0 : index
    %c0_0 = arith.constant 0 : index
    %c0_1 = arith.constant 0 : index
    %c0_2 = arith.constant 0 : index
    %0 = vector.load %arg1[%c0, %c0_0, %c0_1, %c0_2] : memref<1x16x16x4xf32, #tpu.memory_space<vmem>>, vector<1x16x16x4xf32>
    %1 = vector.shape_cast %0 : vector<1x16x16x4xf32> to vector<16x16x4xf32>
    %c0_3 = arith.constant 0 : index
    %c0_4 = arith.constant 0 : index
    %2 = vector.load %arg2[%c0_3, %c0_4] : memref<36x32xf32, #tpu.memory_space<vmem>>, vector<36x32xf32>
    %c0_5 = arith.constant 0 : index
    %c0_6 = arith.constant 0 : index
    %3 = vector.load %arg3[%c0_5, %c0_6] : memref<1x32xf32, #tpu.memory_space<vmem>>, vector<1x32xf32>
    %cst = arith.constant 0.000000e+00 : f32
    %4 = vector.broadcast %cst : f32 to vector<1x16x4xf32>
    %5 = tpu.concatenate %4, %1, %4 in 0 : vector<1x16x4xf32>, vector<16x16x4xf32>, vector<1x16x4xf32> -> vector<18x16x4xf32>
    %cst_7 = arith.constant 0.000000e+00 : f32
    %6 = vector.broadcast %cst_7 : f32 to vector<18x1x4xf32>
    %7 = tpu.concatenate %6, %5, %6 in 1 : vector<18x1x4xf32>, vector<18x16x4xf32>, vector<18x1x4xf32> -> vector<18x18x4xf32>
    %8 = vector.extract_strided_slice %7 {offsets = [0, 0, 0], sizes = [16, 16, 4], strides = [1, 1, 1]} : vector<18x18x4xf32> to vector<16x16x4xf32>
    %9 = vector.extract_strided_slice %7 {offsets = [0, 1, 0], sizes = [16, 16, 4], strides = [1, 1, 1]} : vector<18x18x4xf32> to vector<16x16x4xf32>
    %10 = vector.extract_strided_slice %7 {offsets = [0, 2, 0], sizes = [16, 16, 4], strides = [1, 1, 1]} : vector<18x18x4xf32> to vector<16x16x4xf32>
    %11 = vector.extract_strided_slice %7 {offsets = [1, 0, 0], sizes = [16, 16, 4], strides = [1, 1, 1]} : vector<18x18x4xf32> to vector<16x16x4xf32>
    %12 = vector.extract_strided_slice %7 {offsets = [1, 1, 0], sizes = [16, 16, 4], strides = [1, 1, 1]} : vector<18x18x4xf32> to vector<16x16x4xf32>
    %13 = vector.extract_strided_slice %7 {offsets = [1, 2, 0], sizes = [16, 16, 4], strides = [1, 1, 1]} : vector<18x18x4xf32> to vector<16x16x4xf32>
    %14 = vector.extract_strided_slice %7 {offsets = [2, 0, 0], sizes = [16, 16, 4], strides = [1, 1, 1]} : vector<18x18x4xf32> to vector<16x16x4xf32>
    %15 = vector.extract_strided_slice %7 {offsets = [2, 1, 0], sizes = [16, 16, 4], strides = [1, 1, 1]} : vector<18x18x4xf32> to vector<16x16x4xf32>
    %16 = vector.extract_strided_slice %7 {offsets = [2, 2, 0], sizes = [16, 16, 4], strides = [1, 1, 1]} : vector<18x18x4xf32> to vector<16x16x4xf32>
    %17 = tpu.concatenate %8, %9, %10, %11, %12, %13, %14, %15, %16 in 2 : vector<16x16x4xf32>, vector<16x16x4xf32>, vector<16x16x4xf32>, vector<16x16x4xf32>, vector<16x16x4xf32>, vector<16x16x4xf32>, vector<16x16x4xf32>, vector<16x16x4xf32>, vector<16x16x4xf32> -> vector<16x16x36xf32>
    %18 = vector.shape_cast %17 : vector<16x16x36xf32> to vector<256x36xf32>
    %cst_8 = arith.constant dense<0.000000e+00> : vector<256x32xf32>
    %19 = tpu.matmul %18, %2, %cst_8 {dimension_numbers = #tpu.dot_dimension_numbers<[1], [0], [0], [1], [0, 0, 1, 1], [], []>} : vector<256x36xf32>, vector<36x32xf32>, vector<256x32xf32> -> vector<256x32xf32>
    %20 = vector.broadcast %3 : vector<1x32xf32> to vector<256x32xf32>
    %21 = arith.addf %19, %20 : vector<256x32xf32>
    %cst_9 = arith.constant 0.000000e+00 : f32
    %22 = vector.broadcast %cst_9 : f32 to vector<256x32xf32>
    %23 = arith.maximumf %21, %22 : vector<256x32xf32>
    %24 = vector.shape_cast %23 : vector<256x32xf32> to vector<16x16x32xf32>
    %c0_10 = arith.constant 0 : index
    %c0_11 = arith.constant 0 : index
    %25 = vector.load %arg4[%c0_10, %c0_11] : memref<288x32xf32, #tpu.memory_space<vmem>>, vector<288x32xf32>
    %c0_12 = arith.constant 0 : index
    %c0_13 = arith.constant 0 : index
    %26 = vector.load %arg5[%c0_12, %c0_13] : memref<1x32xf32, #tpu.memory_space<vmem>>, vector<1x32xf32>
    %cst_14 = arith.constant 0.000000e+00 : f32
    %27 = vector.broadcast %cst_14 : f32 to vector<1x16x32xf32>
    %28 = tpu.concatenate %27, %24, %27 in 0 : vector<1x16x32xf32>, vector<16x16x32xf32>, vector<1x16x32xf32> -> vector<18x16x32xf32>
    %cst_15 = arith.constant 0.000000e+00 : f32
    %29 = vector.broadcast %cst_15 : f32 to vector<18x1x32xf32>
    %30 = tpu.concatenate %29, %28, %29 in 1 : vector<18x1x32xf32>, vector<18x16x32xf32>, vector<18x1x32xf32> -> vector<18x18x32xf32>
    %31 = vector.extract_strided_slice %30 {offsets = [0, 0, 0], sizes = [16, 16, 32], strides = [1, 1, 1]} : vector<18x18x32xf32> to vector<16x16x32xf32>
    %32 = vector.extract_strided_slice %30 {offsets = [0, 1, 0], sizes = [16, 16, 32], strides = [1, 1, 1]} : vector<18x18x32xf32> to vector<16x16x32xf32>
    %33 = vector.extract_strided_slice %30 {offsets = [0, 2, 0], sizes = [16, 16, 32], strides = [1, 1, 1]} : vector<18x18x32xf32> to vector<16x16x32xf32>
    %34 = vector.extract_strided_slice %30 {offsets = [1, 0, 0], sizes = [16, 16, 32], strides = [1, 1, 1]} : vector<18x18x32xf32> to vector<16x16x32xf32>
    %35 = vector.extract_strided_slice %30 {offsets = [1, 1, 0], sizes = [16, 16, 32], strides = [1, 1, 1]} : vector<18x18x32xf32> to vector<16x16x32xf32>
    %36 = vector.extract_strided_slice %30 {offsets = [1, 2, 0], sizes = [16, 16, 32], strides = [1, 1, 1]} : vector<18x18x32xf32> to vector<16x16x32xf32>
    %37 = vector.extract_strided_slice %30 {offsets = [2, 0, 0], sizes = [16, 16, 32], strides = [1, 1, 1]} : vector<18x18x32xf32> to vector<16x16x32xf32>
    %38 = vector.extract_strided_slice %30 {offsets = [2, 1, 0], sizes = [16, 16, 32], strides = [1, 1, 1]} : vector<18x18x32xf32> to vector<16x16x32xf32>
    %39 = vector.extract_strided_slice %30 {offsets = [2, 2, 0], sizes = [16, 16, 32], strides = [1, 1, 1]} : vector<18x18x32xf32> to vector<16x16x32xf32>
    %40 = tpu.concatenate %31, %32, %33, %34, %35, %36, %37, %38, %39 in 2 : vector<16x16x32xf32>, vector<16x16x32xf32>, vector<16x16x32xf32>, vector<16x16x32xf32>, vector<16x16x32xf32>, vector<16x16x32xf32>, vector<16x16x32xf32>, vector<16x16x32xf32>, vector<16x16x32xf32> -> vector<16x16x288xf32>
    %41 = vector.shape_cast %40 : vector<16x16x288xf32> to vector<256x288xf32>
    %cst_16 = arith.constant dense<0.000000e+00> : vector<256x32xf32>
    %42 = tpu.matmul %41, %25, %cst_16 {dimension_numbers = #tpu.dot_dimension_numbers<[1], [0], [0], [1], [0, 0, 1, 1], [], []>} : vector<256x288xf32>, vector<288x32xf32>, vector<256x32xf32> -> vector<256x32xf32>
    %43 = vector.broadcast %26 : vector<1x32xf32> to vector<256x32xf32>
    %44 = arith.addf %42, %43 : vector<256x32xf32>
    %cst_17 = arith.constant 0.000000e+00 : f32
    %45 = vector.broadcast %cst_17 : f32 to vector<256x32xf32>
    %46 = arith.maximumf %44, %45 : vector<256x32xf32>
    %47 = vector.shape_cast %46 : vector<256x32xf32> to vector<16x16x32xf32>
    %c0_18 = arith.constant 0 : index
    %c0_19 = arith.constant 0 : index
    %c0_20 = arith.constant 0 : index
    %c0_21 = arith.constant 0 : index
    %48 = vector.load %arg14[%c0_18, %c0_19, %c0_20, %c0_21] : memref<1x16x16x32xf32, #tpu.memory_space<vmem>>, vector<1x16x16x32xf32>
    %49 = vector.shape_cast %48 : vector<1x16x16x32xf32> to vector<16x16x32xf32>
    %50 = vector.shape_cast %47 : vector<16x16x32xf32> to vector<1x16x16x32xf32>
    tpu.vector_store %arg14[%c0_18, %c0_19, %c0_20, %c0_21], %50 {strides = array<i32>} : memref<1x16x16x32xf32, #tpu.memory_space<vmem>>, vector<1x16x16x32xf32>,
    %51 = vector.shape_cast %47 : vector<16x16x32xf32> to vector<8x2x16x32xf32>
    %cst_22 = arith.constant dense<0xFF800000> : vector<8x16x32xf32>
    %52 = vector.multi_reduction <maximumf>, %51, %cst_22 [1] : vector<8x2x16x32xf32> to vector<8x16x32xf32>
    %53 = vector.shape_cast %52 : vector<8x16x32xf32> to vector<8x8x2x32xf32>
    %cst_23 = arith.constant dense<0xFF800000> : vector<8x8x32xf32>
    %54 = vector.multi_reduction <maximumf>, %53, %cst_23 [2] : vector<8x8x2x32xf32> to vector<8x8x32xf32>
    %c0_24 = arith.constant 0 : index
    %c0_25 = arith.constant 0 : index
    %55 = vector.load %arg6[%c0_24, %c0_25] : memref<288x64xf32, #tpu.memory_space<vmem>>, vector<288x64xf32>
    %c0_26 = arith.constant 0 : index
    %c0_27 = arith.constant 0 : index
    %56 = vector.load %arg7[%c0_26, %c0_27] : memref<1x64xf32, #tpu.memory_space<vmem>>, vector<1x64xf32>
    %cst_28 = arith.constant 0.000000e+00 : f32
    %57 = vector.broadcast %cst_28 : f32 to vector<1x8x32xf32>
    %58 = tpu.concatenate %57, %54, %57 in 0 : vector<1x8x32xf32>, vector<8x8x32xf32>, vector<1x8x32xf32> -> vector<10x8x32xf32>
    %cst_29 = arith.constant 0.000000e+00 : f32
    %59 = vector.broadcast %cst_29 : f32 to vector<10x1x32xf32>
    %60 = tpu.concatenate %59, %58, %59 in 1 : vector<10x1x32xf32>, vector<10x8x32xf32>, vector<10x1x32xf32> -> vector<10x10x32xf32>
    %61 = vector.extract_strided_slice %60 {offsets = [0, 0, 0], sizes = [8, 8, 32], strides = [1, 1, 1]} : vector<10x10x32xf32> to vector<8x8x32xf32>
    %62 = vector.extract_strided_slice %60 {offsets = [0, 1, 0], sizes = [8, 8, 32], strides = [1, 1, 1]} : vector<10x10x32xf32> to vector<8x8x32xf32>
    %63 = vector.extract_strided_slice %60 {offsets = [0, 2, 0], sizes = [8, 8, 32], strides = [1, 1, 1]} : vector<10x10x32xf32> to vector<8x8x32xf32>
    %64 = vector.extract_strided_slice %60 {offsets = [1, 0, 0], sizes = [8, 8, 32], strides = [1, 1, 1]} : vector<10x10x32xf32> to vector<8x8x32xf32>
    %65 = vector.extract_strided_slice %60 {offsets = [1, 1, 0], sizes = [8, 8, 32], strides = [1, 1, 1]} : vector<10x10x32xf32> to vector<8x8x32xf32>
    %66 = vector.extract_strided_slice %60 {offsets = [1, 2, 0], sizes = [8, 8, 32], strides = [1, 1, 1]} : vector<10x10x32xf32> to vector<8x8x32xf32>
    %67 = vector.extract_strided_slice %60 {offsets = [2, 0, 0], sizes = [8, 8, 32], strides = [1, 1, 1]} : vector<10x10x32xf32> to vector<8x8x32xf32>
    %68 = vector.extract_strided_slice %60 {offsets = [2, 1, 0], sizes = [8, 8, 32], strides = [1, 1, 1]} : vector<10x10x32xf32> to vector<8x8x32xf32>
    %69 = vector.extract_strided_slice %60 {offsets = [2, 2, 0], sizes = [8, 8, 32], strides = [1, 1, 1]} : vector<10x10x32xf32> to vector<8x8x32xf32>
    %70 = tpu.concatenate %61, %62, %63, %64, %65, %66, %67, %68, %69 in 2 : vector<8x8x32xf32>, vector<8x8x32xf32>, vector<8x8x32xf32>, vector<8x8x32xf32>, vector<8x8x32xf32>, vector<8x8x32xf32>, vector<8x8x32xf32>, vector<8x8x32xf32>, vector<8x8x32xf32> -> vector<8x8x288xf32>
    %71 = vector.shape_cast %70 : vector<8x8x288xf32> to vector<64x288xf32>
    %cst_30 = arith.constant dense<0.000000e+00> : vector<64x64xf32>
    %72 = tpu.matmul %71, %55, %cst_30 {dimension_numbers = #tpu.dot_dimension_numbers<[1], [0], [0], [1], [0, 0, 1, 1], [], []>} : vector<64x288xf32>, vector<288x64xf32>, vector<64x64xf32> -> vector<64x64xf32>
    %73 = vector.broadcast %56 : vector<1x64xf32> to vector<64x64xf32>
    %74 = arith.addf %72, %73 : vector<64x64xf32>
    %cst_31 = arith.constant 0.000000e+00 : f32
    %75 = vector.broadcast %cst_31 : f32 to vector<64x64xf32>
    %76 = arith.maximumf %74, %75 : vector<64x64xf32>
    %77 = vector.shape_cast %76 : vector<64x64xf32> to vector<8x8x64xf32>
    %c0_32 = arith.constant 0 : index
    %c0_33 = arith.constant 0 : index
    %78 = vector.load %arg8[%c0_32, %c0_33] : memref<576x64xf32, #tpu.memory_space<vmem>>, vector<576x64xf32>
    %c0_34 = arith.constant 0 : index
    %c0_35 = arith.constant 0 : index
    %79 = vector.load %arg9[%c0_34, %c0_35] : memref<1x64xf32, #tpu.memory_space<vmem>>, vector<1x64xf32>
    %cst_36 = arith.constant 0.000000e+00 : f32
    %80 = vector.broadcast %cst_36 : f32 to vector<1x8x64xf32>
    %81 = tpu.concatenate %80, %77, %80 in 0 : vector<1x8x64xf32>, vector<8x8x64xf32>, vector<1x8x64xf32> -> vector<10x8x64xf32>
    %cst_37 = arith.constant 0.000000e+00 : f32
    %82 = vector.broadcast %cst_37 : f32 to vector<10x1x64xf32>
    %83 = tpu.concatenate %82, %81, %82 in 1 : vector<10x1x64xf32>, vector<10x8x64xf32>, vector<10x1x64xf32> -> vector<10x10x64xf32>
    %84 = vector.extract_strided_slice %83 {offsets = [0, 0, 0], sizes = [8, 8, 64], strides = [1, 1, 1]} : vector<10x10x64xf32> to vector<8x8x64xf32>
    %85 = vector.extract_strided_slice %83 {offsets = [0, 1, 0], sizes = [8, 8, 64], strides = [1, 1, 1]} : vector<10x10x64xf32> to vector<8x8x64xf32>
    %86 = vector.extract_strided_slice %83 {offsets = [0, 2, 0], sizes = [8, 8, 64], strides = [1, 1, 1]} : vector<10x10x64xf32> to vector<8x8x64xf32>
    %87 = vector.extract_strided_slice %83 {offsets = [1, 0, 0], sizes = [8, 8, 64], strides = [1, 1, 1]} : vector<10x10x64xf32> to vector<8x8x64xf32>
    %88 = vector.extract_strided_slice %83 {offsets = [1, 1, 0], sizes = [8, 8, 64], strides = [1, 1, 1]} : vector<10x10x64xf32> to vector<8x8x64xf32>
    %89 = vector.extract_strided_slice %83 {offsets = [1, 2, 0], sizes = [8, 8, 64], strides = [1, 1, 1]} : vector<10x10x64xf32> to vector<8x8x64xf32>
    %90 = vector.extract_strided_slice %83 {offsets = [2, 0, 0], sizes = [8, 8, 64], strides = [1, 1, 1]} : vector<10x10x64xf32> to vector<8x8x64xf32>
    %91 = vector.extract_strided_slice %83 {offsets = [2, 1, 0], sizes = [8, 8, 64], strides = [1, 1, 1]} : vector<10x10x64xf32> to vector<8x8x64xf32>
    %92 = vector.extract_strided_slice %83 {offsets = [2, 2, 0], sizes = [8, 8, 64], strides = [1, 1, 1]} : vector<10x10x64xf32> to vector<8x8x64xf32>
    %93 = tpu.concatenate %84, %85, %86, %87, %88, %89, %90, %91, %92 in 2 : vector<8x8x64xf32>, vector<8x8x64xf32>, vector<8x8x64xf32>, vector<8x8x64xf32>, vector<8x8x64xf32>, vector<8x8x64xf32>, vector<8x8x64xf32>, vector<8x8x64xf32>, vector<8x8x64xf32> -> vector<8x8x576xf32>
    %94 = vector.shape_cast %93 : vector<8x8x576xf32> to vector<64x576xf32>
    %cst_38 = arith.constant dense<0.000000e+00> : vector<64x64xf32>
    %95 = tpu.matmul %94, %78, %cst_38 {dimension_numbers = #tpu.dot_dimension_numbers<[1], [0], [0], [1], [0, 0, 1, 1], [], []>} : vector<64x576xf32>, vector<576x64xf32>, vector<64x64xf32> -> vector<64x64xf32>
    %96 = vector.broadcast %79 : vector<1x64xf32> to vector<64x64xf32>
    %97 = arith.addf %95, %96 : vector<64x64xf32>
    %cst_39 = arith.constant 0.000000e+00 : f32
    %98 = vector.broadcast %cst_39 : f32 to vector<64x64xf32>
    %99 = arith.maximumf %97, %98 : vector<64x64xf32>
    %100 = vector.shape_cast %99 : vector<64x64xf32> to vector<8x8x64xf32>
    %c0_40 = arith.constant 0 : index
    %c0_41 = arith.constant 0 : index
    %c0_42 = arith.constant 0 : index
    %c0_43 = arith.constant 0 : index
    %101 = vector.load %arg15[%c0_40, %c0_41, %c0_42, %c0_43] : memref<1x8x8x64xf32, #tpu.memory_space<vmem>>, vector<1x8x8x64xf32>
    %102 = vector.shape_cast %101 : vector<1x8x8x64xf32> to vector<8x8x64xf32>
    %103 = vector.shape_cast %100 : vector<8x8x64xf32> to vector<1x8x8x64xf32>
    tpu.vector_store %arg15[%c0_40, %c0_41, %c0_42, %c0_43], %103 {strides = array<i32>} : memref<1x8x8x64xf32, #tpu.memory_space<vmem>>, vector<1x8x8x64xf32>,
    %104 = vector.shape_cast %100 : vector<8x8x64xf32> to vector<4x2x8x64xf32>
    %cst_44 = arith.constant dense<0xFF800000> : vector<4x8x64xf32>
    %105 = vector.multi_reduction <maximumf>, %104, %cst_44 [1] : vector<4x2x8x64xf32> to vector<4x8x64xf32>
    %106 = vector.shape_cast %105 : vector<4x8x64xf32> to vector<4x4x2x64xf32>
    %cst_45 = arith.constant dense<0xFF800000> : vector<4x4x64xf32>
    %107 = vector.multi_reduction <maximumf>, %106, %cst_45 [2] : vector<4x4x2x64xf32> to vector<4x4x64xf32>
    %c0_46 = arith.constant 0 : index
    %c0_47 = arith.constant 0 : index
    %108 = vector.load %arg10[%c0_46, %c0_47] : memref<576x128xf32, #tpu.memory_space<vmem>>, vector<576x128xf32>
    %c0_48 = arith.constant 0 : index
    %c0_49 = arith.constant 0 : index
    %109 = vector.load %arg11[%c0_48, %c0_49] : memref<1x128xf32, #tpu.memory_space<vmem>>, vector<1x128xf32>
    %cst_50 = arith.constant 0.000000e+00 : f32
    %110 = vector.broadcast %cst_50 : f32 to vector<1x4x64xf32>
    %111 = tpu.concatenate %110, %107, %110 in 0 : vector<1x4x64xf32>, vector<4x4x64xf32>, vector<1x4x64xf32> -> vector<6x4x64xf32>
    %cst_51 = arith.constant 0.000000e+00 : f32
    %112 = vector.broadcast %cst_51 : f32 to vector<6x1x64xf32>
    %113 = tpu.concatenate %112, %111, %112 in 1 : vector<6x1x64xf32>, vector<6x4x64xf32>, vector<6x1x64xf32> -> vector<6x6x64xf32>
    %114 = vector.extract_strided_slice %113 {offsets = [0, 0, 0], sizes = [4, 4, 64], strides = [1, 1, 1]} : vector<6x6x64xf32> to vector<4x4x64xf32>
    %115 = vector.extract_strided_slice %113 {offsets = [0, 1, 0], sizes = [4, 4, 64], strides = [1, 1, 1]} : vector<6x6x64xf32> to vector<4x4x64xf32>
    %116 = vector.extract_strided_slice %113 {offsets = [0, 2, 0], sizes = [4, 4, 64], strides = [1, 1, 1]} : vector<6x6x64xf32> to vector<4x4x64xf32>
    %117 = vector.extract_strided_slice %113 {offsets = [1, 0, 0], sizes = [4, 4, 64], strides = [1, 1, 1]} : vector<6x6x64xf32> to vector<4x4x64xf32>
    %118 = vector.extract_strided_slice %113 {offsets = [1, 1, 0], sizes = [4, 4, 64], strides = [1, 1, 1]} : vector<6x6x64xf32> to vector<4x4x64xf32>
    %119 = vector.extract_strided_slice %113 {offsets = [1, 2, 0], sizes = [4, 4, 64], strides = [1, 1, 1]} : vector<6x6x64xf32> to vector<4x4x64xf32>
    %120 = vector.extract_strided_slice %113 {offsets = [2, 0, 0], sizes = [4, 4, 64], strides = [1, 1, 1]} : vector<6x6x64xf32> to vector<4x4x64xf32>
    %121 = vector.extract_strided_slice %113 {offsets = [2, 1, 0], sizes = [4, 4, 64], strides = [1, 1, 1]} : vector<6x6x64xf32> to vector<4x4x64xf32>
    %122 = vector.extract_strided_slice %113 {offsets = [2, 2, 0], sizes = [4, 4, 64], strides = [1, 1, 1]} : vector<6x6x64xf32> to vector<4x4x64xf32>
    %123 = tpu.concatenate %114, %115, %116, %117, %118, %119, %120, %121, %122 in 2 : vector<4x4x64xf32>, vector<4x4x64xf32>, vector<4x4x64xf32>, vector<4x4x64xf32>, vector<4x4x64xf32>, vector<4x4x64xf32>, vector<4x4x64xf32>, vector<4x4x64xf32>, vector<4x4x64xf32> -> vector<4x4x576xf32>
    %124 = vector.shape_cast %123 : vector<4x4x576xf32> to vector<16x576xf32>
    %cst_52 = arith.constant dense<0.000000e+00> : vector<16x128xf32>
    %125 = tpu.matmul %124, %108, %cst_52 {dimension_numbers = #tpu.dot_dimension_numbers<[1], [0], [0], [1], [0, 0, 1, 1], [], []>} : vector<16x576xf32>, vector<576x128xf32>, vector<16x128xf32> -> vector<16x128xf32>
    %126 = vector.broadcast %109 : vector<1x128xf32> to vector<16x128xf32>
    %127 = arith.addf %125, %126 : vector<16x128xf32>
    %cst_53 = arith.constant 0.000000e+00 : f32
    %128 = vector.broadcast %cst_53 : f32 to vector<16x128xf32>
    %129 = arith.maximumf %127, %128 : vector<16x128xf32>
    %130 = vector.shape_cast %129 : vector<16x128xf32> to vector<4x4x128xf32>
    %c0_54 = arith.constant 0 : index
    %c0_55 = arith.constant 0 : index
    %131 = vector.load %arg12[%c0_54, %c0_55] : memref<1152x128xf32, #tpu.memory_space<vmem>>, vector<1152x128xf32>
    %c0_56 = arith.constant 0 : index
    %c0_57 = arith.constant 0 : index
    %132 = vector.load %arg13[%c0_56, %c0_57] : memref<1x128xf32, #tpu.memory_space<vmem>>, vector<1x128xf32>
    %cst_58 = arith.constant 0.000000e+00 : f32
    %133 = vector.broadcast %cst_58 : f32 to vector<1x4x128xf32>
    %134 = tpu.concatenate %133, %130, %133 in 0 : vector<1x4x128xf32>, vector<4x4x128xf32>, vector<1x4x128xf32> -> vector<6x4x128xf32>
    %cst_59 = arith.constant 0.000000e+00 : f32
    %135 = vector.broadcast %cst_59 : f32 to vector<6x1x128xf32>
    %136 = tpu.concatenate %135, %134, %135 in 1 : vector<6x1x128xf32>, vector<6x4x128xf32>, vector<6x1x128xf32> -> vector<6x6x128xf32>
    %137 = vector.extract_strided_slice %136 {offsets = [0, 0, 0], sizes = [4, 4, 128], strides = [1, 1, 1]} : vector<6x6x128xf32> to vector<4x4x128xf32>
    %138 = vector.extract_strided_slice %136 {offsets = [0, 1, 0], sizes = [4, 4, 128], strides = [1, 1, 1]} : vector<6x6x128xf32> to vector<4x4x128xf32>
    %139 = vector.extract_strided_slice %136 {offsets = [0, 2, 0], sizes = [4, 4, 128], strides = [1, 1, 1]} : vector<6x6x128xf32> to vector<4x4x128xf32>
    %140 = vector.extract_strided_slice %136 {offsets = [1, 0, 0], sizes = [4, 4, 128], strides = [1, 1, 1]} : vector<6x6x128xf32> to vector<4x4x128xf32>
    %141 = vector.extract_strided_slice %136 {offsets = [1, 1, 0], sizes = [4, 4, 128], strides = [1, 1, 1]} : vector<6x6x128xf32> to vector<4x4x128xf32>
    %142 = vector.extract_strided_slice %136 {offsets = [1, 2, 0], sizes = [4, 4, 128], strides = [1, 1, 1]} : vector<6x6x128xf32> to vector<4x4x128xf32>
    %143 = vector.extract_strided_slice %136 {offsets = [2, 0, 0], sizes = [4, 4, 128], strides = [1, 1, 1]} : vector<6x6x128xf32> to vector<4x4x128xf32>
    %144 = vector.extract_strided_slice %136 {offsets = [2, 1, 0], sizes = [4, 4, 128], strides = [1, 1, 1]} : vector<6x6x128xf32> to vector<4x4x128xf32>
    %145 = vector.extract_strided_slice %136 {offsets = [2, 2, 0], sizes = [4, 4, 128], strides = [1, 1, 1]} : vector<6x6x128xf32> to vector<4x4x128xf32>
    %146 = tpu.concatenate %137, %138, %139, %140, %141, %142, %143, %144, %145 in 2 : vector<4x4x128xf32>, vector<4x4x128xf32>, vector<4x4x128xf32>, vector<4x4x128xf32>, vector<4x4x128xf32>, vector<4x4x128xf32>, vector<4x4x128xf32>, vector<4x4x128xf32>, vector<4x4x128xf32> -> vector<4x4x1152xf32>
    %147 = vector.shape_cast %146 : vector<4x4x1152xf32> to vector<16x1152xf32>
    %cst_60 = arith.constant dense<0.000000e+00> : vector<16x128xf32>
    %148 = tpu.matmul %147, %131, %cst_60 {dimension_numbers = #tpu.dot_dimension_numbers<[1], [0], [0], [1], [0, 0, 1, 1], [], []>} : vector<16x1152xf32>, vector<1152x128xf32>, vector<16x128xf32> -> vector<16x128xf32>
    %149 = vector.broadcast %132 : vector<1x128xf32> to vector<16x128xf32>
    %150 = arith.addf %148, %149 : vector<16x128xf32>
    %cst_61 = arith.constant 0.000000e+00 : f32
    %151 = vector.broadcast %cst_61 : f32 to vector<16x128xf32>
    %152 = arith.maximumf %150, %151 : vector<16x128xf32>
    %153 = vector.shape_cast %152 : vector<16x128xf32> to vector<4x4x128xf32>
    %c0_62 = arith.constant 0 : index
    %c0_63 = arith.constant 0 : index
    %c0_64 = arith.constant 0 : index
    %c0_65 = arith.constant 0 : index
    %154 = vector.load %arg16[%c0_62, %c0_63, %c0_64, %c0_65] : memref<1x4x4x128xf32, #tpu.memory_space<vmem>>, vector<1x4x4x128xf32>
    %155 = vector.shape_cast %154 : vector<1x4x4x128xf32> to vector<4x4x128xf32>
    %156 = vector.shape_cast %153 : vector<4x4x128xf32> to vector<1x4x4x128xf32>
    tpu.vector_store %arg16[%c0_62, %c0_63, %c0_64, %c0_65], %156 {strides = array<i32>} : memref<1x4x4x128xf32, #tpu.memory_space<vmem>>, vector<1x4x4x128xf32>,
    return
  }
  func.func @transform_0(%arg0: i32) -> (i32, i32, i32, i32) {
    %c0_i32 = arith.constant 0 : i32
    %c0_i32_0 = arith.constant 0 : i32
    %c0_i32_1 = arith.constant 0 : i32
    %c0_i32_2 = arith.constant 0 : i32
    return %arg0, %c0_i32, %c0_i32_0, %c0_i32_1 : i32, i32, i32, i32
  }
  func.func @transform_1(%arg0: i32) -> (i32, i32) {
    %c0_i32 = arith.constant 0 : i32
    %c0_i32_0 = arith.constant 0 : i32
    %c0_i32_1 = arith.constant 0 : i32
    return %c0_i32, %c0_i32_0 : i32, i32
  }
  func.func @transform_2(%arg0: i32) -> (i32, i32) {
    %c0_i32 = arith.constant 0 : i32
    %c0_i32_0 = arith.constant 0 : i32
    %c0_i32_1 = arith.constant 0 : i32
    return %c0_i32, %c0_i32_0 : i32, i32
  }
  func.func @transform_3(%arg0: i32) -> (i32, i32) {
    %c0_i32 = arith.constant 0 : i32
    %c0_i32_0 = arith.constant 0 : i32
    %c0_i32_1 = arith.constant 0 : i32
    return %c0_i32, %c0_i32_0 : i32, i32
  }
  func.func @transform_4(%arg0: i32) -> (i32, i32) {
    %c0_i32 = arith.constant 0 : i32
    %c0_i32_0 = arith.constant 0 : i32
    %c0_i32_1 = arith.constant 0 : i32
    return %c0_i32, %c0_i32_0 : i32, i32
  }
  func.func @transform_5(%arg0: i32) -> (i32, i32) {
    %c0_i32 = arith.constant 0 : i32
    %c0_i32_0 = arith.constant 0 : i32
    %c0_i32_1 = arith.constant 0 : i32
    return %c0_i32, %c0_i32_0 : i32, i32
  }
  func.func @transform_6(%arg0: i32) -> (i32, i32) {
    %c0_i32 = arith.constant 0 : i32
    %c0_i32_0 = arith.constant 0 : i32
    %c0_i32_1 = arith.constant 0 : i32
    return %c0_i32, %c0_i32_0 : i32, i32
  }
  func.func @transform_7(%arg0: i32) -> (i32, i32) {
    %c0_i32 = arith.constant 0 : i32
    %c0_i32_0 = arith.constant 0 : i32
    %c0_i32_1 = arith.constant 0 : i32
    return %c0_i32, %c0_i32_0 : i32, i32
  }
  func.func @transform_8(%arg0: i32) -> (i32, i32) {
    %c0_i32 = arith.constant 0 : i32
    %c0_i32_0 = arith.constant 0 : i32
    %c0_i32_1 = arith.constant 0 : i32
    return %c0_i32, %c0_i32_0 : i32, i32
  }
  func.func @transform_9(%arg0: i32) -> (i32, i32) {
    %c0_i32 = arith.constant 0 : i32
    %c0_i32_0 = arith.constant 0 : i32
    %c0_i32_1 = arith.constant 0 : i32
    return %c0_i32, %c0_i32_0 : i32, i32
  }
  func.func @transform_10(%arg0: i32) -> (i32, i32) {
    %c0_i32 = arith.constant 0 : i32
    %c0_i32_0 = arith.constant 0 : i32
    %c0_i32_1 = arith.constant 0 : i32
    return %c0_i32, %c0_i32_0 : i32, i32
  }
  func.func @transform_11(%arg0: i32) -> (i32, i32) {
    %c0_i32 = arith.constant 0 : i32
    %c0_i32_0 = arith.constant 0 : i32
    %c0_i32_1 = arith.constant 0 : i32
    return %c0_i32, %c0_i32_0 : i32, i32
  }
  func.func @transform_12(%arg0: i32) -> (i32, i32) {
    %c0_i32 = arith.constant 0 : i32
    %c0_i32_0 = arith.constant 0 : i32
    %c0_i32_1 = arith.constant 0 : i32
    return %c0_i32, %c0_i32_0 : i32, i32
  }
  func.func @transform_13(%arg0: i32) -> (i32, i32, i32, i32) {
    %c0_i32 = arith.constant 0 : i32
    %c0_i32_0 = arith.constant 0 : i32
    %c0_i32_1 = arith.constant 0 : i32
    %c0_i32_2 = arith.constant 0 : i32
    return %arg0, %c0_i32, %c0_i32_0, %c0_i32_1 : i32, i32, i32, i32
  }
  func.func @transform_14(%arg0: i32) -> (i32, i32, i32, i32) {
    %c0_i32 = arith.constant 0 : i32
    %c0_i32_0 = arith.constant 0 : i32
    %c0_i32_1 = arith.constant 0 : i32
    %c0_i32_2 = arith.constant 0 : i32
    return %arg0, %c0_i32, %c0_i32_0, %c0_i32_1 : i32, i32, i32, i32
  }
  func.func @transform_15(%arg0: i32) -> (i32, i32, i32, i32) {
    %c0_i32 = arith.constant 0 : i32
    %c0_i32_0 = arith.constant 0 : i32
    %c0_i32_1 = arith.constant 0 : i32
    %c0_i32_2 = arith.constant 0 : i32
    return %arg0, %c0_i32, %c0_i32_0, %c0_i32_1 : i32, i32, i32, i32
  }
}

</mosaic_0001>

<bundles_post_ra>
// kernel: encoder_small_dynamic_forward.1
= control target key start
LH: loop header
LB: loop body
LE: loop exit
PB: predicated region body
PF: predicated region fallthrough
CT: control target
= control target key end

     0   :  { %s14499_s0 = inlined_call_operand.vmem [shape: f32[2,16,16,4], index: 0, kind: input, shape index: {}]   ;;  %s14500_s1 = inlined_call_operand.vmem [shape: f32[36,32], index: 1, kind: input, shape index: {}]   ;;  %s14501_s2 = inlined_call_operand.vmem [shape: f32[1,32], index: 2, kind: input, shape index: {}]   ;;  %s14502_s3 = inlined_call_operand.hbm [shape: f32[288,32], index: 3, kind: input, shape index: {}]   ;;  %s14503_s4 = inlined_call_operand.vmem [shape: f32[1,32], index: 4, kind: input, shape index: {}]   ;;  %s14504_s5 = inlined_call_operand.hbm [shape: f32[288,64], index: 5, kind: input, shape index: {}]   ;;  %s14505_s6 = inlined_call_operand.vmem [shape: f32[1,64], index: 6, kind: input, shape index: {}]   ;;  %s14506_s7 = inlined_call_operand.vmem [shape: f32[576,64], index: 7, kind: input, shape index: {}]   ;;  %s14507_s8 = inlined_call_operand.vmem [shape: f32[1,64], index: 8, kind: input, shape index: {}]   ;;  %s14508_s9 = inlined_call_operand.hbm [shape: f32[576,128], index: 9, kind: input, shape index: {}]   ;;  %s14509_s10 = inlined_call_operand.vmem [shape: f32[1,128], index: 10, kind: input, shape index: {}]   ;;  %s14510_s11 = inlined_call_operand.hbm [shape: f32[1152,128], index: 11, kind: input, shape index: {}]   ;;  %s14511_s12 = inlined_call_operand.vmem [shape: f32[1,128], index: 12, kind: input, shape index: {}]   ;;  %s14512_s13 = inlined_call_operand.hbm [shape: f32[2,16,16,32], index: 13, kind: output, shape index: {0}]   ;;  %s14513_s14 = inlined_call_operand.hbm [shape: f32[2,8,8,64], index: 14, kind: output, shape index: {1}]   ;;  %s14514_s15 = inlined_call_operand.hbm [shape: f32[2,4,4,128], index: 15, kind: output, shape index: {2}]  }
   0x1   :  { %14559 = sst [smem:[#allocation40_spill]] %s14499_s0 }
   0x2   :  { %14560 = sst [smem:[#allocation41_spill]] %s14500_s1 }
   0x3   :  { %14561 = sst [smem:[#allocation42_spill]] %s14511_s12 }
   0x4   :  { %14562 = sst [smem:[#allocation43_spill]] %s14512_s13 }
   0x5   :  { %14563 = sst [smem:[#allocation44_spill]] %s14513_s14 }
   0x6   :  { %14564 = sst [smem:[#allocation45_spill]] %s14514_s15 }
   0x7   :  { %21 = vsyncpa [#allocation3], 0 }
   0x8   :  { %22 = vsyncpa [#allocation6], 0 }
   0x9   :  { %23 = vsyncpa [#allocation9], 0 }
   0xa   :  { %24 = vsyncpa [#allocation4], 0 }
   0xb   :  { %26 = vsyncpa [#allocation4 + $0x1], 0 }
   0xc   :  { %27 = vsyncpa [#allocation12], 0 }
   0xd   :  { %29 = vsyncpa [#allocation12 + $0x1], 0  ;;  %s10297_s18 = smov 0   ;;  %s10299_s19 = smov 0  }
   0xe   :  { %s10301_s20 = smov 0   ;;  %s10303_s21 = smov 0  }
   0xf LB: > { %14565 = sst [smem:[#allocation19_spill]] %s10180_s18  ;;  %s10318_s22 = sadd.s32 4294967295, %s10192_s21   ;;  %s10192_s21 = sphi %s10303_s21, %s14646_s21   ;;  %s10188_s20 = sphi %s10301_s20, %s14648_s20   ;;  %s10184_s19 = sphi %s10299_s19, %s14650_s19   ;;  %s10180_s18 = sphi %s10297_s18, %s14649_s18  }
  0x10   : > { %14566 = sst [smem:[#allocation20_spill]] %s10188_s20  ;;  %s14515_s23 = sadd.s32 4294967294, %s10192_s21  }
  0x11   : > { %14567 = sst [smem:[#allocation21_spill]] %s10192_s21  ;;  %s10322_s24 = sadd.s32 1, %s10192_s21  }
  0x12   : > { %14568 = sst [smem:[#allocation22_spill]] %s10322_s24  ;;  %s320_s25 = sadd.s32 1, %s10188_s20 }
  0x13   : > { %s317_s26 = ssub.s32 %s10192_s21, %s10322_s24  ;;  %p330_p0 = scmp.ne.s32.totalorder %s10188_s20, %s10184_s19 }
  0x14   : > { %p318_p1 = scmp.eq.s32.totalorder %s317_s26, 0  ;;  %p331_p2 = scmp.eq.s32.totalorder %s10318_s22, 1 }
  0x15   : > { %p336_p3 = scmp.ne.s32.totalorder %s10184_s19, %s10180_s18  ;;  %p337_p4 = scmp.eq.s32.totalorder %s14515_s23, 1 }
  0x16   : > { %s10335_s27 = scalar_select %p318_p1, %s10188_s20, %s320_s25  }
  0x17   : > { %p10337_p5 = por %p331_p2, %p330_p0  ;;  %p10341_p6 = por %p337_p4, %p336_p3 }
  0x18   : > { %14569 = sst [smem:[#allocation23_spill]] %s10335_s27  ;;  %p7864_p7 = scmp.ge.s32.totalorder %s10192_s21, 1 }
  0x19   : > { %s14570_s28 = scalar_select %p10337_p5, 1, 0 }
  0x1a   : > { %s14572_s29 = scalar_select %p10341_p6, 1, 0 }
  0x1b   : > { %14571 = sst [smem:[#allocation24_spill]] %s14570_s28  ;;  %p396_p8 = scmp.lt.s32.totalorder %s10192_s21, 3 }
  0x1c   : > { %14573 = sst [smem:[#allocation25_spill]] %s14572_s29  ;;  %p14524_p9 = scmp.eq.s32.totalorder %s10318_s22, 0 }
  0x1d   : > { %p10348_p10 = pnand %p7864_p7, %p396_p8  ;;  %s10194_s16 = smov [#allocation5]  }
  0x1e   : > { %s430_s17 = sshll.u32 %s10194_s16, 4  ;;  %s10195_s26 = smov [#allocation2]   ;;  %s10354_s17 = int_to_ptr.vmem [resolvable:$true] %s430_s17 }
  0x1f   : > { %s14574_s30 = scalar_select %p10348_p10, 1, 0 }
  0x20   : > { %p9193_p11 = pneg %p10348_p10  ;;  %s414_s23 = sshll.u32 %s10195_s26, 4  ;;  %s10362_s23 = int_to_ptr.vmem [resolvable:$true] %s414_s23 }
  0x21   : > { %s10196_s27 = smov [#allocation7]   ;;  %s9946_s18 = scalar_lea.hbm %s14504_s5, 4608 }
  0x22   : > { %p10358_p12 = pnand %p14524_p9, %p9193_p11  ;;  %s10364_s20 = sshll.u32 %s10196_s27, 4  ;;  %s453_s20 = int_to_ptr.vmem [resolvable:$true] %s10364_s20 }
  0x23   : > { %p9947_p13 = scmp.ne.s32.totalorder %s14504_s5, %s9946_s18  ;;  %p9953_p3 = scmp.lt.u32.totalorder %s9946_s18, %s14504_s5 }
  0x24   : > { %p10374_p0 = pneg %p10358_p12 }
  0x26   : > { %p9949_p1 = pnand %p10374_p0, %p9947_p13 }
  0x28   : > { %p9950_p2 = pneg %p9949_p1 }
  0x2a   : > { %p9955_p4 = pnand %p9953_p3, %p9950_p2 }
  0x2c   : > { %9958 = shalt.err (!%p9955_p4)
}
  0x2d   : > { %s9959_s21 = scalar_lea.vmem %s10354_s17, 4608  ;;  %p9967_p9 = scmp.lt.s32.totalorder %s10354_s17, %s10354_s17 }
  0x2e   : > { %p9960_p7 = scmp.ne.s32.totalorder %s10354_s17, %s9959_s21  ;;  %p9968_p6 = scmp.lt.s32.totalorder %s9959_s21, %s9959_s21 }
  0x30   : > { %p9962_p8 = pnand %p9960_p7, %p10374_p0  ;;  %p9969_p13 = por %p9968_p6, %p9967_p9 }
  0x32   : > { %p9963_p11 = pneg %p9962_p8 }
  0x34   : > { %p9970_p1 = pnand %p9969_p13, %p9963_p11 }
  0x36   : > { %9973 = shalt.err (!%p9970_p1)
}
  0x37   : > { %s10197_s24 = smov 128   ;;  %s10198_s18 = smov 8  }
  0x38   : > { %9199 = dma.hbm_to_vmem [thread:$0]  (!%p10358_p12), %s14504_s5, 4608, %s10354_s17, [#allocation6], %s10197_s24, %s10197_s24, %s10198_s18  }
  0x39   : > { %s9974_s21 = scalar_lea.hbm %s14502_s3, 4608 }
  0x3a   : > { %p9975_p6 = scmp.ne.s32.totalorder %s14502_s3, %s9974_s21  ;;  %p9981_p3 = scmp.lt.u32.totalorder %s9974_s21, %s14502_s3 }
  0x3c   : > { %p9977_p9 = pnand %p9975_p6, %p10374_p0 }
  0x3e   : > { %p9978_p2 = pneg %p9977_p9 }
  0x40   : > { %p9983_p4 = pnand %p9981_p3, %p9978_p2 }
  0x42   : > { %9986 = shalt.err (!%p9983_p4)
}
  0x43   : > { %s9987_s17 = scalar_lea.vmem %s10362_s23, 4608  ;;  %p9995_p13 = scmp.lt.s32.totalorder %s10362_s23, %s10362_s23 }
  0x44   : > { %p9988_p7 = scmp.ne.s32.totalorder %s10362_s23, %s9987_s17  ;;  %p9996_p1 = scmp.lt.s32.totalorder %s9987_s17, %s9987_s17 }
  0x46   : > { %p9990_p8 = pnand %p9988_p7, %p10374_p0  ;;  %p9997_p6 = por %p9996_p1, %p9995_p13 }
  0x48   : > { %p9991_p11 = pneg %p9990_p8 }
  0x4a   : > { %p9998_p9 = pnand %p9997_p6, %p9991_p11 }
  0x4c   : > { %10001 = shalt.err (!%p9998_p9)
}
  0x4d   : > { %9196 = dma.hbm_to_vmem [thread:$0]  (!%p10358_p12), %s14502_s3, 4608, %s10362_s23, [#allocation3], %s10197_s24, %s10197_s24, %s10198_s18  }
  0x4e   : > { %s10002_s29 = scalar_lea.hbm %s14508_s9, 9216 }
  0x4f   : > { %p10003_p2 = scmp.ne.s32.totalorder %s14508_s9, %s10002_s29  ;;  %p10009_p7 = scmp.lt.u32.totalorder %s10002_s29, %s14508_s9 }
  0x51   : > { %p10005_p3 = pnand %p10003_p2, %p10374_p0 }
  0x53   : > { %p10006_p4 = pneg %p10005_p3 }
  0x55   : > { %p10011_p8 = pnand %p10009_p7, %p10006_p4 }
  0x57   : > { %10014 = shalt.err (!%p10011_p8)
}
  0x58   : > { %s10015_s17 = scalar_lea.vmem %s453_s20, 9216  ;;  %p10023_p6 = scmp.lt.s32.totalorder %s453_s20, %s453_s20 }
  0x59   : > { %p10016_p11 = scmp.ne.s32.totalorder %s453_s20, %s10015_s17  ;;  %p10024_p9 = scmp.lt.s32.totalorder %s10015_s17, %s10015_s17 }
  0x5b   : > { %p10018_p13 = pnand %p10016_p11, %p10374_p0  ;;  %p10025_p5 = por %p10024_p9, %p10023_p6 }
  0x5d   : > { %p10019_p1 = pneg %p10018_p13 }
  0x5f   : > { %p10026_p10 = pnand %p10025_p5, %p10019_p1 }
  0x61   : > { %10029 = shalt.err (!%p10026_p10)
}
  0x62   : > { %9202 = dma.hbm_to_vmem [thread:$0]  (!%p10358_p12), %s14508_s9, 9216, %s453_s20, [#allocation6], %s10197_s24, %s10197_s24, %s10198_s18  }
  0x63   : > { %s10199_s13 = smov [#allocation8]   ;;  %s10030_s16 = scalar_lea.hbm %s14510_s11, 18432 }
  0x64   : > { %s468_s14 = sshll.u32 %s10199_s13, 4  ;;  %p10031_p5 = scmp.ne.s32.totalorder %s14510_s11, %s10030_s16  ;;  %s469_s14 = int_to_ptr.vmem [resolvable:$true] %s468_s14 }
  0x65   : > { %p10037_p3 = scmp.lt.u32.totalorder %s10030_s16, %s14510_s11 }
  0x66   : > { %p10033_p10 = pnand %p10031_p5, %p10374_p0 }
  0x68   : > { %p10034_p2 = pneg %p10033_p10 }
  0x6a   : > { %p10039_p4 = pnand %p10037_p3, %p10034_p2 }
  0x6c   : > { %10042 = shalt.err (!%p10039_p4)
}
  0x6d   : > { %s10043_s20 = scalar_lea.vmem %s469_s14, 18432  ;;  %p10051_p13 = scmp.lt.s32.totalorder %s469_s14, %s469_s14 }
  0x6e   : > { %p10044_p7 = scmp.ne.s32.totalorder %s469_s14, %s10043_s20  ;;  %p10052_p1 = scmp.lt.s32.totalorder %s10043_s20, %s10043_s20 }
  0x70   : > { %p10046_p8 = pnand %p10044_p7, %p10374_p0  ;;  %p10053_p6 = por %p10052_p1, %p10051_p13 }
  0x72   : > { %p10047_p11 = pneg %p10046_p8 }
  0x74   : > { %p10054_p9 = pnand %p10053_p6, %p10047_p11 }
  0x76   : > { %10057 = shalt.err (!%p10054_p9)
}
  0x77   : > { %9205 = dma.hbm_to_vmem [thread:$0]  (!%p10358_p12), %s14510_s11, 18432, %s469_s14, [#allocation9], %s10197_s24, %s10197_s24, %s10198_s18  }
  0x78   : > { %p14577_p5 = scmp.ne.s32.totalorder %s14574_s30, 0 }
  0x7a   : > { %495 = sbr.rel (%p14577_p5) target bundleno = 2840 (0xb18), region = 72 }
  0x81   : > { %p14578_p0 = scmp.eq.s32.totalorder %s10318_s22, 0 }
  0x83   : > { %10159 = dma.done.wait (%p14578_p0), [#allocation3], 4608   ;;  %p14579_p10 = pmov %p14578_p0 }
  0x84   : > { %p14580_p2 = pmov %p14578_p0 }
  0x85   : > { %10161 = vsyncadd (%p14579_p10), [#allocation3], 4294962688 }
  0x86   : > { %10163 = dma.done.wait (%p14580_p2), [#allocation6], 13824   ;;  %p14581_p3 = pmov %p14578_p0 }
  0x87   : > { %p14582_p4 = pmov %p14578_p0 }
  0x88   : > { %10165 = vsyncadd (%p14581_p3), [#allocation6], 4294953472 }
  0x89   : > { %10167 = dma.done.wait (%p14582_p4), [#allocation9], 18432   ;;  %p14583_p12 = pmov %p14578_p0 }
  0x8a   : > { %vm641_vm0 = vcmask 1040384   ;;  %v10200_v0 = vmov 0.0   ;;  %p565_p7 = scmp.lt.s32.totalorder %s10318_s22, 1  ;;  %vm807_vm1 = vcmask 1046528   ;;  %vm984_vm2 = vcmask 1045504   ;;  %s14588_s0 = sld [smem:[#allocation40_spill]] }
  0x8b   : > { %10169 = vsyncadd (%p14583_p12), [#allocation9], 4294948864  ;;  %v10481_v1 = vrot.slane %v10200_v0, 7  ;;  %s14558_s13 = smov 4   ;;  %s10202_s14 = smov 12   ;;  %vm2116_vm3 = vcmask 1043456  }
  0x8c   : > { %s566_s15 = scalar_select %p565_p7, %s10318_s22, 1  ;;  %vm1749_vm4 = vcmask 31744   ;;  %vm1782_vm5 = vcmask 64512   ;;  %vm1815_vm6 = vcmask 97280   ;;  %vm1848_vm7 = vcmask 130048  }
  0x8d   : > { %v10486_v2 = vsel %vm641_vm0, 0.0, %v10481_v1  ;;  %v10490_v3 = vsel %vm641_vm0, %v10481_v1, 0.0  ;;  %v809_v4 = vrot.slane %v10481_v1, 1  ;;  %v986_v5 = vrot.slane %v10481_v1, 2  ;;  %s10203_s28 = smov 8   ;;  %s10204_s29 = smov 16  }
  0x8e   : > { %14584 = vst [vmem:[#allocation26_spill] sm:$0xff] %v10486_v2  ;;  %14585 = vst [vmem:[#allocation27_spill] sm:$0xff] %v10490_v3  ;;  %v14533_v6 = vrot.slane %v10486_v2, 1  ;;  %v14534_v7 = vrot.slane %v10490_v3, 1  ;;  %v14532_v8 = vrot.slane %v10490_v3, 2  ;;  %v14531_v9 = vrot.slane %v10486_v2, 2 }
  0x8f   : > { %s8002_s30 = sshll.u32 %s566_s15, 8  ;;  %s10205_s16 = smov 20   ;;  %vm1881_vm8 = vcmask 162816   ;;  %vm1914_vm9 = vcmask 195584   ;;  %vm1947_vm10 = vcmask 228352   ;;  %vm1980_vm11 = vcmask 261120  }
  0x90   : > { %v10502_v10 = vsel %vm807_vm1, %v14533_v6, %v809_v4  ;;  %v10507_v11 = vsel %vm807_vm1, %v809_v4, %v14534_v7  ;;  %s10512_s18 = scalar_lea.vmem %s14588_s0, %s8002_s30  ;;  %v10517_v12 = vsel %vm984_vm2, %v14531_v9, %v986_v5  ;;  %v10522_v13 = vsel %vm984_vm2, %v986_v5, %v14532_v8  ;;  %s14590_s1 = sld [smem:[#allocation41_spill]]  ;;  %v2387_v6 = vld [vmem:[#allocation2 + $0x50] sm:$0xff]  ;;  %v2388_v7 = vld [vmem:[#allocation2 + $0x58] sm:$0xff] }
  0x91   : > { %14586 = vst [vmem:[#allocation28_spill] sm:$0xff] %v10502_v10  ;;  %14587 = vst [vmem:[#allocation29_spill] sm:$0xff] %v10507_v11  ;;  %v10526_v14 = vpack.i.bf16 %v10507_v11, %v10502_v10  ;;  %v570_v15 = vld [vmem:[%s10512_s18] sm:$0xff]  ;;  %v571_v16 = vld [vmem:[%s10512_s18 + $0x8] sm:$0xff]  ;;  %v10534_v19 = vpack.i.bf16 %v10522_v13, %v10517_v12  ;;  %s10206_s20 = smov 24   ;;  %s10207_s26 = smov 28  }
  0x92   : > { %14589 = vst [vmem:[#allocation30_spill] sm:$0xff] %v10522_v13  ;;  %v644_v17 = vrot.slane %v570_v15, 7  ;;  %v645_v18 = vrot.slane %v571_v16, 7  ;;  %v572_v31 = vld [vmem:[%s10512_s18 + $0x10] sm:$0xff]  ;;  %v573_v33 = vld [vmem:[%s10512_s18 + $0x18] sm:$0xff]  ;;  %v574_v55 = vld [vmem:[%s10512_s18 + $0x20] sm:$0xff] }
  0x93   : > { %9278 = vrot.lane.b32.xlu0 %v10526_v14, %s14558_s13  ;;  %v647_v34 = vrot.slane %v572_v31, 7  ;;  %v648_v35 = vrot.slane %v573_v33, 7  ;;  %v575_v56 = vld [vmem:[%s10512_s18 + $0x28] sm:$0xff]  ;;  %s10208_s27 = smov 32   ;;  %v650_v58 = vrot.slane %v574_v55, 7  ;;  %vm2019_vm12 = vcmask 293888  }
  0x94   : > { %v10537_v20 = vsel %vm641_vm0, 0.0, %v644_v17  ;;  %v10540_v21 = vsel %vm641_vm0, %v644_v17, %v645_v18  ;;  %v759_v24 = vsel %vm641_vm0, %v645_v18, 0.0  ;;  %v651_v59 = vrot.slane %v575_v56, 7  ;;  %s12687_s12 = sand.u32 1, %s10184_s19   ;;  %s7648_s21 = sand.u32 1, %s10318_s22  }
  0x95   : > { %1162 = vrot.lane.b32.xlu1 %v10537_v20, %s10202_s14  ;;  %v813_v22 = vrot.slane %v10537_v20, 1  ;;  %v814_v23 = vrot.slane %v10540_v21, 1  ;;  %v816_v26 = vrot.slane %v759_v24, 1  ;;  %v990_v27 = vrot.slane %v10537_v20, 2  ;;  %s7875_s25 = sshll.u32 %s12687_s12, 8  ;;  %s7876_s23 = sshll.u32 %s12687_s12, 6 }
  0x96   : > { %v991_v28 = vrot.slane %v10540_v21, 2  ;;  %v993_v32 = vrot.slane %v759_v24, 2  ;;  %v10566_v37 = vsel %vm641_vm0, 0.0, %v647_v34  ;;  %v602_v38 = vld [vmem:[%s14590_s1] sm:$0xff]  ;;  %v603_v39 = vld [vmem:[%s14590_s1 + $0x8] sm:$0xff]  ;;  %v10576_v40 = vsel %vm641_vm0, %v647_v34, %v648_v35  ;;  %v604_v44 = vld [vmem:[%s14590_s1 + $0x10] sm:$0xff] }
  0x97   : > { %9283 = vrot.lane.b32.xlu0 %v10534_v19, %s10203_s28  ;;  %v815_v25 = vsel %vm807_vm1, %v813_v22, %v814_v23  ;;  %v817_v29 = vsel %vm807_vm1, %v814_v23, %v816_v26  ;;  %v8747_v41 = vpack.c.bf16 %v603_v39, %v602_v38  ;;  %v818_v42 = vrot.slane %v10566_v37, 1  ;;  %v605_v45 = vld [vmem:[%s14590_s1 + $0x18] sm:$0xff]  ;;  %v606_v50 = vld [vmem:[%s14590_s1 + $0x20] sm:$0xf]  ;;  %s12735_s24 = scalar_lea.vmem [#allocation10], %s7875_s25  ;;  %s14117_s15 = scalar_lea.vmem [#allocation11], %s7876_s23 }
  0x98   : > { %v992_v30 = vsel %vm984_vm2, %v990_v27, %v991_v28  ;;  %v994_v36 = vsel %vm984_vm2, %v991_v28, %v993_v32  ;;  %v819_v43 = vrot.slane %v10576_v40, 1  ;;  %v8751_v46 = vpack.c.bf16 %v605_v45, %v604_v44  ;;  %v577_v26 = vld [vmem:[%s10512_s18 + $0x38] sm:$0xff]  ;;  %v578_v44 = vld [vmem:[%s10512_s18 + $0x40] sm:$0xff]  ;;  %v579_v45 = vld [vmem:[%s10512_s18 + $0x48] sm:$0xff]  ;;  %s8004_s17 = sshll.u32 %s10318_s22, 10  ;;  %s8003_s23 = sshll.u32 %s10318_s22, 12 }
  0x99   : > { %1164 = vrot.lane.b32.xlu1 %v10540_v21, %s10202_s14  ;;  %8748 = vmatprep.subr.bf16.mxu1 %v8747_v41  ;;  %v760_v47 = vsel %vm641_vm0, %v648_v35, 0.0  ;;  %v995_v51 = vrot.slane %v10566_v37, 2  ;;  %v996_v52 = vrot.slane %v10576_v40, 2  ;;  %v10614_v61 = vsel %vm641_vm0, 0.0, %v650_v58  ;;  %s14379_s30 = scalar_lea.sflag [#allocation12], %s7648_s21 }
  0x9a   : > { %8750 = vmatpush3.bf16.msra.mxu1 %v8747_v41  ;;  %v820_v48 = vsel %vm807_vm1, %v818_v42, %v819_v43  ;;  %v821_v49 = vrot.slane %v760_v47, 1  ;;  %v998_v57 = vrot.slane %v760_v47, 2  ;;  %v10617_v62 = vsel %vm641_vm0, %v650_v58, %v651_v59 }
  0x9b   : > { %1264 = vrot.lane.b32.xlu0 %v815_v25, %s10204_s29  ;;  %8752 = vmatprep.subr.bf16.mxu1 %v8751_v46  ;;  %v997_v54 = vsel %vm984_vm2, %v995_v51, %v996_v52  ;;  %v761_v63 = vsel %vm641_vm0, %v651_v59, 0.0  ;;  %v823_v0 = vrot.slane %v10614_v61, 1  ;;  %v824_v4 = vrot.slane %v10617_v62, 1 }
  0x9c   : > { %v822_v53 = vsel %vm807_vm1, %v819_v43, %v821_v49  ;;  %v999_v60 = vsel %vm984_vm2, %v996_v52, %v998_v57  ;;  %v826_v5 = vrot.slane %v761_v63, 1  ;;  %v1000_v16 = vrot.slane %v10614_v61, 2 }
  0x9d   : > { %892 = vrot.lane.b32.xlu1 %v815_v25, %s14558_s13  ;;  %v825_v15 = vsel %vm807_vm1, %v823_v0, %v824_v4  ;;  %v1001_v17 = vrot.slane %v10617_v62, 2  ;;  %v1003_v23 = vrot.slane %v761_v63, 2  ;;  %v576_v25 = vld [vmem:[%s10512_s18 + $0x30] sm:$0xff]  ;;  %v654_v28 = vrot.slane %v577_v26, 7 }
  0x9e   : > { %8754 = vmatpush3.bf16.msra.mxu1 %v8751_v46  ;;  %v827_v18 = vsel %vm807_vm1, %v824_v4, %v826_v5  ;;  %v653_v27 = vrot.slane %v576_v25, 7  ;;  %v656_v46 = vrot.slane %v578_v44, 7  ;;  %v657_v47 = vrot.slane %v579_v45, 7 }
  0x9f   : > { %1266 = vrot.lane.b32.xlu0 %v817_v29, %s10204_s29  ;;  %8539 = vmatprep.subr.msk.mxu1 %vm2116_vm3, %v606_v50  ;;  %v1002_v22 = vsel %vm984_vm2, %v1000_v16, %v1001_v17  ;;  %v1004_v24 = vsel %vm984_vm2, %v1001_v17, %v1003_v23  ;;  %v762_v31 = vsel %vm641_vm0, %v654_v28, 0.0  ;;  %v580_v23 = vld [vmem:[%s10512_s18 + $0x50] sm:$0xff]  ;;  %vm3405_vm13 = vcmask 523264  }
  0xa0   : > { %v831_v34 = vrot.slane %v762_v31, 1  ;;  %v1008_v42 = vrot.slane %v762_v31, 2  ;;  %v10691_v49 = vsel %vm641_vm0, %v656_v46, %v657_v47  ;;  %vm3438_vm14 = vcmask 785408  }
  0xa1   : > { %1365 = vrot.lane.b32.xlu1 %v992_v30, %s10205_s16  ;;  %v834_v52 = vrot.slane %v10691_v49, 1  ;;  %v1011_v56 = vrot.slane %v10691_v49, 2  ;;  %vm4551_vm15 = vcmask 254976  }
  0xa2   : > { %8540 = vmatpush3.msk.msra.mxu1 %vm2116_vm3, %v606_v50  ;;  %v763_v50 = vsel %vm641_vm0, %v657_v47, 0.0  ;;  %vm5101_vm3 = vcmask 1041409  }
  0xa3   : > { %894 = vrot.lane.b32.xlu0 %v817_v29, %s14558_s13  ;;  %v10651_v29 = vsel %vm641_vm0, 0.0, %v653_v27  ;;  %v1013_v63 = vrot.slane %v763_v50, 2 }
  0xa4   : > { %v828_v32 = vrot.slane %v10651_v29, 1 }
  0xa5   : > { %1069 = vrot.lane.b32.xlu1 %v992_v30, %s10203_s28  ;;  %v10654_v30 = vsel %vm641_vm0, %v653_v27, %v654_v28  ;;  %v10726_v5 = vsel %vm984_vm2, %v1011_v56, %v1013_v63  ;;  %v659_v27 = vrot.slane %v580_v23, 7 }
  0xa6   : > { %v829_v33 = vrot.slane %v10654_v30, 1  ;;  %v1006_v38 = vrot.slane %v10654_v30, 2 }
  0xa7   : > { %1367 = vrot.lane.b32.xlu0 %v994_v36, %s10205_s16 }
  0xa8   : > { %v830_v35 = vsel %vm807_vm1, %v828_v32, %v829_v33  ;;  %v832_v39 = vsel %vm807_vm1, %v829_v33, %v831_v34  ;;  %v1009_v43 = vsel %vm984_vm2, %v1006_v38, %v1008_v42  ;;  %v10758_v34 = vsel %vm641_vm0, 0.0, %v659_v27 }
  0xa9   : > { %1461 = vrot.lane.b32.xlu1 %v10566_v37, %s10206_s20 }
  0xab   : > { %1071 = vrot.lane.b32.xlu0 %v994_v36, %s10203_s28  ;;  %v1005_v36 = vrot.slane %v10651_v29, 2 }
  0xad   : > { %1166 = vrot.lane.b32.xlu1 %v10566_v37, %s10202_s14  ;;  %v1007_v41 = vsel %vm984_vm2, %v1005_v36, %v1006_v38 }
  0xaf   : > { %1463 = vrot.lane.b32.xlu0 %v10576_v40, %s10206_s20 }
  0xb1   : > { %1557 = vrot.lane.b32.xlu1 %v820_v48, %s10207_s26 }
  0xb3   : > { %1168 = vrot.lane.b32.xlu0 %v10576_v40, %s10202_s14 }
  0xb5   : > { %1268 = vrot.lane.b32.xlu1 %v820_v48, %s10204_s29 }
  0xb7   : > { %1559 = vrot.lane.b32.xlu0 %v822_v53, %s10207_s26 }
  0xb9   : > { %1653 = vrot.lane.b32.xlu1 %v997_v54, %s10208_s27 }
  0xbb   : > { %1270 = vrot.lane.b32.xlu0 %v822_v53, %s10204_s29 }
  0xbd   : > { %1369 = vrot.lane.b32.xlu1 %v997_v54, %s10205_s16 }
  0xbf   : > { %1655 = vrot.lane.b32.xlu0 %v999_v60, %s10208_s27 }
  0xc1   : > { %1371 = vrot.lane.b32.xlu1 %v999_v60, %s10205_s16 }
  0xc3   : > { %1465 = vrot.lane.b32.xlu0 %v10614_v61, %s10206_s20 }
  0xc5   : > { %1467 = vrot.lane.b32.xlu1 %v10617_v62, %s10206_s20 }
  0xc7   : > { %1561 = vrot.lane.b32.xlu0 %v825_v15, %s10207_s26 }
  0xc9   : > { %1563 = vrot.lane.b32.xlu1 %v827_v18, %s10207_s26 }
  0xcb   : > { %1657 = vrot.lane.b32.xlu0 %v1002_v22, %s10208_s27 }
  0xcd   : > { %896 = vrot.lane.b32.xlu1 %v820_v48, %s14558_s13  ;;  %v10688_v48 = vsel %vm641_vm0, 0.0, %v656_v46 }
  0xce   : > { %v833_v51 = vrot.slane %v10688_v48, 1  ;;  %v1010_v55 = vrot.slane %v10688_v48, 2 }
  0xcf   : > { %1659 = vrot.lane.b32.xlu0 %v1004_v24, %s10208_s27 }
  0xd1   : > { %898 = vrot.lane.b32.xlu1 %v822_v53, %s14558_s13  ;;  %v836_v53 = vrot.slane %v763_v50, 1 }
  0xd3   : > { %1073 = vrot.lane.b32.xlu0 %v997_v54, %s10203_s28  ;;  %v10701_v54 = vsel %vm807_vm1, %v833_v51, %v834_v52  ;;  %v10710_v58 = vsel %vm807_vm1, %v834_v52, %v836_v53  ;;  %v1015_v51 = vrot.slane %v10758_v34, 2 }
  0xd5   : > { %1075 = vrot.lane.b32.xlu1 %v999_v60, %s10203_s28  ;;  %v10715_v60 = vsel %vm984_vm2, %v1010_v55, %v1011_v56 }
  0xd7   : > { %1170 = vrot.lane.b32.xlu0 %v10614_v61, %s10202_s14 }
  0xd9   : > { %1172 = vrot.lane.b32.xlu1 %v10617_v62, %s10202_s14 }
  0xdb   : > { %1272 = vrot.lane.b32.xlu0 %v825_v15, %s10204_s29 }
  0xdd   : > { %1274 = vrot.lane.b32.xlu1 %v827_v18, %s10204_s29 }
  0xdf   : > { %1373 = vrot.lane.b32.xlu0 %v1002_v22, %s10205_s16 }
  0xe1   : > { %1375 = vrot.lane.b32.xlu1 %v1004_v24, %s10205_s16 }
  0xe3   : > { %1469 = vrot.lane.b32.xlu0 %v10651_v29, %s10206_s20 }
  0xe5   : > { %1471 = vrot.lane.b32.xlu1 %v10654_v30, %s10206_s20 }
  0xe7   : > { %1565 = vrot.lane.b32.xlu0 %v830_v35, %s10207_s26 }
  0xe9   : > { %1567 = vrot.lane.b32.xlu1 %v832_v39, %s10207_s26 }
  0xeb   : > { %1661 = vrot.lane.b32.xlu0 %v1007_v41, %s10208_s27 }
  0xed   : > { %900 = vrot.lane.b32.xlu1 %v825_v15, %s14558_s13 }
  0xef   : > { %1663 = vrot.lane.b32.xlu0 %v1009_v43, %s10208_s27 }
  0xf1   : > { %902 = vrot.lane.b32.xlu1 %v827_v18, %s14558_s13 }
  0xf3   : > { %1077 = vrot.lane.b32.xlu0 %v1002_v22, %s10203_s28 }
  0xf5   : > { %1079 = vrot.lane.b32.xlu1 %v1004_v24, %s10203_s28  ;;  %v581_v24 = vld [vmem:[%s10512_s18 + $0x58] sm:$0xff] }
  0xf6   : > { %v660_v28 = vrot.slane %v581_v24, 7 }
  0xf7   : > { %1174 = vrot.lane.b32.xlu0 %v10651_v29, %s10202_s14 }
  0xf9   : > { %1176 = vrot.lane.b32.xlu1 %v10654_v30, %s10202_s14 }
  0xfb   : > { %1276 = vrot.lane.b32.xlu0 %v830_v35, %s10204_s29 }
  0xfd   : > { %1278 = vrot.lane.b32.xlu1 %v832_v39, %s10204_s29 }
  0xff   : > { %1377 = vrot.lane.b32.xlu0 %v1007_v41, %s10205_s16 }
 0x101   : > { %1379 = vrot.lane.b32.xlu1 %v1009_v43, %s10205_s16 }
 0x103   : > { %1473 = vrot.lane.b32.xlu0 %v10688_v48, %s10206_s20 }
 0x105   : > { %v10705_v57 = vpop.permute.xlu0 %9278  ;;  %1475 = vrot.lane.b32.xlu1 %v10691_v49, %s10206_s20 }
 0x106   : > { %v9280_v32 = vunpack.i.l.bf16 %v10705_v57  ;;  %v9281_v53 = vunpack.i.h.bf16 %v10705_v57 }
 0x107   : > { %v1163_v59 = vpop.permute.xlu1 %1162  ;;  %1569 = vrot.lane.b32.xlu0 %v10701_v54, %s10207_s26 }
 0x109   : > { %v10717_v0 = vpop.permute.xlu0 %9283  ;;  %1571 = vrot.lane.b32.xlu1 %v10710_v58, %s10207_s26 }
 0x10a   : > { %v9285_v36 = vunpack.i.l.bf16 %v10717_v0  ;;  %v9286_v63 = vunpack.i.h.bf16 %v10717_v0 }
 0x10b   : > { %v10721_v4 = vpop.permute.xlu1 %1164  ;;  %1665 = vrot.lane.b32.xlu0 %v10715_v60, %s10208_s27 }
 0x10d   : > { %904 = vrot.lane.b32.xlu1 %v830_v35, %s14558_s13  ;;  %v1265_v15 = vpop.permute.xlu0 %1264  ;;  %v10761_v35 = vsel %vm641_vm0, %v659_v27, %v660_v28 }
 0x10e   : > { %v839_v42 = vrot.slane %v10761_v35, 1  ;;  %v1016_v52 = vrot.slane %v10761_v35, 2 }
 0x10f   : > { %v10729_v16 = vpop.permute.xlu1 %892  ;;  %1667 = vrot.lane.b32.xlu0 %v10726_v5, %s10208_s27 }
 0x111   : > { %906 = vrot.lane.b32.xlu1 %v832_v39, %s14558_s13  ;;  %v10734_v17 = vpop.permute.xlu0 %1266  ;;  %v764_v39 = vsel %vm641_vm0, %v660_v28, 0.0  ;;  %v1751_v28 = vsel %vm1749_vm4, %v10481_v1, %v9281_v53 }
 0x112   : > { %v841_v46 = vrot.slane %v764_v39, 1  ;;  %v1018_v27 = vrot.slane %v764_v39, 2 }
 0x113   : > { %v1366_v18 = vpop.permute.xlu1 %1365  ;;  %1081 = vrot.lane.b32.xlu0 %v1007_v41, %s10203_s28  ;;  %v838_v41 = vrot.slane %v10758_v34, 1 }
 0x114   : > { %v10789_v23 = vsel %vm807_vm1, %v839_v42, %v841_v46 }
 0x115   : > { %1083 = vrot.lane.b32.xlu1 %v1009_v43, %s10203_s28  ;;  %v10738_v22 = vpop.permute.xlu0 %894  ;;  %v1750_v43 = vsel %vm1749_vm4, %v10486_v2, %v9280_v32  ;;  %v10779_v50 = vsel %vm807_vm1, %v838_v41, %v839_v42 }
 0x116   : > { %v1783_v45 = vsel %vm1782_vm5, %v1750_v43, %v9285_v36  ;;  %v1784_v36 = vsel %vm1782_vm5, %v1751_v28, %v9286_v63 }
 0x117   : > { %v10742_v25 = vpop.permute.xlu1 %1069  ;;  %1178 = vrot.lane.b32.xlu0 %v10688_v48, %s10202_s14  ;;  %v1816_v55 = vsel %vm1815_vm6, %v1783_v45, %v1163_v59  ;;  %v10795_v59 = vsel %vm984_vm2, %v1015_v51, %v1016_v52  ;;  %v1817_v43 = vsel %vm1815_vm6, %v1784_v36, %v10721_v4 }
 0x118   : > { %v1849_v57 = vsel %vm1848_vm7, %v1816_v55, %v1265_v15  ;;  %v1850_v45 = vsel %vm1848_vm7, %v1817_v43, %v10734_v17  ;;  %v1752_v55 = vsel %vm1749_vm4, %v10537_v20, %v10729_v16  ;;  %v1753_v20 = vsel %vm1749_vm4, %v10540_v21, %v10738_v22 }
 0x119   : > { %1180 = vrot.lane.b32.xlu1 %v10691_v49, %s10202_s14  ;;  %v10748_v26 = vpop.permute.xlu0 %1367  ;;  %v1882_v0 = vsel %vm1881_vm8, %v1849_v57, %v1366_v18  ;;  %v10809_v18 = vsel %vm984_vm2, %v1016_v52, %v1018_v27  ;;  %v1785_v63 = vsel %vm1782_vm5, %v1752_v55, %v10742_v25 }
 0x11a   : > { %v1883_v46 = vsel %vm1881_vm8, %v1850_v45, %v10748_v26  ;;  %v582_v26 = vld [vmem:[%s10512_s18 + $0x60] sm:$0xff] }
 0x11b   : > { %v1462_v31 = vpop.permute.xlu1 %1461  ;;  %1280 = vrot.lane.b32.xlu0 %v10701_v54, %s10204_s29  ;;  %v662_v57 = vrot.slane %v582_v26, 7 }
 0x11c   : > { %v1915_v41 = vsel %vm1914_vm9, %v1882_v0, %v1462_v31 }
 0x11d   : > { %1282 = vrot.lane.b32.xlu1 %v10710_v58, %s10204_s29  ;;  %v10755_v33 = vpop.permute.xlu0 %1071  ;;  %v10860_v21 = vsel %vm641_vm0, 0.0, %v662_v57 }
 0x11e   : > { %v1786_v25 = vsel %vm1782_vm5, %v1753_v20, %v10755_v33  ;;  %v843_v43 = vrot.slane %v10860_v21, 1 }
 0x11f   : > { %v10764_v38 = vpop.permute.xlu1 %1166  ;;  %1381 = vrot.lane.b32.xlu0 %v10715_v60, %s10205_s16 }
 0x121   : > { %1383 = vrot.lane.b32.xlu1 %v10726_v5, %s10205_s16  ;;  %v1464_v44 = vpop.permute.xlu0 %1463 }
 0x122   : > { %v1916_v4 = vsel %vm1914_vm9, %v1883_v46, %v1464_v44  ;;  %v583_v44 = vld [vmem:[%s10512_s18 + $0x68] sm:$0xff] }
 0x123   : > { %v1558_v47 = vpop.permute.xlu1 %1557  ;;  %1477 = vrot.lane.b32.xlu0 %v10758_v34, %s10206_s20  ;;  %v663_v27 = vrot.slane %v583_v44, 7 }
 0x124   : > { %v1948_v15 = vsel %vm1947_vm10, %v1915_v41, %v1558_v47 }
 0x125   : > { %1479 = vrot.lane.b32.xlu1 %v10761_v35, %s10206_s20  ;;  %v1169_v56 = vpop.permute.xlu0 %1168  ;;  %v10863_v22 = vsel %vm641_vm0, %v662_v57, %v663_v27 }
 0x126   : > { %v844_v45 = vrot.slane %v10863_v22, 1 }
 0x127   : > { %v1269_v24 = vpop.permute.xlu1 %1268  ;;  %1573 = vrot.lane.b32.xlu0 %v10779_v50, %s10207_s26 }
 0x129   : > { %1575 = vrot.lane.b32.xlu1 %v10789_v23, %s10207_s26  ;;  %v1560_v32 = vpop.permute.xlu0 %1559 }
 0x12a   : > { %v1949_v51 = vsel %vm1947_vm10, %v1916_v4, %v1560_v32  ;;  %v1819_v32 = vsel %vm1815_vm6, %v1786_v25, %v1169_v56  ;;  %v765_v56 = vsel %vm641_vm0, %v663_v27, 0.0  ;;  %v585_v25 = vld [vmem:[%s10512_s18 + $0x78] sm:$0xff] }
 0x12b   : > { %v1654_v42 = vpop.permute.xlu1 %1653  ;;  %1669 = vrot.lane.b32.xlu0 %v10795_v59, %s10208_s27  ;;  %v846_v4 = vrot.slane %v765_v56, 1 }
 0x12c   : > { %v1981_v39 = vsel %vm1980_vm11, %v1948_v15, %v1654_v42 }
 0x12d   : > { %908 = vrot.lane.b32.xlu1 %v10701_v54, %s14558_s13  ;;  %8541 = vmatprep.mubr.msk.f32.mxu1 %vm2019_vm12, %v1981_v39  ;;  %v1271_v31 = vpop.permute.xlu0 %1270  ;;  %v10890_v26 = vsel %vm807_vm1, %v844_v45, %v846_v4 }
 0x12e   : > { %v1852_v41 = vsel %vm1848_vm7, %v1819_v32, %v1271_v31 }
 0x12f   : > { %v1370_v47 = vpop.permute.xlu1 %1369  ;;  %1671 = vrot.lane.b32.xlu0 %v10809_v18, %s10208_s27 }
 0x131   : > { %910 = vrot.lane.b32.xlu1 %v10710_v58, %s14558_s13  ;;  %v1656_v54 = vpop.permute.xlu0 %1655 }
 0x132   : > { %v1982_v52 = vsel %vm1980_vm11, %v1949_v51, %v1656_v54  ;;  %v10883_v54 = vsel %vm807_vm1, %v843_v43, %v844_v45 }
 0x133   : > { %v1372_v53 = vpop.permute.xlu1 %1371  ;;  %1085 = vrot.lane.b32.xlu0 %v10715_v60, %s10203_s28  ;;  %8542 = vmatmul.mubr.msk.f32.vlgmr.msra.gmra.mrb[0].mxu1 %vm2019_vm12, %v1982_v52  ;;  %v1818_v60 = vsel %vm1815_vm6, %v1785_v63, %v10764_v38  ;;  %v1020_v52 = vrot.slane %v10860_v21, 2 }
 0x134   : > { %v1851_v28 = vsel %vm1848_vm7, %v1818_v60, %v1269_v24  ;;  %v1885_v15 = vsel %vm1881_vm8, %v1852_v41, %v1372_v53  ;;  %v1021_v53 = vrot.slane %v10863_v22, 2 }
 0x135   : > { %1087 = vrot.lane.b32.xlu1 %v10726_v5, %s10203_s28  ;;  %v1466_v17 = vpop.permute.xlu0 %1465  ;;  %v1884_v16 = vsel %vm1881_vm8, %v1851_v28, %v1370_v47 }
 0x136   : > { %v1917_v38 = vsel %vm1914_vm9, %v1884_v16, %v1466_v17  ;;  %v10895_v55 = vsel %vm984_vm2, %v1020_v52, %v1021_v53 }
 0x137   : > { %v1468_v58 = vpop.permute.xlu1 %1467  ;;  %1182 = vrot.lane.b32.xlu0 %v10758_v34, %s10202_s14 }
 0x138   : > { %v1918_v39 = vsel %vm1914_vm9, %v1885_v15, %v1468_v58  ;;  %v1023_v58 = vrot.slane %v765_v56, 2 }
 0x139   : > { %1184 = vrot.lane.b32.xlu1 %v10761_v35, %s10202_s14  ;;  %v1562_v5 = vpop.permute.xlu0 %1561 }
 0x13a   : > { %v1950_v36 = vsel %vm1947_vm10, %v1917_v38, %v1562_v5  ;;  %v10902_v5 = vsel %vm984_vm2, %v1021_v53, %v1023_v58 }
 0x13b   : > { %v1564_v0 = vpop.permute.xlu1 %1563  ;;  %1284 = vrot.lane.b32.xlu0 %v10779_v50, %s10204_s29 }
 0x13c   : > { %v1951_v31 = vsel %vm1947_vm10, %v1918_v39, %v1564_v0  ;;  %v584_v0 = vld [vmem:[%s10512_s18 + $0x70] sm:$0xff] }
 0x13d   : > { %1286 = vrot.lane.b32.xlu1 %v10789_v23, %s10204_s29  ;;  %v1658_v24 = vpop.permute.xlu0 %1657 }
 0x13e   : > { %v1983_v33 = vsel %vm1980_vm11, %v1950_v36, %v1658_v24  ;;  %v665_v36 = vrot.slane %v584_v0, 7 }
 0x13f   : > { %v897_v42 = vpop.permute.xlu1 %896  ;;  %1385 = vrot.lane.b32.xlu0 %v10795_v59, %s10205_s16  ;;  %8544 = vmatprep.mubr.msk.f32.mxu1 %vm2019_vm12, %v1983_v33 }
 0x141   : > { %1387 = vrot.lane.b32.xlu1 %v10809_v18, %s10205_s16  ;;  %v1660_v46 = vpop.permute.xlu0 %1659 }
 0x142   : > { %v1984_v47 = vsel %vm1980_vm11, %v1951_v31, %v1660_v46 }
 0x143   : > { %v899_v51 = vpop.permute.xlu1 %898  ;;  %1481 = vrot.lane.b32.xlu0 %v10860_v21, %s10206_s20  ;;  %8545 = vmatmul.mubr.msk.f32.gmra.mrb[2].mxu1 %vm2019_vm12, %v1984_v47 }
 0x144   : > { %v1755_v41 = vsel %vm1749_vm4, %v10576_v40, %v899_v51  ;;  %v10937_v40 = vsel %vm641_vm0, 0.0, %v665_v36 }
 0x145   : > { %1483 = vrot.lane.b32.xlu1 %v10863_v22, %s10206_s20  ;;  %v1074_v17 = vpop.permute.xlu0 %1073  ;;  %v848_v53 = vrot.slane %v10937_v40, 1 }
 0x147   : > { %v1076_v44 = vpop.permute.xlu1 %1075  ;;  %1577 = vrot.lane.b32.xlu0 %v10883_v54, %s10207_s26 }
 0x148   : > { %v1788_v15 = vsel %vm1782_vm5, %v1755_v41, %v1076_v44 }
 0x149   : > { %1579 = vrot.lane.b32.xlu1 %v10890_v26, %s10207_s26  ;;  %v1171_v63 = vpop.permute.xlu0 %1170 }
 0x14b   : > { %v1173_v60 = vpop.permute.xlu1 %1172  ;;  %1673 = vrot.lane.b32.xlu0 %v10895_v55, %s10208_s27 }
 0x14c   : > { %v1821_v56 = vsel %vm1815_vm6, %v1788_v15, %v1173_v60  ;;  %v587_v15 = vld [vmem:[%s10512_s18 + $0x88] sm:$0xff] }
 0x14d   : > { %912 = vrot.lane.b32.xlu1 %v10779_v50, %s14558_s13  ;;  %v1273_v57 = vpop.permute.xlu0 %1272  ;;  %v1754_v50 = vsel %vm1749_vm4, %v10566_v37, %v897_v42 }
 0x14f   : > { %v1275_v27 = vpop.permute.xlu1 %1274  ;;  %1675 = vrot.lane.b32.xlu0 %v10902_v5, %s10208_s27 }
 0x150   : > { %v1854_v31 = vsel %vm1848_vm7, %v1821_v56, %v1275_v27 }
 0x151   : > { %914 = vrot.lane.b32.xlu1 %v10789_v23, %s14558_s13  ;;  %v1374_v28 = vpop.permute.xlu0 %1373  ;;  %v1787_v23 = vsel %vm1782_vm5, %v1754_v50, %v1074_v17 }
 0x152   : > { %v1820_v32 = vsel %vm1815_vm6, %v1787_v23, %v1171_v63 }
 0x153   : > { %v1376_v20 = vpop.permute.xlu1 %1375  ;;  %1089 = vrot.lane.b32.xlu0 %v10795_v59, %s10203_s28  ;;  %v1853_v24 = vsel %vm1848_vm7, %v1820_v32, %v1273_v57 }
 0x154   : > { %v1886_v37 = vsel %vm1881_vm8, %v1853_v24, %v1374_v28  ;;  %v1887_v47 = vsel %vm1881_vm8, %v1854_v31, %v1376_v20  ;;  %v1025_v28 = vrot.slane %v10937_v40, 2 }
 0x155   : > { %1091 = vrot.lane.b32.xlu1 %v10809_v18, %s10203_s28  ;;  %v1470_v16 = vpop.permute.xlu0 %1469  ;;  %v666_v18 = vrot.slane %v585_v25, 7 }
 0x156   : > { %v1919_v42 = vsel %vm1914_vm9, %v1886_v37, %v1470_v16 }
 0x157   : > { %v1472_v38 = vpop.permute.xlu1 %1471  ;;  %1186 = vrot.lane.b32.xlu0 %v10860_v21, %s10202_s14  ;;  %v10940_v45 = vsel %vm641_vm0, %v665_v36, %v666_v18  ;;  %v766_v51 = vsel %vm641_vm0, %v666_v18, 0.0 }
 0x158   : > { %v1920_v52 = vsel %vm1914_vm9, %v1887_v47, %v1472_v38  ;;  %v849_v17 = vrot.slane %v10940_v45, 1  ;;  %v851_v60 = vrot.slane %v766_v51, 1  ;;  %v1026_v20 = vrot.slane %v10940_v45, 2 }
 0x159   : > { %1188 = vrot.lane.b32.xlu1 %v10863_v22, %s10202_s14  ;;  %v1566_v59 = vpop.permute.xlu0 %1565  ;;  %v1028_v38 = vrot.slane %v766_v51, 2 }
 0x15a   : > { %v1952_v39 = vsel %vm1947_vm10, %v1919_v42, %v1566_v59  ;;  %v10960_v27 = vsel %vm807_vm1, %v848_v53, %v849_v17  ;;  %v10967_v0 = vsel %vm807_vm1, %v849_v17, %v851_v60  ;;  %v10972_v50 = vsel %vm984_vm2, %v1025_v28, %v1026_v20 }
 0x15b   : > { %v1568_v33 = vpop.permute.xlu1 %1567  ;;  %1288 = vrot.lane.b32.xlu0 %v10883_v54, %s10204_s29  ;;  %v10979_v59 = vsel %vm984_vm2, %v1026_v20, %v1028_v38 }
 0x15c   : > { %v1953_v44 = vsel %vm1947_vm10, %v1920_v52, %v1568_v33  ;;  %v586_v33 = vld [vmem:[%s10512_s18 + $0x80] sm:$0xff] }
 0x15d   : > { %1290 = vrot.lane.b32.xlu1 %v10890_v26, %s10204_s29  ;;  %v1662_v43 = vpop.permute.xlu0 %1661 }
 0x15e   : > { %v1985_v46 = vsel %vm1980_vm11, %v1952_v39, %v1662_v43  ;;  %v668_v39 = vrot.slane %v586_v33, 7 }
 0x15f   : > { %v901_v4 = vpop.permute.xlu1 %900  ;;  %1389 = vrot.lane.b32.xlu0 %v10895_v55, %s10205_s16  ;;  %8547 = vmatprep.mubr.msk.f32.mxu1 %vm2019_vm12, %v1985_v46 }
 0x161   : > { %1391 = vrot.lane.b32.xlu1 %v10902_v5, %s10205_s16  ;;  %v1664_v58 = vpop.permute.xlu0 %1663 }
 0x162   : > { %v1986_v63 = vsel %vm1980_vm11, %v1953_v44, %v1664_v58 }
 0x163   : > { %v903_v57 = vpop.permute.xlu1 %902  ;;  %1485 = vrot.lane.b32.xlu0 %v10937_v40, %s10206_s20  ;;  %8548 = vmatmul.mubr.msk.f32.gmra.mrb[4].mxu1 %vm2019_vm12, %v1986_v63 }
 0x164   : > { %v1757_v31 = vsel %vm1749_vm4, %v10617_v62, %v903_v57  ;;  %v11014_v62 = vsel %vm641_vm0, 0.0, %v668_v39 }
 0x165   : > { %1487 = vrot.lane.b32.xlu1 %v10940_v45, %s10206_s20  ;;  %v1078_v16 = vpop.permute.xlu0 %1077  ;;  %v853_v20 = vrot.slane %v11014_v62, 1 }
 0x167   : > { %v1080_v25 = vpop.permute.xlu1 %1079  ;;  %1581 = vrot.lane.b32.xlu0 %v10960_v27, %s10207_s26 }
 0x168   : > { %v1790_v47 = vsel %vm1782_vm5, %v1757_v31, %v1080_v25 }
 0x169   : > { %1583 = vrot.lane.b32.xlu1 %v10967_v0, %s10207_s26  ;;  %v1175_v23 = vpop.permute.xlu0 %1174 }
 0x16b   : > { %v1177_v32 = vpop.permute.xlu1 %1176  ;;  %1677 = vrot.lane.b32.xlu0 %v10972_v50, %s10208_s27 }
 0x16c   : > { %v1823_v51 = vsel %vm1815_vm6, %v1790_v47, %v1177_v32  ;;  %v589_v47 = vld [vmem:[%s10512_s18 + $0x98] sm:$0xff] }
 0x16d   : > { %916 = vrot.lane.b32.xlu1 %v10883_v54, %s14558_s13  ;;  %v1277_v36 = vpop.permute.xlu0 %1276  ;;  %v1756_v54 = vsel %vm1749_vm4, %v10614_v61, %v901_v4 }
 0x16f   : > { %v1279_v18 = vpop.permute.xlu1 %1278  ;;  %1679 = vrot.lane.b32.xlu0 %v10979_v59, %s10208_s27 }
 0x170   : > { %v1856_v44 = vsel %vm1848_vm7, %v1823_v51, %v1279_v18 }
 0x171   : > { %918 = vrot.lane.b32.xlu1 %v10890_v26, %s14558_s13  ;;  %v1378_v24 = vpop.permute.xlu0 %1377  ;;  %v1789_v26 = vsel %vm1782_vm5, %v1756_v54, %v1078_v16 }
 0x172   : > { %v1822_v56 = vsel %vm1815_vm6, %v1789_v26, %v1175_v23 }
 0x173   : > { %v1380_v41 = vpop.permute.xlu1 %1379  ;;  %1093 = vrot.lane.b32.xlu0 %v10895_v55, %s10203_s28  ;;  %v1855_v43 = vsel %vm1848_vm7, %v1822_v56, %v1277_v36 }
 0x174   : > { %v1888_v61 = vsel %vm1881_vm8, %v1855_v43, %v1378_v24  ;;  %v1889_v63 = vsel %vm1881_vm8, %v1856_v44, %v1380_v41  ;;  %v1030_v24 = vrot.slane %v11014_v62, 2  ;;  %v2410_v44 = vld [vmem:[#allocation2 + $0x108] sm:$0xff] }
 0x175   : > { %1095 = vrot.lane.b32.xlu1 %v10902_v5, %s10203_s28  ;;  %v1474_v37 = vpop.permute.xlu0 %1473  ;;  %v669_v5 = vrot.slane %v587_v15, 7 }
 0x176   : > { %v1921_v4 = vsel %vm1914_vm9, %v1888_v61, %v1474_v37 }
 0x177   : > { %v1476_v42 = vpop.permute.xlu1 %1475  ;;  %1190 = vrot.lane.b32.xlu0 %v10937_v40, %s10202_s14  ;;  %v11017_v17 = vsel %vm641_vm0, %v668_v39, %v669_v5  ;;  %v767_v57 = vsel %vm641_vm0, %v669_v5, 0.0 }
 0x178   : > { %v1922_v28 = vsel %vm1914_vm9, %v1889_v63, %v1476_v42  ;;  %v854_v16 = vrot.slane %v11017_v17, 1  ;;  %v856_v32 = vrot.slane %v767_v57, 1  ;;  %v1031_v41 = vrot.slane %v11017_v17, 2 }
 0x179   : > { %1192 = vrot.lane.b32.xlu1 %v10940_v45, %s10202_s14  ;;  %v1570_v55 = vpop.permute.xlu0 %1569  ;;  %v1033_v42 = vrot.slane %v767_v57, 2 }
 0x17a   : > { %v1954_v52 = vsel %vm1947_vm10, %v1921_v4, %v1570_v55  ;;  %v11037_v18 = vsel %vm807_vm1, %v853_v20, %v854_v16  ;;  %v11044_v33 = vsel %vm807_vm1, %v854_v16, %v856_v32  ;;  %v11049_v54 = vsel %vm984_vm2, %v1030_v24, %v1031_v41  ;;  %v2411_v32 = vld [vmem:[#allocation2 + $0x110] sm:$0xff] }
 0x17b   : > { %v1572_v46 = vpop.permute.xlu1 %1571  ;;  %1292 = vrot.lane.b32.xlu0 %v10960_v27, %s10204_s29  ;;  %v11056_v55 = vsel %vm984_vm2, %v1031_v41, %v1033_v42 }
 0x17c   : > { %v1955_v25 = vsel %vm1947_vm10, %v1922_v28, %v1572_v46  ;;  %v588_v46 = vld [vmem:[%s10512_s18 + $0x90] sm:$0xff] }
 0x17d   : > { %1294 = vrot.lane.b32.xlu1 %v10967_v0, %s10204_s29  ;;  %v1666_v53 = vpop.permute.xlu0 %1665 }
 0x17e   : > { %v1987_v58 = vsel %vm1980_vm11, %v1954_v52, %v1666_v53  ;;  %v671_v52 = vrot.slane %v588_v46, 7  ;;  %v2409_v53 = vld [vmem:[#allocation2 + $0x100] sm:$0xff] }
 0x17f   : > { %v905_v60 = vpop.permute.xlu1 %904  ;;  %1393 = vrot.lane.b32.xlu0 %v10972_v50, %s10205_s16  ;;  %8550 = vmatprep.mubr.msk.f32.mxu1 %vm2019_vm12, %v1987_v58  ;;  %v8803_v63 = vpack.c.bf16 %v2410_v44, %v2409_v53 }
 0x181   : > { %1395 = vrot.lane.b32.xlu1 %v10979_v59, %s10205_s16  ;;  %v1668_v38 = vpop.permute.xlu0 %1667  ;;  %8804 = vmatprep.subr.bf16.mxu0 %v8803_v63 }
 0x182   : > { %v1988_v23 = vsel %vm1980_vm11, %v1955_v25, %v1668_v38  ;;  %8806 = vmatpush3.bf16.msra.mxu0 %v8803_v63 }
 0x183   : > { %v907_v36 = vpop.permute.xlu1 %906  ;;  %1489 = vrot.lane.b32.xlu0 %v11014_v62, %s10206_s20  ;;  %8551 = vmatmul.mubr.msk.f32.gmra.mrb[6].mxu1 %vm2019_vm12, %v1988_v23 }
 0x185   : > { %1491 = vrot.lane.b32.xlu1 %v11017_v17, %s10206_s20  ;;  %v1082_v37 = vpop.permute.xlu0 %1081 }
 0x187   : > { %v1084_v15 = vpop.permute.xlu1 %1083  ;;  %1585 = vrot.lane.b32.xlu0 %v11037_v18, %s10207_s26 }
 0x189   : > { %1587 = vrot.lane.b32.xlu1 %v11044_v33, %s10207_s26  ;;  %v1179_v26 = vpop.permute.xlu0 %1178 }
 0x18b   : > { %v1181_v56 = vpop.permute.xlu1 %1180  ;;  %1681 = vrot.lane.b32.xlu0 %v11049_v54, %s10208_s27 }
 0x18d   : > { %920 = vrot.lane.b32.xlu1 %v10960_v27, %s14558_s13  ;;  %v1281_v39 = vpop.permute.xlu0 %1280  ;;  %v1758_v27 = vsel %vm1749_vm4, %v10651_v29, %v905_v60  ;;  %v1759_v29 = vsel %vm1749_vm4, %v10654_v30, %v907_v36  ;;  %v11091_v30 = vsel %vm641_vm0, 0.0, %v671_v52  ;;  %v2412_v36 = vld [vmem:[#allocation2 + $0x118] sm:$0xff] }
 0x18e   : > { %v1792_v28 = vsel %vm1782_vm5, %v1759_v29, %v1084_v15 }
 0x18f   : > { %v1283_v5 = vpop.permute.xlu1 %1282  ;;  %1683 = vrot.lane.b32.xlu0 %v11056_v55, %s10208_s27  ;;  %v1825_v16 = vsel %vm1815_vm6, %v1792_v28, %v1181_v56 }
 0x190   : > { %v1858_v24 = vsel %vm1848_vm7, %v1825_v16, %v1283_v5  ;;  %v590_v16 = vld [vmem:[%s10512_s18 + $0xa0] sm:$0xff] }
 0x191   : > { %922 = vrot.lane.b32.xlu1 %v10967_v0, %s14558_s13  ;;  %v1382_v43 = vpop.permute.xlu0 %1381  ;;  %v1791_v0 = vsel %vm1782_vm5, %v1758_v27, %v1082_v37  ;;  %v8807_v37 = vpack.c.bf16 %v2412_v36, %v2411_v32  ;;  %v674_v36 = vrot.slane %v590_v16, 7 }
 0x192   : > { %v1824_v51 = vsel %vm1815_vm6, %v1791_v0, %v1179_v26 }
 0x193   : > { %v1384_v31 = vpop.permute.xlu1 %1383  ;;  %1097 = vrot.lane.b32.xlu0 %v10972_v50, %s10203_s28  ;;  %v1857_v58 = vsel %vm1848_vm7, %v1824_v51, %v1281_v39  ;;  %v858_v39 = vrot.slane %v11091_v30, 1  ;;  %8808 = vmatprep.subr.bf16.mxu0 %v8807_v37 }
 0x194   : > { %v1890_v60 = vsel %vm1881_vm8, %v1857_v58, %v1382_v43  ;;  %v1891_v15 = vsel %vm1881_vm8, %v1858_v24, %v1384_v31  ;;  %8810 = vmatpush3.bf16.msra.mxu0 %v8807_v37 }
 0x195   : > { %1099 = vrot.lane.b32.xlu1 %v10979_v59, %s10203_s28  ;;  %v1478_v61 = vpop.permute.xlu0 %1477  ;;  %v672_v59 = vrot.slane %v589_v47, 7 }
 0x196   : > { %v1923_v20 = vsel %vm1914_vm9, %v1890_v60, %v1478_v61 }
 0x197   : > { %v1480_v4 = vpop.permute.xlu1 %1479  ;;  %1194 = vrot.lane.b32.xlu0 %v11014_v62, %s10202_s14  ;;  %v11094_v23 = vsel %vm641_vm0, %v671_v52, %v672_v59  ;;  %v768_v26 = vsel %vm641_vm0, %v672_v59, 0.0 }
 0x198   : > { %v1924_v56 = vsel %vm1914_vm9, %v1891_v15, %v1480_v4  ;;  %v859_v43 = vrot.slane %v11094_v23, 1  ;;  %v861_v46 = vrot.slane %v768_v26, 1  ;;  %v1035_v4 = vrot.slane %v11091_v30, 2 }
 0x199   : > { %1196 = vrot.lane.b32.xlu1 %v11017_v17, %s10202_s14  ;;  %v1574_v50 = vpop.permute.xlu0 %1573  ;;  %v1036_v0 = vrot.slane %v11094_v23, 2  ;;  %v1038_v53 = vrot.slane %v768_v26, 2 }
 0x19a   : > { %v1956_v25 = vsel %vm1947_vm10, %v1923_v20, %v1574_v50  ;;  %v11114_v27 = vsel %vm807_vm1, %v858_v39, %v859_v43  ;;  %v11121_v50 = vsel %vm807_vm1, %v859_v43, %v861_v46 }
 0x19b   : > { %v1576_v57 = vpop.permute.xlu1 %1575  ;;  %1296 = vrot.lane.b32.xlu0 %v11037_v18, %s10204_s29  ;;  %v11126_v59 = vsel %vm984_vm2, %v1035_v4, %v1036_v0  ;;  %v11133_v63 = vsel %vm984_vm2, %v1036_v0, %v1038_v53 }
 0x19c   : > { %v1957_v5 = vsel %vm1947_vm10, %v1924_v56, %v1576_v57 }
 0x19d   : > { %1298 = vrot.lane.b32.xlu1 %v11044_v33, %s10204_s29  ;;  %v1670_v38 = vpop.permute.xlu0 %1669 }
 0x19e   : > { %v1989_v41 = vsel %vm1980_vm11, %v1956_v25, %v1670_v38  ;;  %v591_v25 = vld [vmem:[%s10512_s18 + $0xa8] sm:$0xff] }
 0x19f   : > { %v909_v42 = vpop.permute.xlu1 %908  ;;  %1397 = vrot.lane.b32.xlu0 %v11049_v54, %s10205_s16  ;;  %8553 = vmatprep.mubr.msk.f32.mxu1 %vm2019_vm12, %v1989_v41 }
 0x1a1   : > { %1399 = vrot.lane.b32.xlu1 %v11056_v55, %s10205_s16  ;;  %v1672_v31 = vpop.permute.xlu0 %1671 }
 0x1a2   : > { %v1990_v61 = vsel %vm1980_vm11, %v1957_v5, %v1672_v31 }
 0x1a3   : > { %v911_v47 = vpop.permute.xlu1 %910  ;;  %1493 = vrot.lane.b32.xlu0 %v11091_v30, %s10206_s20  ;;  %8554 = vmatmul.mubr.msk.f32.gmra.mrb[8].mxu1 %vm2019_vm12, %v1990_v61 }
 0x1a4   : > { %v1761_v41 = vsel %vm1749_vm4, %v10691_v49, %v911_v47  ;;  %v11168_v49 = vsel %vm641_vm0, 0.0, %v674_v36 }
 0x1a5   : > { %1495 = vrot.lane.b32.xlu1 %v11094_v23, %s10206_s20  ;;  %v1086_v51 = vpop.permute.xlu0 %1085  ;;  %v863_v0 = vrot.slane %v11168_v49, 1 }
 0x1a7   : > { %v1088_v52 = vpop.permute.xlu1 %1087  ;;  %1589 = vrot.lane.b32.xlu0 %v11114_v27, %s10207_s26 }
 0x1a8   : > { %v1794_v15 = vsel %vm1782_vm5, %v1761_v41, %v1088_v52 }
 0x1a9   : > { %1591 = vrot.lane.b32.xlu1 %v11121_v50, %s10207_s26  ;;  %v1183_v44 = vpop.permute.xlu0 %1182 }
 0x1ab   : > { %v1185_v58 = vpop.permute.xlu1 %1184  ;;  %1685 = vrot.lane.b32.xlu0 %v11126_v59, %s10208_s27 }
 0x1ac   : > { %v1827_v26 = vsel %vm1815_vm6, %v1794_v15, %v1185_v58  ;;  %v593_v15 = vld [vmem:[%s10512_s18 + $0xb8] sm:$0xff] }
 0x1ad   : > { %924 = vrot.lane.b32.xlu1 %v11037_v18, %s14558_s13  ;;  %v1285_v29 = vpop.permute.xlu0 %1284  ;;  %v1760_v18 = vsel %vm1749_vm4, %v10688_v48, %v909_v42 }
 0x1af   : > { %v1287_v60 = vpop.permute.xlu1 %1286  ;;  %1687 = vrot.lane.b32.xlu0 %v11133_v63, %s10208_s27 }
 0x1b0   : > { %v1860_v5 = vsel %vm1848_vm7, %v1827_v26, %v1287_v60 }
 0x1b1   : > { %926 = vrot.lane.b32.xlu1 %v11044_v33, %s14558_s13  ;;  %v1386_v57 = vpop.permute.xlu0 %1385  ;;  %v1793_v33 = vsel %vm1782_vm5, %v1760_v18, %v1086_v51 }
 0x1b2   : > { %v1826_v32 = vsel %vm1815_vm6, %v1793_v33, %v1183_v44 }
 0x1b3   : > { %v1388_v28 = vpop.permute.xlu1 %1387  ;;  %1101 = vrot.lane.b32.xlu0 %v11049_v54, %s10203_s28  ;;  %v1859_v24 = vsel %vm1848_vm7, %v1826_v32, %v1285_v29 }
 0x1b4   : > { %v1892_v48 = vsel %vm1881_vm8, %v1859_v24, %v1386_v57  ;;  %v1893_v61 = vsel %vm1881_vm8, %v1860_v5, %v1388_v28  ;;  %v1040_v57 = vrot.slane %v11168_v49, 2 }
 0x1b5   : > { %1103 = vrot.lane.b32.xlu1 %v11056_v55, %s10203_s28  ;;  %v1482_v20 = vpop.permute.xlu0 %1481  ;;  %v675_v55 = vrot.slane %v591_v25, 7 }
 0x1b6   : > { %v1925_v42 = vsel %vm1914_vm9, %v1892_v48, %v1482_v20 }
 0x1b7   : > { %v1484_v38 = vpop.permute.xlu1 %1483  ;;  %1198 = vrot.lane.b32.xlu0 %v11091_v30, %s10202_s14  ;;  %v11171_v43 = vsel %vm641_vm0, %v674_v36, %v675_v55  ;;  %v769_v47 = vsel %vm641_vm0, %v675_v55, 0.0 }
 0x1b8   : > { %v1926_v4 = vsel %vm1914_vm9, %v1893_v61, %v1484_v38  ;;  %v864_v51 = vrot.slane %v11171_v43, 1  ;;  %v866_v58 = vrot.slane %v769_v47, 1  ;;  %v1041_v28 = vrot.slane %v11171_v43, 2 }
 0x1b9   : > { %1200 = vrot.lane.b32.xlu1 %v11094_v23, %s10202_s14  ;;  %v1578_v54 = vpop.permute.xlu0 %1577  ;;  %v1043_v38 = vrot.slane %v769_v47, 2 }
 0x1ba   : > { %v1958_v56 = vsel %vm1947_vm10, %v1925_v42, %v1578_v54  ;;  %v11191_v60 = vsel %vm807_vm1, %v863_v0, %v864_v51  ;;  %v11198_v16 = vsel %vm807_vm1, %v864_v51, %v866_v58  ;;  %v11203_v18 = vsel %vm984_vm2, %v1040_v57, %v1041_v28 }
 0x1bb   : > { %v1580_v37 = vpop.permute.xlu1 %1579  ;;  %1300 = vrot.lane.b32.xlu0 %v11114_v27, %s10204_s29  ;;  %v11210_v54 = vsel %vm984_vm2, %v1041_v28, %v1043_v38 }
 0x1bc   : > { %v1959_v52 = vsel %vm1947_vm10, %v1926_v4, %v1580_v37  ;;  %v592_v37 = vld [vmem:[%s10512_s18 + $0xb0] sm:$0xff] }
 0x1bd   : > { %1302 = vrot.lane.b32.xlu1 %v11121_v50, %s10204_s29  ;;  %v1674_v39 = vpop.permute.xlu0 %1673 }
 0x1be   : > { %v1991_v31 = vsel %vm1980_vm11, %v1958_v56, %v1674_v39  ;;  %v677_v56 = vrot.slane %v592_v37, 7 }
 0x1bf   : > { %v913_v46 = vpop.permute.xlu1 %912  ;;  %1401 = vrot.lane.b32.xlu0 %v11126_v59, %s10205_s16  ;;  %8556 = vmatprep.mubr.msk.f32.mxu1 %vm2019_vm12, %v1991_v31 }
 0x1c1   : > { %1403 = vrot.lane.b32.xlu1 %v11133_v63, %s10205_s16  ;;  %v1676_v53 = vpop.permute.xlu0 %1675 }
 0x1c2   : > { %v1992_v44 = vsel %vm1980_vm11, %v1959_v52, %v1676_v53 }
 0x1c3   : > { %v915_v29 = vpop.permute.xlu1 %914  ;;  %1497 = vrot.lane.b32.xlu0 %v11168_v49, %s10206_s20  ;;  %8557 = vmatmul.mubr.msk.f32.gmra.mrb[10].mxu1 %vm2019_vm12, %v1992_v44 }
 0x1c4   : > { %v1763_v5 = vsel %vm1749_vm4, %v10761_v35, %v915_v29  ;;  %v11245_v35 = vsel %vm641_vm0, 0.0, %v677_v56 }
 0x1c5   : > { %1499 = vrot.lane.b32.xlu1 %v11171_v43, %s10206_s20  ;;  %v1090_v20 = vpop.permute.xlu0 %1089  ;;  %v868_v28 = vrot.slane %v11245_v35, 1 }
 0x1c7   : > { %v1092_v25 = vpop.permute.xlu1 %1091  ;;  %1593 = vrot.lane.b32.xlu0 %v11191_v60, %s10207_s26 }
 0x1c8   : > { %v1796_v61 = vsel %vm1782_vm5, %v1763_v5, %v1092_v25 }
 0x1c9   : > { %1595 = vrot.lane.b32.xlu1 %v11198_v16, %s10207_s26  ;;  %v1187_v33 = vpop.permute.xlu0 %1186 }
 0x1cb   : > { %v1189_v32 = vpop.permute.xlu1 %1188  ;;  %1689 = vrot.lane.b32.xlu0 %v11203_v18, %s10208_s27 }
 0x1cc   : > { %v1829_v47 = vsel %vm1815_vm6, %v1796_v61, %v1189_v32  ;;  %v595_v61 = vld [vmem:[%s10512_s18 + $0xc8] sm:$0xff] }
 0x1cd   : > { %928 = vrot.lane.b32.xlu1 %v11114_v27, %s14558_s13  ;;  %v1289_v36 = vpop.permute.xlu0 %1288  ;;  %v1762_v27 = vsel %vm1749_vm4, %v10758_v34, %v913_v46 }
 0x1cf   : > { %v1291_v55 = vpop.permute.xlu1 %1290  ;;  %1691 = vrot.lane.b32.xlu0 %v11210_v54, %s10208_s27 }
 0x1d0   : > { %v1862_v52 = vsel %vm1848_vm7, %v1829_v47, %v1291_v55 }
 0x1d1   : > { %930 = vrot.lane.b32.xlu1 %v11121_v50, %s14558_s13  ;;  %v1390_v24 = vpop.permute.xlu0 %1389  ;;  %v1795_v50 = vsel %vm1782_vm5, %v1762_v27, %v1090_v20 }
 0x1d2   : > { %v1828_v26 = vsel %vm1815_vm6, %v1795_v50, %v1187_v33 }
 0x1d3   : > { %v1392_v41 = vpop.permute.xlu1 %1391  ;;  %1105 = vrot.lane.b32.xlu0 %v11126_v59, %s10203_s28  ;;  %v1861_v39 = vsel %vm1848_vm7, %v1828_v26, %v1289_v36 }
 0x1d4   : > { %v1894_v34 = vsel %vm1881_vm8, %v1861_v39, %v1390_v24  ;;  %v1895_v44 = vsel %vm1881_vm8, %v1862_v52, %v1392_v41  ;;  %v1045_v24 = vrot.slane %v11245_v35, 2 }
 0x1d5   : > { %1107 = vrot.lane.b32.xlu1 %v11133_v63, %s10203_s28  ;;  %v1486_v48 = vpop.permute.xlu0 %1485  ;;  %v678_v63 = vrot.slane %v593_v15, 7 }
 0x1d6   : > { %v1927_v46 = vsel %vm1914_vm9, %v1894_v34, %v1486_v48 }
 0x1d7   : > { %v1488_v42 = vpop.permute.xlu1 %1487  ;;  %1202 = vrot.lane.b32.xlu0 %v11168_v49, %s10202_s14  ;;  %v11248_v51 = vsel %vm641_vm0, %v677_v56, %v678_v63  ;;  %v770_v29 = vsel %vm641_vm0, %v678_v63, 0.0 }
 0x1d8   : > { %v1928_v57 = vsel %vm1914_vm9, %v1895_v44, %v1488_v42  ;;  %v869_v20 = vrot.slane %v11248_v51, 1  ;;  %v871_v32 = vrot.slane %v770_v29, 1  ;;  %v1046_v41 = vrot.slane %v11248_v51, 2 }
 0x1d9   : > { %1204 = vrot.lane.b32.xlu1 %v11171_v43, %s10202_s14  ;;  %v1582_v59 = vpop.permute.xlu0 %1581  ;;  %v1048_v42 = vrot.slane %v770_v29, 2 }
 0x1da   : > { %v1960_v4 = vsel %vm1947_vm10, %v1927_v46, %v1582_v59  ;;  %v11268_v55 = vsel %vm807_vm1, %v868_v28, %v869_v20  ;;  %v11275_v37 = vsel %vm807_vm1, %v869_v20, %v871_v32  ;;  %v11280_v27 = vsel %vm984_vm2, %v1045_v24, %v1046_v41 }
 0x1db   : > { %v1584_v31 = vpop.permute.xlu1 %1583  ;;  %1304 = vrot.lane.b32.xlu0 %v11191_v60, %s10204_s29  ;;  %v11287_v59 = vsel %vm984_vm2, %v1046_v41, %v1048_v42 }
 0x1dc   : > { %v1961_v25 = vsel %vm1947_vm10, %v1928_v57, %v1584_v31  ;;  %v594_v31 = vld [vmem:[%s10512_s18 + $0xc0] sm:$0xff] }
 0x1dd   : > { %1306 = vrot.lane.b32.xlu1 %v11198_v16, %s10204_s29  ;;  %v1678_v0 = vpop.permute.xlu0 %1677 }
 0x1de   : > { %v1993_v53 = vsel %vm1980_vm11, %v1960_v4, %v1678_v0  ;;  %v680_v4 = vrot.slane %v594_v31, 7 }
 0x1df   : > { %v917_v58 = vpop.permute.xlu1 %916  ;;  %1405 = vrot.lane.b32.xlu0 %v11203_v18, %s10205_s16  ;;  %8559 = vmatprep.mubr.msk.f32.mxu1 %vm2019_vm12, %v1993_v53 }
 0x1e1   : > { %1407 = vrot.lane.b32.xlu1 %v11210_v54, %s10205_s16  ;;  %v1680_v38 = vpop.permute.xlu0 %1679 }
 0x1e2   : > { %v1994_v33 = vsel %vm1980_vm11, %v1961_v25, %v1680_v38 }
 0x1e3   : > { %v919_v36 = vpop.permute.xlu1 %918  ;;  %1501 = vrot.lane.b32.xlu0 %v11245_v35, %s10206_s20  ;;  %8560 = vmatmul.mubr.msk.f32.gmra.mrb[12].mxu1 %vm2019_vm12, %v1994_v33 }
 0x1e4   : > { %v1765_v52 = vsel %vm1749_vm4, %v10863_v22, %v919_v36  ;;  %v11322_v22 = vsel %vm641_vm0, 0.0, %v680_v4 }
 0x1e5   : > { %1503 = vrot.lane.b32.xlu1 %v11248_v51, %s10206_s20  ;;  %v1094_v48 = vpop.permute.xlu0 %1093  ;;  %v873_v41 = vrot.slane %v11322_v22, 1 }
 0x1e7   : > { %v1096_v15 = vpop.permute.xlu1 %1095  ;;  %1597 = vrot.lane.b32.xlu0 %v11268_v55, %s10207_s26 }
 0x1e8   : > { %v1798_v44 = vsel %vm1782_vm5, %v1765_v52, %v1096_v15 }
 0x1e9   : > { %1599 = vrot.lane.b32.xlu1 %v11275_v37, %s10207_s26  ;;  %v1191_v50 = vpop.permute.xlu0 %1190 }
 0x1eb   : > { %v1193_v26 = vpop.permute.xlu1 %1192  ;;  %1693 = vrot.lane.b32.xlu0 %v11280_v27, %s10208_s27 }
 0x1ec   : > { %v1831_v29 = vsel %vm1815_vm6, %v1798_v44, %v1193_v26 }
 0x1ed   : > { %932 = vrot.lane.b32.xlu1 %v11191_v60, %s14558_s13  ;;  %v1293_v56 = vpop.permute.xlu0 %1292  ;;  %v1764_v60 = vsel %vm1749_vm4, %v10860_v21, %v917_v58 }
 0x1ef   : > { %v1295_v63 = vpop.permute.xlu1 %1294  ;;  %1695 = vrot.lane.b32.xlu0 %v11287_v59, %s10208_s27 }
 0x1f0   : > { %v1864_v25 = vsel %vm1848_vm7, %v1831_v29, %v1295_v63  ;;  %v11347_v63 = vld [vmem:[%s14501_s2] ss:$0 sm:$0xff] }
 0x1f1   : > { %934 = vrot.lane.b32.xlu1 %v11198_v16, %s14558_s13  ;;  %v1394_v39 = vpop.permute.xlu0 %1393  ;;  %v1797_v16 = vsel %vm1782_vm5, %v1764_v60, %v1094_v48 }
 0x1f2   : > { %v1830_v47 = vsel %vm1815_vm6, %v1797_v16, %v1191_v50 }
 0x1f3   : > { %v1396_v5 = vpop.permute.xlu1 %1395  ;;  %1109 = vrot.lane.b32.xlu0 %v11203_v18, %s10203_s28  ;;  %v1863_v0 = vsel %vm1848_vm7, %v1830_v47, %v1293_v56 }
 0x1f4   : > { %v1896_v21 = vsel %vm1881_vm8, %v1863_v0, %v1394_v39  ;;  %v1897_v33 = vsel %vm1881_vm8, %v1864_v25, %v1396_v5  ;;  %v1050_v5 = vrot.slane %v11322_v22, 2 }
 0x1f5   : > { %1111 = vrot.lane.b32.xlu1 %v11210_v54, %s10203_s28  ;;  %v1490_v34 = vpop.permute.xlu0 %1489  ;;  %v681_v54 = vrot.slane %v595_v61, 7 }
 0x1f6   : > { %v1929_v58 = vsel %vm1914_vm9, %v1896_v21, %v1490_v34 }
 0x1f7   : > { %v1492_v46 = vpop.permute.xlu1 %1491  ;;  %1206 = vrot.lane.b32.xlu0 %v11245_v35, %s10202_s14  ;;  %v11325_v20 = vsel %vm641_vm0, %v680_v4, %v681_v54  ;;  %v771_v36 = vsel %vm641_vm0, %v681_v54, 0.0 }
 0x1f8   : > { %v1930_v24 = vsel %vm1914_vm9, %v1897_v33, %v1492_v46  ;;  %v874_v48 = vrot.slane %v11325_v20, 1  ;;  %v876_v26 = vrot.slane %v771_v36, 1  ;;  %v1051_v34 = vrot.slane %v11325_v20, 2 }
 0x1f9   : > { %1208 = vrot.lane.b32.xlu1 %v11248_v51, %s10202_s14  ;;  %v1586_v18 = vpop.permute.xlu0 %1585  ;;  %v1053_v54 = vrot.slane %v771_v36, 2  ;;  %v596_v36 = vld [vmem:[%s10512_s18 + $0xd0] sm:$0xff] }
 0x1fa   : > { %v1962_v57 = vsel %vm1947_vm10, %v1929_v58, %v1586_v18  ;;  %v11350_v39 = vsel %vm807_vm1, %v873_v41, %v874_v48  ;;  %v11357_v60 = vsel %vm807_vm1, %v874_v48, %v876_v26  ;;  %v11364_v4 = vsel %vm984_vm2, %v1050_v5, %v1051_v34  ;;  %v597_v41 = vld [vmem:[%s10512_s18 + $0xd8] sm:$0xff] }
 0x1fb   : > { %v1588_v53 = vpop.permute.xlu1 %1587  ;;  %1308 = vrot.lane.b32.xlu0 %v11268_v55, %s10204_s29  ;;  %v11375_v29 = vsel %vm984_vm2, %v1051_v34, %v1053_v54  ;;  %v684_v34 = vrot.slane %v597_v41, 7 }
 0x1fc   : > { %v1963_v15 = vsel %vm1947_vm10, %v1930_v24, %v1588_v53 }
 0x1fd   : > { %1310 = vrot.lane.b32.xlu1 %v11275_v37, %s10204_s29  ;;  %v1682_v28 = vpop.permute.xlu0 %1681 }
 0x1fe   : > { %v1995_v38 = vsel %vm1980_vm11, %v1962_v57, %v1682_v28 }
 0x1ff   : > { %v921_v32 = vpop.permute.xlu1 %920  ;;  %1409 = vrot.lane.b32.xlu0 %v11280_v27, %s10205_s16  ;;  %8562 = vmatprep.mubr.msk.f32.mxu1 %vm2019_vm12, %v1995_v38 }
 0x201   : > { %1411 = vrot.lane.b32.xlu1 %v11287_v59, %s10205_s16  ;;  %v1684_v42 = vpop.permute.xlu0 %1683 }
 0x202   : > { %v1996_v50 = vsel %vm1980_vm11, %v1963_v15, %v1684_v42 }
 0x203   : > { %v923_v56 = vpop.permute.xlu1 %922  ;;  %1505 = vrot.lane.b32.xlu0 %v11322_v22, %s10206_s20  ;;  %8563 = vmatmul.mubr.msk.f32.gmra.mrb[14].mxu1 %vm2019_vm12, %v1996_v50 }
 0x205   : > { %1507 = vrot.lane.b32.xlu1 %v11325_v20, %s10206_s20  ;;  %v1098_v31 = vpop.permute.xlu0 %1097 }
 0x206   : > { %v8543_v61 = vpop.f32.mrb[0].mxu1 }
 0x207   : > { %v2192_v46 = vadd.f32 %v8543_v61, %v11347_v63  ;;  %v1100_v16 = vpop.permute.xlu1 %1099  ;;  %v2186_v47 = vpop.f32.mrb[1].mxu1  ;;  %1601 = vrot.lane.b32.xlu0 %v11350_v39, %s10207_s26  ;;  %v1767_v61 = vsel %vm1749_vm4, %v10940_v45, %v923_v56 }
 0x208   : > { %v2187_v18 = vadd.f32 %v11347_v63, %v2186_v47 }
 0x209   : > { %v2346_v0 = vmax.f32 %v2192_v46, 0.0  ;;  %1603 = vrot.lane.b32.xlu1 %v11357_v60, %s10207_s26  ;;  %v1195_v52 = vpop.permute.xlu0 %1194 }
 0x20a   : > { %v2345_v21 = vmax.f32 %v2187_v18, 0.0  ;;  %v1800_v18 = vsel %vm1782_vm5, %v1767_v61, %v1100_v16 }
 0x20b   : > { %v11368_v53 = vrot.slane %v2346_v0, 7  ;;  %v1197_v44 = vpop.permute.xlu1 %1196  ;;  %1697 = vrot.lane.b32.xlu0 %v11364_v4, %s10208_s27 }
 0x20c   : > { %v11372_v58 = vrot.slane %v2345_v21, 7 }
 0x20d   : > { %936 = vrot.lane.b32.xlu1 %v11268_v55, %s14558_s13  ;;  %v1297_v57 = vpop.permute.xlu0 %1296 }
 0x20e   : > { %v11382_v28 = vsel %vm641_vm0, %v11372_v58, %v11368_v53 }
 0x20f   : > { %v1299_v25 = vpop.permute.xlu1 %1298  ;;  %1699 = vrot.lane.b32.xlu0 %v11375_v29, %s10208_s27 }
 0x211   : > { %938 = vrot.lane.b32.xlu1 %v11275_v37, %s14558_s13  ;;  %v1398_v38 = vpop.permute.xlu0 %1397  ;;  %v1766_v37 = vsel %vm1749_vm4, %v10937_v40, %v921_v32 }
 0x212   : > { %v1799_v26 = vsel %vm1782_vm5, %v1766_v37, %v1098_v31  ;;  %v1833_v31 = vsel %vm1815_vm6, %v1800_v18, %v1197_v44  ;;  %v772_v37 = vsel %vm641_vm0, %v684_v34, 0.0 }
 0x213   : > { %v1400_v33 = vpop.permute.xlu1 %1399  ;;  %1113 = vrot.lane.b32.xlu0 %v11280_v27, %s10203_s28  ;;  %v683_v27 = vrot.slane %v596_v36, 7  ;;  %v1832_v46 = vsel %vm1815_vm6, %v1799_v26, %v1195_v52  ;;  %v1866_v45 = vsel %vm1848_vm7, %v1833_v31, %v1299_v25 }
 0x214   : > { %v1865_v40 = vsel %vm1848_vm7, %v1832_v46, %v1297_v57  ;;  %v881_v46 = vrot.slane %v772_v37, 1 }
 0x215   : > { %1115 = vrot.lane.b32.xlu1 %v11287_v59, %s10203_s28  ;;  %v1494_v55 = vpop.permute.xlu0 %1493  ;;  %v1898_v0 = vsel %vm1881_vm8, %v1865_v40, %v1398_v38  ;;  %v11413_v36 = vsel %vm641_vm0, 0.0, %v683_v27  ;;  %v11423_v57 = vsel %vm641_vm0, %v683_v27, %v684_v34 }
 0x216   : > { %v8546_v24 = vpop.f32.mrb[2].mxu1  ;;  %14591 = vst [vmem:[#allocation31_spill] sm:$0xff] %v11413_v36  ;;  %v1931_v56 = vsel %vm1914_vm9, %v1898_v0, %v1494_v55  ;;  %14592 = vst [vmem:[#allocation32_spill] sm:$0xff] %v11423_v57  ;;  %v1899_v55 = vsel %vm1881_vm8, %v1866_v45, %v1400_v33  ;;  %v878_v26 = vrot.slane %v11413_v36, 1  ;;  %v879_v33 = vrot.slane %v11423_v57, 1 }
 0x217   : > { %v2202_v48 = vadd.f32 %v8546_v24, %v11347_v63  ;;  %v1496_v15 = vpop.permute.xlu1 %1495  ;;  %v2196_v42 = vpop.f32.mrb[3].mxu1  ;;  %1210 = vrot.lane.b32.xlu0 %v11322_v22, %s10202_s14  ;;  %v1055_v40 = vrot.slane %v11413_v36, 2  ;;  %v1058_v45 = vrot.slane %v772_v37, 2 }
 0x218   : > { %v2197_v50 = vadd.f32 %v11347_v63, %v2196_v42  ;;  %v11462_v18 = vsel %vm807_vm1, %v878_v26, %v879_v33  ;;  %v11469_v31 = vsel %vm807_vm1, %v879_v33, %v881_v46 }
 0x219   : > { %v2348_v59 = vmax.f32 %v2202_v48, 0.0  ;;  %1212 = vrot.lane.b32.xlu1 %v11325_v20, %s10202_s14  ;;  %v1590_v5 = vpop.permute.xlu0 %1589 }
 0x21a   : > { %v2347_v47 = vmax.f32 %v2197_v50, 0.0  ;;  %v1964_v25 = vsel %vm1947_vm10, %v1931_v56, %v1590_v5  ;;  %v1932_v50 = vsel %vm1914_vm9, %v1899_v55, %v1496_v15 }
 0x21b   : > { %v2450_v32 = vrot.slane %v2348_v59, 7  ;;  %v1592_v54 = vpop.permute.xlu1 %1591  ;;  %1312 = vrot.lane.b32.xlu0 %v11350_v39, %s10204_s29 }
 0x21c   : > { %v2449_v21 = vrot.slane %v2347_v47, 7  ;;  %v1965_v59 = vsel %vm1947_vm10, %v1932_v50, %v1592_v54  ;;  %v599_v50 = vld [vmem:[%s10512_s18 + $0xe8] sm:$0xff] }
 0x21d   : > { %v11418_v16 = vsel %vm641_vm0, %v2450_v32, 0.0  ;;  %1314 = vrot.lane.b32.xlu1 %v11357_v60, %s10204_s29  ;;  %v1686_v52 = vpop.permute.xlu0 %1685  ;;  %v687_v33 = vrot.slane %v599_v50, 7 }
 0x21e   : > { %v2782_v44 = vrot.slane %v11418_v16, 2  ;;  %v11427_v38 = vsel %vm641_vm0, %v2449_v21, %v2450_v32  ;;  %v11430_v24 = vsel %vm641_vm0, 0.0, %v2449_v21  ;;  %v1997_v41 = vsel %vm1980_vm11, %v1964_v25, %v1686_v52 }
 0x21f   : > { %v925_v48 = vpop.permute.xlu1 %924  ;;  %1413 = vrot.lane.b32.xlu0 %v11364_v4, %s10205_s16  ;;  %v2779_v42 = vrot.slane %v11430_v24, 2  ;;  %8565 = vmatprep.mubr.msk.f32.mxu1 %vm2019_vm12, %v1997_v41  ;;  %v2780_v27 = vrot.slane %v11427_v38, 2  ;;  %v1056_v32 = vrot.slane %v11423_v57, 2 }
 0x221   : > { %1415 = vrot.lane.b32.xlu1 %v11375_v29, %s10205_s16  ;;  %v1688_v5 = vpop.permute.xlu0 %1687  ;;  %v11449_v34 = vsel %vm984_vm2, %v2779_v42, %v2780_v27  ;;  %v11452_v15 = vsel %vm984_vm2, %v2780_v27, %v2782_v44  ;;  %v11474_v21 = vsel %vm984_vm2, %v1055_v40, %v1056_v32  ;;  %v11481_v44 = vsel %vm984_vm2, %v1056_v32, %v1058_v45  ;;  %v598_v42 = vld [vmem:[%s10512_s18 + $0xe0] sm:$0xff] }
 0x222   : > { %v1998_v61 = vsel %vm1980_vm11, %v1965_v59, %v1688_v5  ;;  %8597 = vmatprep.mubr.msk.f32.mxu0 %vm1980_vm11, %v11449_v34 }
 0x223   : > { %v927_v47 = vpop.permute.xlu1 %926  ;;  %1509 = vrot.lane.b32.xlu0 %v11413_v36, %s10206_s20  ;;  %8598 = vmatmul.mubr.msk.f32.vlgmr.msra.gmra.mrb[0].mxu0 %vm1980_vm11, %v11452_v15 }
 0x224   : > { %8566 = vmatmul.mubr.msk.f32.gmra.mrb[16].mxu1 %vm2019_vm12, %v1998_v61  ;;  %v1769_v45 = vsel %vm1749_vm4, %v11017_v17, %v927_v47 }
 0x225   : > { %1511 = vrot.lane.b32.xlu1 %v11423_v57, %s10206_s20  ;;  %v1102_v54 = vpop.permute.xlu0 %1101 }
 0x227   : > { %v1104_v0 = vpop.permute.xlu1 %1103  ;;  %1605 = vrot.lane.b32.xlu0 %v11462_v18, %s10207_s26 }
 0x229   : > { %1607 = vrot.lane.b32.xlu1 %v11469_v31, %s10207_s26  ;;  %v1199_v56 = vpop.permute.xlu0 %1198 }
 0x22b   : > { %v1201_v52 = vpop.permute.xlu1 %1200  ;;  %1701 = vrot.lane.b32.xlu0 %v11474_v21, %s10208_s27 }
 0x22d   : > { %940 = vrot.lane.b32.xlu1 %v11350_v39, %s14558_s13  ;;  %v1301_v25 = vpop.permute.xlu0 %1300  ;;  %v686_v39 = vrot.slane %v598_v42, 7 }
 0x22f   : > { %v1303_v55 = vpop.permute.xlu1 %1302  ;;  %1703 = vrot.lane.b32.xlu0 %v11481_v44, %s10208_s27  ;;  %v11505_v32 = vsel %vm641_vm0, 0.0, %v686_v39 }
 0x230   : > { %14593 = vst [vmem:[#allocation33_spill] sm:$0xff] %v11505_v32  ;;  %v883_v47 = vrot.slane %v11505_v32, 1 }
 0x231   : > { %942 = vrot.lane.b32.xlu1 %v11357_v60, %s14558_s13  ;;  %v1402_v41 = vpop.permute.xlu0 %1401  ;;  %v1768_v60 = vsel %vm1749_vm4, %v11014_v62, %v925_v48  ;;  %v11511_v62 = vsel %vm641_vm0, %v686_v39, %v687_v33  ;;  %v1802_v48 = vsel %vm1782_vm5, %v1769_v45, %v1104_v0 }
 0x232   : > { %v1801_v46 = vsel %vm1782_vm5, %v1768_v60, %v1102_v54  ;;  %14594 = vst [vmem:[#allocation34_spill] sm:$0xff] %v11511_v62 }
 0x233   : > { %v1404_v37 = vpop.permute.xlu1 %1403  ;;  %1117 = vrot.lane.b32.xlu0 %v11364_v4, %s10203_s28  ;;  %v1834_v42 = vsel %vm1815_vm6, %v1801_v46, %v1199_v56 }
 0x234   : > { %v1867_v54 = vsel %vm1848_vm7, %v1834_v42, %v1301_v25 }
 0x235   : > { %1119 = vrot.lane.b32.xlu1 %v11375_v29, %s10203_s28  ;;  %v1498_v27 = vpop.permute.xlu0 %1497  ;;  %v1900_v60 = vsel %vm1881_vm8, %v1867_v54, %v1402_v41 }
 0x236   : > { %v8549_v26 = vpop.f32.mrb[4].mxu1  ;;  %v1933_v39 = vsel %vm1914_vm9, %v1900_v60, %v1498_v27 }
 0x237   : > { %v2212_v59 = vadd.f32 %v8549_v26, %v11347_v63  ;;  %v1500_v5 = vpop.permute.xlu1 %1499  ;;  %v2206_v61 = vpop.f32.mrb[5].mxu1  ;;  %1214 = vrot.lane.b32.xlu0 %v11413_v36, %s10202_s14 }
 0x238   : > { %v2207_v4 = vadd.f32 %v11347_v63, %v2206_v61  ;;  %v1835_v61 = vsel %vm1815_vm6, %v1802_v48, %v1201_v52 }
 0x239   : > { %v2350_v40 = vmax.f32 %v2212_v59, 0.0  ;;  %1216 = vrot.lane.b32.xlu1 %v11423_v57, %s10202_s14  ;;  %v1594_v29 = vpop.permute.xlu0 %1593  ;;  %v1868_v56 = vsel %vm1848_vm7, %v1835_v61, %v1303_v55 }
 0x23a   : > { %v2349_v50 = vmax.f32 %v2207_v4, 0.0  ;;  %v884_v4 = vrot.slane %v11511_v62, 1  ;;  %v1966_v55 = vsel %vm1947_vm10, %v1933_v39, %v1594_v29  ;;  %v1901_v27 = vsel %vm1881_vm8, %v1868_v56, %v1404_v37  ;;  %v2378_v56 = vld [vmem:[#allocation2 + $0x8] sm:$0xff] }
 0x23b   : > { %v2453_v26 = vrot.slane %v2350_v40, 7  ;;  %v1596_v59 = vpop.permute.xlu1 %1595  ;;  %1316 = vrot.lane.b32.xlu0 %v11462_v18, %s10204_s29  ;;  %v1934_v48 = vsel %vm1914_vm9, %v1901_v27, %v1500_v5  ;;  %v1060_v39 = vrot.slane %v11505_v32, 2  ;;  %v14538_v27 = vmov 0.0|0.0  }
 0x23c   : > { %v2452_v17 = vrot.slane %v2349_v50, 7  ;;  %v773_v50 = vsel %vm641_vm0, %v687_v33, 0.0  ;;  %v1967_v29 = vsel %vm1947_vm10, %v1934_v48, %v1596_v59  ;;  %v11564_v59 = vsel %vm807_vm1, %v883_v47, %v884_v4  ;;  %8755 = vmatprep.subr.bf16.mxu1 %v14538_v27  ;;  %v2380_v48 = vld [vmem:[#allocation2 + $0x18] sm:$0xff] }
 0x23d   : > { %v11523_v0 = vsel %vm641_vm0, %v2453_v26, 0.0  ;;  %1318 = vrot.lane.b32.xlu1 %v11469_v31, %s10204_s29  ;;  %v1690_v25 = vpop.permute.xlu0 %1689  ;;  %v886_v33 = vrot.slane %v773_v50, 1 }
 0x23e   : > { %v2787_v52 = vrot.slane %v11523_v0, 2  ;;  %v11530_v41 = vsel %vm641_vm0, %v2452_v17, %v2453_v26  ;;  %v11533_v46 = vsel %vm641_vm0, 0.0, %v2452_v17  ;;  %v1999_v40 = vsel %vm1980_vm11, %v1966_v55, %v1690_v25  ;;  %v2377_v17 = vld [vmem:[#allocation2] sm:$0xff] }
 0x23f   : > { %v11538_v45 = vpop.permute.xlu1 %928  ;;  %1417 = vrot.lane.b32.xlu0 %v11474_v21, %s10205_s16  ;;  %v2784_v42 = vrot.slane %v11533_v46, 2  ;;  %8568 = vmatprep.mubr.msk.f32.mxu1 %vm2019_vm12, %v1999_v40  ;;  %v2785_v54 = vrot.slane %v11530_v41, 2  ;;  %v1061_v25 = vrot.slane %v11511_v62, 2  ;;  %v11575_v47 = vsel %vm807_vm1, %v884_v4, %v886_v33  ;;  %v2381_v33 = vld [vmem:[#allocation2 + $0x20] sm:$0xff] }
 0x241   : > { %1419 = vrot.lane.b32.xlu1 %v11481_v44, %s10205_s16  ;;  %v1692_v37 = vpop.permute.xlu0 %1691  ;;  %v11552_v61 = vsel %vm984_vm2, %v2784_v42, %v2785_v54  ;;  %v11555_v60 = vsel %vm984_vm2, %v2785_v54, %v2787_v52  ;;  %v8756_v52 = vpack.c.bf16 %v2378_v56, %v2377_v17  ;;  %v2379_v42 = vld [vmem:[#allocation2 + $0x10] sm:$0xff]  ;;  %v11583_v54 = vsel %vm984_vm2, %v1060_v39, %v1061_v25  ;;  %v2382_v17 = vld [vmem:[#allocation2 + $0x28] sm:$0xff] }
 0x242   : > { %v2000_v26 = vsel %vm1980_vm11, %v1967_v29, %v1692_v37  ;;  %8600 = vmatprep.mubr.msk.f32.mxu0 %vm1980_vm11, %v11552_v61  ;;  %v1063_v29 = vrot.slane %v773_v50, 2  ;;  %v8759_v37 = vpack.c.bf16 %v2380_v48, %v2379_v42  ;;  %v8762_v39 = vpack.c.bf16 %v2382_v17, %v2381_v33  ;;  %v2383_v42 = vld [vmem:[#allocation2 + $0x30] sm:$0xff]  ;;  %v2384_v48 = vld [vmem:[#allocation2 + $0x38] sm:$0xff]  ;;  %v2386_v33 = vld [vmem:[#allocation2 + $0x48] sm:$0xff] }
 0x243   : > { %v11559_v5 = vpop.permute.xlu1 %930  ;;  %1513 = vrot.lane.b32.xlu0 %v11505_v32, %s10206_s20  ;;  %8601 = vmatmul.mubr.msk.f32.gmra.mrb[2].mxu0 %vm1980_vm11, %v11555_v60  ;;  %v600_v17 = vld [vmem:[%s10512_s18 + $0xf0] sm:$0xff] }
 0x244   : > { %8569 = vmatmul.mubr.msk.f32.gmra.mrb[18].mxu1 %vm2019_vm12, %v2000_v26  ;;  %v11591_v56 = vsel %vm984_vm2, %v1061_v25, %v1063_v29 }
 0x245   : > { %1515 = vrot.lane.b32.xlu1 %v11511_v62, %s10206_s20  ;;  %v1106_v55 = vpop.permute.xlu0 %1105  ;;  %8757 = vmatpush1.bf16.msra.mxu1 %v8756_v52 }
 0x246   : > { %8758 = vmatprep.subr.bf16.mxu1 %v14538_v27 }
 0x247   : > { %v11577_v40 = vpop.permute.xlu1 %1107  ;;  %1609 = vrot.lane.b32.xlu0 %v11564_v59, %s10207_s26 }
 0x249   : > { %1611 = vrot.lane.b32.xlu1 %v11575_v47, %s10207_s26  ;;  %v1203_v4 = vpop.permute.xlu0 %1202  ;;  %8760 = vmatpush1.bf16.msra.mxu1 %v8759_v37  ;;  %v8765_v37 = vpack.c.bf16 %v2384_v48, %v2383_v42  ;;  %v601_v48 = vld [vmem:[%s10512_s18 + $0xf8] sm:$0xff]  ;;  %s14557_s18 = smov 64  }
 0x24a   : > { %8761 = vmatprep.subr.bf16.mxu1 %v14538_v27 }
 0x24b   : > { %v1205_v26 = vpop.permute.xlu1 %1204  ;;  %1705 = vrot.lane.b32.xlu0 %v11583_v54, %s10208_s27 }
 0x24d   : > { %944 = vrot.lane.b32.xlu1 %v11462_v18, %s14558_s13  ;;  %v1305_v50 = vpop.permute.xlu0 %1304  ;;  %8763 = vmatpush1.bf16.msra.mxu1 %v8762_v39  ;;  %v2385_v18 = vld [vmem:[#allocation2 + $0x40] sm:$0xff] }
 0x24e   : > { %8764 = vmatprep.subr.bf16.mxu1 %v14538_v27  ;;  %v8768_v39 = vpack.c.bf16 %v2386_v33, %v2385_v18  ;;  %v8771_v33 = vpack.c.bf16 %v2388_v7, %v2387_v6 }
 0x24f   : > { %v1307_v52 = vpop.permute.xlu1 %1306  ;;  %1707 = vrot.lane.b32.xlu0 %v11591_v56, %s10208_s27 }
 0x251   : > { %946 = vrot.lane.b32.xlu1 %v11469_v31, %s14558_s13  ;;  %v1406_v25 = vpop.permute.xlu0 %1405  ;;  %8766 = vmatpush1.bf16.msra.mxu1 %v8765_v37 }
 0x252   : > { %8767 = vmatprep.subr.bf16.mxu1 %v14538_v27 }
 0x253   : > { %v1408_v29 = vpop.permute.xlu1 %1407  ;;  %1121 = vrot.lane.b32.xlu0 %v11474_v21, %s10203_s28  ;;  %v689_v21 = vrot.slane %v600_v17, 7  ;;  %v1771_v17 = vsel %vm1749_vm4, %v11094_v23, %v11559_v5  ;;  %v2389_v23 = vld [vmem:[#allocation2 + $0x60] sm:$0xff]  ;;  %v2390_v5 = vld [vmem:[#allocation2 + $0x68] sm:$0xff] }
 0x255   : > { %1123 = vrot.lane.b32.xlu1 %v11481_v44, %s10203_s28  ;;  %v1502_v9 = vpop.permute.xlu0 %1501  ;;  %8769 = vmatpush1.bf16.msra.mxu1 %v8768_v39  ;;  %v1770_v44 = vsel %vm1749_vm4, %v11091_v30, %v11538_v45  ;;  %v11628_v45 = vsel %vm641_vm0, 0.0, %v689_v21 }
 0x256   : > { %v8552_v42 = vpop.f32.mrb[6].mxu1  ;;  %8770 = vmatprep.subr.bf16.mxu1 %v14538_v27  ;;  %v1803_v39 = vsel %vm1782_vm5, %v1770_v44, %v1106_v55  ;;  %v14595_v55 = vmov 0.0|0.0  }
 0x257   : > { %v2222_v31 = vadd.f32 %v8552_v42, %v11347_v63  ;;  %v1504_v37 = vpop.permute.xlu1 %1503  ;;  %v2216_v8 = vpop.f32.mrb[7].mxu1  ;;  %1218 = vrot.lane.b32.xlu0 %v11505_v32, %s10202_s14  ;;  %v690_v32 = vrot.slane %v601_v48, 7  ;;  %v1836_v27 = vsel %vm1815_vm6, %v1803_v39, %v1203_v4 }
 0x258   : > { %v2217_v18 = vadd.f32 %v11347_v63, %v2216_v8  ;;  %v1804_v8 = vsel %vm1782_vm5, %v1771_v17, %v11577_v40  ;;  %v1869_v6 = vsel %vm1848_vm7, %v1836_v27, %v1305_v50  ;;  %v8774_v40 = vpack.c.bf16 %v2390_v5, %v2389_v23 }
 0x259   : > { %v2352_v42 = vmax.f32 %v2222_v31, 0.0  ;;  %1220 = vrot.lane.b32.xlu1 %v11511_v62, %s10202_s14  ;;  %v1598_v3 = vpop.permute.xlu0 %1597  ;;  %8772 = vmatpush1.bf16.msra.mxu1 %v8771_v33  ;;  %v1837_v4 = vsel %vm1815_vm6, %v1804_v8, %v1205_v26  ;;  %v1902_v48 = vsel %vm1881_vm8, %v1869_v6, %v1406_v25  ;;  %v11641_v33 = vsel %vm641_vm0, %v689_v21, %v690_v32  ;;  %v2391_v8 = vld [vmem:[#allocation2 + $0x70] sm:$0xff]  ;;  %v2392_v6 = vld [vmem:[#allocation2 + $0x78] sm:$0xff] }
 0x25a   : > { %v2351_v57 = vmax.f32 %v2217_v18, 0.0  ;;  %8773 = vmatprep.subr.bf16.mxu1 %v14595_v55  ;;  %v1870_v27 = vsel %vm1848_vm7, %v1837_v4, %v1307_v52  ;;  %v1935_v50 = vsel %vm1914_vm9, %v1902_v48, %v1502_v9  ;;  %v774_v17 = vsel %vm641_vm0, %v690_v32, 0.0  ;;  %v2404_v62 = vld [vmem:[#allocation2 + $0xd8] sm:$0xff] }
 0x25b   : > { %v2456_v7 = vrot.slane %v2352_v42, 7  ;;  %v1600_v30 = vpop.permute.xlu1 %1599  ;;  %1320 = vrot.lane.b32.xlu0 %v11564_v59, %s10204_s29  ;;  %v1968_v9 = vsel %vm1947_vm10, %v1935_v50, %v1598_v3  ;;  %v1903_v52 = vsel %vm1881_vm8, %v1870_v27, %v1408_v29  ;;  %v1260_v23 = vrot.slane %v11641_v33, 1  ;;  %v2394_v50 = vld [vmem:[#allocation2 + $0x88] sm:$0xff] }
 0x25c   : > { %v2455_v31 = vrot.slane %v2351_v57, 7  ;;  %v1936_v3 = vsel %vm1914_vm9, %v1903_v52, %v1504_v37  ;;  %v8777_v4 = vpack.c.bf16 %v2392_v6, %v2391_v8  ;;  %v2395_v6 = vld [vmem:[#allocation2 + $0x90] sm:$0xff] }
 0x25d   : > { %v11636_v44 = vsel %vm641_vm0, %v2456_v7, 0.0  ;;  %1322 = vrot.lane.b32.xlu1 %v11575_v47, %s10204_s29  ;;  %v1694_v18 = vpop.permute.xlu0 %1693  ;;  %8775 = vmatpush1.bf16.msra.mxu1 %v8774_v40  ;;  %v1969_v5 = vsel %vm1947_vm10, %v1936_v3, %v1600_v30  ;;  %v1262_v40 = vrot.slane %v774_v17, 1  ;;  %v2393_v30 = vld [vmem:[#allocation2 + $0x80] sm:$0xff]  ;;  %v2396_v3 = vld [vmem:[#allocation2 + $0x98] sm:$0xff] }
 0x25e   : > { %v2792_v26 = vrot.slane %v11636_v44, 2  ;;  %v11645_v25 = vsel %vm641_vm0, %v2455_v31, %v2456_v7  ;;  %v11648_v57 = vsel %vm641_vm0, 0.0, %v2455_v31  ;;  %v2001_v39 = vsel %vm1980_vm11, %v1968_v9, %v1694_v18  ;;  %8776 = vmatprep.subr.bf16.mxu1 %v14595_v55 }
 0x25f   : > { %v11653_v42 = vpop.permute.xlu1 %932  ;;  %1421 = vrot.lane.b32.xlu0 %v11583_v54, %s10205_s16  ;;  %v2789_v21 = vrot.slane %v11648_v57, 2  ;;  %8571 = vmatprep.mubr.msk.f32.mxu1 %vm2019_vm12, %v2001_v39  ;;  %v2790_v29 = vrot.slane %v11645_v25, 2  ;;  %v1259_v7 = vrot.slane %v11628_v45, 1  ;;  %v1360_v18 = vrot.slane %v11628_v45, 2 }
 0x260   : > { %v8780_v39 = vpack.c.bf16 %v2394_v50, %v2393_v30 }
 0x261   : > { %1423 = vrot.lane.b32.xlu1 %v11591_v56, %s10205_s16  ;;  %v1696_v32 = vpop.permute.xlu0 %1695  ;;  %v11670_v31 = vsel %vm984_vm2, %v2789_v21, %v2790_v29  ;;  %v11673_v37 = vsel %vm984_vm2, %v2790_v29, %v2792_v26  ;;  %v1361_v26 = vrot.slane %v11641_v33, 2  ;;  %v11687_v9 = vsel %vm807_vm1, %v1259_v7, %v1260_v23  ;;  %8778 = vmatpush1.bf16.msra.mxu1 %v8777_v4  ;;  %v2397_v4 = vld [vmem:[#allocation2 + $0xa0] sm:$0xff] }
 0x262   : > { %v2002_v48 = vsel %vm1980_vm11, %v1969_v5, %v1696_v32  ;;  %8603 = vmatprep.mubr.msk.f32.mxu0 %vm1980_vm11, %v11670_v31  ;;  %v11692_v21 = vsel %vm807_vm1, %v1260_v23, %v1262_v40  ;;  %8779 = vmatprep.subr.bf16.mxu1 %v14595_v55  ;;  %v1363_v7 = vrot.slane %v774_v17, 2  ;;  %v8783_v32 = vpack.c.bf16 %v2396_v3, %v2395_v6  ;;  %v2401_v3 = vld [vmem:[#allocation2 + $0xc0] sm:$0xff] }
 0x263   : > { %v11677_v27 = vpop.permute.xlu1 %934  ;;  %1517 = vrot.lane.b32.xlu0 %v11628_v45, %s10206_s20  ;;  %8604 = vmatmul.mubr.msk.f32.gmra.mrb[4].mxu0 %vm1980_vm11, %v11673_v37  ;;  %v11698_v29 = vsel %vm984_vm2, %v1360_v18, %v1361_v26  ;;  %v2399_v18 = vld [vmem:[#allocation2 + $0xb0] sm:$0xff] }
 0x264   : > { %8572 = vmatmul.mubr.msk.f32.gmra.mrb[20].mxu1 %vm2019_vm12, %v2002_v48  ;;  %v2398_v48 = vld [vmem:[#allocation2 + $0xa8] sm:$0xff]  ;;  %v11706_v40 = vsel %vm984_vm2, %v1361_v26, %v1363_v7 }
 0x265   : > { %1519 = vrot.lane.b32.xlu1 %v11641_v33, %s10206_s20  ;;  %v1110_v52 = vpop.permute.xlu0 %1109  ;;  %8781 = vmatpush1.bf16.msra.mxu1 %v8780_v39  ;;  %v8786_v30 = vpack.c.bf16 %v2398_v48, %v2397_v4  ;;  %v2400_v39 = vld [vmem:[#allocation2 + $0xb8] sm:$0xff]  ;;  %v2402_v7 = vld [vmem:[#allocation2 + $0xc8] sm:$0xff] }
 0x266   : > { %8782 = vmatprep.subr.bf16.mxu1 %v14595_v55  ;;  %v8789_v26 = vpack.c.bf16 %v2400_v39, %v2399_v18  ;;  %v8792_v4 = vpack.c.bf16 %v2402_v7, %v2401_v3 }
 0x267   : > { %v1112_v8 = vpop.permute.xlu1 %1111  ;;  %1613 = vrot.lane.b32.xlu0 %v11687_v9, %s10207_s26 }
 0x269   : > { %1615 = vrot.lane.b32.xlu1 %v11692_v21, %s10207_s26  ;;  %v1207_v5 = vpop.permute.xlu0 %1206  ;;  %8784 = vmatpush1.bf16.msra.mxu1 %v8783_v32 }
 0x26a   : > { %8785 = vmatprep.subr.bf16.mxu1 %v14595_v55 }
 0x26b   : > { %v1209_v23 = vpop.permute.xlu1 %1208  ;;  %1709 = vrot.lane.b32.xlu0 %v11698_v29, %s10208_s27 }
 0x26d   : > { %948 = vrot.lane.b32.xlu1 %v11564_v59, %s14558_s13  ;;  %v1309_v17 = vpop.permute.xlu0 %1308  ;;  %8787 = vmatpush1.bf16.msra.mxu1 %v8786_v30 }
 0x26e   : > { %8788 = vmatprep.subr.bf16.mxu1 %v14595_v55 }
 0x26f   : > { %v1311_v50 = vpop.permute.xlu1 %1310  ;;  %1711 = vrot.lane.b32.xlu0 %v11706_v40, %s10208_s27 }
 0x271   : > { %950 = vrot.lane.b32.xlu1 %v11575_v47, %s14558_s13  ;;  %v1410_v6 = vpop.permute.xlu0 %1409  ;;  %8790 = vmatpush1.bf16.msra.mxu1 %v8789_v26 }
 0x272   : > { %8791 = vmatprep.subr.bf16.mxu1 %v14595_v55 }
 0x273   : > { %v1412_v59 = vpop.permute.xlu1 %1411  ;;  %1125 = vrot.lane.b32.xlu0 %v11583_v54, %s10203_s28  ;;  %v1772_v54 = vsel %vm1749_vm4, %v11168_v49, %v11653_v42 }
 0x274   : > { %v1805_v26 = vsel %vm1782_vm5, %v1772_v54, %v1110_v52 }
 0x275   : > { %1127 = vrot.lane.b32.xlu1 %v11591_v56, %s10203_s28  ;;  %v1506_v32 = vpop.permute.xlu0 %1505  ;;  %v2403_v56 = vld [vmem:[#allocation2 + $0xd0] sm:$0xff]  ;;  %8793 = vmatpush1.bf16.msra.mxu1 %v8792_v4  ;;  %v1838_v36 = vsel %vm1815_vm6, %v1805_v26, %v1207_v5  ;;  %v2405_v5 = vld [vmem:[#allocation2 + $0xe0] sm:$0xff]  ;;  %v2406_v4 = vld [vmem:[#allocation2 + $0xe8] sm:$0xff]  ;;  %v9287_v26 = vpack.i.bf16 %v10481_v1, %v10486_v2 }
 0x276   : > { %v8555_v48 = vpop.f32.mrb[8].mxu1  ;;  %8794 = vmatprep.subr.bf16.mxu1 %v14595_v55  ;;  %v1871_v52 = vsel %vm1848_vm7, %v1838_v36, %v1309_v17 }
 0x277   : > { %v2232_v47 = vadd.f32 %v8555_v48, %v11347_v63  ;;  %v1508_v30 = vpop.permute.xlu1 %1507  ;;  %v2226_v18 = vpop.f32.mrb[9].mxu1  ;;  %1222 = vrot.lane.b32.xlu0 %v11628_v45, %s10202_s14  ;;  %v8795_v48 = vpack.c.bf16 %v2404_v62, %v2403_v56  ;;  %v1773_v45 = vsel %vm1749_vm4, %v11171_v43, %v11677_v27  ;;  %v11742_v62 = vsel %vm641_vm0, 0.0, %v11372_v58 }
 0x278   : > { %v2227_v39 = vadd.f32 %v11347_v63, %v2226_v18  ;;  %v1806_v42 = vsel %vm1782_vm5, %v1773_v45, %v1112_v8  ;;  %v8798_v58 = vpack.c.bf16 %v2406_v4, %v2405_v5  ;;  %v2407_v45 = vld [vmem:[#allocation2 + $0xf0] sm:$0xff] }
 0x279   : > { %v2354_v3 = vmax.f32 %v2232_v47, 0.0  ;;  %1224 = vrot.lane.b32.xlu1 %v11641_v33, %s10202_s14  ;;  %v1602_v7 = vpop.permute.xlu0 %1601  ;;  %v1839_v43 = vsel %vm1815_vm6, %v1806_v42, %v1209_v23  ;;  %v1904_v33 = vsel %vm1881_vm8, %v1871_v52, %v1410_v6  ;;  %8796 = vmatpush1.bf16.msra.mxu1 %v8795_v48  ;;  %s10211_s14 = smov 96  }
 0x27a   : > { %v2353_v49 = vmax.f32 %v2227_v39, 0.0  ;;  %v1872_v8 = vsel %vm1848_vm7, %v1839_v43, %v1311_v50  ;;  %v1937_v36 = vsel %vm1914_vm9, %v1904_v33, %v1506_v32  ;;  %8797 = vmatprep.subr.bf16.mxu1 %v14595_v55  ;;  %v2557_v33 = vsel %vm641_vm0, %v11368_v53, 0.0 }
 0x27b   : > { %v2459_v47 = vrot.slane %v2354_v3, 7  ;;  %v1604_v18 = vpop.permute.xlu1 %1603  ;;  %1324 = vrot.lane.b32.xlu0 %v11687_v9, %s10204_s29  ;;  %v1970_v50 = vsel %vm1947_vm10, %v1937_v36, %v1602_v7  ;;  %v1905_v32 = vsel %vm1881_vm8, %v1872_v8, %v1412_v59  ;;  %v2774_v3 = vrot.slane %v11742_v62, 2 }
 0x27c   : > { %v2458_v27 = vrot.slane %v2353_v49, 7  ;;  %v2775_v7 = vrot.slane %v11382_v28, 2  ;;  %v1938_v48 = vsel %vm1914_vm9, %v1905_v32, %v1508_v30  ;;  %v2408_v49 = vld [vmem:[#allocation2 + $0xf8] sm:$0xff]  ;;  %v2777_v5 = vrot.slane %v2557_v33, 2 }
 0x27d   : > { %v11749_v17 = vsel %vm641_vm0, %v2459_v47, 0.0  ;;  %1326 = vrot.lane.b32.xlu1 %v11692_v21, %s10204_s29  ;;  %v1698_v9 = vpop.permute.xlu0 %1697  ;;  %v1971_v42 = vsel %vm1947_vm10, %v1938_v48, %v1604_v18  ;;  %8799 = vmatpush1.bf16.msra.mxu1 %v8798_v58  ;;  %v8801_v52 = vpack.c.bf16 %v2408_v49, %v2407_v45  ;;  %v2608_v18 = vrot.slane %v11430_v24, 1 }
 0x27e   : > { %v2797_v23 = vrot.slane %v11749_v17, 2  ;;  %v11755_v6 = vsel %vm641_vm0, %v2458_v27, %v2459_v47  ;;  %v11758_v54 = vsel %vm641_vm0, 0.0, %v2458_v27  ;;  %v2003_v39 = vsel %vm1980_vm11, %v1970_v50, %v1698_v9  ;;  %8800 = vmatprep.subr.bf16.mxu1 %v14595_v55 }
 0x27f   : > { %v11764_v21 = vpop.permute.xlu1 %936  ;;  %1425 = vrot.lane.b32.xlu0 %v11698_v29, %s10205_s16  ;;  %v2794_v56 = vrot.slane %v11758_v54, 2  ;;  %8574 = vmatprep.mubr.msk.f32.mxu1 %vm2019_vm12, %v2003_v39  ;;  %v2795_v59 = vrot.slane %v11755_v6, 2  ;;  %v2609_v27 = vrot.slane %v11427_v38, 1  ;;  %v2776_v55 = vsel %vm984_vm2, %v2774_v3, %v2775_v7 }
 0x280   : > { %v9302_v8 = vpack.i.bf16 %v10502_v10, %v2776_v55  ;;  %v9307_v58 = vpack.i.bf16 %v10517_v12, %v11430_v24  ;;  %v2613_v48 = vrot.slane %v11533_v46, 1 }
 0x281   : > { %1427 = vrot.lane.b32.xlu1 %v11706_v40, %s10205_s16  ;;  %v1700_v29 = vpop.permute.xlu0 %1699  ;;  %v11781_v43 = vsel %vm984_vm2, %v2794_v56, %v2795_v59  ;;  %v11784_v30 = vsel %vm984_vm2, %v2795_v59, %v2797_v23  ;;  %8802 = vmatpush1.bf16.msra.mxu1 %v8801_v52  ;;  %v11806_v36 = vsel %vm807_vm1, %v2608_v18, %v2609_v27  ;;  %v2603_v56 = vrot.slane %v11742_v62, 1 }
 0x282   : > { %v2004_v47 = vsel %vm1980_vm11, %v1971_v42, %v1700_v29  ;;  %8606 = vmatprep.mubr.msk.f32.mxu0 %vm1980_vm11, %v11781_v43  ;;  %v2778_v23 = vsel %vm984_vm2, %v2775_v7, %v2777_v5  ;;  %v9322_v7 = vpack.i.bf16 %v10522_v13, %v11427_v38  ;;  %v2614_v59 = vrot.slane %v11530_v41, 1 }
 0x283   : > { %v11791_v40 = vpop.permute.xlu1 %938  ;;  %9288 = vrot.lane.b32.xlu0 %v9287_v26, %s10206_s20  ;;  %8607 = vmatmul.mubr.msk.f32.gmra.mrb[6].mxu0 %vm1980_vm11, %v11784_v30  ;;  %v9317_v39 = vpack.i.bf16 %v10507_v11, %v2778_v23  ;;  %v2604_v26 = vrot.slane %v11382_v28, 1  ;;  %v9337_v5 = vpack.i.bf16 %v2776_v55, %v11533_v46  ;;  %s7683_s20 = sshll.u32 %s14117_s15, 4  ;;  %s14376_s20 = int_to_ptr.vmem [resolvable:$true] %s7683_s20 }
 0x284   : > { %8575 = vmatmul.mubr.msk.f32.gmra.mrb[22].mxu1 %vm2019_vm12, %v2004_v47  ;;  %v2606_v47 = vrot.slane %v2557_v33, 1  ;;  %v11838_v18 = vsel %vm807_vm1, %v2613_v48, %v2614_v59  ;;  %s10058_s25 = scalar_lea.vmem %s14376_s20, 1024 }
 0x285   : > { %9293 = vrot.lane.b32.xlu1 %v10526_v14, %s10207_s26  ;;  %v1114_v53 = vpop.permute.xlu0 %1113  ;;  %v2611_v14 = vrot.slane %v11418_v16, 1  ;;  %v11832_v42 = vsel %vm807_vm1, %v2603_v56, %v2604_v26  ;;  %v9342_v33 = vpack.i.bf16 %v11430_v24, %v11838_v18  ;;  %s14632_s26 = sld [smem:[#allocation24_spill]]  ;;  %p10059_p8 = scmp.ne.s32.totalorder %s14376_s20, %s10058_s25 }
 0x286   : > { %v9332_v29 = vpack.i.bf16 %v11832_v42, %v11449_v34  ;;  %v11848_v56 = vsel %vm807_vm1, %v2604_v26, %v2606_v47  ;;  %v2618_v47 = vrot.slane %v11648_v57, 1 }
 0x287   : > { %v1116_v4 = vpop.permute.xlu1 %1115  ;;  %9298 = vrot.lane.b32.xlu0 %v10534_v19, %s10208_s27  ;;  %v9312_v19 = vpack.i.bf16 %v11742_v62, %v11806_v36  ;;  %v11821_v16 = vsel %vm807_vm1, %v2609_v27, %v2611_v14 }
 0x288   : > { %v9327_v49 = vpack.i.bf16 %v11382_v28, %v11821_v16 }
 0x289   : > { %9303 = vrot.lane.b32.xlu1 %v9302_v8, %s10208_s27  ;;  %v1211_v9 = vpop.permute.xlu0 %1210  ;;  %v2616_v8 = vrot.slane %v11523_v0, 1  ;;  %v9347_v0 = vpack.i.bf16 %v11848_v56, %v11452_v15 }
 0x28b   : > { %v1213_v50 = vpop.permute.xlu1 %1212  ;;  %9308 = vrot.lane.b32.xlu0 %v9307_v58, %s14557_s18  ;;  %v11860_v26 = vsel %vm807_vm1, %v2614_v59, %v2616_v8  ;;  %p14634_p11 = scmp.ne.s32.totalorder %s14632_s26, 0 }
 0x28d   : > { %9313 = vrot.lane.b32.xlu1 %v9312_v19, %s10211_s14  ;;  %v1313_v32 = vpop.permute.xlu0 %1312  ;;  %p10060_p13 = pnand %p10059_p8, %p14634_p11 }
 0x28f   : > { %v1315_v3 = vpop.permute.xlu1 %1314  ;;  %9318 = vrot.lane.b32.xlu0 %v9317_v39, %s10208_s27  ;;  %p10061_p1 = pneg %p10060_p13 }
 0x291   : > { %9323 = vrot.lane.b32.xlu1 %v9322_v7, %s14557_s18  ;;  %v1414_v45 = vpop.permute.xlu0 %1413  ;;  %v1774_v7 = vsel %vm1749_vm4, %v11245_v35, %v11764_v21  ;;  %v1775_v35 = vsel %vm1749_vm4, %v11248_v51, %v11791_v40 }
 0x292   : > { %v1807_v48 = vsel %vm1782_vm5, %v1774_v7, %v1114_v53  ;;  %v1808_v53 = vsel %vm1782_vm5, %v1775_v35, %v1116_v4 }
 0x293   : > { %v1416_v52 = vpop.permute.xlu1 %1415  ;;  %9328 = vrot.lane.b32.xlu0 %v9327_v49, %s10211_s14  ;;  %v1841_v59 = vsel %vm1815_vm6, %v1808_v53, %v1213_v50  ;;  %v2621_v53 = vrot.slane %v11636_v44, 1 }
 0x294   : > { %v1874_v40 = vsel %vm1848_vm7, %v1841_v59, %v1315_v3 }
 0x295   : > { %9333 = vrot.lane.b32.xlu1 %v9332_v29, %s10208_s27  ;;  %v1510_v27 = vpop.permute.xlu0 %1509 }
 0x296   : > { %v8558_v58 = vpop.f32.mrb[10].mxu1 }
 0x297   : > { %v2242_v14 = vadd.f32 %v8558_v58, %v11347_v63  ;;  %v1512_v19 = vpop.permute.xlu1 %1511  ;;  %v2236_v39 = vpop.f32.mrb[11].mxu1  ;;  %9338 = vrot.lane.b32.xlu0 %v9337_v5, %s14557_s18  ;;  %v9352_v5 = vpack.i.bf16 %v2778_v23, %v11530_v41  ;;  %v2619_v23 = vrot.slane %v11645_v25, 1 }
 0x298   : > { %v2237_v55 = vadd.f32 %v11347_v63, %v2236_v39  ;;  %v1840_v63 = vsel %vm1815_vm6, %v1807_v48, %v1211_v9 }
 0x299   : > { %v2356_v49 = vmax.f32 %v2242_v14, 0.0  ;;  %9343 = vrot.lane.b32.xlu1 %v9342_v33, %s10211_s14  ;;  %v1606_v29 = vpop.permute.xlu0 %1605  ;;  %v1873_v58 = vsel %vm1848_vm7, %v1840_v63, %v1313_v32  ;;  %v9357_v32 = vpack.i.bf16 %v11427_v38, %v11860_v26  ;;  %v11927_v59 = vsel %vm807_vm1, %v2619_v23, %v2621_v53 }
 0x29a   : > { %v2355_v21 = vmax.f32 %v2237_v55, 0.0  ;;  %v1906_v8 = vsel %vm1881_vm8, %v1873_v58, %v1414_v45  ;;  %v1907_v55 = vsel %vm1881_vm8, %v1874_v40, %v1416_v52  ;;  %v2623_v40 = vrot.slane %v11758_v54, 1 }
 0x29b   : > { %v2462_v14 = vrot.slane %v2356_v49, 7  ;;  %v1608_v39 = vpop.permute.xlu1 %1607  ;;  %9348 = vrot.lane.b32.xlu0 %v9347_v0, %s10208_s27  ;;  %v1939_v9 = vsel %vm1914_vm9, %v1906_v8, %v1510_v27  ;;  %v9362_v27 = vpack.i.bf16 %v11806_v36, %v11552_v61  ;;  %v1940_v35 = vsel %vm1914_vm9, %v1907_v55, %v1512_v19 }
 0x29c   : > { %v2461_v51 = vrot.slane %v2355_v21, 7  ;;  %v1972_v3 = vsel %vm1947_vm10, %v1939_v9, %v1606_v29  ;;  %v1973_v63 = vsel %vm1947_vm10, %v1940_v35, %v1608_v39  ;;  %v9367_v21 = vpack.i.bf16 %v11449_v34, %v11648_v57 }
 0x29d   : > { %v11876_v33 = vsel %vm641_vm0, %v2462_v14, 0.0  ;;  %9353 = vrot.lane.b32.xlu1 %v9352_v5, %s14557_s18  ;;  %v1702_v4 = vpop.permute.xlu0 %1701  ;;  %v11898_v5 = vsel %vm807_vm1, %v2618_v47, %v2619_v23  ;;  %v9377_v34 = vpack.i.bf16 %v11821_v16, %v11555_v60  ;;  %v2624_v9 = vrot.slane %v11755_v6, 1 }
 0x29e   : > { %v2802_v7 = vrot.slane %v11876_v33, 2  ;;  %v11883_v50 = vsel %vm641_vm0, %v2461_v51, %v2462_v14  ;;  %v11886_v45 = vsel %vm641_vm0, 0.0, %v2461_v51  ;;  %v2005_v0 = vsel %vm1980_vm11, %v1972_v3, %v1702_v4 }
 0x29f   : > { %v11893_v48 = vpop.permute.xlu1 %940  ;;  %9358 = vrot.lane.b32.xlu0 %v9357_v32, %s10211_s14  ;;  %v2799_v49 = vrot.slane %v11886_v45, 2  ;;  %8577 = vmatprep.mubr.msk.f32.mxu1 %vm2019_vm12, %v2005_v0  ;;  %v2800_v29 = vrot.slane %v11883_v50, 2  ;;  %v9372_v39 = vpack.i.bf16 %v11533_v46, %v11898_v5  ;;  %v9382_v51 = vpack.i.bf16 %v11452_v15, %v11645_v25 }
 0x2a0   : > { %v9387_v32 = vpack.i.bf16 %v11530_v41, %v11927_v59  ;;  %v9392_v23 = vpack.i.bf16 %v11838_v18, %v11670_v31  ;;  %v11941_v3 = vsel %vm807_vm1, %v2623_v40, %v2624_v9  ;;  %v2626_v55 = vrot.slane %v11749_v17, 1 }
 0x2a1   : > { %9363 = vrot.lane.b32.xlu1 %v9362_v27, %s10208_s27  ;;  %v1704_v52 = vpop.permute.xlu0 %1703  ;;  %v11910_v47 = vsel %vm984_vm2, %v2799_v49, %v2800_v29  ;;  %v11913_v19 = vsel %vm984_vm2, %v2800_v29, %v2802_v7  ;;  %v9397_v27 = vpack.i.bf16 %v11552_v61, %v11758_v54  ;;  %v9402_v49 = vpack.i.bf16 %v11648_v57, %v11941_v3 }
 0x2a2   : > { %v2006_v58 = vsel %vm1980_vm11, %v1973_v63, %v1704_v52  ;;  %8609 = vmatprep.mubr.msk.f32.mxu0 %vm1980_vm11, %v11910_v47  ;;  %v9407_v35 = vpack.i.bf16 %v11860_v26, %v11673_v37  ;;  %v11954_v63 = vsel %vm807_vm1, %v2624_v9, %v2626_v55  ;;  %v9412_v61 = vpack.i.bf16 %v11555_v60, %v11755_v6 }
 0x2a3   : > { %v943_v14 = vpop.permute.xlu1 %942  ;;  %9368 = vrot.lane.b32.xlu0 %v9367_v21, %s14557_s18  ;;  %8610 = vmatmul.mubr.msk.f32.gmra.mrb[8].mxu0 %vm1980_vm11, %v11913_v19  ;;  %v2628_v17 = vrot.slane %v11886_v45, 1  ;;  %v2629_v21 = vrot.slane %v11883_v50, 1  ;;  %v2631_v55 = vrot.slane %v11876_v33, 1 }
 0x2a4   : > { %8578 = vmatmul.mubr.msk.f32.gmra.mrb[24].mxu1 %vm2019_vm12, %v2006_v58  ;;  %v9417_v58 = vpack.i.bf16 %v11645_v25, %v11954_v63 }
 0x2a5   : > { %9373 = vrot.lane.b32.xlu1 %v9372_v39, %s10211_s14  ;;  %v1118_v44 = vpop.permute.xlu0 %1117 }
 0x2a7   : > { %v1120_v8 = vpop.permute.xlu1 %1119  ;;  %9378 = vrot.lane.b32.xlu0 %v9377_v34, %s10208_s27  ;;  %v9422_v34 = vpack.i.bf16 %v11898_v5, %v11781_v43 }
 0x2a9   : > { %9383 = vrot.lane.b32.xlu1 %v9382_v51, %s14557_s18  ;;  %v1215_v4 = vpop.permute.xlu0 %1214  ;;  %v11969_v51 = vld [vmem:[%s14501_s2] ss:$0 sm:$0xff] }
 0x2ab   : > { %v1217_v7 = vpop.permute.xlu1 %1216  ;;  %9388 = vrot.lane.b32.xlu0 %v9387_v32, %s10211_s14  ;;  %v1776_v32 = vsel %vm1749_vm4, %v11322_v22, %v11893_v48 }
 0x2ad   : > { %9393 = vrot.lane.b32.xlu1 %v9392_v23, %s10208_s27  ;;  %v1317_v15 = vpop.permute.xlu0 %1316 }
 0x2af   : > { %v1319_v0 = vpop.permute.xlu1 %1318  ;;  %9398 = vrot.lane.b32.xlu0 %v9397_v27, %s14557_s18  ;;  %v11978_v27 = vsel %vm807_vm1, %v2628_v17, %v2629_v21 }
 0x2b1   : > { %9403 = vrot.lane.b32.xlu1 %v9402_v49, %s10211_s14  ;;  %v1418_v29 = vpop.permute.xlu0 %1417  ;;  %v1809_v49 = vsel %vm1782_vm5, %v1776_v32, %v1118_v44  ;;  %v9432_v44 = vpack.i.bf16 %v11758_v54, %v11978_v27  ;;  %v12002_v32 = vsel %vm807_vm1, %v2629_v21, %v2631_v55  ;;  %v9442_v21 = vpack.i.bf16 %v11673_v37, %v11883_v50 }
 0x2b2   : > { %v1842_v22 = vsel %vm1815_vm6, %v1809_v49, %v1215_v4  ;;  %v9447_v37 = vpack.i.bf16 %v11755_v6, %v12002_v32 }
 0x2b3   : > { %v1420_v52 = vpop.permute.xlu1 %1419  ;;  %9408 = vrot.lane.b32.xlu0 %v9407_v35, %s10208_s27 }
 0x2b5   : > { %9413 = vrot.lane.b32.xlu1 %v9412_v61, %s14557_s18  ;;  %v1514_v53 = vpop.permute.xlu0 %1513 }
 0x2b6   : > { %v8561_v39 = vpop.f32.mrb[12].mxu1 }
 0x2b7   : > { %v2252_v60 = vadd.f32 %v11969_v51, %v8561_v39  ;;  %v1516_v40 = vpop.permute.xlu1 %1515  ;;  %v2246_v9 = vpop.f32.mrb[13].mxu1  ;;  %9418 = vrot.lane.b32.xlu0 %v9417_v58, %s10211_s14  ;;  %v9427_v58 = vpack.i.bf16 %v11670_v31, %v11886_v45  ;;  %v1777_v39 = vsel %vm1749_vm4, %v11325_v20, %v943_v14  ;;  %v9437_v31 = vpack.i.bf16 %v11927_v59, %v11784_v30 }
 0x2b8   : > { %v2247_v23 = vadd.f32 %v11969_v51, %v2246_v9  ;;  %v1810_v17 = vsel %vm1782_vm5, %v1777_v39, %v1120_v8  ;;  %v1875_v9 = vsel %vm1848_vm7, %v1842_v22, %v1317_v15 }
 0x2b9   : > { %v2358_v35 = vmax.f32 %v2252_v60, 0.0  ;;  %9423 = vrot.lane.b32.xlu1 %v9422_v34, %s10208_s27  ;;  %v1610_v61 = vpop.permute.xlu0 %1609  ;;  %v1843_v34 = vsel %vm1815_vm6, %v1810_v17, %v1217_v7  ;;  %v1908_v20 = vsel %vm1881_vm8, %v1875_v9, %v1418_v29 }
 0x2ba   : > { %v2357_v48 = vmax.f32 %v2247_v23, 0.0  ;;  %v1876_v4 = vsel %vm1848_vm7, %v1843_v34, %v1319_v0  ;;  %v1941_v8 = vsel %vm1914_vm9, %v1908_v20, %v1514_v53 }
 0x2bb   : > { %v2465_v33 = vrot.slane %v2358_v35, 7  ;;  %v1612_v11 = vpop.permute.xlu1 %1611  ;;  %9428 = vrot.lane.b32.xlu0 %v9427_v58, %s14557_s18  ;;  %v1974_v29 = vsel %vm1947_vm10, %v1941_v8, %v1610_v61  ;;  %v1909_v0 = vsel %vm1881_vm8, %v1876_v4, %v1420_v52  ;;  %v9467_v8 = vpack.i.bf16 %v11954_v63, %v11913_v19 }
 0x2bc   : > { %v2464_v14 = vrot.slane %v2357_v48, 7  ;;  %v1942_v58 = vsel %vm1914_vm9, %v1909_v0, %v1516_v40 }
 0x2bd   : > { %v2563_v15 = vsel %vm641_vm0, %v2465_v33, 0.0  ;;  %9433 = vrot.lane.b32.xlu1 %v9432_v44, %s10211_s14  ;;  %v1706_v60 = vpop.permute.xlu0 %1705  ;;  %v1975_v61 = vsel %vm1947_vm10, %v1942_v58, %v1612_v11 }
 0x2be   : > { %v2807_v23 = vrot.slane %v2563_v15, 2  ;;  %v12005_v49 = vsel %vm641_vm0, %v2464_v14, %v2465_v33  ;;  %v12008_v7 = vsel %vm641_vm0, 0.0, %v2464_v14  ;;  %v2007_v53 = vsel %vm1980_vm11, %v1974_v29, %v1706_v60 }
 0x2bf   : > { %v945_v35 = vpop.permute.xlu1 %944  ;;  %9438 = vrot.lane.b32.xlu0 %v9437_v31, %s10208_s27  ;;  %v2804_v55 = vrot.slane %v12008_v7, 2  ;;  %v2633_v39 = vrot.slane %v12008_v7, 1  ;;  %v2634_v22 = vrot.slane %v12005_v49, 1  ;;  %8580 = vmatprep.mubr.msk.f32.mxu1 %vm2019_vm12, %v2007_v53  ;;  %v2805_v52 = vrot.slane %v12005_v49, 2 }
 0x2c0   : > { %v9452_v33 = vpack.i.bf16 %v11941_v3, %v11910_v47  ;;  %v9457_v34 = vpack.i.bf16 %v11781_v43, %v12008_v7  ;;  %v2636_v20 = vrot.slane %v2563_v15, 1  ;;  %v9472_v43 = vpack.i.bf16 %v11784_v30, %v12005_v49 }
 0x2c1   : > { %9443 = vrot.lane.b32.xlu1 %v9442_v21, %s14557_s18  ;;  %v1708_v48 = vpop.permute.xlu0 %1707  ;;  %v12028_v40 = vsel %vm984_vm2, %v2804_v55, %v2805_v52  ;;  %v12031_v9 = vsel %vm984_vm2, %v2805_v52, %v2807_v23  ;;  %v12042_v44 = vsel %vm807_vm1, %v2633_v39, %v2634_v22 }
 0x2c2   : > { %v2008_v17 = vsel %vm1980_vm11, %v1975_v61, %v1708_v48  ;;  %8612 = vmatprep.mubr.msk.f32.mxu0 %vm1980_vm11, %v12028_v40  ;;  %v9462_v4 = vpack.i.bf16 %v11886_v45, %v12042_v44  ;;  %v12054_v23 = vsel %vm807_vm1, %v2634_v22, %v2636_v20  ;;  %v9482_v53 = vpack.i.bf16 %v11978_v27, %v12028_v40  ;;  %v14596_v48 = vld [vmem:[#allocation31_spill] sm:$0xff] }
 0x2c3   : > { %v947_v11 = vpop.permute.xlu1 %946  ;;  %9448 = vrot.lane.b32.xlu0 %v9447_v37, %s10211_s14  ;;  %8613 = vmatmul.mubr.msk.f32.gmra.mrb[10].mxu0 %vm1980_vm11, %v12031_v9  ;;  %v9477_v0 = vpack.i.bf16 %v11883_v50, %v12054_v23  ;;  %v1778_v37 = vsel %vm1749_vm4, %v14596_v48, %v945_v35 }
 0x2c4   : > { %8581 = vmatmul.mubr.msk.f32.gmra.mrb[26].mxu1 %vm2019_vm12, %v2008_v17 }
 0x2c5   : > { %9453 = vrot.lane.b32.xlu1 %v9452_v33, %s10208_s27  ;;  %v1122_v31 = vpop.permute.xlu0 %1121  ;;  %v14597_v33 = vld [vmem:[#allocation32_spill] sm:$0xff] }
 0x2c6   : > { %v1811_v20 = vsel %vm1782_vm5, %v1778_v37, %v1122_v31 }
 0x2c7   : > { %v1124_v14 = vpop.permute.xlu1 %1123  ;;  %9458 = vrot.lane.b32.xlu0 %v9457_v34, %s14557_s18  ;;  %v1779_v34 = vsel %vm1749_vm4, %v14597_v33, %v947_v11 }
 0x2c9   : > { %9463 = vrot.lane.b32.xlu1 %v9462_v4, %s10211_s14  ;;  %v1219_v60 = vpop.permute.xlu0 %1218 }
 0x2cb   : > { %v1221_v29 = vpop.permute.xlu1 %1220  ;;  %9468 = vrot.lane.b32.xlu0 %v9467_v8, %s10208_s27 }
 0x2cd   : > { %9473 = vrot.lane.b32.xlu1 %v9472_v43, %s14557_s18  ;;  %v1321_v15 = vpop.permute.xlu0 %1320  ;;  %v1812_v43 = vsel %vm1782_vm5, %v1779_v34, %v1124_v14 }
 0x2cf   : > { %v1323_v21 = vpop.permute.xlu1 %1322  ;;  %9478 = vrot.lane.b32.xlu0 %v9477_v0, %s10211_s14  ;;  %v1844_v0 = vsel %vm1815_vm6, %v1811_v20, %v1219_v60 }
 0x2d0   : > { %v1877_v10 = vsel %vm1848_vm7, %v1844_v0, %v1321_v15 }
 0x2d1   : > { %9483 = vrot.lane.b32.xlu1 %v9482_v53, %s10208_s27  ;;  %v1422_v55 = vpop.permute.xlu0 %1421 }
 0x2d2   : > { %v1910_v48 = vsel %vm1881_vm8, %v1877_v10, %v1422_v55 }
 0x2d3   : > { %v1424_v58 = vpop.permute.xlu1 %1423 }
 0x2d5   : > { %v1518_v39 = vpop.permute.xlu0 %1517 }
 0x2d6   : > { %v8564_v22 = vpop.f32.mrb[14].mxu1 }
 0x2d7   : > { %v2262_v30 = vadd.f32 %v11969_v51, %v8564_v22  ;;  %v1520_v52 = vpop.permute.xlu1 %1519  ;;  %v2256_v61 = vpop.f32.mrb[15].mxu1  ;;  %v1845_v22 = vsel %vm1815_vm6, %v1812_v43, %v1221_v29 }
 0x2d8   : > { %v2257_v17 = vadd.f32 %v11969_v51, %v2256_v61  ;;  %v1878_v61 = vsel %vm1848_vm7, %v1845_v22, %v1323_v21  ;;  %v9497_v22 = vpack.i.bf16 %v12002_v32, %v12031_v9 }
 0x2d9   : > { %v2360_v4 = vmax.f32 %v2262_v30, 0.0  ;;  %v1614_v8 = vpop.permute.xlu0 %1613  ;;  %v1911_v31 = vsel %vm1881_vm8, %v1878_v61, %v1424_v58  ;;  %v1943_v30 = vsel %vm1914_vm9, %v1910_v48, %v1518_v39 }
 0x2da   : > { %v2359_v53 = vmax.f32 %v2257_v17, 0.0  ;;  %v1976_v15 = vsel %vm1947_vm10, %v1943_v30, %v1614_v8  ;;  %v1944_v34 = vsel %vm1914_vm9, %v1911_v31, %v1520_v52 }
 0x2db   : > { %v2468_v13 = vrot.slane %v2360_v4, 7  ;;  %v1616_v35 = vpop.permute.xlu1 %1615 }
 0x2dc   : > { %v2467_v11 = vrot.slane %v2359_v53, 7  ;;  %v1977_v4 = vsel %vm1947_vm10, %v1944_v34, %v1616_v35 }
 0x2dd   : > { %v2564_v14 = vsel %vm641_vm0, %v2468_v13, 0.0  ;;  %v1710_v37 = vpop.permute.xlu0 %1709 }
 0x2de   : > { %v2812_v60 = vrot.slane %v2564_v14, 2  ;;  %v12083_v17 = vsel %vm641_vm0, %v2467_v11, %v2468_v13  ;;  %v12086_v29 = vsel %vm641_vm0, 0.0, %v2467_v11  ;;  %v2009_v55 = vsel %vm1980_vm11, %v1976_v15, %v1710_v37 }
 0x2df   : > { %v2638_v21 = vrot.slane %v12086_v29, 1  ;;  %v2639_v10 = vrot.slane %v12083_v17, 1  ;;  %v949_v58 = vpop.permute.xlu1 %948  ;;  %v9487_v39 = vpack.i.bf16 %v11910_v47, %v12086_v29  ;;  %v2641_v33 = vrot.slane %v2564_v14, 1  ;;  %8583 = vmatprep.mubr.msk.f32.mxu1 %vm2019_vm12, %v2009_v55  ;;  %v14598_v55 = vld [vmem:[#allocation33_spill] sm:$0xff] }
 0x2e0   : > { %v2809_v13 = vrot.slane %v12086_v29, 2  ;;  %v2810_v20 = vrot.slane %v12083_v17, 2  ;;  %v9502_v11 = vpack.i.bf16 %v11913_v19, %v12083_v17  ;;  %v1780_v19 = vsel %vm1749_vm4, %v14598_v55, %v949_v58 }
 0x2e1   : > { %9488 = vrot.lane.b32.xlu0 %v9487_v39, %s14557_s18  ;;  %v1712_v8 = vpop.permute.xlu0 %1711  ;;  %v12101_v43 = vsel %vm807_vm1, %v2638_v21, %v2639_v10  ;;  %v12121_v61 = vsel %vm807_vm1, %v2639_v10, %v2641_v33  ;;  %v14599_v39 = vld [vmem:[#allocation34_spill] sm:$0xff] }
 0x2e2   : > { %v2010_v0 = vsel %vm1980_vm11, %v1977_v4, %v1712_v8  ;;  %v12105_v47 = vsel %vm984_vm2, %v2809_v13, %v2810_v20  ;;  %v12108_v52 = vsel %vm984_vm2, %v2810_v20, %v2812_v60  ;;  %v9492_v53 = vpack.i.bf16 %v12008_v7, %v12101_v43 }
 0x2e3   : > { %8615 = vmatprep.mubr.msk.f32.mxu0 %vm1980_vm11, %v12105_v47  ;;  %v951_v35 = vpop.permute.xlu1 %950  ;;  %8584 = vmatmul.mubr.msk.f32.gmra.mrb[28].mxu1 %vm2019_vm12, %v2010_v0  ;;  %v9507_v30 = vpack.i.bf16 %v12005_v49, %v12121_v61  ;;  %v9512_v37 = vpack.i.bf16 %v12042_v44, %v12105_v47 }
 0x2e4   : > { %8616 = vmatmul.mubr.msk.f32.gmra.mrb[12].mxu0 %vm1980_vm11, %v12108_v52  ;;  %9493 = vrot.lane.b32.xlu1 %v9492_v53, %s10211_s14  ;;  %v1781_v33 = vsel %vm1749_vm4, %v14599_v39, %v951_v35  ;;  %vm5103_vm4 = vcmask 1042434  }
 0x2e5   : > { %9498 = vrot.lane.b32.xlu0 %v9497_v22, %s10208_s27  ;;  %v1126_v48 = vpop.permute.xlu0 %1125 }
 0x2e6   : > { %v1813_v13 = vsel %vm1782_vm5, %v1780_v19, %v1126_v48 }
 0x2e7   : > { %v1128_v31 = vpop.permute.xlu1 %1127 }
 0x2e8   : > { %9503 = vrot.lane.b32.xlu1 %v9502_v11, %s14557_s18  ;;  %v1814_v20 = vsel %vm1782_vm5, %v1781_v33, %v1128_v31  ;;  %vm5105_vm5 = vcmask 1043459  }
 0x2e9   : > { %9508 = vrot.lane.b32.xlu0 %v9507_v30, %s10211_s14  ;;  %v1223_v14 = vpop.permute.xlu0 %1222 }
 0x2ea   : > { %v1846_v4 = vsel %vm1815_vm6, %v1813_v13, %v1223_v14 }
 0x2eb   : > { %v1225_v60 = vpop.permute.xlu1 %1224 }
 0x2ec   : > { %9513 = vrot.lane.b32.xlu1 %v9512_v37, %s10208_s27  ;;  %v1847_v8 = vsel %vm1815_vm6, %v1814_v20, %v1225_v60  ;;  %vm5107_vm6 = vcmask 1044484  }
 0x2ed   : > { %v1325_v15 = vpop.permute.xlu0 %1324 }
 0x2ee   : > { %v1879_v53 = vsel %vm1848_vm7, %v1846_v4, %v1325_v15 }
 0x2ef   : > { %v1327_v21 = vpop.permute.xlu1 %1326 }
 0x2f0   : > { %v1880_v22 = vsel %vm1848_vm7, %v1847_v8, %v1327_v21  ;;  %vm5109_vm7 = vcmask 1045509  }
 0x2f1   : > { %v1426_v10 = vpop.permute.xlu0 %1425 }
 0x2f2   : > { %v1912_v58 = vsel %vm1881_vm8, %v1879_v53, %v1426_v10 }
 0x2f3   : > { %v1428_v34 = vpop.permute.xlu1 %1427 }
 0x2f4   : > { %v1913_v35 = vsel %vm1881_vm8, %v1880_v22, %v1428_v34  ;;  %vm5111_vm8 = vcmask 1046534  }
 0x2f5   : > { %v9289_v0 = vpop.permute.xlu0 %9288 }
 0x2f6   : > { %v9291_v11 = vunpack.i.h.bf16 %v9289_v0  ;;  %v9290_v30 = vunpack.i.l.bf16 %v9289_v0  ;;  %v12145_v55 = vpop.f32.mrb[0].mxu0 }
 0x2f7   : > { %v8567_v37 = vpop.f32.mrb[16].mxu1  ;;  %v9294_v31 = vpop.permute.xlu1 %9293 }
 0x2f8   : > { %v2272_v48 = vadd.f32 %v11969_v51, %v8567_v37  ;;  %v2266_v14 = vpop.f32.mrb[17].mxu1  ;;  %v1945_v60 = vsel %vm1914_vm9, %v1912_v58, %v9290_v30  ;;  %v1946_v19 = vsel %vm1914_vm9, %v1913_v35, %v9291_v11  ;;  %v9296_v15 = vunpack.i.h.bf16 %v9294_v31  ;;  %v12151_v33 = vpop.f32.mrb[1].mxu0 }
 0x2f9   : > { %v9295_v39 = vunpack.i.l.bf16 %v9294_v31  ;;  %v2267_v21 = vadd.f32 %v11969_v51, %v2266_v14  ;;  %v9299_v10 = vpop.permute.xlu0 %9298  ;;  %vm5113_vm9 = vcmask 1047559  }
 0x2fa   : > { %v2362_v13 = vmax.f32 %v2272_v48, 0.0  ;;  %v9301_v34 = vunpack.i.h.bf16 %v9299_v10  ;;  %v9300_v20 = vunpack.i.l.bf16 %v9299_v10  ;;  %v1979_v0 = vsel %vm1947_vm10, %v1946_v19, %v9296_v15 }
 0x2fb   : > { %v2361_v4 = vmax.f32 %v2267_v21, 0.0  ;;  %v1978_v8 = vsel %vm1947_vm10, %v1945_v60, %v9295_v39  ;;  %v9304_v22 = vpop.permute.xlu1 %9303 }
 0x2fc   : > { %v2471_v53 = vrot.slane %v2362_v13, 7  ;;  %v2011_v30 = vsel %vm1980_vm11, %v1978_v8, %v9300_v20  ;;  %v2012_v11 = vsel %vm1980_vm11, %v1979_v0, %v9301_v34  ;;  %v9306_v35 = vunpack.i.h.bf16 %v9304_v22 }
 0x2fd   : > { %v2470_v58 = vrot.slane %v2361_v4, 7  ;;  %v9309_v37 = vpop.permute.xlu0 %9308  ;;  %8586 = vmatprep.mubr.msk.f32.mxu1 %vm2019_vm12, %v2011_v30  ;;  %v9305_v31 = vunpack.i.l.bf16 %v9304_v22 }
 0x2fe   : > { %v2565_v48 = vsel %vm641_vm0, %v2471_v53, 0.0  ;;  %v9311_v14 = vunpack.i.h.bf16 %v9309_v37  ;;  %v9310_v60 = vunpack.i.l.bf16 %v9309_v37  ;;  %8587 = vmatmul.mubr.msk.f32.gmra.mrb[30].mxu1 %vm2019_vm12, %v2012_v11  ;;  %v3373_v34 = vsel %vm1980_vm11, %v10486_v2, %v9306_v35 }
 0x2ff   : > { %v2646_v19 = vrot.slane %v2565_v48, 1  ;;  %v2817_v15 = vrot.slane %v2565_v48, 2  ;;  %v12161_v39 = vsel %vm641_vm0, %v2470_v58, %v2471_v53  ;;  %v12164_v21 = vsel %vm641_vm0, 0.0, %v2470_v58  ;;  %v9314_v20 = vpop.permute.xlu1 %9313 }
 0x300   : > { %v2643_v10 = vrot.slane %v12164_v21, 1  ;;  %v2644_v13 = vrot.slane %v12161_v39, 1  ;;  %v9517_v4 = vpack.i.bf16 %v12028_v40, %v12164_v21  ;;  %v9316_v8 = vunpack.i.h.bf16 %v9314_v20 }
 0x301   : > { %v9315_v0 = vunpack.i.l.bf16 %v9314_v20  ;;  %v9319_v22 = vpop.permute.xlu0 %9318  ;;  %v2814_v53 = vrot.slane %v12164_v21, 2  ;;  %v2815_v30 = vrot.slane %v12161_v39, 2  ;;  %v3471_v37 = vsel %vm1980_vm11, %v11832_v42, %v9305_v31 }
 0x302   : > { %9518 = vrot.lane.b32.xlu0 %v9517_v4, %s14557_s18  ;;  %v9321_v11 = vunpack.i.h.bf16 %v9319_v22  ;;  %v9320_v58 = vunpack.i.l.bf16 %v9319_v22  ;;  %v12178_v35 = vsel %vm807_vm1, %v2643_v10, %v2644_v13  ;;  %v3503_v40 = vsel %vm3405_vm13, %v3471_v37, %v9310_v60 }
 0x303   : > { %v12181_v48 = vsel %vm984_vm2, %v2814_v53, %v2815_v30  ;;  %v12185_v20 = vsel %vm984_vm2, %v2815_v30, %v2817_v15  ;;  %v9522_v2 = vpack.i.bf16 %v12086_v29, %v12178_v35  ;;  %v9324_v4 = vpop.permute.xlu1 %9323  ;;  %v3535_v42 = vsel %vm3438_vm14, %v3503_v40, %v9315_v0 }
 0x304   : > { %8618 = vmatprep.mubr.msk.f32.mxu0 %vm1980_vm11, %v12181_v48  ;;  %v3406_v31 = vsel %vm3405_vm13, %v3373_v34, %v9311_v14  ;;  %v9527_v10 = vpack.i.bf16 %v12054_v23, %v12108_v52  ;;  %v9326_v22 = vunpack.i.h.bf16 %v9324_v4  ;;  %v9325_v53 = vunpack.i.l.bf16 %v9324_v4  ;;  %3701 = vmatprep.mubr.f32.mxu1 %v3535_v42 }
 0x305   : > { %8619 = vmatmul.mubr.msk.f32.gmra.mrb[14].mxu0 %vm1980_vm11, %v12185_v20  ;;  %v3439_v60 = vsel %vm3438_vm14, %v3406_v31, %v9316_v8  ;;  %v9329_v15 = vpop.permute.xlu0 %9328  ;;  %9523 = vrot.lane.b32.xlu1 %v9522_v2, %s10211_s14  ;;  %v12200_v0 = vsel %vm807_vm1, %v2644_v13, %v2646_v19  ;;  %v3472_v14 = vsel %vm1980_vm11, %v11848_v56, %v9320_v58 }
 0x306   : > { %3702 = vmatmul.mubr.f32.vlgmr.msra.gmra.mrb[32].mxu1 %v3439_v60  ;;  %v9331_v30 = vunpack.i.h.bf16 %v9329_v15  ;;  %v9330_v37 = vunpack.i.l.bf16 %v9329_v15  ;;  %9528 = vrot.lane.b32.xlu0 %v9527_v10, %s10208_s27  ;;  %v3504_v34 = vsel %vm3405_vm13, %v3472_v14, %v9325_v53  ;;  %v3374_v40 = vsel %vm1980_vm11, %v10481_v1, %v9321_v11 }
 0x307   : > { %v9334_v8 = vpop.permute.xlu1 %9333  ;;  %v9532_v2 = vpack.i.bf16 %v12031_v9, %v12161_v39  ;;  %v3407_v42 = vsel %vm3405_vm13, %v3374_v40, %v9326_v22  ;;  %v9537_v56 = vpack.i.bf16 %v12083_v17, %v12200_v0  ;;  %v9542_v53 = vpack.i.bf16 %v12101_v43, %v12181_v48 }
 0x308   : > { %v3536_v4 = vsel %vm3438_vm14, %v3504_v34, %v9330_v37  ;;  %v9336_v19 = vunpack.i.h.bf16 %v9334_v8  ;;  %v9335_v13 = vunpack.i.l.bf16 %v9334_v8  ;;  %v3440_v31 = vsel %vm3438_vm14, %v3407_v42, %v9331_v30 }
 0x309   : > { %v9339_v58 = vpop.permute.xlu0 %9338  ;;  %3706 = vmatprep.mubr.f32.mxu1 %v3536_v4  ;;  %9533 = vrot.lane.b32.xlu1 %v9532_v2, %s14557_s18 }
 0x30a   : > { %v9341_v11 = vunpack.i.h.bf16 %v9339_v58  ;;  %v9340_v10 = vunpack.i.l.bf16 %v9339_v58  ;;  %3707 = vmatmul.mubr.f32.gmra.mrb[34].mxu1 %v3440_v31  ;;  %9538 = vrot.lane.b32.xlu0 %v9537_v56, %s10211_s14  ;;  %v3473_v9 = vsel %vm1980_vm11, %v11806_v36, %v9335_v13  ;;  %v3375_v22 = vsel %vm1980_vm11, %v11742_v62, %v9336_v19 }
 0x30b   : > { %v9344_v60 = vpop.permute.xlu1 %9343 }
 0x30c   : > { %v3505_v15 = vsel %vm3405_vm13, %v3473_v9, %v9340_v10  ;;  %v3408_v30 = vsel %vm3405_vm13, %v3375_v22, %v9341_v11  ;;  %v9346_v37 = vunpack.i.h.bf16 %v9344_v60  ;;  %v9345_v14 = vunpack.i.l.bf16 %v9344_v60 }
 0x30d   : > { %v9349_v34 = vpop.permute.xlu0 %9348  ;;  %9543 = vrot.lane.b32.xlu1 %v9542_v53, %s10208_s27 }
 0x30e   : > { %v9351_v40 = vunpack.i.h.bf16 %v9349_v34  ;;  %v9350_v8 = vunpack.i.l.bf16 %v9349_v34  ;;  %v3537_v36 = vsel %vm3438_vm14, %v3505_v15, %v9345_v14  ;;  %v3441_v2 = vsel %vm3438_vm14, %v3408_v30, %v9346_v37 }
 0x30f   : > { %v9354_v62 = vpop.permute.xlu1 %9353  ;;  %3711 = vmatprep.mubr.f32.mxu1 %v3537_v36 }
 0x310   : > { %v3474_v4 = vsel %vm1980_vm11, %v11821_v16, %v9350_v8  ;;  %v3376_v42 = vsel %vm1980_vm11, %v11382_v28, %v9351_v40  ;;  %v9356_v19 = vunpack.i.h.bf16 %v9354_v62  ;;  %v9355_v13 = vunpack.i.l.bf16 %v9354_v62  ;;  %3712 = vmatmul.mubr.f32.gmra.mrb[36].mxu1 %v3441_v2 }
 0x311   : > { %v9359_v56 = vpop.permute.xlu0 %9358 }
 0x312   : > { %v9361_v58 = vunpack.i.h.bf16 %v9359_v56  ;;  %v9360_v31 = vunpack.i.l.bf16 %v9359_v56  ;;  %v3506_v11 = vsel %vm3405_vm13, %v3474_v4, %v9355_v13  ;;  %v3409_v10 = vsel %vm3405_vm13, %v3376_v42, %v9356_v19 }
 0x313   : > { %v9364_v9 = vpop.permute.xlu1 %9363 }
 0x314   : > { %v3538_v22 = vsel %vm3438_vm14, %v3506_v11, %v9360_v31  ;;  %v3442_v53 = vsel %vm3438_vm14, %v3409_v10, %v9361_v58  ;;  %v9366_v60 = vunpack.i.h.bf16 %v9364_v9  ;;  %v9365_v16 = vunpack.i.l.bf16 %v9364_v9 }
 0x315   : > { %v9369_v15 = vpop.permute.xlu0 %9368  ;;  %3716 = vmatprep.mubr.f32.mxu1 %v3538_v22 }
 0x316   : > { %v9371_v28 = vunpack.i.h.bf16 %v9369_v15  ;;  %v9370_v30 = vunpack.i.l.bf16 %v9369_v15  ;;  %3717 = vmatmul.mubr.f32.gmra.mrb[38].mxu1 %v3442_v53  ;;  %v12236_v14 = vpop.f32.mrb[2].mxu0  ;;  %v3475_v34 = vsel %vm1980_vm11, %v11838_v18, %v9365_v16  ;;  %v3377_v40 = vsel %vm1980_vm11, %v11430_v24, %v9366_v60 }
 0x317   : > { %v8570_v37 = vpop.f32.mrb[18].mxu1  ;;  %v12243_v36 = vpop.f32.mrb[3].mxu0 }
 0x318   : > { %v2282_v8 = vadd.f32 %v11969_v51, %v8570_v37  ;;  %v9374_v2 = vpop.permute.xlu1 %9373  ;;  %v3507_v62 = vsel %vm3405_vm13, %v3475_v34, %v9370_v30  ;;  %v3410_v4 = vsel %vm3405_vm13, %v3377_v40, %v9371_v28  ;;  %v2276_v13 = vpop.f32.mrb[19].mxu1 }
 0x319   : > { %v9376_v42 = vunpack.i.h.bf16 %v9374_v2  ;;  %v9375_v19 = vunpack.i.l.bf16 %v9374_v2  ;;  %v9379_v56 = vpop.permute.xlu0 %9378  ;;  %v2277_v31 = vadd.f32 %v11969_v51, %v2276_v13 }
 0x31a   : > { %v2364_v58 = vmax.f32 %v2282_v8, 0.0  ;;  %v9381_v18 = vunpack.i.h.bf16 %v9379_v56  ;;  %v9380_v11 = vunpack.i.l.bf16 %v9379_v56 }
 0x31b   : > { %v3539_v24 = vsel %vm3438_vm14, %v3507_v62, %v9375_v19  ;;  %v3443_v10 = vsel %vm3438_vm14, %v3410_v4, %v9376_v42  ;;  %v2363_v22 = vmax.f32 %v2277_v31, 0.0 }
 0x31c   : > { %v2474_v9 = vrot.slane %v2364_v58, 7  ;;  %v9384_v53 = vpop.permute.xlu1 %9383  ;;  %3721 = vmatprep.mubr.f32.mxu1 %v3539_v24  ;;  %v3476_v60 = vsel %vm1980_vm11, %v11860_v26, %v9380_v11  ;;  %v3378_v16 = vsel %vm1980_vm11, %v11427_v38, %v9381_v18 }
 0x31d   : > { %v9386_v15 = vunpack.i.h.bf16 %v9384_v53  ;;  %v9385_v28 = vunpack.i.l.bf16 %v9384_v53  ;;  %3722 = vmatmul.mubr.f32.gmra.mrb[40].mxu1 %v3443_v10  ;;  %v9389_v30 = vpop.permute.xlu0 %9388  ;;  %v2473_v34 = vrot.slane %v2363_v22, 7 }
 0x31e   : > { %v2566_v37 = vsel %vm641_vm0, %v2474_v9, 0.0  ;;  %v9391_v40 = vunpack.i.h.bf16 %v9389_v30  ;;  %v9390_v8 = vunpack.i.l.bf16 %v9389_v30 }
 0x31f   : > { %v2822_v2 = vrot.slane %v2566_v37, 2  ;;  %v3508_v62 = vsel %vm3405_vm13, %v3476_v60, %v9385_v28  ;;  %v3411_v4 = vsel %vm3405_vm13, %v3378_v16, %v9386_v15  ;;  %v12258_v42 = vsel %vm641_vm0, %v2473_v34, %v2474_v9 }
 0x320   : > { %v12261_v26 = vsel %vm641_vm0, 0.0, %v2473_v34  ;;  %v9394_v38 = vpop.permute.xlu1 %9393  ;;  %v3540_v19 = vsel %vm3438_vm14, %v3508_v62, %v9390_v8  ;;  %v3444_v13 = vsel %vm3438_vm14, %v3411_v4, %v9391_v40  ;;  %v2649_v58 = vrot.slane %v12258_v42, 1 }
 0x321   : > { %v2648_v56 = vrot.slane %v12261_v26, 1  ;;  %v9396_v31 = vunpack.i.h.bf16 %v9394_v38  ;;  %v9395_v18 = vunpack.i.l.bf16 %v9394_v38  ;;  %v9399_v11 = vpop.permute.xlu0 %9398  ;;  %3726 = vmatprep.mubr.f32.mxu1 %v3540_v19  ;;  %v2651_v24 = vrot.slane %v2566_v37, 1 }
 0x322   : > { %v9547_v10 = vpack.i.bf16 %v12105_v47, %v12261_v26  ;;  %v9400_v9 = vunpack.i.l.bf16 %v9399_v11  ;;  %3727 = vmatmul.mubr.f32.gmra.mrb[42].mxu1 %v3444_v13  ;;  %v2819_v22 = vrot.slane %v12261_v26, 2  ;;  %v9401_v53 = vunpack.i.h.bf16 %v9399_v11 }
 0x323   : > { %v2820_v60 = vrot.slane %v12258_v42, 2  ;;  %v12272_v16 = vsel %vm807_vm1, %v2648_v56, %v2649_v58  ;;  %v3477_v15 = vsel %vm1980_vm11, %v11898_v5, %v9395_v18  ;;  %v3379_v37 = vsel %vm1980_vm11, %v11533_v46, %v9396_v31 }
 0x324   : > { %9548 = vrot.lane.b32.xlu0 %v9547_v10, %s14557_s18  ;;  %v9404_v28 = vpop.permute.xlu1 %9403  ;;  %v9552_v30 = vpack.i.bf16 %v12164_v21, %v12272_v16  ;;  %v3509_v47 = vsel %vm3405_vm13, %v3477_v15, %v9400_v9  ;;  %v9557_v4 = vpack.i.bf16 %v12121_v61, %v12185_v20  ;;  %v3412_v13 = vsel %vm3405_vm13, %v3379_v37, %v9401_v53 }
 0x325   : > { %v12283_v34 = vsel %vm984_vm2, %v2819_v22, %v2820_v60  ;;  %v9406_v40 = vunpack.i.h.bf16 %v9404_v28  ;;  %v9405_v8 = vunpack.i.l.bf16 %v9404_v28  ;;  %v12286_v62 = vsel %vm984_vm2, %v2820_v60, %v2822_v2  ;;  %v9409_v5 = vpop.permute.xlu0 %9408 }
 0x326   : > { %8621 = vmatprep.mubr.msk.f32.mxu0 %vm1980_vm11, %v12283_v34  ;;  %9553 = vrot.lane.b32.xlu1 %v9552_v30, %s10211_s14  ;;  %v9411_v38 = vunpack.i.h.bf16 %v9409_v5  ;;  %v9410_v19 = vunpack.i.l.bf16 %v9409_v5  ;;  %v9562_v2 = vpack.i.bf16 %v12108_v52, %v12258_v42  ;;  %v12300_v56 = vsel %vm807_vm1, %v2649_v58, %v2651_v24 }
 0x327   : > { %8622 = vmatmul.mubr.msk.f32.gmra.mrb[16].mxu0 %vm1980_vm11, %v12286_v62  ;;  %v3541_v46 = vsel %vm3438_vm14, %v3509_v47, %v9405_v8  ;;  %v3445_v18 = vsel %vm3438_vm14, %v3412_v13, %v9406_v40  ;;  %v9567_v58 = vpack.i.bf16 %v12161_v39, %v12300_v56 }
 0x328   : > { %9558 = vrot.lane.b32.xlu0 %v9557_v4, %s10208_s27  ;;  %v9414_v31 = vpop.permute.xlu1 %9413  ;;  %3731 = vmatprep.mubr.f32.mxu1 %v3541_v46  ;;  %v3478_v11 = vsel %vm1980_vm11, %v11927_v59, %v9410_v19  ;;  %v3380_v10 = vsel %vm1980_vm11, %v11530_v41, %v9411_v38  ;;  %v9572_v59 = vpack.i.bf16 %v12178_v35, %v12283_v34 }
 0x329   : > { %v9416_v9 = vunpack.i.h.bf16 %v9414_v31  ;;  %v9415_v22 = vunpack.i.l.bf16 %v9414_v31  ;;  %3732 = vmatmul.mubr.f32.gmra.mrb[44].mxu1 %v3445_v18  ;;  %v9419_v52 = vpop.permute.xlu0 %9418 }
 0x32a   : > { %9563 = vrot.lane.b32.xlu1 %v9562_v2, %s14557_s18  ;;  %v9421_v24 = vunpack.i.h.bf16 %v9419_v52  ;;  %v9420_v53 = vunpack.i.l.bf16 %v9419_v52 }
 0x32b   : > { %v3510_v60 = vsel %vm3405_vm13, %v3478_v11, %v9415_v22  ;;  %v3413_v15 = vsel %vm3405_vm13, %v3380_v10, %v9416_v9 }
 0x32c   : > { %9568 = vrot.lane.b32.xlu0 %v9567_v58, %s10211_s14  ;;  %v9424_v41 = vpop.permute.xlu1 %9423  ;;  %v3542_v28 = vsel %vm3438_vm14, %v3510_v60, %v9420_v53  ;;  %v3446_v30 = vsel %vm3438_vm14, %v3413_v15, %v9421_v24 }
 0x32d   : > { %v9426_v47 = vunpack.i.h.bf16 %v9424_v41  ;;  %v9425_v37 = vunpack.i.l.bf16 %v9424_v41  ;;  %v9429_v40 = vpop.permute.xlu0 %9428  ;;  %3736 = vmatprep.mubr.f32.mxu1 %v3542_v28 }
 0x32e   : > { %9573 = vrot.lane.b32.xlu1 %v9572_v59, %s10208_s27  ;;  %v9431_v8 = vunpack.i.h.bf16 %v9429_v40  ;;  %v9430_v5 = vunpack.i.l.bf16 %v9429_v40  ;;  %3737 = vmatmul.mubr.f32.gmra.mrb[46].mxu1 %v3446_v30 }
 0x32f   : > { %v3479_v4 = vsel %vm1980_vm11, %v11941_v3, %v9425_v37  ;;  %v3381_v38 = vsel %vm1980_vm11, %v11648_v57, %v9426_v47 }
 0x330   : > { %v9434_v19 = vpop.permute.xlu1 %9433  ;;  %v3511_v46 = vsel %vm3405_vm13, %v3479_v4, %v9430_v5  ;;  %v3414_v2 = vsel %vm3405_vm13, %v3381_v38, %v9431_v8 }
 0x331   : > { %v9436_v13 = vunpack.i.h.bf16 %v9434_v19  ;;  %v9435_v31 = vunpack.i.l.bf16 %v9434_v19  ;;  %v9439_v18 = vpop.permute.xlu0 %9438 }
 0x332   : > { %v9441_v11 = vunpack.i.h.bf16 %v9439_v18  ;;  %v9440_v10 = vunpack.i.l.bf16 %v9439_v18 }
 0x333   : > { %v3543_v9 = vsel %vm3438_vm14, %v3511_v46, %v9435_v31  ;;  %v3447_v22 = vsel %vm3438_vm14, %v3414_v2, %v9436_v13 }
 0x334   : > { %v9444_v52 = vpop.permute.xlu1 %9443  ;;  %3741 = vmatprep.mubr.f32.mxu1 %v3543_v9  ;;  %v3480_v3 = vsel %vm1980_vm11, %v11954_v63, %v9440_v10  ;;  %v3382_v57 = vsel %vm1980_vm11, %v11645_v25, %v9441_v11 }
 0x335   : > { %v9446_v58 = vunpack.i.h.bf16 %v9444_v52  ;;  %v9445_v24 = vunpack.i.l.bf16 %v9444_v52  ;;  %3742 = vmatmul.mubr.f32.gmra.mrb[48].mxu1 %v3447_v22  ;;  %v9449_v53 = vpop.permute.xlu0 %9448 }
 0x336   : > { %v9451_v60 = vunpack.i.h.bf16 %v9449_v53  ;;  %v9450_v15 = vunpack.i.l.bf16 %v9449_v53  ;;  %v12331_v41 = vpop.f32.mrb[4].mxu0 }
 0x337   : > { %v8573_v59 = vpop.f32.mrb[20].mxu1  ;;  %v3512_v28 = vsel %vm3405_vm13, %v3480_v3, %v9445_v24  ;;  %v3415_v30 = vsel %vm3405_vm13, %v3382_v57, %v9446_v58  ;;  %v12336_v37 = vpop.f32.mrb[5].mxu0 }
 0x338   : > { %v2292_v47 = vadd.f32 %v11969_v51, %v8573_v59  ;;  %v9454_v63 = vpop.permute.xlu1 %9453  ;;  %v3544_v25 = vsel %vm3438_vm14, %v3512_v28, %v9450_v15  ;;  %v3448_v40 = vsel %vm3438_vm14, %v3415_v30, %v9451_v60  ;;  %v2286_v4 = vpop.f32.mrb[21].mxu1 }
 0x339   : > { %v9456_v8 = vunpack.i.h.bf16 %v9454_v63  ;;  %v9455_v5 = vunpack.i.l.bf16 %v9454_v63  ;;  %v9459_v38 = vpop.permute.xlu0 %9458  ;;  %3746 = vmatprep.mubr.f32.mxu1 %v3544_v25  ;;  %v2287_v46 = vadd.f32 %v11969_v51, %v2286_v4 }
 0x33a   : > { %v2366_v19 = vmax.f32 %v2292_v47, 0.0  ;;  %v9461_v2 = vunpack.i.h.bf16 %v9459_v38  ;;  %v9460_v13 = vunpack.i.l.bf16 %v9459_v38  ;;  %3747 = vmatmul.mubr.f32.gmra.mrb[50].mxu1 %v3448_v40 }
 0x33b   : > { %v3481_v31 = vsel %vm1980_vm11, %v11978_v27, %v9455_v5  ;;  %v3383_v18 = vsel %vm1980_vm11, %v11758_v54, %v9456_v8  ;;  %v2365_v10 = vmax.f32 %v2287_v46, 0.0 }
 0x33c   : > { %v2477_v11 = vrot.slane %v2366_v19, 7  ;;  %v9464_v9 = vpop.permute.xlu1 %9463  ;;  %v3513_v22 = vsel %vm3405_vm13, %v3481_v31, %v9460_v13  ;;  %v3416_v52 = vsel %vm3405_vm13, %v3383_v18, %v9461_v2 }
 0x33d   : > { %v9466_v3 = vunpack.i.h.bf16 %v9464_v9  ;;  %v9465_v57 = vunpack.i.l.bf16 %v9464_v9  ;;  %v9469_v58 = vpop.permute.xlu0 %9468  ;;  %v2476_v53 = vrot.slane %v2365_v10, 7 }
 0x33e   : > { %v2567_v24 = vsel %vm641_vm0, %v2477_v11, 0.0  ;;  %v9471_v60 = vunpack.i.h.bf16 %v9469_v58  ;;  %v9470_v15 = vunpack.i.l.bf16 %v9469_v58 }
 0x33f   : > { %v2656_v59 = vrot.slane %v2567_v24, 1  ;;  %v2827_v27 = vrot.slane %v2567_v24, 2  ;;  %v3545_v28 = vsel %vm3438_vm14, %v3513_v22, %v9465_v57  ;;  %v3449_v54 = vsel %vm3438_vm14, %v3416_v52, %v9466_v3 }
 0x340   : > { %v12351_v30 = vsel %vm641_vm0, %v2476_v53, %v2477_v11  ;;  %v12354_v47 = vsel %vm641_vm0, 0.0, %v2476_v53  ;;  %v9474_v63 = vpop.permute.xlu1 %9473  ;;  %3751 = vmatprep.mubr.f32.mxu1 %v3545_v28  ;;  %v3482_v25 = vsel %vm1980_vm11, %v12002_v32, %v9470_v15  ;;  %v3384_v40 = vsel %vm1980_vm11, %v11755_v6, %v9471_v60 }
 0x341   : > { %v2653_v8 = vrot.slane %v12354_v47, 1  ;;  %v2654_v5 = vrot.slane %v12351_v30, 1  ;;  %v9476_v4 = vunpack.i.h.bf16 %v9474_v63  ;;  %v9475_v38 = vunpack.i.l.bf16 %v9474_v63  ;;  %3752 = vmatmul.mubr.f32.gmra.mrb[52].mxu1 %v3449_v54  ;;  %v9479_v19 = vpop.permute.xlu0 %9478 }
 0x342   : > { %v9577_v46 = vpack.i.bf16 %v12181_v48, %v12354_v47  ;;  %v9481_v2 = vunpack.i.h.bf16 %v9479_v19  ;;  %v9480_v13 = vunpack.i.l.bf16 %v9479_v19  ;;  %v2824_v31 = vrot.slane %v12354_v47, 2 }
 0x343   : > { %v2825_v32 = vrot.slane %v12351_v30, 2  ;;  %v12367_v18 = vsel %vm807_vm1, %v2653_v8, %v2654_v5  ;;  %v3514_v6 = vsel %vm3405_vm13, %v3482_v25, %v9475_v38  ;;  %v3417_v11 = vsel %vm3405_vm13, %v3384_v40, %v9476_v4 }
 0x344   : > { %9578 = vrot.lane.b32.xlu0 %v9577_v46, %s14557_s18  ;;  %v9582_v10 = vpack.i.bf16 %v12261_v26, %v12367_v18  ;;  %v3546_v48 = vsel %vm3438_vm14, %v3514_v6, %v9480_v13  ;;  %v3450_v9 = vsel %vm3438_vm14, %v3417_v11, %v9481_v2  ;;  %v9587_v3 = vpack.i.bf16 %v12200_v0, %v12286_v62  ;;  %v9484_v60 = vpop.permute.xlu1 %9483 }
 0x345   : > { %v12377_v22 = vsel %vm984_vm2, %v2824_v31, %v2825_v32  ;;  %v12380_v52 = vsel %vm984_vm2, %v2825_v32, %v2827_v27  ;;  %3756 = vmatprep.mubr.f32.mxu1 %v3546_v48  ;;  %v12390_v57 = vsel %vm807_vm1, %v2654_v5, %v2656_v59  ;;  %v9592_v58 = vpack.i.bf16 %v12185_v20, %v12351_v30  ;;  %v12416_v31 = vld [vmem:[%s14501_s2] ss:$0 sm:$0xff] }
 0x346   : > { %8624 = vmatprep.mubr.msk.f32.mxu0 %vm1980_vm11, %v12377_v22  ;;  %9583 = vrot.lane.b32.xlu1 %v9582_v10, %s10211_s14  ;;  %v9597_v24 = vpack.i.bf16 %v12258_v42, %v12390_v57  ;;  %v9602_v53 = vpack.i.bf16 %v12272_v16, %v12377_v22  ;;  %v9486_v15 = vunpack.i.h.bf16 %v9484_v60  ;;  %v9485_v59 = vunpack.i.l.bf16 %v9484_v60 }
 0x347   : > { %8625 = vmatmul.mubr.msk.f32.gmra.mrb[18].mxu0 %vm1980_vm11, %v12380_v52  ;;  %3757 = vmatmul.mubr.f32.gmra.mrb[54].mxu1 %v3450_v9 }
 0x348   : > { %9588 = vrot.lane.b32.xlu0 %v9587_v3, %s10208_s27  ;;  %v3483_v5 = vsel %vm1980_vm11, %v12042_v44, %v9485_v59  ;;  %v3385_v4 = vsel %vm1980_vm11, %v11886_v45, %v9486_v15 }
 0x34a   : > { %9593 = vrot.lane.b32.xlu1 %v9592_v58, %s14557_s18 }
 0x34c   : > { %9598 = vrot.lane.b32.xlu0 %v9597_v24, %s10211_s14 }
 0x34e   : > { %9603 = vrot.lane.b32.xlu1 %v9602_v53, %s10208_s27 }
 0x353   : > { %v9489_v27 = vpop.permute.xlu0 %9488 }
 0x354   : > { %v9491_v28 = vunpack.i.h.bf16 %v9489_v27  ;;  %v9490_v54 = vunpack.i.l.bf16 %v9489_v27 }
 0x356   : > { %v9494_v63 = vpop.permute.xlu1 %9493  ;;  %v12402_v20 = vpop.f32.mrb[6].mxu0  ;;  %v3515_v2 = vsel %vm3405_vm13, %v3483_v5, %v9490_v54  ;;  %v3418_v13 = vsel %vm3405_vm13, %v3385_v4, %v9491_v28 }
 0x357   : > { %v9496_v25 = vunpack.i.h.bf16 %v9494_v63  ;;  %v9495_v40 = vunpack.i.l.bf16 %v9494_v63  ;;  %v8576_v8 = vpop.f32.mrb[22].mxu1  ;;  %v12409_v46 = vpop.f32.mrb[7].mxu0 }
 0x358   : > { %v2302_v38 = vadd.f32 %v11969_v51, %v8576_v8  ;;  %v2296_v19 = vpop.f32.mrb[23].mxu1  ;;  %v9499_v44 = vpop.permute.xlu0 %9498 }
 0x359   : > { %v2297_v32 = vadd.f32 %v12416_v31, %v2296_v19  ;;  %v3547_v6 = vsel %vm3438_vm14, %v3515_v2, %v9495_v40  ;;  %v3451_v45 = vsel %vm3438_vm14, %v3418_v13, %v9496_v25  ;;  %v9501_v11 = vunpack.i.h.bf16 %v9499_v44 }
 0x35a   : > { %v2368_v51 = vmax.f32 %v2302_v38, 0.0  ;;  %v9500_v10 = vunpack.i.l.bf16 %v9499_v44  ;;  %v9504_v48 = vpop.permute.xlu1 %9503  ;;  %3761 = vmatprep.mubr.f32.mxu1 %v3547_v6 }
 0x35b   : > { %v2367_v9 = vmax.f32 %v2297_v32, 0.0  ;;  %v9506_v3 = vunpack.i.h.bf16 %v9504_v48  ;;  %v9505_v58 = vunpack.i.l.bf16 %v9504_v48  ;;  %3762 = vmatmul.mubr.f32.gmra.mrb[56].mxu1 %v3451_v45  ;;  %v3386_v27 = vsel %vm1980_vm11, %v11883_v50, %v9501_v11 }
 0x35c   : > { %v2480_v24 = vrot.slane %v2368_v51, 7  ;;  %v3484_v53 = vsel %vm1980_vm11, %v12054_v23, %v9500_v10  ;;  %v9509_v15 = vpop.permute.xlu0 %9508  ;;  %v9617_v51 = vpack.i.bf16 %v12300_v56, %v12380_v52 }
 0x35d   : > { %v2479_v60 = vrot.slane %v2367_v9, 7  ;;  %v3516_v59 = vsel %vm3405_vm13, %v3484_v53, %v9505_v58  ;;  %v9511_v54 = vunpack.i.h.bf16 %v9509_v15  ;;  %v9510_v63 = vunpack.i.l.bf16 %v9509_v15 }
 0x35e   : > { %v2568_v28 = vsel %vm641_vm0, %v2480_v24, 0.0  ;;  %v3419_v25 = vsel %vm3405_vm13, %v3386_v27, %v9506_v3  ;;  %v9514_v3 = vpop.permute.xlu1 %9513 }
 0x35f   : > { %v12429_v40 = vsel %vm641_vm0, %v2479_v60, %v2480_v24  ;;  %v12432_v8 = vsel %vm641_vm0, 0.0, %v2479_v60  ;;  %v2832_v23 = vrot.slane %v2568_v28, 2  ;;  %v3548_v38 = vsel %vm3438_vm14, %v3516_v59, %v9510_v63 }
 0x360   : > { %v2658_v5 = vrot.slane %v12432_v8, 1  ;;  %v2659_v4 = vrot.slane %v12429_v40, 1  ;;  %v3452_v50 = vsel %vm3438_vm14, %v3419_v25, %v9511_v54  ;;  %v9607_v19 = vpack.i.bf16 %v12283_v34, %v12432_v8  ;;  %3766 = vmatprep.mubr.f32.mxu1 %v3548_v38 }
 0x361   : > { %v2829_v2 = vrot.slane %v12432_v8, 2  ;;  %v2661_v13 = vrot.slane %v2568_v28, 1  ;;  %v2830_v32 = vrot.slane %v12429_v40, 2  ;;  %3767 = vmatmul.mubr.f32.gmra.mrb[58].mxu1 %v3452_v50  ;;  %v9622_v10 = vpack.i.bf16 %v12286_v62, %v12429_v40 }
 0x362   : > { %v12443_v44 = vsel %vm807_vm1, %v2658_v5, %v2659_v4  ;;  %9608 = vrot.lane.b32.xlu0 %v9607_v19, %s14557_s18  ;;  %v9515_v58 = vunpack.i.l.bf16 %v9514_v3  ;;  %v9516_v53 = vunpack.i.h.bf16 %v9514_v3 }
 0x363   : > { %v9612_v6 = vpack.i.bf16 %v12354_v47, %v12443_v44  ;;  %v12449_v45 = vsel %vm984_vm2, %v2829_v2, %v2830_v32  ;;  %v12452_v34 = vsel %vm984_vm2, %v2830_v32, %v2832_v23  ;;  %v12462_v11 = vsel %vm807_vm1, %v2659_v4, %v2661_v13 }
 0x364   : > { %8627 = vmatprep.mubr.msk.f32.mxu0 %vm1980_vm11, %v12449_v45  ;;  %v9627_v48 = vpack.i.bf16 %v12351_v30, %v12462_v11  ;;  %v9632_v9 = vpack.i.bf16 %v12367_v18, %v12449_v45  ;;  %v3485_v63 = vsel %vm1980_vm11, %v12101_v43, %v9515_v58  ;;  %v3387_v50 = vsel %vm1980_vm11, %v12008_v7, %v9516_v53 }
 0x365   : > { %9613 = vrot.lane.b32.xlu1 %v9612_v6, %s10211_s14  ;;  %8628 = vmatmul.mubr.msk.f32.gmra.mrb[20].mxu0 %vm1980_vm11, %v12452_v34 }
 0x366   : > { %9618 = vrot.lane.b32.xlu0 %v9617_v51, %s10208_s27 }
 0x369   : > { %9623 = vrot.lane.b32.xlu1 %v9622_v10, %s14557_s18 }
 0x36a   : > { %9628 = vrot.lane.b32.xlu0 %v9627_v48, %s10211_s14 }
 0x36d   : > { %9633 = vrot.lane.b32.xlu1 %v9632_v9, %s10208_s27 }
 0x374   : > { %v9519_v24 = vpop.permute.xlu0 %9518 }
 0x375   : > { %v9521_v60 = vunpack.i.h.bf16 %v9519_v24  ;;  %v9520_v15 = vunpack.i.l.bf16 %v9519_v24 }
 0x376   : > { %v12474_v59 = vpop.f32.mrb[8].mxu0 }
 0x377   : > { %v8579_v62 = vpop.f32.mrb[24].mxu1  ;;  %v9524_v27 = vpop.permute.xlu1 %9523  ;;  %v3517_v13 = vsel %vm3405_vm13, %v3485_v63, %v9520_v15  ;;  %v3420_v32 = vsel %vm3405_vm13, %v3387_v50, %v9521_v60 }
 0x378   : > { %v2312_v28 = vadd.f32 %v12416_v31, %v8579_v62  ;;  %v2306_v54 = vpop.f32.mrb[25].mxu1  ;;  %v9526_v25 = vunpack.i.h.bf16 %v9524_v27  ;;  %v9525_v23 = vunpack.i.l.bf16 %v9524_v27  ;;  %v12480_v4 = vpop.f32.mrb[9].mxu0 }
 0x379   : > { %v2307_v5 = vadd.f32 %v12416_v31, %v2306_v54  ;;  %v9529_v38 = vpop.permute.xlu0 %9528 }
 0x37a   : > { %v2370_v19 = vmax.f32 %v2312_v28, 0.0  ;;  %v9530_v2 = vunpack.i.l.bf16 %v9529_v38  ;;  %v9531_v51 = vunpack.i.h.bf16 %v9529_v38  ;;  %v3549_v43 = vsel %vm3438_vm14, %v3517_v13, %v9525_v23 }
 0x37b   : > { %v2369_v6 = vmax.f32 %v2307_v5, 0.0  ;;  %v3453_v10 = vsel %vm3438_vm14, %v3420_v32, %v9526_v25  ;;  %v9534_v9 = vpop.permute.xlu1 %9533  ;;  %3771 = vmatprep.mubr.f32.mxu1 %v3549_v43 }
 0x37c   : > { %v2483_v48 = vrot.slane %v2370_v19, 7  ;;  %v9536_v58 = vunpack.i.h.bf16 %v9534_v9  ;;  %v9535_v24 = vunpack.i.l.bf16 %v9534_v9  ;;  %3772 = vmatmul.mubr.f32.gmra.mrb[60].mxu1 %v3453_v10  ;;  %v3486_v60 = vsel %vm1980_vm11, %v12121_v61, %v9530_v2 }
 0x37d   : > { %v2482_v3 = vrot.slane %v2369_v6, 7  ;;  %v9539_v62 = vpop.permute.xlu0 %9538  ;;  %v3388_v63 = vsel %vm1980_vm11, %v12005_v49, %v9531_v51 }
 0x37e   : > { %v2569_v7 = vsel %vm641_vm0, %v2483_v48, 0.0  ;;  %v9541_v53 = vunpack.i.h.bf16 %v9539_v62  ;;  %v9540_v15 = vunpack.i.l.bf16 %v9539_v62  ;;  %v3518_v5 = vsel %vm3405_vm13, %v3486_v60, %v9535_v24 }
 0x37f   : > { %v2837_v27 = vrot.slane %v2569_v7, 2  ;;  %v12492_v28 = vsel %vm641_vm0, %v2482_v3, %v2483_v48  ;;  %v12495_v54 = vsel %vm641_vm0, 0.0, %v2482_v3  ;;  %v3421_v38 = vsel %vm3405_vm13, %v3388_v63, %v9536_v58  ;;  %v9544_v58 = vpop.permute.xlu1 %9543 }
 0x380   : > { %14600 = vst [vmem:[#allocation31_spill] sm:$0xff] %v12492_v28  ;;  %14601 = vst [vmem:[#allocation32_spill] sm:$0xff] %v12495_v54  ;;  %v2663_v25 = vrot.slane %v12495_v54, 1  ;;  %v2664_v23 = vrot.slane %v12492_v28, 1  ;;  %v3550_v61 = vsel %vm3438_vm14, %v3518_v5, %v9540_v15  ;;  %v3454_v50 = vsel %vm3438_vm14, %v3421_v38, %v9541_v53 }
 0x381   : > { %3776 = vmatprep.mubr.f32.mxu1 %v3550_v61  ;;  %v9637_v19 = vpack.i.bf16 %v12377_v22, %v12495_v54  ;;  %v2834_v2 = vrot.slane %v12495_v54, 2  ;;  %v2835_v49 = vrot.slane %v12492_v28, 2  ;;  %v2666_v32 = vrot.slane %v2569_v7, 1 }
 0x382   : > { %v12510_v13 = vsel %vm807_vm1, %v2663_v25, %v2664_v23  ;;  %3777 = vmatmul.mubr.f32.gmra.mrb[62].mxu1 %v3454_v50  ;;  %v9647_v22 = vpack.i.bf16 %v12390_v57, %v12452_v34  ;;  %v9652_v10 = vpack.i.bf16 %v12380_v52, %v12492_v28  ;;  %v9545_v24 = vunpack.i.l.bf16 %v9544_v58 }
 0x383   : > { %v9642_v6 = vpack.i.bf16 %v12432_v8, %v12510_v13  ;;  %9638 = vrot.lane.b32.xlu0 %v9637_v19, %s14557_s18  ;;  %v12516_v51 = vsel %vm984_vm2, %v2834_v2, %v2835_v49  ;;  %v12519_v43 = vsel %vm984_vm2, %v2835_v49, %v2837_v27  ;;  %v12531_v48 = vsel %vm807_vm1, %v2664_v23, %v2666_v32 }
 0x384   : > { %8630 = vmatprep.mubr.msk.f32.mxu0 %vm1980_vm11, %v12516_v51  ;;  %v9657_v9 = vpack.i.bf16 %v12429_v40, %v12531_v48  ;;  %v9662_v3 = vpack.i.bf16 %v12443_v44, %v12516_v51  ;;  %v9546_v52 = vunpack.i.h.bf16 %v9544_v58  ;;  %v3487_v23 = vsel %vm1980_vm11, %v12178_v35, %v9545_v24 }
 0x385   : > { %9643 = vrot.lane.b32.xlu1 %v9642_v6, %s10211_s14  ;;  %8631 = vmatmul.mubr.msk.f32.gmra.mrb[22].mxu0 %vm1980_vm11, %v12519_v43 }
 0x386   : > { %v3389_v19 = vsel %vm1980_vm11, %v12086_v29, %v9546_v52 }
 0x387   : > { %9648 = vrot.lane.b32.xlu0 %v9647_v22, %s10208_s27 }
 0x389   : > { %9653 = vrot.lane.b32.xlu1 %v9652_v10, %s14557_s18 }
 0x38b   : > { %9658 = vrot.lane.b32.xlu0 %v9657_v9, %s10211_s14 }
 0x38d   : > { %9663 = vrot.lane.b32.xlu1 %v9662_v3, %s10208_s27 }
 0x396   : > { %v9549_v62 = vpop.permute.xlu0 %9548  ;;  %v12541_v15 = vpop.f32.mrb[10].mxu0 }
 0x397   : > { %v9551_v7 = vunpack.i.h.bf16 %v9549_v62  ;;  %v9550_v53 = vunpack.i.l.bf16 %v9549_v62  ;;  %v8582_v60 = vpop.f32.mrb[26].mxu1  ;;  %v12547_v50 = vpop.f32.mrb[11].mxu0 }
 0x398   : > { %v9554_v27 = vpop.permute.xlu1 %9553  ;;  %v2322_v63 = vadd.f32 %v12416_v31, %v8582_v60  ;;  %v2316_v25 = vpop.f32.mrb[27].mxu1 }
 0x399   : > { %v9556_v5 = vunpack.i.h.bf16 %v9554_v27  ;;  %v9555_v38 = vunpack.i.l.bf16 %v9554_v27  ;;  %v2317_v61 = vadd.f32 %v12416_v31, %v2316_v25  ;;  %v3519_v32 = vsel %vm3405_vm13, %v3487_v23, %v9550_v53 }
 0x39a   : > { %v2372_v2 = vmax.f32 %v2322_v63, 0.0  ;;  %v9559_v49 = vpop.permute.xlu0 %9558  ;;  %v3422_v6 = vsel %vm3405_vm13, %v3389_v19, %v9551_v7 }
 0x39b   : > { %v2371_v22 = vmax.f32 %v2317_v61, 0.0  ;;  %v9561_v10 = vunpack.i.h.bf16 %v9559_v49  ;;  %v9560_v9 = vunpack.i.l.bf16 %v9559_v49  ;;  %v3551_v35 = vsel %vm3438_vm14, %v3519_v32, %v9555_v38 }
 0x39c   : > { %v2486_v3 = vrot.slane %v2372_v2, 7  ;;  %v9564_v58 = vpop.permute.xlu1 %9563  ;;  %3781 = vmatprep.mubr.f32.mxu1 %v3551_v35  ;;  %v3455_v24 = vsel %vm3438_vm14, %v3422_v6, %v9556_v5 }
 0x39d   : > { %v2485_v62 = vrot.slane %v2371_v22, 7  ;;  %v9566_v60 = vunpack.i.h.bf16 %v9564_v58  ;;  %v9565_v27 = vunpack.i.l.bf16 %v9564_v58  ;;  %3782 = vmatmul.mubr.f32.gmra.mrb[64].mxu1 %v3455_v24  ;;  %v3488_v63 = vsel %vm1980_vm11, %v12200_v0, %v9560_v9 }
 0x39e   : > { %v2570_v29 = vsel %vm641_vm0, %v2486_v3, 0.0  ;;  %v9569_v52 = vpop.permute.xlu0 %9568  ;;  %v3390_v25 = vsel %vm1980_vm11, %v12083_v17, %v9561_v10  ;;  %v9677_v58 = vpack.i.bf16 %v12462_v11, %v12519_v43 }
 0x39f   : > { %v12557_v53 = vsel %vm641_vm0, %v2485_v62, %v2486_v3  ;;  %v12560_v7 = vsel %vm641_vm0, 0.0, %v2485_v62  ;;  %v9571_v38 = vunpack.i.h.bf16 %v9569_v52  ;;  %v9570_v61 = vunpack.i.l.bf16 %v9569_v52 }
 0x3a0   : > { %14602 = vst [vmem:[#allocation33_spill] sm:$0xff] %v12557_v53  ;;  %14603 = vst [vmem:[#allocation34_spill] sm:$0xff] %v12560_v7  ;;  %v2668_v23 = vrot.slane %v12560_v7, 1  ;;  %v2669_v5 = vrot.slane %v12557_v53, 1  ;;  %v2842_v19 = vrot.slane %v2570_v29, 2  ;;  %v3520_v2 = vsel %vm3405_vm13, %v3488_v63, %v9565_v27 }
 0x3a1   : > { %v3423_v49 = vsel %vm3405_vm13, %v3390_v25, %v9566_v60  ;;  %v3552_v32 = vsel %vm3438_vm14, %v3520_v2, %v9570_v61  ;;  %v9667_v0 = vpack.i.bf16 %v12449_v45, %v12560_v7  ;;  %v2839_v17 = vrot.slane %v12560_v7, 2 }
 0x3a2   : > { %v3456_v6 = vsel %vm3438_vm14, %v3423_v49, %v9571_v38  ;;  %v2671_v22 = vrot.slane %v2570_v29, 1  ;;  %3786 = vmatprep.mubr.f32.mxu1 %v3552_v32  ;;  %v2840_v10 = vrot.slane %v12557_v53, 2  ;;  %v12577_v9 = vsel %vm807_vm1, %v2668_v23, %v2669_v5  ;;  %v9574_v29 = vpop.permute.xlu1 %9573 }
 0x3a3   : > { %3787 = vmatmul.mubr.f32.gmra.mrb[66].mxu1 %v3456_v6  ;;  %9668 = vrot.lane.b32.xlu0 %v9667_v0, %s14557_s18  ;;  %v9672_v35 = vpack.i.bf16 %v12495_v54, %v12577_v9  ;;  %v9682_v62 = vpack.i.bf16 %v12452_v34, %v12557_v53  ;;  %v9575_v52 = vunpack.i.l.bf16 %v9574_v29  ;;  %v9576_v63 = vunpack.i.h.bf16 %v9574_v29 }
 0x3a4   : > { %v12583_v3 = vsel %vm984_vm2, %v2839_v17, %v2840_v10  ;;  %v12586_v45 = vsel %vm984_vm2, %v2840_v10, %v2842_v19  ;;  %v12596_v24 = vsel %vm807_vm1, %v2669_v5, %v2671_v22 }
 0x3a5   : > { %8633 = vmatprep.mubr.msk.f32.mxu0 %vm1980_vm11, %v12583_v3  ;;  %9673 = vrot.lane.b32.xlu1 %v9672_v35, %s10211_s14  ;;  %v9687_v60 = vpack.i.bf16 %v12492_v28, %v12596_v24  ;;  %v9692_v27 = vpack.i.bf16 %v12510_v13, %v12583_v3  ;;  %v3489_v22 = vsel %vm1980_vm11, %v12272_v16, %v9575_v52 }
 0x3a6   : > { %8634 = vmatmul.mubr.msk.f32.gmra.mrb[24].mxu0 %vm1980_vm11, %v12586_v45 }
 0x3a7   : > { %9678 = vrot.lane.b32.xlu0 %v9677_v58, %s10208_s27 }
 0x3a9   : > { %9683 = vrot.lane.b32.xlu1 %v9682_v62, %s14557_s18  ;;  %v3391_v62 = vsel %vm1980_vm11, %v12164_v21, %v9576_v63 }
 0x3ab   : > { %9688 = vrot.lane.b32.xlu0 %v9687_v60, %s10211_s14 }
 0x3ad   : > { %9693 = vrot.lane.b32.xlu1 %v9692_v27, %s10208_s27 }
 0x3b6   : > { %v9579_v25 = vpop.permute.xlu0 %9578  ;;  %v8585_v23 = vpop.f32.mrb[28].mxu1 }
 0x3b7   : > { %v9581_v5 = vunpack.i.h.bf16 %v9579_v25  ;;  %v9580_v38 = vunpack.i.l.bf16 %v9579_v25  ;;  %v12608_v34 = vpop.f32.mrb[12].mxu0  ;;  %v2332_v61 = vadd.f32 %v12416_v31, %v8585_v23  ;;  %v2326_v19 = vpop.f32.mrb[29].mxu1 }
 0x3b8   : > { %v9584_v2 = vpop.permute.xlu1 %9583  ;;  %v2327_v49 = vadd.f32 %v12416_v31, %v2326_v19  ;;  %v12612_v32 = vpop.f32.mrb[13].mxu0 }
 0x3b9   : > { %v9586_v6 = vunpack.i.h.bf16 %v9584_v2  ;;  %v9585_v0 = vunpack.i.l.bf16 %v9584_v2  ;;  %v2374_v17 = vmax.f32 %v2332_v61, 0.0  ;;  %v3521_v58 = vsel %vm3405_vm13, %v3489_v22, %v9580_v38 }
 0x3ba   : > { %v2373_v10 = vmax.f32 %v2327_v49, 0.0  ;;  %v9589_v35 = vpop.permute.xlu0 %9588  ;;  %v3424_v25 = vsel %vm3405_vm13, %v3391_v62, %v9581_v5 }
 0x3bb   : > { %v2489_v60 = vrot.slane %v2374_v17, 7  ;;  %v9590_v27 = vunpack.i.l.bf16 %v9589_v35  ;;  %v3553_v29 = vsel %vm3438_vm14, %v3521_v58, %v9585_v0  ;;  %v9591_v19 = vunpack.i.h.bf16 %v9589_v35 }
 0x3bc   : > { %v2488_v23 = vrot.slane %v2373_v10, 7  ;;  %v9594_v2 = vpop.permute.xlu1 %9593  ;;  %3791 = vmatprep.mubr.f32.mxu1 %v3553_v29  ;;  %v3457_v61 = vsel %vm3438_vm14, %v3424_v25, %v9586_v6 }
 0x3bd   : > { %v2571_v16 = vsel %vm641_vm0, %v2489_v60, 0.0  ;;  %v9596_v52 = vunpack.i.h.bf16 %v9594_v2  ;;  %v9595_v49 = vunpack.i.l.bf16 %v9594_v2  ;;  %3792 = vmatmul.mubr.f32.gmra.mrb[68].mxu1 %v3457_v61  ;;  %v3490_v5 = vsel %vm1980_vm11, %v12300_v56, %v9590_v27 }
 0x3be   : > { %v2847_v38 = vrot.slane %v2571_v16, 2  ;;  %v12624_v21 = vsel %vm641_vm0, %v2488_v23, %v2489_v60  ;;  %v12627_v63 = vsel %vm641_vm0, 0.0, %v2488_v23  ;;  %v9599_v0 = vpop.permute.xlu0 %9598  ;;  %v3392_v58 = vsel %vm1980_vm11, %v12161_v39, %v9591_v19 }
 0x3bf   : > { %14604 = vst [vmem:[#allocation35_spill] sm:$0xff] %v12624_v21  ;;  %14605 = vst [vmem:[#allocation36_spill] sm:$0xff] %v12627_v63  ;;  %v2673_v17 = vrot.slane %v12627_v63, 1  ;;  %v2674_v6 = vrot.slane %v12624_v21, 1  ;;  %v9601_v22 = vunpack.i.h.bf16 %v9599_v0  ;;  %v9600_v10 = vunpack.i.l.bf16 %v9599_v0 }
 0x3c0   : > { %v3522_v35 = vsel %vm3405_vm13, %v3490_v5, %v9595_v49  ;;  %v9697_v62 = vpack.i.bf16 %v12516_v51, %v12627_v63  ;;  %v2844_v60 = vrot.slane %v12627_v63, 2  ;;  %v3425_v56 = vsel %vm3405_vm13, %v3392_v58, %v9596_v52  ;;  %v9604_v0 = vpop.permute.xlu1 %9603 }
 0x3c1   : > { %v3554_v29 = vsel %vm3438_vm14, %v3522_v35, %v9600_v10  ;;  %v2676_v27 = vrot.slane %v2571_v16, 1  ;;  %v3458_v25 = vsel %vm3438_vm14, %v3425_v56, %v9601_v22  ;;  %v2845_v23 = vrot.slane %v12624_v21, 2 }
 0x3c2   : > { %3796 = vmatprep.mubr.f32.mxu1 %v3554_v29  ;;  %9698 = vrot.lane.b32.xlu0 %v9697_v62, %s14557_s18  ;;  %v12645_v2 = vsel %vm807_vm1, %v2673_v17, %v2674_v6  ;;  %v9707_v61 = vpack.i.bf16 %v12531_v48, %v12586_v45  ;;  %v9712_v52 = vpack.i.bf16 %v12519_v43, %v12624_v21  ;;  %v9606_v22 = vunpack.i.h.bf16 %v9604_v0 }
 0x3c3   : > { %3797 = vmatmul.mubr.f32.gmra.mrb[70].mxu1 %v3458_v25  ;;  %v9702_v39 = vpack.i.bf16 %v12560_v7, %v12645_v2  ;;  %v12650_v51 = vsel %vm984_vm2, %v2844_v60, %v2845_v23  ;;  %v12653_v19 = vsel %vm984_vm2, %v2845_v23, %v2847_v38  ;;  %v12663_v16 = vsel %vm807_vm1, %v2674_v6, %v2676_v27 }
 0x3c4   : > { %8636 = vmatprep.mubr.msk.f32.mxu0 %vm1980_vm11, %v12650_v51  ;;  %v9717_v49 = vpack.i.bf16 %v12557_v53, %v12663_v16  ;;  %v9722_v38 = vpack.i.bf16 %v12577_v9, %v12650_v51  ;;  %v9605_v10 = vunpack.i.l.bf16 %v9604_v0 }
 0x3c5   : > { %8637 = vmatmul.mubr.msk.f32.gmra.mrb[26].mxu0 %vm1980_vm11, %v12653_v19  ;;  %9703 = vrot.lane.b32.xlu1 %v9702_v39, %s10211_s14  ;;  %v3393_v39 = vsel %vm1980_vm11, %v12261_v26, %v9606_v22 }
 0x3c6   : > { %9708 = vrot.lane.b32.xlu0 %v9707_v61, %s10208_s27  ;;  %v3491_v23 = vsel %vm1980_vm11, %v12367_v18, %v9605_v10 }
 0x3c9   : > { %9713 = vrot.lane.b32.xlu1 %v9712_v52, %s14557_s18 }
 0x3ca   : > { %9718 = vrot.lane.b32.xlu0 %v9717_v49, %s10211_s14 }
 0x3cd   : > { %9723 = vrot.lane.b32.xlu1 %v9722_v38, %s10208_s27  ;;  %v12692_v38 = vld [vmem:[%s14503_s4] ss:$0 sm:$0xff] }
 0x3d1   : > { %v8588_v5 = vpop.f32.mrb[30].mxu1 }
 0x3d2   : > { %v2342_v17 = vadd.f32 %v12416_v31, %v8588_v5  ;;  %v2336_v6 = vpop.f32.mrb[31].mxu1 }
 0x3d3   : > { %v2337_v43 = vadd.f32 %v12416_v31, %v2336_v6 }
 0x3d4   : > { %v2376_v35 = vmax.f32 %v2342_v17, 0.0  ;;  %v9609_v62 = vpop.permute.xlu0 %9608 }
 0x3d5   : > { %v2375_v58 = vmax.f32 %v2337_v43, 0.0  ;;  %v9610_v29 = vunpack.i.l.bf16 %v9609_v62  ;;  %v9611_v27 = vunpack.i.h.bf16 %v9609_v62 }
 0x3d6   : > { %v2492_v60 = vrot.slane %v2376_v35, 7 }
 0x3d7   : > { %v2491_v56 = vrot.slane %v2375_v58, 7  ;;  %v9614_v25 = vpop.permute.xlu1 %9613  ;;  %v3523_v18 = vsel %vm3405_vm13, %v3491_v23, %v9610_v29 }
 0x3d8   : > { %v12682_v61 = vsel %vm641_vm0, %v2492_v60, 0.0  ;;  %v12684_v52 = vpop.f32.mrb[14].mxu0  ;;  %v9616_v31 = vunpack.i.h.bf16 %v9614_v25  ;;  %v9615_v49 = vunpack.i.l.bf16 %v9614_v25  ;;  %v9619_v22 = vpop.permute.xlu0 %9618 }
 0x3d9   : > { %14606 = vst [vmem:[#allocation37_spill] sm:$0xff] %v12684_v52  ;;  %v3046_v0 = vrot.slane %v12682_v61, 1  ;;  %v3083_v26 = vrot.slane %v12682_v61, 2  ;;  %v12698_v5 = vsel %vm641_vm0, %v2491_v56, %v2492_v60  ;;  %v12701_v17 = vsel %vm641_vm0, 0.0, %v2491_v56  ;;  %v12703_v6 = vpop.f32.mrb[15].mxu0  ;;  %v3703_v62 = vpop.f32.mrb[32].mxu1 }
 0x3da   : > { %14607 = vst [vmem:[#allocation38_spill] sm:$0xff] %v12703_v6  ;;  %v3043_v10 = vrot.slane %v12701_v17, 1  ;;  %v3044_v43 = vrot.slane %v12698_v5, 1  ;;  %v3080_v35 = vrot.slane %v12701_v17, 2  ;;  %v9621_v58 = vunpack.i.h.bf16 %v9619_v22  ;;  %v3705_v60 = vpop.f32.mrb[33].mxu1 }
 0x3db   : > { %v9620_v29 = vunpack.i.l.bf16 %v9619_v22  ;;  %v3704_v25 = vadd.f32 %v12692_v38, %v3703_v62  ;;  %v9624_v23 = vpop.permute.xlu1 %9623  ;;  %v3555_v56 = vsel %vm3438_vm14, %v3523_v18, %v9615_v49  ;;  %v3426_v61 = vsel %vm3405_vm13, %v3393_v39, %v9611_v27 }
 0x3dc   : > { %v9626_v53 = vunpack.i.h.bf16 %v9624_v23  ;;  %v9625_v52 = vunpack.i.l.bf16 %v9624_v23  ;;  %3801 = vmatprep.mubr.f32.mxu1 %v3555_v56  ;;  %v3459_v7 = vsel %vm3438_vm14, %v3426_v61, %v9616_v31  ;;  %v9727_v6 = vpack.i.bf16 %v12583_v3, %v12701_v17  ;;  %v9629_v22 = vpop.permute.xlu0 %9628 }
 0x3dd   : > { %v3929_v28 = vadd.f32 %v12151_v33, %v3704_v25  ;;  %3802 = vmatmul.mubr.f32.gmra.mrb[72].mxu1 %v3459_v7  ;;  %v3708_v54 = vpop.f32.mrb[34].mxu1  ;;  %v3081_v62 = vrot.slane %v12698_v5, 2  ;;  %v3492_v49 = vsel %vm1980_vm11, %v12390_v57, %v9620_v29  ;;  %v12720_v27 = vsel %vm807_vm1, %v3043_v10, %v3044_v43 }
 0x3de   : > { %v9631_v39 = vunpack.i.h.bf16 %v9629_v22  ;;  %v9630_v18 = vunpack.i.l.bf16 %v9629_v22  ;;  %9728 = vrot.lane.b32.xlu0 %v9727_v6, %s14557_s18  ;;  %v3709_v3 = vadd.f32 %v12692_v38, %v3708_v54  ;;  %v3710_v31 = vpop.f32.mrb[35].mxu1  ;;  %v3524_v33 = vsel %vm3405_vm13, %v3492_v49, %v9625_v52  ;;  %v14609_v22 = vld [vmem:[#allocation30_spill] sm:$0xff] }
 0x3df   : > { %v4087_v7 = vmax.f32 %v3929_v28, 0.0  ;;  %v3082_v25 = vsel %vm984_vm2, %v3080_v35, %v3081_v62  ;;  %v3084_v60 = vsel %vm984_vm2, %v3081_v62, %v3083_v26  ;;  %v9732_v57 = vpack.i.bf16 %v12627_v63, %v12720_v27  ;;  %v14610_v49 = vld [vmem:[#allocation26_spill] sm:$0xff] }
 0x3e0   : > { %v9737_v10 = vpack.i.bf16 %v12596_v24, %v12653_v19  ;;  %v3934_v29 = vadd.f32 %v12145_v55, %v3709_v3  ;;  %8639 = vmatprep.mubr.msk.f32.mxu0 %vm1980_vm11, %v3082_v25  ;;  %v3556_v28 = vsel %vm3438_vm14, %v3524_v33, %v9630_v18  ;;  %v3394_v54 = vsel %vm1980_vm11, %v12258_v42, %v9621_v58 }
 0x3e1   : > { %4119 = vst.msk [vmem:[%s12735_s24] sm:$0xff] %vm1980_vm11, %v4087_v7  ;;  %8640 = vmatmul.mubr.msk.f32.gmra.mrb[28].mxu0 %vm1980_vm11, %v3084_v60  ;;  %9733 = vrot.lane.b32.xlu1 %v9732_v57, %s10211_s14  ;;  %v10212_v52 = vmov 1983009808   ;;  %v4219_v26 = vlaneseq  ;;  %v3427_v35 = vsel %vm3405_vm13, %v3394_v54, %v9626_v53  ;;  %v9742_v23 = vpack.i.bf16 %v12586_v45, %v12698_v5 }
 0x3e2   : > { %v4217_v55 = vunpack.c.l.s4 %v10212_v52  ;;  %v4088_v6 = vmax.f32 %v3934_v29, 0.0  ;;  %3806 = vmatprep.mubr.f32.mxu1 %v3556_v28  ;;  %9738 = vrot.lane.b32.xlu0 %v9737_v10, %s10208_s27  ;;  %v12749_v56 = vsel %vm807_vm1, %v3044_v43, %v3046_v0  ;;  %v3460_v61 = vsel %vm3438_vm14, %v3427_v35, %v9631_v39  ;;  %v14612_v35 = vld [vmem:[#allocation29_spill] sm:$0xff] }
 0x3e3   : > { %14608 = vst [vmem:[#allocation39_spill] sm:$0xff] %v12749_v56  ;;  %8642 = vmatprep.mubr.msk.f32.mxu0 %vm1980_vm11, %v10517_v12  ;;  %3807 = vmatmul.mubr.f32.gmra.mrb[74].mxu1 %v3460_v61  ;;  %v3713_v42 = vpop.f32.mrb[36].mxu1  ;;  %v9747_v53 = vpack.i.bf16 %v12624_v21, %v12749_v56  ;;  %v4220_v43 = vshrl.u32 %v4219_v26, 7  ;;  %v9752_v12 = vpack.i.bf16 %v12645_v2, %v3082_v25  ;;  %v4151_v10 = vsel %vm1980_vm11, %v4087_v7, -inf  ;;  %v14611_v25 = vld [vmem:[#allocation28_spill] sm:$0xff] }
 0x3e4   : > { %4120 = vst.msk [vmem:[%s12735_s24 + $0x8] sm:$0xff] %vm1980_vm11, %v4088_v6  ;;  %v3714_v58 = vadd.f32 %v12692_v38, %v3713_v42  ;;  %v3715_v45 = vpop.f32.mrb[37].mxu1  ;;  %v4218_v0 = vunpack.c.0.s8 %v4217_v55  ;;  %v9757_v39 = vpack.i.bf16 %v12650_v51, %v14610_v49  ;;  %v9762_v51 = vpack.i.bf16 %v12701_v17, %v14611_v25 }
 0x3e5   : > { %9743 = vrot.lane.b32.xlu1 %v9742_v23, %s14557_s18  ;;  %8643 = vmatmul.mubr.msk.f32.gmra.mrb[30].mxu0 %vm1980_vm11, %v14609_v22  ;;  %v9767_v29 = vpack.i.bf16 %v12663_v16, %v3084_v60  ;;  %v9772_v26 = vpack.i.bf16 %v12653_v19, %v10481_v1  ;;  %v4154_v17 = vsel %vm1980_vm11, %v4088_v6, -inf  ;;  %v9777_v60 = vpack.i.bf16 %v12698_v5, %v14612_v35  ;;  %v14613_v5 = vld [vmem:[#allocation27_spill] sm:$0xff] }
 0x3e6   : > { %9748 = vrot.lane.b32.xlu0 %v9747_v53, %s10211_s14  ;;  %v3939_v62 = vadd.f32 %v12243_v36, %v3714_v58  ;;  %v12768_v31 = vsub.s32 %v4218_v0, %v4220_v43  ;;  %v12793_v58 = vpop.permute.xlu1 %9633  ;;  %v14614_v6 = vrot.slane %v14613_v5, 1  ;;  %v14615_v0 = vrot.slane %v14610_v49, 1 }
 0x3e8   : > { %v4089_v18 = vmax.f32 %v3939_v62, 0.0  ;;  %v12802_v43 = vsel %vm807_vm1, %v14615_v0, %v14614_v6 }
 0x3e9   : > { %9753 = vrot.lane.b32.xlu1 %v9752_v12, %s10208_s27  ;;  %v3718_v3 = vpop.f32.mrb[38].mxu1 }
 0x3ea   : > { %9758 = vrot.lane.b32.xlu0 %v9757_v39, %s14557_s18  ;;  %v3719_v33 = vadd.f32 %v12692_v38, %v3718_v3  ;;  %v3720_v57 = vpop.f32.mrb[39].mxu1  ;;  %4121 = vst.msk [vmem:[%s12735_s24 + $0x10] sm:$0xff] %vm1980_vm11, %v4089_v18  ;;  %v4152_v36 = vsel %vm1980_vm11, %v4089_v18, -inf  ;;  %v14616_v18 = vrot.slane %v14613_v5, 2  ;;  %v14617_v3 = vrot.slane %v14610_v49, 2 }
 0x3eb   : > { %v4153_v28 = vmax.f32 %v4151_v10, %v4152_v36 }
 0x3ec   : > { %v3944_v54 = vadd.f32 %v12236_v14, %v3719_v33  ;;  %v12812_v33 = vsel %vm984_vm2, %v14617_v3, %v14616_v18 }
 0x3ed   : > { %9763 = vrot.lane.b32.xlu1 %v9762_v51, %s10211_s14  ;;  %v4215_v52 = vcombine.high %v4153_v28, %v4153_v28  ;;  %v4222_v55 = vrot.slane %v4153_v28, %v12768_v31 }
 0x3ee   : > { %v4090_v7 = vmax.f32 %v3944_v54, 0.0  ;;  %9768 = vrot.lane.b32.xlu0 %v9767_v29, %s10208_s27 }
 0x3ef   : > { %v4229_v23 = vrot.slane %v4215_v52, %v12768_v31  ;;  %v4230_v14 = vcombine.high %v4222_v55, %v4222_v55  ;;  %v4552_v61 = vsel %vm4551_vm15, %v4222_v55, -inf }
 0x3f0   : > { %4122 = vst.msk [vmem:[%s12735_s24 + $0x18] sm:$0xff] %vm1980_vm11, %v4090_v7  ;;  %v4155_v42 = vsel %vm1980_vm11, %v4090_v7, -inf  ;;  %v3723_v53 = vpop.f32.mrb[40].mxu1  ;;  %v4553_v45 = vrot.slane %v4552_v61, 4 }
 0x3f1   : > { %v4156_v22 = vmax.f32 %v4154_v17, %v4155_v42  ;;  %v3724_v1 = vadd.f32 %v12692_v38, %v3723_v53  ;;  %9773 = vrot.lane.b32.xlu1 %v9772_v26, %s14557_s18  ;;  %v3725_v19 = vpop.f32.mrb[41].mxu1  ;;  %v4231_v12 = vcombine.high %v4229_v23, %v4229_v23  ;;  %v4559_v62 = vsel %vm4551_vm15, %v4230_v14, -inf }
 0x3f2   : > { %v4566_v39 = vsel %vm4551_vm15, %v4229_v23, -inf  ;;  %9778 = vrot.lane.b32.xlu0 %v9777_v60, %s10211_s14  ;;  %v4554_v57 = vmax.f32 %v4552_v61, %v4553_v45  ;;  %v4560_v10 = vrot.slane %v4559_v62, 4 }
 0x3f3   : > { %v4567_v36 = vrot.slane %v4566_v39, 4  ;;  %v4232_v25 = vcombine.high %v4156_v22, %v4156_v22  ;;  %v4573_v29 = vsel %vm4551_vm15, %v4231_v12, -inf  ;;  %v4239_v28 = vrot.slane %v4156_v22, %v12768_v31 }
 0x3f4   : > { %v12818_v54 = vadd.f32 %v12336_v37, %v3724_v1  ;;  %v4555_v52 = vrot.slane %v4554_v57, 2  ;;  %v4561_v55 = vmax.f32 %v4559_v62, %v4560_v10  ;;  %v4574_v26 = vrot.slane %v4573_v29, 4 }
 0x3f5   : > { %v4568_v7 = vmax.f32 %v4566_v39, %v4567_v36  ;;  %v3728_v17 = vpop.f32.mrb[42].mxu1  ;;  %v4246_v35 = vrot.slane %v4232_v25, %v12768_v31  ;;  %v4247_v60 = vcombine.high %v4239_v28, %v4239_v28  ;;  %v4580_v23 = vsel %vm4551_vm15, %v4239_v28, -inf  ;;  %v12823_v22 = vpop.permute.xlu0 %9638 }
 0x3f6   : > { %v14552_v14 = vmax.f32 %v12818_v54, 0.0  ;;  %v3730_v61 = vpop.f32.mrb[43].mxu1  ;;  %v4556_v42 = vmax.f32 %v4554_v57, %v4555_v52  ;;  %v4562_v53 = vrot.slane %v4561_v55, 2  ;;  %v4575_v45 = vmax.f32 %v4573_v29, %v4574_v26 }
 0x3f7   : > { %v4569_v37 = vrot.slane %v4568_v7, 2  ;;  %v4248_v1 = vcombine.high %v4246_v35, %v4246_v35  ;;  %v4581_v19 = vrot.slane %v4580_v23, 4  ;;  %v4587_v5 = vsel %vm4551_vm15, %v4247_v60, -inf  ;;  %v12831_v18 = vpop.permute.xlu1 %9643 }
 0x3f8   : > { %v4594_v6 = vsel %vm4551_vm15, %v4246_v35, -inf  ;;  %4123 = vst.msk [vmem:[%s12735_s24 + $0x20] sm:$0xff] %vm1980_vm11, %v14552_v14  ;;  %v4557_v0 = vrot.slane %v4556_v42, 1  ;;  %v4563_v12 = vmax.f32 %v4561_v55, %v4562_v53  ;;  %v4576_v39 = vrot.slane %v4575_v45, 2 }
 0x3f9   : > { %v4570_v62 = vmax.f32 %v4568_v7, %v4569_v37  ;;  %v4582_v3 = vmax.f32 %v4580_v23, %v4581_v19  ;;  %v4588_v57 = vrot.slane %v4587_v5, 4  ;;  %v4595_v10 = vrot.slane %v4594_v6, 4  ;;  %v9649_v51 = vpop.permute.xlu0 %9648 }
 0x3fa   : > { %v4601_v36 = vsel %vm4551_vm15, %v4248_v1, -inf  ;;  %v12834_v25 = vpop.f32.mrb[16].mxu0  ;;  %v9635_v29 = vunpack.i.l.bf16 %v12793_v58  ;;  %v4564_v28 = vrot.slane %v4563_v12, 1  ;;  %v4577_v26 = vmax.f32 %v4575_v45, %v4576_v39 }
 0x3fb   : > { %14618 = vst [vmem:[#allocation30_spill] sm:$0xff] %v12834_v25  ;;  %v4571_v52 = vrot.slane %v4570_v62, 1  ;;  %v12837_v35 = vpop.f32.mrb[17].mxu0  ;;  %v4583_v55 = vrot.slane %v4582_v3, 2  ;;  %v4589_v7 = vmax.f32 %v4587_v5, %v4588_v57  ;;  %v4596_v60 = vmax.f32 %v4594_v6, %v4595_v10  ;;  %v9654_v39 = vpop.permute.xlu1 %9653 }
 0x3fc   : > { %v4602_v61 = vrot.slane %v4601_v36, 4  ;;  %v3733_v53 = vpop.f32.mrb[44].mxu1  ;;  %v4558_v37 = vmax.f32 %v4556_v42, %v4557_v0  ;;  %v4565_v23 = vmax.f32 %v4563_v12, %v4564_v28  ;;  %v4578_v14 = vrot.slane %v4577_v26, 1 }
 0x3fd   : > { %v4572_v19 = vmax.f32 %v4570_v62, %v4571_v52  ;;  %v3735_v1 = vpop.f32.mrb[45].mxu1  ;;  %v4584_v49 = vmax.f32 %v4582_v3, %v4583_v55  ;;  %v4590_v25 = vrot.slane %v4589_v7, 2  ;;  %v4597_v21 = vrot.slane %v4596_v60, 2 }
 0x3fe   : > { %v4603_v56 = vmax.f32 %v4601_v36, %v4602_v61  ;;  %v4579_v63 = vmax.f32 %v4577_v26, %v4578_v14  ;;  %v5102_v45 = vsel %vm5101_vm3, %v4565_v23, %v4558_v37  ;;  %v3493_v5 = vsel %vm1980_vm11, %v12443_v44, %v9635_v29 }
 0x3ff   : > { %v14619_v6 = vunpack.i.h.bf16 %v12793_v58  ;;  %v5104_v0 = vsel %vm5103_vm4, %v4572_v19, %v5102_v45  ;;  %v4585_v12 = vrot.slane %v4584_v49, 1  ;;  %v4591_v62 = vmax.f32 %v4589_v7, %v4590_v25  ;;  %v9664_v19 = vpop.permute.xlu1 %9663 }
 0x400   : > { %v4598_v3 = vmax.f32 %v4596_v60, %v4597_v21  ;;  %v4604_v57 = vrot.slane %v4603_v56, 2  ;;  %v5106_v14 = vsel %vm5105_vm5, %v4579_v63, %v5104_v0  ;;  %v9640_v10 = vunpack.i.l.bf16 %v12823_v22  ;;  %v9659_v63 = vpop.permute.xlu0 %9658 }
 0x401   : > { %v3395_v42 = vsel %vm1980_vm11, %v12354_v47, %v14619_v6  ;;  %v3729_v36 = vadd.f32 %v12692_v38, %v3728_v17  ;;  %v3738_v44 = vpop.f32.mrb[46].mxu1  ;;  %v4586_v58 = vmax.f32 %v4584_v49, %v4585_v12  ;;  %v4592_v29 = vrot.slane %v4591_v62, 1 }
 0x402   : > { %v9641_v47 = vunpack.i.h.bf16 %v12823_v22  ;;  %v9645_v28 = vunpack.i.l.bf16 %v12831_v18  ;;  %v3740_v52 = vpop.f32.mrb[47].mxu1  ;;  %v4599_v26 = vrot.slane %v4598_v3, 1  ;;  %v4605_v25 = vmax.f32 %v4603_v56, %v4604_v57 }
 0x403   : > { %v3954_v21 = vadd.f32 %v12331_v41, %v3729_v36  ;;  %v9646_v55 = vunpack.i.h.bf16 %v12831_v18  ;;  %v4593_v7 = vmax.f32 %v4591_v62, %v4592_v29  ;;  %v5108_v17 = vsel %vm5107_vm6, %v4586_v58, %v5106_v14  ;;  %v5016_v29 = vld [vmem:[#allocation5 + $0x80] sm:$0xff]  ;;  %v5017_v52 = vld [vmem:[#allocation5 + $0x88] sm:$0xff] }
 0x404   : > { %v9651_v60 = vunpack.i.h.bf16 %v9649_v51  ;;  %v9650_v61 = vunpack.i.l.bf16 %v9649_v51  ;;  %v4606_v49 = vrot.slane %v4605_v25, 1  ;;  %v9655_v23 = vunpack.i.l.bf16 %v9654_v39 }
 0x405   : > { %v4092_v37 = vmax.f32 %v3954_v21, 0.0  ;;  %v3525_v22 = vsel %vm3405_vm13, %v3493_v5, %v9640_v10  ;;  %v9656_v1 = vunpack.i.h.bf16 %v9654_v39  ;;  %v9660_v45 = vunpack.i.l.bf16 %v9659_v63 }
 0x406   : > { %v3557_v56 = vsel %vm3438_vm14, %v3525_v22, %v9645_v28  ;;  %v3734_v41 = vadd.f32 %v12692_v38, %v3733_v53  ;;  %v4600_v18 = vmax.f32 %v4598_v3, %v4599_v26  ;;  %v4607_v6 = vmax.f32 %v4605_v25, %v4606_v49  ;;  %v5000_v26 = vld [vmem:[#allocation5] sm:$0xff]  ;;  %v5001_v25 = vld [vmem:[#allocation5 + $0x8] sm:$0xff] }
 0x407   : > { %4124 = vst.msk [vmem:[%s12735_s24 + $0x28] sm:$0xff] %vm1980_vm11, %v4092_v37  ;;  %3811 = vmatprep.mubr.f32.mxu1 %v3557_v56  ;;  %v9661_v0 = vunpack.i.h.bf16 %v9659_v63  ;;  %v3428_v51 = vsel %vm3405_vm13, %v3395_v42, %v9641_v47  ;;  %v9665_v5 = vunpack.i.l.bf16 %v9664_v19  ;;  %v3494_v39 = vsel %vm1980_vm11, %v12462_v11, %v9650_v61 }
 0x408   : > { %v3959_v12 = vadd.f32 %v12409_v46, %v3734_v41  ;;  %v3461_v62 = vsel %vm3438_vm14, %v3428_v51, %v9646_v55  ;;  %v3743_v57 = vpop.f32.mrb[48].mxu1  ;;  %v3526_v53 = vsel %vm3405_vm13, %v3494_v39, %v9655_v23  ;;  %v3396_v3 = vsel %vm1980_vm11, %v12351_v30, %v9651_v60 }
 0x409   : > { %3812 = vmatmul.mubr.f32.gmra.mrb[76].mxu1 %v3461_v62  ;;  %v3739_v14 = vadd.f32 %v12692_v38, %v3738_v44  ;;  %v3744_v10 = vadd.f32 %v12692_v38, %v3743_v57  ;;  %v3745_v42 = vpop.f32.mrb[49].mxu1  ;;  %v3558_v36 = vsel %vm3438_vm14, %v3526_v53, %v9660_v45  ;;  %v3429_v58 = vsel %vm3405_vm13, %v3396_v3, %v9656_v1 }
 0x40a   : > { %v4093_v46 = vmax.f32 %v3959_v12, 0.0  ;;  %v5110_v11 = vsel %vm5109_vm7, %v4593_v7, %v5108_v17  ;;  %3816 = vmatprep.mubr.f32.mxu1 %v3558_v36  ;;  %v3462_v47 = vsel %vm3438_vm14, %v3429_v58, %v9661_v0  ;;  %v14620_v21 = vmax.f32 %v12818_v54, 0.0 }
 0x40b   : > { %v3964_v28 = vadd.f32 %v12402_v20, %v3739_v14  ;;  %v12876_v30 = vadd.f32 %v12480_v4, %v3744_v10  ;;  %v5112_v44 = vsel %vm5111_vm8, %v4600_v18, %v5110_v11  ;;  %v9666_v7 = vunpack.i.h.bf16 %v9664_v19 }
 0x40c   : > { %v4157_v55 = vsel %vm1980_vm11, %v14620_v21, -inf  ;;  %4125 = vst.msk [vmem:[%s12735_s24 + $0x30] sm:$0xff] %vm1980_vm11, %v4093_v46  ;;  %v4158_v63 = vsel %vm1980_vm11, %v4093_v46, -inf  ;;  %v5114_v20 = vsel %vm5113_vm9, %v4607_v6, %v5112_v44  ;;  %v4160_v54 = vsel %vm1980_vm11, %v4092_v37, -inf }
 0x40d   : > { %v4159_v4 = vmax.f32 %v4157_v55, %v4158_v63  ;;  %3817 = vmatmul.mubr.f32.gmra.mrb[78].mxu1 %v3462_v47  ;;  %v4094_v17 = vmax.f32 %v3964_v28, 0.0  ;;  %v4095_v60 = vmax.f32 %v12876_v30, 0.0  ;;  %v3748_v61 = vpop.f32.mrb[50].mxu1  ;;  %v5164_v49 = vrot.slane %v5114_v20, 7 }
 0x40e   : > { %v3749_v23 = vadd.f32 %v12692_v38, %v3748_v61  ;;  %v3750_v22 = vpop.f32.mrb[51].mxu1  ;;  %v8811_v1 = vpack.c.bf16 %v5017_v52, %v5016_v29  ;;  %v8813_v56 = vpack.c.bf16 %v5001_v25, %v5000_v26  ;;  %v12899_v18 = vsel %vm1980_vm11, %v12510_v13, %v9665_v5 }
 0x40f   : > { %v4249_v45 = vcombine.high %v4159_v4, %v4159_v4  ;;  %v4256_v19 = vrot.slane %v4159_v4, %v12768_v31  ;;  %4126 = vst.msk [vmem:[%s12735_s24 + $0x38] sm:$0xff] %vm1980_vm11, %v4094_v17  ;;  %v4161_v41 = vsel %vm1980_vm11, %v4094_v17, -inf  ;;  %4127 = vst.msk [vmem:[%s12735_s24 + $0x40] sm:$0xff] %vm1980_vm11, %v4095_v60  ;;  %v12905_v0 = vsel %vm641_vm0, 0.0, %v5164_v49 }
 0x410   : > { %v4162_v37 = vmax.f32 %v4160_v54, %v4161_v41  ;;  %v12902_v6 = vadd.f32 %v12474_v59, %v3749_v23  ;;  %v12909_v51 = vsel %vm1980_vm11, %v12432_v8, %v9666_v7  ;;  %8812 = vmatprep.subr.bf16.mxu0 %v8811_v1  ;;  %v12914_v13 = vsel %vm641_vm0, %v5164_v49, 0.0 }
 0x411   : > { %v4263_v12 = vrot.slane %v4249_v45, %v12768_v31  ;;  %v4264_v62 = vcombine.high %v4256_v19, %v4256_v19  ;;  %v4608_v39 = vsel %vm4551_vm15, %v4256_v19, -inf  ;;  %8814 = vmatpush3.bf16.msra.mxu0 %v8813_v56  ;;  %v5257_v10 = vrot.slane %v12905_v0, 2 }
 0x412   : > { %v4609_v59 = vrot.slane %v4608_v39, 4  ;;  %v4266_v5 = vcombine.high %v4162_v37, %v4162_v37  ;;  %v4273_v57 = vrot.slane %v4162_v37, %v12768_v31  ;;  %v4096_v53 = vmax.f32 %v12902_v6, 0.0 }
 0x413   : > { %v4265_v3 = vcombine.high %v4263_v12, %v4263_v12  ;;  %v4615_v8 = vsel %vm4551_vm15, %v4264_v62, -inf  ;;  %v4622_v14 = vsel %vm4551_vm15, %v4263_v12, -inf  ;;  %v5258_v44 = vrot.slane %v12914_v13, 2 }
 0x414   : > { %v4610_v42 = vmax.f32 %v4608_v39, %v4609_v59  ;;  %v4616_v46 = vrot.slane %v4615_v8, 4  ;;  %v4623_v36 = vrot.slane %v4622_v14, 4  ;;  %v4280_v58 = vrot.slane %v4266_v5, %v12768_v31  ;;  %4128 = vst.msk [vmem:[%s12735_s24 + $0x48] sm:$0xff] %vm1980_vm11, %v4096_v53  ;;  %v12926_v11 = vpop.f32.mrb[52].mxu1 }
 0x415   : > { %v4629_v29 = vsel %vm4551_vm15, %v4265_v3, -inf  ;;  %v4281_v47 = vcombine.high %v4273_v57, %v4273_v57  ;;  %v4636_v28 = vsel %vm4551_vm15, %v4273_v57, -inf  ;;  %v3755_v52 = vpop.f32.mrb[53].mxu1  ;;  %v12933_v23 = vpop.permute.xlu0 %9668  ;;  %v3754_v30 = vadd.f32 %v12692_v38, %v12926_v11 }
 0x416   : > { %v4611_v26 = vrot.slane %v4610_v42, 2  ;;  %v4617_v25 = vmax.f32 %v4615_v8, %v4616_v46  ;;  %v4624_v21 = vmax.f32 %v4622_v14, %v4623_v36  ;;  %v4630_v55 = vrot.slane %v4629_v29, 4 }
 0x417   : > { %v4282_v63 = vcombine.high %v4280_v58, %v4280_v58  ;;  %v4637_v7 = vrot.slane %v4636_v28, 4  ;;  %v4643_v20 = vsel %vm4551_vm15, %v4281_v47, -inf  ;;  %v4650_v4 = vsel %vm4551_vm15, %v4280_v58, -inf  ;;  %v12938_v39 = vpop.permute.xlu1 %9673 }
 0x418   : > { %v4612_v17 = vmax.f32 %v4610_v42, %v4611_v26  ;;  %v4618_v61 = vrot.slane %v4617_v25, 2  ;;  %v4625_v49 = vrot.slane %v4624_v21, 2  ;;  %v4631_v54 = vmax.f32 %v4629_v29, %v4630_v55 }
 0x419   : > { %v4638_v22 = vmax.f32 %v4636_v28, %v4637_v7  ;;  %v4644_v1 = vrot.slane %v4643_v20, 4  ;;  %v4651_v56 = vrot.slane %v4650_v4, 4  ;;  %v4657_v45 = vsel %vm4551_vm15, %v4282_v63, -inf  ;;  %v9679_v7 = vpop.permute.xlu0 %9678 }
 0x41a   : > { %v4613_v19 = vrot.slane %v4612_v17, 1  ;;  %v4619_v41 = vmax.f32 %v4617_v25, %v4618_v61  ;;  %v4626_v37 = vmax.f32 %v4624_v21, %v4625_v49  ;;  %v4632_v12 = vrot.slane %v4631_v54, 2  ;;  %v12936_v62 = vpop.f32.mrb[18].mxu0  ;;  %v3758_v14 = vpop.f32.mrb[54].mxu1 }
 0x41b   : > { %v4639_v59 = vrot.slane %v4638_v22, 2  ;;  %v4645_v5 = vmax.f32 %v4643_v20, %v4644_v1  ;;  %v4652_v57 = vmax.f32 %v4650_v4, %v4651_v56  ;;  %v4658_v3 = vrot.slane %v4657_v45, 4  ;;  %v12940_v8 = vpop.f32.mrb[19].mxu0  ;;  %v3760_v29 = vpop.f32.mrb[55].mxu1 }
 0x41c   : > { %v4614_v42 = vmax.f32 %v4612_v17, %v4613_v19  ;;  %v4620_v46 = vrot.slane %v4619_v41, 1  ;;  %v4627_v36 = vrot.slane %v4626_v37, 1  ;;  %v4633_v58 = vmax.f32 %v4631_v54, %v4632_v12  ;;  %v9684_v19 = vpop.permute.xlu1 %9683 }
 0x41d   : > { %v4640_v47 = vmax.f32 %v4638_v22, %v4639_v59  ;;  %v4646_v28 = vrot.slane %v4645_v5, 2  ;;  %v4653_v52 = vrot.slane %v4652_v57, 2  ;;  %v4659_v26 = vmax.f32 %v4657_v45, %v4658_v3 }
 0x41e   : > { %v4621_v25 = vmax.f32 %v4619_v41, %v4620_v46  ;;  %v4628_v21 = vmax.f32 %v4626_v37, %v4627_v36  ;;  %v4634_v55 = vrot.slane %v4633_v58, 1  ;;  %v12943_v63 = vsel %vm984_vm2, %v5257_v10, %v5258_v44 }
 0x41f   : > { %v4641_v20 = vrot.slane %v4640_v47, 1  ;;  %v4647_v4 = vmax.f32 %v4645_v5, %v4646_v28  ;;  %v4654_v61 = vmax.f32 %v4652_v57, %v4653_v52  ;;  %v4660_v49 = vrot.slane %v4659_v26, 2 }
 0x420   : > { %v4635_v17 = vmax.f32 %v4633_v58, %v4634_v55  ;;  %v5115_v1 = vsel %vm5101_vm3, %v4621_v25, %v4614_v42  ;;  %v4163_v54 = vsel %vm1980_vm11, %v4095_v60, -inf  ;;  %v9782_v22 = vpack.i.bf16 %v12802_v43, %v12943_v63  ;;  %v9689_v58 = vpop.permute.xlu0 %9688 }
 0x421   : > { %v5116_v56 = vsel %vm5103_vm4, %v4628_v21, %v5115_v1  ;;  %v4642_v45 = vmax.f32 %v4640_v47, %v4641_v20  ;;  %v4648_v10 = vrot.slane %v4647_v4, 1  ;;  %v4655_v44 = vrot.slane %v4654_v61, 1  ;;  %v12972_v21 = vpop.permute.xlu1 %9693 }
 0x422   : > { %v4661_v41 = vmax.f32 %v4659_v26, %v4660_v49  ;;  %v5117_v37 = vsel %vm5105_vm5, %v4635_v17, %v5116_v56  ;;  %9783 = vrot.lane.b32.xlu1 %v9782_v22, %s10208_s27  ;;  %v9670_v12 = vunpack.i.l.bf16 %v12933_v23  ;;  %v4166_v5 = vsel %vm1980_vm11, %v4096_v53, -inf }
 0x423   : > { %v4649_v60 = vmax.f32 %v4647_v4, %v4648_v10  ;;  %v5118_v59 = vsel %vm5107_vm6, %v4642_v45, %v5117_v37  ;;  %v9671_v57 = vunpack.i.h.bf16 %v12933_v23  ;;  %v3979_v42 = vadd.f32 %v12547_v50, %v3754_v30 }
 0x424   : > { %v4662_v3 = vrot.slane %v4661_v41, 1  ;;  %v9676_v46 = vunpack.i.h.bf16 %v12938_v39  ;;  %v9675_v36 = vunpack.i.l.bf16 %v12938_v39  ;;  %v4656_v29 = vmax.f32 %v4654_v61, %v4655_v44 }
 0x425   : > { %v9681_v11 = vunpack.i.h.bf16 %v9679_v7  ;;  %v9680_v47 = vunpack.i.l.bf16 %v9679_v7  ;;  %v3759_v28 = vadd.f32 %v12692_v38, %v3758_v14  ;;  %v4097_v52 = vmax.f32 %v3979_v42, 0.0 }
 0x426   : > { %v9686_v6 = vunpack.i.h.bf16 %v9684_v19  ;;  %v9685_v26 = vunpack.i.l.bf16 %v9684_v19  ;;  %v3527_v53 = vsel %vm3405_vm13, %v12899_v18, %v9670_v12  ;;  %v9690_v25 = vunpack.i.l.bf16 %v9689_v58 }
 0x427   : > { %v3984_v23 = vadd.f32 %v12541_v15, %v3759_v28  ;;  %v3559_v50 = vsel %vm3438_vm14, %v3527_v53, %v9675_v36  ;;  %v3430_v39 = vsel %vm3405_vm13, %v12909_v51, %v9671_v57  ;;  %v4663_v55 = vmax.f32 %v4661_v41, %v4662_v3  ;;  %4129 = vst.msk [vmem:[%s12735_s24 + $0x50] sm:$0xff] %vm1980_vm11, %v4097_v52 }
 0x428   : > { %v4164_v14 = vsel %vm1980_vm11, %v4097_v52, -inf  ;;  %3821 = vmatprep.mubr.f32.mxu1 %v3559_v50  ;;  %v9691_v7 = vunpack.i.h.bf16 %v9689_v58  ;;  %v3463_v18 = vsel %vm3438_vm14, %v3430_v39, %v9676_v46  ;;  %v3496_v4 = vsel %vm1980_vm11, %v12531_v48, %v9680_v47 }
 0x429   : > { %v4165_v20 = vmax.f32 %v4163_v54, %v4164_v14  ;;  %v4098_v15 = vmax.f32 %v3984_v23, 0.0  ;;  %3822 = vmatmul.mubr.f32.gmra.mrb[80].mxu1 %v3463_v18  ;;  %v3398_v51 = vsel %vm1980_vm11, %v12429_v40, %v9681_v11  ;;  %v9696_v61 = vunpack.i.h.bf16 %v12972_v21 }
 0x42a   : > { %v3528_v49 = vsel %vm3405_vm13, %v3496_v4, %v9685_v26  ;;  %v3431_v17 = vsel %vm3405_vm13, %v3398_v51, %v9686_v6  ;;  %v5119_v1 = vsel %vm5109_vm7, %v4649_v60, %v5118_v59  ;;  %v5211_v44 = vrot.slane %v12905_v0, 1 }
 0x42b   : > { %v4283_v22 = vcombine.high %v4165_v20, %v4165_v20  ;;  %v4290_v56 = vrot.slane %v4165_v20, %v12768_v31  ;;  %4130 = vst.msk [vmem:[%s12735_s24 + $0x58] sm:$0xff] %vm1980_vm11, %v4098_v15  ;;  %v4167_v54 = vsel %vm1980_vm11, %v4098_v15, -inf  ;;  %v3560_v48 = vsel %vm3438_vm14, %v3528_v49, %v9690_v25 }
 0x42c   : > { %v4168_v45 = vmax.f32 %v4166_v5, %v4167_v54  ;;  %3826 = vmatprep.mubr.f32.mxu1 %v3560_v48  ;;  %v3464_v40 = vsel %vm3438_vm14, %v3431_v17, %v9691_v7  ;;  %v5120_v10 = vsel %vm5111_vm8, %v4656_v29, %v5119_v1  ;;  %v5212_v36 = vrot.slane %v12914_v13, 1 }
 0x42d   : > { %v4297_v19 = vrot.slane %v4283_v22, %v12768_v31  ;;  %v4298_v41 = vcombine.high %v4290_v56, %v4290_v56  ;;  %v4664_v37 = vsel %vm4551_vm15, %v4290_v56, -inf  ;;  %3827 = vmatmul.mubr.f32.gmra.mrb[82].mxu1 %v3464_v40  ;;  %v12997_v12 = vsel %vm5113_vm9, %v4663_v55, %v5120_v10 }
 0x42e   : > { %v4665_v30 = vrot.slane %v4664_v37, 4  ;;  %v4300_v60 = vcombine.high %v4168_v45, %v4168_v45  ;;  %v4307_v59 = vrot.slane %v4168_v45, %v12768_v31  ;;  %v5165_v5 = vrot.slane %v12997_v12, 7  ;;  %v13001_v57 = vpop.f32.mrb[56].mxu1 }
 0x42f   : > { %v4299_v3 = vcombine.high %v4297_v19, %v4297_v19  ;;  %v4671_v42 = vsel %vm4551_vm15, %v4298_v41, -inf  ;;  %v4678_v46 = vsel %vm4551_vm15, %v4297_v19, -inf  ;;  %v3765_v58 = vpop.f32.mrb[57].mxu1  ;;  %v9695_v12 = vunpack.i.l.bf16 %v12972_v21 }
 0x430   : > { %v4666_v29 = vmax.f32 %v4664_v37, %v4665_v30  ;;  %v4672_v11 = vrot.slane %v4671_v42, 4  ;;  %v4679_v47 = vrot.slane %v4678_v46, 4  ;;  %v4314_v28 = vrot.slane %v4300_v60, %v12768_v31 }
 0x431   : > { %v4685_v52 = vsel %vm4551_vm15, %v4299_v3, -inf  ;;  %v4315_v6 = vcombine.high %v4307_v59, %v4307_v59  ;;  %v4692_v26 = vsel %vm4551_vm15, %v4307_v59, -inf  ;;  %v13012_v53 = vsel %vm641_vm0, 0.0, %v5165_v5 }
 0x432   : > { %v4667_v23 = vrot.slane %v4666_v29, 2  ;;  %v4673_v50 = vmax.f32 %v4671_v42, %v4672_v11  ;;  %v4680_v25 = vmax.f32 %v4678_v46, %v4679_v47  ;;  %v4686_v39 = vrot.slane %v4685_v52, 4 }
 0x433   : > { %v4316_v55 = vcombine.high %v4314_v28, %v4314_v28  ;;  %v4693_v14 = vrot.slane %v4692_v26, 4  ;;  %v4699_v7 = vsel %vm4551_vm15, %v4315_v6, -inf  ;;  %v4706_v18 = vsel %vm4551_vm15, %v4314_v28, -inf }
 0x434   : > { %v4668_v20 = vmax.f32 %v4666_v29, %v4667_v23  ;;  %v4674_v15 = vrot.slane %v4673_v50, 2  ;;  %v4681_v4 = vrot.slane %v4680_v25, 2  ;;  %v4687_v51 = vmax.f32 %v4685_v52, %v4686_v39  ;;  %v3768_v40 = vpop.f32.mrb[58].mxu1  ;;  %v13017_v30 = vpop.permute.xlu0 %9698 }
 0x435   : > { %v4694_v49 = vmax.f32 %v4692_v26, %v4693_v14  ;;  %v4700_v17 = vrot.slane %v4699_v7, 4  ;;  %v4707_v1 = vrot.slane %v4706_v18, 4  ;;  %v4713_v22 = vsel %vm4551_vm15, %v4316_v55, -inf  ;;  %v3770_v60 = vpop.f32.mrb[59].mxu1 }
 0x436   : > { %v4669_v56 = vrot.slane %v4668_v20, 1  ;;  %v4675_v54 = vmax.f32 %v4673_v50, %v4674_v15  ;;  %v4682_v48 = vmax.f32 %v4680_v25, %v4681_v4  ;;  %v4688_v45 = vrot.slane %v4687_v51, 2 }
 0x437   : > { %v4695_v10 = vrot.slane %v4694_v49, 2  ;;  %v4701_v19 = vmax.f32 %v4699_v7, %v4700_v17  ;;  %v4708_v41 = vmax.f32 %v4706_v18, %v4707_v1  ;;  %v4714_v37 = vrot.slane %v4713_v22, 4  ;;  %v9704_v4 = vpop.permute.xlu1 %9703 }
 0x438   : > { %v4670_v59 = vmax.f32 %v4668_v20, %v4669_v56  ;;  %v4676_v3 = vrot.slane %v4675_v54, 1  ;;  %v4683_v42 = vrot.slane %v4682_v48, 1  ;;  %v4689_v46 = vmax.f32 %v4687_v51, %v4688_v45  ;;  %v13019_v28 = vpop.f32.mrb[20].mxu0 }
 0x439   : > { %v4696_v58 = vmax.f32 %v4694_v49, %v4695_v10  ;;  %v4702_v29 = vrot.slane %v4701_v19, 2  ;;  %v4709_v11 = vrot.slane %v4708_v41, 2  ;;  %v4715_v47 = vmax.f32 %v4713_v22, %v4714_v37  ;;  %v13023_v50 = vpop.f32.mrb[21].mxu0  ;;  %v9709_v22 = vpop.permute.xlu0 %9708 }
 0x43a   : > { %v4677_v52 = vmax.f32 %v4675_v54, %v4676_v3  ;;  %v4684_v6 = vmax.f32 %v4682_v48, %v4683_v42  ;;  %v4690_v26 = vrot.slane %v4689_v46, 1  ;;  %v9787_v23 = vpack.i.bf16 %v12812_v33, %v13012_v53 }
 0x43b   : > { %v4697_v25 = vrot.slane %v4696_v58, 1  ;;  %v4703_v39 = vmax.f32 %v4701_v19, %v4702_v29  ;;  %v4710_v55 = vmax.f32 %v4708_v41, %v4709_v11  ;;  %v4716_v14 = vrot.slane %v4715_v47, 2 }
 0x43c   : > { %v4691_v7 = vmax.f32 %v4689_v46, %v4690_v26  ;;  %v5122_v18 = vsel %vm5101_vm3, %v4677_v52, %v4670_v59  ;;  %9788 = vrot.lane.b32.xlu0 %v9787_v23, %s14557_s18  ;;  %v5189_v20 = vsel %vm641_vm0, %v5165_v5, 0.0  ;;  %v5214_v15 = vrot.slane %v13012_v53, 1 }
 0x43d   : > { %v5123_v51 = vsel %vm5103_vm4, %v4684_v6, %v5122_v18  ;;  %v4698_v49 = vmax.f32 %v4696_v58, %v4697_v25  ;;  %v4704_v17 = vrot.slane %v4703_v39, 1  ;;  %v4711_v1 = vrot.slane %v4710_v55, 1 }
 0x43e   : > { %v4717_v56 = vmax.f32 %v4715_v47, %v4716_v14  ;;  %v5124_v54 = vsel %vm5105_vm5, %v4691_v7, %v5123_v51  ;;  %v5215_v48 = vrot.slane %v5189_v20, 1  ;;  %v5260_v45 = vrot.slane %v13012_v53, 2  ;;  %v14621_v7 = vld [vmem:[#allocation32_spill] sm:$0xff] }
 0x43f   : > { %v5125_v10 = vsel %vm5107_vm6, %v4698_v49, %v5124_v54  ;;  %v13041_v5 = vsel %vm807_vm1, %v5211_v44, %v5212_v36  ;;  %v5261_v19 = vrot.slane %v5189_v20, 2  ;;  %v4705_v41 = vmax.f32 %v4703_v39, %v4704_v17  ;;  %v5018_v51 = vld [vmem:[#allocation5 + $0x90] sm:$0xff]  ;;  %v5019_v49 = vld [vmem:[#allocation5 + $0x98] sm:$0xff] }
 0x440   : > { %v4718_v37 = vrot.slane %v4717_v56, 1  ;;  %v13044_v60 = vsel %vm807_vm1, %v5214_v15, %v5215_v48  ;;  %v3764_v59 = vadd.f32 %v12692_v38, %v13001_v57  ;;  %v9700_v13 = vunpack.i.l.bf16 %v13017_v30  ;;  %v9714_v57 = vpop.permute.xlu1 %9713  ;;  %v14622_v48 = vld [vmem:[#allocation31_spill] sm:$0xff] }
 0x441   : > { %v9792_v3 = vpack.i.bf16 %v12905_v0, %v13044_v60  ;;  %v13051_v42 = vsel %vm984_vm2, %v5260_v45, %v5261_v19  ;;  %v3769_v44 = vadd.f32 %v12692_v38, %v3768_v40  ;;  %v4712_v36 = vmax.f32 %v4710_v55, %v4711_v1  ;;  %v9719_v38 = vpop.permute.xlu0 %9718  ;;  %v5002_v1 = vld [vmem:[#allocation5 + $0x10] sm:$0xff] }
 0x442   : > { %v9797_v46 = vpack.i.bf16 %v13041_v5, %v13051_v42  ;;  %v13058_v58 = vadd.f32 %v12612_v32, %v3764_v59  ;;  %v9701_v29 = vunpack.i.h.bf16 %v13017_v30  ;;  %v4719_v11 = vmax.f32 %v4717_v56, %v4718_v37  ;;  %v5021_v37 = vld [vmem:[#allocation5 + $0xa8] sm:$0xff]  ;;  %v5004_v59 = vld [vmem:[#allocation5 + $0x20] sm:$0xff] }
 0x443   : > { %9793 = vrot.lane.b32.xlu1 %v9792_v3, %s10211_s14  ;;  %v13063_v47 = vadd.f32 %v12608_v34, %v3769_v44  ;;  %v9706_v52 = vunpack.i.h.bf16 %v9704_v4  ;;  %v9705_v6 = vunpack.i.l.bf16 %v9704_v4  ;;  %v9711_v32 = vunpack.i.h.bf16 %v9709_v22  ;;  %v5005_v3 = vld [vmem:[#allocation5 + $0x28] sm:$0xff] }
 0x444   : > { %9798 = vrot.lane.b32.xlu0 %v9797_v46, %s10208_s27  ;;  %v4099_v40 = vmax.f32 %v13058_v58, 0.0  ;;  %v9710_v26 = vunpack.i.l.bf16 %v9709_v22  ;;  %v3497_v30 = vsel %vm1980_vm11, %v12577_v9, %v9695_v12  ;;  %v9716_v25 = vunpack.i.h.bf16 %v9714_v57  ;;  %v5003_v22 = vld [vmem:[#allocation5 + $0x18] sm:$0xff]  ;;  %v5022_v46 = vld [vmem:[#allocation5 + $0xb0] sm:$0xff] }
 0x445   : > { %v4100_v23 = vmax.f32 %v13063_v47, 0.0  ;;  %v9715_v39 = vunpack.i.l.bf16 %v9714_v57  ;;  %v3529_v34 = vsel %vm3405_vm13, %v3497_v30, %v9700_v13  ;;  %v9720_v14 = vunpack.i.l.bf16 %v9719_v38 }
 0x446   : > { %4131 = vst.msk [vmem:[%s12735_s24 + $0x60] sm:$0xff] %vm1980_vm11, %v4099_v40  ;;  %v3561_v55 = vsel %vm3438_vm14, %v3529_v34, %v9705_v6  ;;  %v3399_v18 = vsel %vm1980_vm11, %v14621_v7, %v9696_v61  ;;  %v5126_v9 = vsel %vm5109_vm7, %v4705_v41, %v5125_v10  ;;  %v9721_v20 = vunpack.i.h.bf16 %v9719_v38  ;;  %v5020_v10 = vld [vmem:[#allocation5 + $0xa0] sm:$0xff]  ;;  %v5006_v34 = vld [vmem:[#allocation5 + $0x30] sm:$0xff] }
 0x447   : > { %4132 = vst.msk [vmem:[%s12735_s24 + $0x68] sm:$0xff] %vm1980_vm11, %v4100_v23  ;;  %3831 = vmatprep.mubr.f32.mxu1 %v3561_v55  ;;  %v3432_v15 = vsel %vm3405_vm13, %v3399_v18, %v9701_v29  ;;  %v5127_v4 = vsel %vm5111_vm8, %v4712_v36, %v5126_v9  ;;  %v3498_v61 = vsel %vm1980_vm11, %v12596_v24, %v9710_v26  ;;  %v5023_v29 = vld [vmem:[#allocation5 + $0xb8] sm:$0xff]  ;;  %v5024_v9 = vld [vmem:[#allocation5 + $0xc0] sm:$0xff] }
 0x448   : > { %v3465_v17 = vsel %vm3438_vm14, %v3432_v15, %v9706_v52  ;;  %v5128_v21 = vsel %vm5113_vm9, %v4719_v11, %v5127_v4  ;;  %v3530_v54 = vsel %vm3405_vm13, %v3498_v61, %v9715_v39  ;;  %v3400_v45 = vsel %vm1980_vm11, %v14622_v48, %v9711_v32  ;;  %v9724_v11 = vpop.permute.xlu1 %9723  ;;  %v13127_v48 = vld [vmem:[#allocation5 + $0xd0] sm:$0xff] }
 0x449   : > { %3832 = vmatmul.mubr.f32.gmra.mrb[84].mxu1 %v3465_v17  ;;  %v5166_v56 = vrot.slane %v5128_v21, 7  ;;  %v3562_v12 = vsel %vm3438_vm14, %v3530_v54, %v9720_v14  ;;  %v3433_v19 = vsel %vm3405_vm13, %v3400_v45, %v9716_v25  ;;  %v8815_v41 = vpack.c.bf16 %v5019_v49, %v5018_v51  ;;  %v13116_v49 = vld [vmem:[#allocation5 + $0x40] sm:$0xff]  ;;  %v13118_v17 = vld [vmem:[#allocation5 + $0x48] sm:$0xff]  ;;  %v13129_v45 = vld [vmem:[#allocation5 + $0xd8] sm:$0xff] }
 0x44a   : > { %3836 = vmatprep.mubr.f32.mxu1 %v3562_v12  ;;  %v3466_v44 = vsel %vm3438_vm14, %v3433_v19, %v9721_v20  ;;  %v8817_v36 = vpack.c.bf16 %v5003_v22, %v5002_v1  ;;  %v8819_v26 = vpack.c.bf16 %v5021_v37, %v5020_v10  ;;  %v8821_v30 = vpack.c.bf16 %v5005_v3, %v5004_v59  ;;  %v5025_v20 = vld [vmem:[#allocation5 + $0xc8] sm:$0xff]  ;;  %v13124_v21 = vld [vmem:[%s14503_s4] ss:$0 sm:$0xff]  ;;  %v13142_v37 = vld [vmem:[#allocation5 + $0x58] sm:$0xff] }
 0x44b   : > { %v13097_v24 = vsel %vm641_vm0, 0.0, %v5166_v56  ;;  %v5190_v13 = vsel %vm641_vm0, %v5166_v56, 0.0  ;;  %8816 = vmatprep.subr.bf16.mxu0 %v8815_v41  ;;  %v8823_v39 = vpack.c.bf16 %v5023_v29, %v5022_v46  ;;  %v9726_v55 = vunpack.i.h.bf16 %v9724_v11  ;;  %v13140_v41 = vld [vmem:[#allocation5 + $0x50] sm:$0xff]  ;;  %v14623_v59 = vld [vmem:[#allocation38_spill] sm:$0xff] }
 0x44c   : > { %v9802_v57 = vpack.i.bf16 %v12943_v63, %v13097_v24  ;;  %v5217_v52 = vrot.slane %v13097_v24, 1  ;;  %v5218_v6 = vrot.slane %v5190_v13, 1  ;;  %v5263_v38 = vrot.slane %v13097_v24, 2  ;;  %8818 = vmatpush3.bf16.msra.mxu0 %v8817_v36  ;;  %v5007_v63 = vld [vmem:[#allocation5 + $0x38] sm:$0xff]  ;;  %v13153_v36 = vld [vmem:[#allocation5 + $0xe8] sm:$0xff]  ;;  %v13155_v46 = vld [vmem:[#allocation5 + $0x60] sm:$0xff] }
 0x44d   : > { %3837 = vmatmul.mubr.f32.gmra.mrb[86].mxu1 %v3466_v44  ;;  %v5264_v32 = vrot.slane %v5190_v13, 2  ;;  %v9725_v14 = vunpack.i.l.bf16 %v9724_v11  ;;  %8820 = vmatprep.subr.bf16.mxu0 %v8819_v26  ;;  %v8825_v54 = vpack.c.bf16 %v5007_v63, %v5006_v34  ;;  %v4169_v10 = vsel %vm1980_vm11, %v4099_v40, -inf  ;;  %v14624_v40 = vld [vmem:[#allocation34_spill] sm:$0xff] }
 0x44e   : > { %9803 = vrot.lane.b32.xlu1 %v9802_v57, %s14557_s18  ;;  %v13107_v25 = vsel %vm807_vm1, %v5217_v52, %v5218_v6  ;;  %v13137_v12 = vsel %vm1980_vm11, %v4100_v23, -inf  ;;  %v8827_v19 = vpack.c.bf16 %v5025_v20, %v5024_v9  ;;  %v3401_v47 = vsel %vm1980_vm11, %v14624_v40, %v9726_v55  ;;  %v13151_v44 = vld [vmem:[#allocation5 + $0xe0] sm:$0xff]  ;;  %v13160_v6 = vld [vmem:[#allocation5 + $0x68] sm:$0xff] }
 0x44f   : > { %v9807_v7 = vpack.i.bf16 %v13012_v53, %v13107_v25  ;;  %v13112_v18 = vsel %vm984_vm2, %v5263_v38, %v5264_v32  ;;  %v3773_v4 = vpop.f32.mrb[60].mxu1  ;;  %v3499_v58 = vsel %vm1980_vm11, %v12645_v2, %v9725_v14  ;;  %v8829_v23 = vpack.c.bf16 %v13118_v17, %v13116_v49  ;;  %v13162_v38 = vld [vmem:[#allocation5 + $0xf0] sm:$0xff]  ;;  %v13164_v32 = vld [vmem:[#allocation5 + $0xf8] sm:$0xff] }
 0x450   : > { %v9812_v15 = vpack.i.bf16 %v13044_v60, %v13112_v18  ;;  %v9729_v51 = vpop.permute.xlu0 %9728  ;;  %v3774_v61 = vadd.f32 %v13124_v21, %v3773_v4  ;;  %v3775_v56 = vpop.f32.mrb[61].mxu1  ;;  %8822 = vmatpush3.bf16.msra.mxu0 %v8821_v30  ;;  %v8831_v2 = vpack.c.bf16 %v13129_v45, %v13127_v48  ;;  %v8835_v9 = vpack.c.bf16 %v13153_v36, %v13151_v44  ;;  %v13183_v48 = vld [vmem:[#allocation5 + $0x70] sm:$0xff]  ;;  %v13185_v45 = vld [vmem:[#allocation5 + $0x78] sm:$0xff] }
 0x451   : > { %9808 = vrot.lane.b32.xlu0 %v9807_v7, %s10211_s14  ;;  %v9731_v1 = vunpack.i.h.bf16 %v9729_v51  ;;  %v9730_v22 = vunpack.i.l.bf16 %v9729_v51  ;;  %8824 = vmatprep.subr.bf16.mxu0 %v8823_v39  ;;  %v8833_v7 = vpack.c.bf16 %v13142_v37, %v13140_v41  ;;  %v8837_v49 = vpack.c.bf16 %v13160_v6, %v13155_v46 }
 0x452   : > { %9813 = vrot.lane.b32.xlu1 %v9812_v15, %s10208_s27  ;;  %v3999_v3 = vadd.f32 %v14623_v59, %v3774_v61  ;;  %v8839_v17 = vpack.c.bf16 %v13164_v32, %v13162_v38 }
 0x453   : > { %v9734_v13 = vpop.permute.xlu1 %9733  ;;  %v3531_v52 = vsel %vm3405_vm13, %v3499_v58, %v9730_v22  ;;  %v3434_v34 = vsel %vm3405_vm13, %v3401_v47, %v9731_v1 }
 0x454   : > { %v9736_v29 = vunpack.i.h.bf16 %v9734_v13  ;;  %v9735_v57 = vunpack.i.l.bf16 %v9734_v13  ;;  %v9739_v11 = vpop.permute.xlu0 %9738  ;;  %v4101_v26 = vmax.f32 %v3999_v3, 0.0  ;;  %8826 = vmatpush3.bf16.msra.mxu0 %v8825_v54  ;;  %v14626_v13 = vld [vmem:[#allocation33_spill] sm:$0xff] }
 0x455   : > { %v9741_v30 = vunpack.i.h.bf16 %v9739_v11  ;;  %v9740_v39 = vunpack.i.l.bf16 %v9739_v11  ;;  %v3778_v63 = vpop.f32.mrb[62].mxu1  ;;  %8828 = vmatprep.subr.bf16.mxu0 %v8827_v19  ;;  %v14625_v19 = vld [vmem:[#allocation37_spill] sm:$0xff] }
 0x456   : > { %v3563_v55 = vsel %vm3438_vm14, %v3531_v52, %v9735_v57  ;;  %v3467_v14 = vsel %vm3438_vm14, %v3434_v34, %v9736_v29  ;;  %4133 = vst.msk [vmem:[%s12735_s24 + $0x70] sm:$0xff] %vm1980_vm11, %v4101_v26  ;;  %v4170_v20 = vsel %vm1980_vm11, %v4101_v26, -inf  ;;  %v3779_v15 = vadd.f32 %v13124_v21, %v3778_v63  ;;  %v3780_v4 = vpop.f32.mrb[63].mxu1 }
 0x457   : > { %v9744_v51 = vpop.permute.xlu1 %9743  ;;  %3841 = vmatprep.mubr.f32.mxu1 %v3563_v55  ;;  %v4171_v61 = vmax.f32 %v4169_v10, %v4170_v20  ;;  %v3500_v54 = vsel %vm1980_vm11, %v12663_v16, %v9740_v39  ;;  %v3402_v10 = vsel %vm1980_vm11, %v14626_v13, %v9741_v30 }
 0x458   : > { %v9746_v1 = vunpack.i.h.bf16 %v9744_v51  ;;  %v9745_v22 = vunpack.i.l.bf16 %v9744_v51  ;;  %v9749_v56 = vpop.permute.xlu0 %9748  ;;  %3842 = vmatmul.mubr.f32.gmra.mrb[88].mxu1 %v3467_v14  ;;  %v4004_v41 = vadd.f32 %v14625_v19, %v3779_v15  ;;  %v13188_v37 = vpop.f32.mrb[22].mxu0  ;;  %8830 = vmatpush3.bf16.msra.mxu0 %v8829_v23  ;;  %v8841_v23 = vpack.c.bf16 %v13185_v45, %v13183_v48 }
 0x459   : > { %v9751_v59 = vunpack.i.h.bf16 %v9749_v56  ;;  %v9750_v3 = vunpack.i.l.bf16 %v9749_v56  ;;  %v4317_v58 = vcombine.high %v4171_v61, %v4171_v61  ;;  %v4324_v40 = vrot.slane %v4171_v61, %v12768_v31  ;;  %v13193_v47 = vpop.f32.mrb[23].mxu0  ;;  %8832 = vmatprep.subr.bf16.mxu0 %v8831_v2 }
 0x45a   : > { %v3532_v16 = vsel %vm3405_vm13, %v3500_v54, %v9745_v22  ;;  %v3435_v44 = vsel %vm3405_vm13, %v3402_v10, %v9746_v1  ;;  %v4102_v36 = vmax.f32 %v4004_v41, 0.0 }
 0x45b   : > { %v13197_v46 = vpop.permute.xlu1 %9753  ;;  %v3564_v29 = vsel %vm3438_vm14, %v3532_v16, %v9750_v3  ;;  %v3468_v57 = vsel %vm3438_vm14, %v3435_v44, %v9751_v59  ;;  %v4331_v11 = vrot.slane %v4317_v58, %v12768_v31  ;;  %v4332_v52 = vcombine.high %v4324_v40, %v4324_v40 }
 0x45c   : > { %v4720_v6 = vsel %vm4551_vm15, %v4324_v40, -inf  ;;  %v9756_v38 = vunpack.i.h.bf16 %v13197_v46  ;;  %v13206_v32 = vpop.permute.xlu0 %9758  ;;  %3846 = vmatprep.mubr.f32.mxu1 %v3564_v29  ;;  %4134 = vst.msk [vmem:[%s12735_s24 + $0x78] sm:$0xff] %vm1980_vm11, %v4102_v36  ;;  %v4173_v26 = vsel %vm1980_vm11, %v4102_v36, -inf  ;;  %v9755_v30 = vunpack.i.l.bf16 %v13197_v46  ;;  %8834 = vmatpush3.bf16.msra.mxu0 %v8833_v7 }
 0x45d   : > { %v4721_v2 = vrot.slane %v4720_v6, 4  ;;  %v9761_v39 = vunpack.i.h.bf16 %v13206_v32  ;;  %3847 = vmatmul.mubr.f32.gmra.mrb[90].mxu1 %v3468_v57  ;;  %v4333_v34 = vcombine.high %v4331_v11, %v4331_v11  ;;  %v4727_v63 = vsel %vm4551_vm15, %v4332_v52, -inf  ;;  %8836 = vmatprep.subr.bf16.mxu0 %v8835_v9 }
 0x45e   : > { %v4734_v55 = vsel %vm4551_vm15, %v4331_v11, -inf  ;;  %v4174_v14 = vmax.f32 %v13137_v12, %v4173_v26  ;;  %v4728_v15 = vrot.slane %v4727_v63, 4  ;;  %v9760_v51 = vunpack.i.l.bf16 %v13206_v32 }
 0x45f   : > { %v4722_v20 = vmax.f32 %v4720_v6, %v4721_v2  ;;  %v4735_v4 = vrot.slane %v4734_v55, 4  ;;  %v13217_v61 = vpop.permute.xlu1 %9763  ;;  %v4741_v1 = vsel %vm4551_vm15, %v4333_v34, -inf }
 0x460   : > { %v4334_v22 = vcombine.high %v4174_v14, %v4174_v14  ;;  %v4341_v7 = vrot.slane %v4174_v14, %v12768_v31  ;;  %v9766_v56 = vunpack.i.h.bf16 %v13217_v61  ;;  %v4729_v48 = vmax.f32 %v4727_v63, %v4728_v15  ;;  %8838 = vmatpush3.bf16.msra.mxu0 %v8837_v49  ;;  %v9769_v26 = vpop.permute.xlu0 %9768 }
 0x461   : > { %v4723_v54 = vrot.slane %v4722_v20, 2  ;;  %v4736_v45 = vmax.f32 %v4734_v55, %v4735_v4  ;;  %v4742_v19 = vrot.slane %v4741_v1, 4  ;;  %v9765_v59 = vunpack.i.l.bf16 %v13217_v61  ;;  %8840 = vmatprep.subr.bf16.mxu0 %v8839_v17 }
 0x462   : > { %v4348_v12 = vrot.slane %v4334_v22, %v12768_v31  ;;  %v4349_v9 = vcombine.high %v4341_v7, %v4341_v7  ;;  %v4748_v41 = vsel %vm4551_vm15, %v4341_v7, -inf  ;;  %v4730_v13 = vrot.slane %v4729_v48, 2 }
 0x463   : > { %v4724_v3 = vmax.f32 %v4722_v20, %v4723_v54  ;;  %v4737_v10 = vrot.slane %v4736_v45, 2  ;;  %v4743_v58 = vmax.f32 %v4741_v1, %v4742_v19  ;;  %v4749_v16 = vrot.slane %v4748_v41, 4  ;;  %v9774_v22 = vpop.permute.xlu1 %9773 }
 0x464   : > { %v4350_v40 = vcombine.high %v4348_v12, %v4348_v12  ;;  %v4755_v44 = vsel %vm4551_vm15, %v4349_v9, -inf  ;;  %v4762_v36 = vsel %vm4551_vm15, %v4348_v12, -inf  ;;  %v4731_v49 = vmax.f32 %v4729_v48, %v4730_v13  ;;  %8842 = vmatpush3.bf16.msra.mxu0 %v8841_v23 }
 0x465   : > { %v4725_v29 = vrot.slane %v4724_v3, 1  ;;  %v4738_v57 = vmax.f32 %v4736_v45, %v4737_v10  ;;  %v4744_v11 = vrot.slane %v4743_v58, 2  ;;  %v4750_v52 = vmax.f32 %v4748_v41, %v4749_v16 }
 0x466   : > { %v4756_v6 = vrot.slane %v4755_v44, 4  ;;  %v4763_v2 = vrot.slane %v4762_v36, 4  ;;  %v4769_v17 = vsel %vm4551_vm15, %v4350_v40, -inf  ;;  %v4732_v63 = vrot.slane %v4731_v49, 1 }
 0x467   : > { %v4726_v34 = vmax.f32 %v4724_v3, %v4725_v29  ;;  %v4739_v55 = vrot.slane %v4738_v57, 1  ;;  %v4745_v14 = vmax.f32 %v4743_v58, %v4744_v11  ;;  %v4751_v20 = vrot.slane %v4750_v52, 2 }
 0x468   : > { %v4757_v15 = vmax.f32 %v4755_v44, %v4756_v6  ;;  %v4764_v4 = vmax.f32 %v4762_v36, %v4763_v2  ;;  %v4770_v1 = vrot.slane %v4769_v17, 4  ;;  %v4733_v7 = vmax.f32 %v4731_v49, %v4732_v63  ;;  %v9779_v36 = vpop.permute.xlu0 %9778 }
 0x469   : > { %v4740_v54 = vmax.f32 %v4738_v57, %v4739_v55  ;;  %v4746_v48 = vrot.slane %v4745_v14, 1  ;;  %v9771_v45 = vunpack.i.h.bf16 %v9769_v26  ;;  %v4752_v23 = vmax.f32 %v4750_v52, %v4751_v20 }
 0x46a   : > { %v4758_v19 = vrot.slane %v4757_v15, 2  ;;  %v4765_v12 = vrot.slane %v4764_v4, 2  ;;  %v4771_v9 = vmax.f32 %v4769_v17, %v4770_v1  ;;  %v5129_v13 = vsel %vm5101_vm3, %v4733_v7, %v4726_v34  ;;  %v14628_v7 = vld [vmem:[#allocation39_spill] sm:$0xff] }
 0x46b   : > { %v4747_v41 = vmax.f32 %v4745_v14, %v4746_v48  ;;  %v9770_v3 = vunpack.i.l.bf16 %v9769_v26  ;;  %v9776_v10 = vunpack.i.h.bf16 %v9774_v22  ;;  %v5130_v58 = vsel %vm5103_vm4, %v4740_v54, %v5129_v13  ;;  %v14629_v54 = vld [vmem:[#allocation35_spill] sm:$0xff] }
 0x46c   : > { %v4753_v40 = vrot.slane %v4752_v23, 1  ;;  %v4759_v16 = vmax.f32 %v4757_v15, %v4758_v19  ;;  %v4766_v44 = vmax.f32 %v4764_v4, %v4765_v12  ;;  %v4772_v29 = vrot.slane %v4771_v9, 2 }
 0x46d   : > { %v5131_v49 = vsel %vm5105_vm5, %v4747_v41, %v5130_v58  ;;  %v9775_v57 = vunpack.i.l.bf16 %v9774_v22  ;;  %v3501_v11 = vsel %vm1980_vm11, %v12720_v27, %v9755_v30  ;;  %v9781_v63 = vunpack.i.h.bf16 %v9779_v36  ;;  %v14627_v27 = vld [vmem:[#allocation36_spill] sm:$0xff] }
 0x46e   : > { %v4754_v52 = vmax.f32 %v4752_v23, %v4753_v40  ;;  %v4760_v6 = vrot.slane %v4759_v16, 1  ;;  %v4767_v2 = vrot.slane %v4766_v44, 1  ;;  %v3533_v17 = vsel %vm3405_vm13, %v3501_v11, %v9760_v51  ;;  %v14630_v11 = vld [vmem:[#allocation30_spill] sm:$0xff] }
 0x46f   : > { %v4773_v26 = vmax.f32 %v4771_v9, %v4772_v29  ;;  %v3565_v34 = vsel %vm3438_vm14, %v3533_v17, %v9765_v59  ;;  %v9780_v55 = vunpack.i.l.bf16 %v9779_v36  ;;  %v3403_v30 = vsel %vm1980_vm11, %v14627_v27, %v9756_v38 }
 0x470   : > { %v4761_v14 = vmax.f32 %v4759_v16, %v4760_v6  ;;  %v4768_v20 = vmax.f32 %v4766_v44, %v4767_v2  ;;  %v5132_v15 = vsel %vm5107_vm6, %v4754_v52, %v5131_v49  ;;  %3851 = vmatprep.mubr.f32.mxu1 %v3565_v34  ;;  %v3783_v4 = vpop.f32.mrb[64].mxu1  ;;  %v3436_v22 = vsel %vm3405_vm13, %v3403_v30, %v9761_v39 }
 0x471   : > { %v4774_v1 = vrot.slane %v4773_v26, 1  ;;  %v3502_v59 = vsel %vm1980_vm11, %v14628_v7, %v9770_v3  ;;  %v3404_v48 = vsel %vm1980_vm11, %v14629_v54, %v9771_v45  ;;  %v3785_v23 = vpop.f32.mrb[65].mxu1  ;;  %v3469_v46 = vsel %vm3438_vm14, %v3436_v22, %v9766_v56 }
 0x472   : > { %v3534_v19 = vsel %vm3405_vm13, %v3502_v59, %v9775_v57  ;;  %v3437_v38 = vsel %vm3405_vm13, %v3404_v48, %v9776_v10  ;;  %v3784_v12 = vadd.f32 %v13124_v21, %v3783_v4  ;;  %3852 = vmatmul.mubr.f32.gmra.mrb[92].mxu1 %v3469_v46  ;;  %v5133_v41 = vsel %vm5109_vm7, %v4761_v14, %v5132_v15 }
 0x473   : > { %v4775_v9 = vmax.f32 %v4773_v26, %v4774_v1  ;;  %v3566_v39 = vsel %vm3438_vm14, %v3534_v19, %v9780_v55  ;;  %v3470_v45 = vsel %vm3438_vm14, %v3437_v38, %v9781_v63  ;;  %v5134_v56 = vsel %vm5111_vm8, %v4768_v20, %v5133_v41 }
 0x474   : > { %3856 = vmatprep.mubr.f32.mxu1 %v3566_v39  ;;  %v4009_v61 = vadd.f32 %v12837_v35, %v3784_v12 }
 0x475   : > { %v5135_v13 = vsel %vm5113_vm9, %v4775_v9, %v5134_v56 }
 0x476   : > { %v4103_v3 = vmax.f32 %v4009_v61, 0.0  ;;  %v5167_v58 = vrot.slane %v5135_v13, 7  ;;  %3857 = vmatmul.mubr.f32.gmra.mrb[94].mxu1 %v3470_v45  ;;  %v3788_v10 = vpop.f32.mrb[66].mxu1 }
 0x477   : > { %v3789_v40 = vadd.f32 %v13124_v21, %v3788_v10  ;;  %v3790_v16 = vpop.f32.mrb[67].mxu1 }
 0x478   : > { %4135 = vst.msk [vmem:[%s12735_s24 + $0x80] sm:$0xff] %vm1980_vm11, %v4103_v3  ;;  %v13267_v44 = vsel %vm641_vm0, 0.0, %v5167_v58  ;;  %v5191_v36 = vsel %vm641_vm0, %v5167_v58, 0.0  ;;  %v4175_v22 = vsel %vm1980_vm11, %v4103_v3, -inf }
 0x479   : > { %v9817_v35 = vpack.i.bf16 %v13051_v42, %v13267_v44  ;;  %v5220_v29 = vrot.slane %v13267_v44, 1  ;;  %v5221_v49 = vrot.slane %v5191_v36, 1  ;;  %v5266_v57 = vrot.slane %v13267_v44, 2  ;;  %v13275_v6 = vpop.f32.mrb[24].mxu0 }
 0x47a   : > { %v4014_v52 = vadd.f32 %v14630_v11, %v3789_v40  ;;  %v5267_v2 = vrot.slane %v5191_v36, 2  ;;  %v13278_v17 = vpop.f32.mrb[25].mxu0 }
 0x47b   : > { %9818 = vrot.lane.b32.xlu0 %v9817_v35, %s14557_s18  ;;  %v13281_v26 = vsel %vm807_vm1, %v5220_v29, %v5221_v49 }
 0x47c   : > { %v4104_v34 = vmax.f32 %v4014_v52, 0.0  ;;  %v9822_v63 = vpack.i.bf16 %v13097_v24, %v13281_v26  ;;  %v13286_v55 = vsel %vm984_vm2, %v5266_v57, %v5267_v2 }
 0x47d   : > { %v9827_v14 = vpack.i.bf16 %v13107_v25, %v13286_v55 }
 0x47e   : > { %4136 = vst.msk [vmem:[%s12735_s24 + $0x88] sm:$0xff] %vm1980_vm11, %v4104_v34  ;;  %9823 = vrot.lane.b32.xlu1 %v9822_v63, %s10211_s14  ;;  %v4178_v45 = vsel %vm1980_vm11, %v4104_v34, -inf }
 0x47f   : > { %9828 = vrot.lane.b32.xlu0 %v9827_v14, %s10208_s27 }
 0x490   : > { %v3793_v20 = vpop.f32.mrb[68].mxu1 }
 0x491   : > { %v3794_v15 = vadd.f32 %v13124_v21, %v3793_v20  ;;  %v3795_v27 = vpop.f32.mrb[69].mxu1 }
 0x493   : > { %v4019_v30 = vadd.f32 %v12940_v8, %v3794_v15 }
 0x495   : > { %v4105_v4 = vmax.f32 %v4019_v30, 0.0 }
 0x496   : > { %v3798_v1 = vpop.f32.mrb[70].mxu1 }
 0x497   : > { %4137 = vst.msk [vmem:[%s12735_s24 + $0x90] sm:$0xff] %vm1980_vm11, %v4105_v4  ;;  %v4176_v7 = vsel %vm1980_vm11, %v4105_v4, -inf  ;;  %v3799_v59 = vadd.f32 %v13124_v21, %v3798_v1  ;;  %v3800_v54 = vpop.f32.mrb[71].mxu1 }
 0x498   : > { %v4177_v48 = vmax.f32 %v4175_v22, %v4176_v7  ;;  %v13302_v46 = vpop.f32.mrb[26].mxu0 }
 0x499   : > { %v4024_v23 = vadd.f32 %v12936_v62, %v3799_v59  ;;  %v13305_v38 = vpop.f32.mrb[27].mxu0 }
 0x49a   : > { %v4351_v19 = vcombine.high %v4177_v48, %v4177_v48  ;;  %v4358_v8 = vrot.slane %v4177_v48, %v12768_v31 }
 0x49b   : > { %v4106_v12 = vmax.f32 %v4024_v23, 0.0 }
 0x49c   : > { %v4365_v9 = vrot.slane %v4351_v19, %v12768_v31  ;;  %v4366_v39 = vcombine.high %v4358_v8, %v4358_v8  ;;  %v4776_v41 = vsel %vm4551_vm15, %v4358_v8, -inf }
 0x49d   : > { %v4777_v61 = vrot.slane %v4776_v41, 4  ;;  %4138 = vst.msk [vmem:[%s12735_s24 + $0x98] sm:$0xff] %vm1980_vm11, %v4106_v12  ;;  %v4179_v62 = vsel %vm1980_vm11, %v4106_v12, -inf }
 0x49e   : > { %v4367_v56 = vcombine.high %v4365_v9, %v4365_v9  ;;  %v4783_v13 = vsel %vm4551_vm15, %v4366_v39, -inf  ;;  %v4790_v3 = vsel %vm4551_vm15, %v4365_v9, -inf  ;;  %v4180_v58 = vmax.f32 %v4178_v45, %v4179_v62 }
 0x49f   : > { %v4778_v10 = vmax.f32 %v4776_v41, %v4777_v61  ;;  %v4784_v40 = vrot.slane %v4783_v13, 4  ;;  %v4791_v16 = vrot.slane %v4790_v3, 4 }
 0x4a0   : > { %v4797_v36 = vsel %vm4551_vm15, %v4367_v56, -inf  ;;  %v4368_v35 = vcombine.high %v4180_v58, %v4180_v58  ;;  %v4375_v29 = vrot.slane %v4180_v58, %v12768_v31 }
 0x4a1   : > { %v4779_v49 = vrot.slane %v4778_v10, 2  ;;  %v4785_v57 = vmax.f32 %v4783_v13, %v4784_v40  ;;  %v4792_v11 = vmax.f32 %v4790_v3, %v4791_v16  ;;  %v4798_v52 = vrot.slane %v4797_v36, 4 }
 0x4a2   : > { %v4382_v2 = vrot.slane %v4368_v35, %v12768_v31  ;;  %v4383_v34 = vcombine.high %v4375_v29, %v4375_v29  ;;  %v4804_v63 = vsel %vm4551_vm15, %v4375_v29, -inf }
 0x4a3   : > { %v4780_v14 = vmax.f32 %v4778_v10, %v4779_v49  ;;  %v4786_v20 = vrot.slane %v4785_v57, 2  ;;  %v4793_v15 = vrot.slane %v4792_v11, 2  ;;  %v4799_v27 = vmax.f32 %v4797_v36, %v4798_v52 }
 0x4a4   : > { %v4384_v30 = vcombine.high %v4382_v2, %v4382_v2  ;;  %v4805_v4 = vrot.slane %v4804_v63, 4  ;;  %v4811_v1 = vsel %vm4551_vm15, %v4383_v34, -inf  ;;  %v4818_v22 = vsel %vm4551_vm15, %v4382_v2, -inf }
 0x4a5   : > { %v4781_v7 = vrot.slane %v4780_v14, 1  ;;  %v4787_v59 = vmax.f32 %v4785_v57, %v4786_v20  ;;  %v4794_v54 = vmax.f32 %v4792_v11, %v4793_v15  ;;  %v4800_v48 = vrot.slane %v4799_v27, 2  ;;  %v9784_v20 = vpop.permute.xlu1 %9783 }
 0x4a6   : > { %v4806_v23 = vmax.f32 %v4804_v63, %v4805_v4  ;;  %v4812_v19 = vrot.slane %v4811_v1, 4  ;;  %v4819_v8 = vrot.slane %v4818_v22, 4  ;;  %v4825_v12 = vsel %vm4551_vm15, %v4384_v30, -inf }
 0x4a7   : > { %v4788_v9 = vrot.slane %v4787_v59, 1  ;;  %v4795_v39 = vrot.slane %v4794_v54, 1  ;;  %v4801_v41 = vmax.f32 %v4799_v27, %v4800_v48  ;;  %v4826_v56 = vrot.slane %v4825_v12, 4 }
 0x4a8   : > { %v4807_v45 = vrot.slane %v4806_v23, 2  ;;  %v4813_v61 = vmax.f32 %v4811_v1, %v4812_v19  ;;  %v4820_v62 = vmax.f32 %v4818_v22, %v4819_v8  ;;  %v4782_v13 = vmax.f32 %v4780_v14, %v4781_v7 }
 0x4a9   : > { %v4789_v3 = vmax.f32 %v4787_v59, %v4788_v9  ;;  %v4796_v58 = vmax.f32 %v4794_v54, %v4795_v39  ;;  %v4802_v10 = vrot.slane %v4801_v41, 1  ;;  %v4827_v35 = vmax.f32 %v4825_v12, %v4826_v56  ;;  %v14631_v56 = vld [vmem:[#allocation26_spill] sm:$0xff] }
 0x4aa   : > { %v4808_v40 = vmax.f32 %v4806_v23, %v4807_v45  ;;  %v4814_v16 = vrot.slane %v4813_v61, 2  ;;  %v4821_v36 = vrot.slane %v4820_v62, 2  ;;  %v9786_v54 = vunpack.i.h.bf16 %v9784_v20 }
 0x4ab   : > { %v4803_v29 = vmax.f32 %v4801_v41, %v4802_v10  ;;  %v5136_v49 = vsel %vm5101_vm3, %v4789_v3, %v4782_v13  ;;  %v4828_v34 = vrot.slane %v4827_v35, 2  ;;  %v9785_v8 = vunpack.i.l.bf16 %v9784_v20 }
 0x4ac   : > { %v5137_v57 = vsel %vm5103_vm4, %v4796_v58, %v5136_v49  ;;  %v4809_v11 = vrot.slane %v4808_v40, 1  ;;  %v4815_v52 = vmax.f32 %v4813_v61, %v4814_v16  ;;  %v4822_v2 = vmax.f32 %v4820_v62, %v4821_v36 }
 0x4ad   : > { %v5138_v63 = vsel %vm5105_vm5, %v4803_v29, %v5137_v57  ;;  %v4829_v30 = vmax.f32 %v4827_v35, %v4828_v34  ;;  %v5411_v13 = vsel %vm1980_vm11, %v14631_v56, %v9786_v54 }
 0x4ae   : > { %v4810_v14 = vmax.f32 %v4808_v40, %v4809_v11  ;;  %v4816_v15 = vrot.slane %v4815_v52, 1  ;;  %v4823_v27 = vrot.slane %v4822_v2, 1  ;;  %v9789_v4 = vpop.permute.xlu0 %9788 }
 0x4af   : > { %v4830_v48 = vrot.slane %v4829_v30, 1  ;;  %v9791_v12 = vunpack.i.h.bf16 %v9789_v4  ;;  %v9790_v41 = vunpack.i.l.bf16 %v9789_v4 }
 0x4b0   : > { %v4817_v1 = vmax.f32 %v4815_v52, %v4816_v15  ;;  %v4824_v22 = vmax.f32 %v4822_v2, %v4823_v27  ;;  %v5139_v7 = vsel %vm5107_vm6, %v4810_v14, %v5138_v63  ;;  %v3803_v59 = vpop.f32.mrb[72].mxu1 }
 0x4b1   : > { %v3804_v23 = vadd.f32 %v13124_v21, %v3803_v59  ;;  %v3805_v19 = vpop.f32.mrb[73].mxu1  ;;  %v4831_v39 = vmax.f32 %v4829_v30, %v4830_v48  ;;  %v5419_v29 = vsel %vm3405_vm13, %v5411_v13, %v9791_v12 }
 0x4b2   : > { %v5140_v9 = vsel %vm5109_vm7, %v4817_v1, %v5139_v7 }
 0x4b3   : > { %v13329_v45 = vadd.f32 %v13023_v50, %v3804_v23  ;;  %v5141_v61 = vsel %vm5111_vm8, %v4824_v22, %v5140_v9  ;;  %v5435_v50 = vsel %vm1980_vm11, %v13041_v5, %v9785_v8 }
 0x4b4   : > { %v13332_v62 = vpop.f32.mrb[28].mxu0  ;;  %v5142_v40 = vsel %vm5113_vm9, %v4831_v39, %v5141_v61  ;;  %v5443_v49 = vsel %vm3405_vm13, %v5435_v50, %v9790_v41 }
 0x4b5   : > { %v9794_v3 = vpop.permute.xlu1 %9793  ;;  %v4107_v58 = vmax.f32 %v13329_v45, 0.0  ;;  %v13337_v10 = vpop.f32.mrb[29].mxu0  ;;  %v5168_v35 = vrot.slane %v5142_v40, 7 }
 0x4b6   : > { %v9796_v16 = vunpack.i.h.bf16 %v9794_v3  ;;  %v9795_v36 = vunpack.i.l.bf16 %v9794_v3  ;;  %v3808_v57 = vpop.f32.mrb[74].mxu1  ;;  %v9799_v7 = vpop.permute.xlu0 %9798 }
 0x4b7   : > { %4139 = vst.msk [vmem:[%s12735_s24 + $0xa0] sm:$0xff] %vm1980_vm11, %v4107_v58  ;;  %v3809_v2 = vadd.f32 %v13124_v21, %v3808_v57  ;;  %v3810_v34 = vpop.f32.mrb[75].mxu1  ;;  %v13350_v63 = vsel %vm641_vm0, 0.0, %v5168_v35  ;;  %v5192_v20 = vsel %vm641_vm0, %v5168_v35, 0.0  ;;  %v9801_v48 = vunpack.i.h.bf16 %v9799_v7 }
 0x4b8   : > { %v5451_v11 = vsel %vm3438_vm14, %v5443_v49, %v9795_v36  ;;  %v5427_v52 = vsel %vm3438_vm14, %v5419_v29, %v9796_v16  ;;  %v9832_v5 = vpack.i.bf16 %v13112_v18, %v13350_v63  ;;  %v5223_v15 = vrot.slane %v13350_v63, 1  ;;  %v13381_v36 = vpop.f32.mrb[30].mxu0 }
 0x4b9   : > { %5545 = vmatprep.mubr.f32.mxu0 %v5451_v11  ;;  %v4034_v14 = vadd.f32 %v13019_v28, %v3809_v2  ;;  %v5224_v27 = vrot.slane %v5192_v20, 1  ;;  %v5269_v30 = vrot.slane %v13350_v63, 2  ;;  %v5270_v4 = vrot.slane %v5192_v20, 2  ;;  %v13383_v50 = vpop.f32.mrb[31].mxu0 }
 0x4ba   : > { %5546 = vmatmul.mubr.f32.vlgmr.msra.gmra.mrb[32].mxu0 %v5427_v52  ;;  %9833 = vrot.lane.b32.xlu1 %v9832_v5, %s14557_s18  ;;  %v9800_v23 = vunpack.i.l.bf16 %v9799_v7  ;;  %v5412_v61 = vsel %vm1980_vm11, %v12905_v0, %v9801_v48  ;;  %v4181_v2 = vsel %vm1980_vm11, %v4107_v58, -inf }
 0x4bb   : > { %v4108_v1 = vmax.f32 %v4034_v14, 0.0  ;;  %v13360_v22 = vsel %vm807_vm1, %v5223_v15, %v5224_v27  ;;  %v13365_v54 = vsel %vm984_vm2, %v5269_v30, %v5270_v4 }
 0x4bc   : > { %v9837_v59 = vpack.i.bf16 %v13267_v44, %v13360_v22  ;;  %v9842_v28 = vpack.i.bf16 %v13281_v26, %v13365_v54  ;;  %v5436_v45 = vsel %vm1980_vm11, %v13044_v60, %v9800_v23 }
 0x4bd   : > { %4140 = vst.msk [vmem:[%s12735_s24 + $0xa8] sm:$0xff] %vm1980_vm11, %v4108_v1 }
 0x4be   : > { %9838 = vrot.lane.b32.xlu0 %v9837_v59, %s10211_s14  ;;  %9843 = vrot.lane.b32.xlu1 %v9842_v28, %s10208_s27 }
 0x4c0   : > { %v9804_v19 = vpop.permute.xlu1 %9803 }
 0x4c1   : > { %v9806_v8 = vunpack.i.h.bf16 %v9804_v19  ;;  %v9805_v12 = vunpack.i.l.bf16 %v9804_v19 }
 0x4c3   : > { %v9809_v9 = vpop.permute.xlu0 %9808  ;;  %v5444_v13 = vsel %vm3405_vm13, %v5436_v45, %v9805_v12  ;;  %v5420_v3 = vsel %vm3405_vm13, %v5412_v61, %v9806_v8 }
 0x4c4   : > { %v9811_v39 = vunpack.i.h.bf16 %v9809_v9  ;;  %v9810_v41 = vunpack.i.l.bf16 %v9809_v9  ;;  %v13400_v28 = vpop.permute.xlu1 %9813 }
 0x4c5   : > { %v9815_v45 = vunpack.i.l.bf16 %v13400_v28 }
 0x4c6   : > { %v5452_v40 = vsel %vm3438_vm14, %v5444_v13, %v9810_v41  ;;  %v5428_v16 = vsel %vm3438_vm14, %v5420_v3, %v9811_v39  ;;  %v9816_v41 = vunpack.i.h.bf16 %v13400_v28 }
 0x4c7   : > { %5550 = vmatprep.mubr.f32.mxu0 %v5452_v40 }
 0x4c8   : > { %5551 = vmatmul.mubr.f32.gmra.mrb[34].mxu0 %v5428_v16 }
 0x4dc   : > { %v3813_v35 = vpop.f32.mrb[76].mxu1 }
 0x4dd   : > { %v3814_v60 = vadd.f32 %v13124_v21, %v3813_v35  ;;  %v3815_v0 = vpop.f32.mrb[77].mxu1 }
 0x4df   : > { %v4039_v29 = vadd.f32 %v13193_v47, %v3814_v60  ;;  %v4184_v47 = vsel %vm1980_vm11, %v4108_v1, -inf }
 0x4e0   : > { %v3818_v49 = vpop.f32.mrb[78].mxu1 }
 0x4e1   : > { %v4109_v57 = vmax.f32 %v4039_v29, 0.0  ;;  %v3819_v11 = vadd.f32 %v13124_v21, %v3818_v49  ;;  %v3820_v52 = vpop.f32.mrb[79].mxu1 }
 0x4e3   : > { %4141 = vst.msk [vmem:[%s12735_s24 + $0xb0] sm:$0xff] %vm1980_vm11, %v4109_v57  ;;  %v4182_v34 = vsel %vm1980_vm11, %v4109_v57, -inf  ;;  %v4044_v5 = vadd.f32 %v13188_v37, %v3819_v11 }
 0x4e4   : > { %v4183_v20 = vmax.f32 %v4181_v2, %v4182_v34 }
 0x4e5   : > { %v4110_v14 = vmax.f32 %v4044_v5, 0.0 }
 0x4e6   : > { %v4385_v15 = vcombine.high %v4183_v20, %v4183_v20  ;;  %v4392_v27 = vrot.slane %v4183_v20, %v12768_v31 }
 0x4e7   : > { %4142 = vst.msk [vmem:[%s12735_s24 + $0xb8] sm:$0xff] %vm1980_vm11, %v4110_v14  ;;  %v4185_v30 = vsel %vm1980_vm11, %v4110_v14, -inf }
 0x4e8   : > { %v4399_v4 = vrot.slane %v4385_v15, %v12768_v31  ;;  %v4400_v58 = vcombine.high %v4392_v27, %v4392_v27  ;;  %v4832_v7 = vsel %vm4551_vm15, %v4392_v27, -inf  ;;  %v4186_v59 = vmax.f32 %v4184_v47, %v4185_v30 }
 0x4e9   : > { %v4833_v37 = vrot.slane %v4832_v7, 4 }
 0x4ea   : > { %v4401_v48 = vcombine.high %v4399_v4, %v4399_v4  ;;  %v4839_v23 = vsel %vm4551_vm15, %v4400_v58, -inf  ;;  %v4846_v19 = vsel %vm4551_vm15, %v4399_v4, -inf  ;;  %v4402_v8 = vcombine.high %v4186_v59, %v4186_v59 }
 0x4eb   : > { %v4834_v1 = vmax.f32 %v4832_v7, %v4833_v37  ;;  %v4840_v12 = vrot.slane %v4839_v23, 4  ;;  %v4847_v9 = vrot.slane %v4846_v19, 4  ;;  %v4409_v39 = vrot.slane %v4186_v59, %v12768_v31 }
 0x4ec   : > { %v4853_v61 = vsel %vm4551_vm15, %v4401_v48, -inf  ;;  %v4416_v13 = vrot.slane %v4402_v8, %v12768_v31 }
 0x4ed   : > { %v4835_v3 = vrot.slane %v4834_v1, 2  ;;  %v4841_v40 = vmax.f32 %v4839_v23, %v4840_v12  ;;  %v4848_v16 = vmax.f32 %v4846_v19, %v4847_v9  ;;  %v4854_v35 = vrot.slane %v4853_v61, 4  ;;  %v9819_v28 = vpop.permute.xlu0 %9818 }
 0x4ee   : > { %v4417_v60 = vcombine.high %v4409_v39, %v4409_v39  ;;  %v4418_v0 = vcombine.high %v4416_v13, %v4416_v13  ;;  %v4860_v29 = vsel %vm4551_vm15, %v4409_v39, -inf  ;;  %v4874_v49 = vsel %vm4551_vm15, %v4416_v13, -inf }
 0x4ef   : > { %v4836_v57 = vmax.f32 %v4834_v1, %v4835_v3  ;;  %v4842_v11 = vrot.slane %v4841_v40, 2  ;;  %v4849_v52 = vrot.slane %v4848_v16, 2  ;;  %v4855_v2 = vmax.f32 %v4853_v61, %v4854_v35 }
 0x4f0   : > { %v4861_v34 = vrot.slane %v4860_v29, 4  ;;  %v4867_v5 = vsel %vm4551_vm15, %v4417_v60, -inf  ;;  %v4875_v20 = vrot.slane %v4874_v49, 4  ;;  %v4881_v14 = vsel %vm4551_vm15, %v4418_v0, -inf  ;;  %v9824_v39 = vpop.permute.xlu1 %9823 }
 0x4f1   : > { %v4837_v15 = vrot.slane %v4836_v57, 1  ;;  %v4843_v27 = vmax.f32 %v4841_v40, %v4842_v11  ;;  %v4850_v47 = vmax.f32 %v4848_v16, %v4849_v52  ;;  %v4856_v30 = vrot.slane %v4855_v2, 2 }
 0x4f2   : > { %v4862_v4 = vmax.f32 %v4860_v29, %v4861_v34  ;;  %v4868_v58 = vrot.slane %v4867_v5, 4  ;;  %v4876_v7 = vmax.f32 %v4874_v49, %v4875_v20  ;;  %v4882_v59 = vrot.slane %v4881_v14, 4 }
 0x4f3   : > { %v4838_v37 = vmax.f32 %v4836_v57, %v4837_v15  ;;  %v4844_v48 = vrot.slane %v4843_v27, 1  ;;  %v4851_v23 = vrot.slane %v4850_v47, 1  ;;  %v4857_v19 = vmax.f32 %v4855_v2, %v4856_v30 }
 0x4f4   : > { %v4863_v8 = vrot.slane %v4862_v4, 2  ;;  %v4869_v1 = vmax.f32 %v4867_v5, %v4868_v58  ;;  %v4877_v12 = vrot.slane %v4876_v7, 2  ;;  %v4883_v9 = vmax.f32 %v4881_v14, %v4882_v59 }
 0x4f5   : > { %v4845_v61 = vmax.f32 %v4843_v27, %v4844_v48  ;;  %v4852_v13 = vmax.f32 %v4850_v47, %v4851_v23  ;;  %v4858_v3 = vrot.slane %v4857_v19, 1  ;;  %v9821_v40 = vunpack.i.h.bf16 %v9819_v28 }
 0x4f6   : > { %v4864_v16 = vmax.f32 %v4862_v4, %v4863_v8  ;;  %v4870_v35 = vrot.slane %v4869_v1, 2  ;;  %v4878_v60 = vmax.f32 %v4876_v7, %v4877_v12  ;;  %v4884_v0 = vrot.slane %v4883_v9, 2 }
 0x4f7   : > { %v4859_v29 = vmax.f32 %v4857_v19, %v4858_v3  ;;  %v5143_v49 = vsel %vm5101_vm3, %v4845_v61, %v4838_v37  ;;  %v9820_v57 = vunpack.i.l.bf16 %v9819_v28  ;;  %v9826_v11 = vunpack.i.h.bf16 %v9824_v39 }
 0x4f8   : > { %v5144_v52 = vsel %vm5103_vm4, %v4852_v13, %v5143_v49  ;;  %v4865_v2 = vrot.slane %v4864_v16, 1  ;;  %v4871_v34 = vmax.f32 %v4869_v1, %v4870_v35  ;;  %v4879_v5 = vrot.slane %v4878_v60, 1 }
 0x4f9   : > { %v4885_v20 = vmax.f32 %v4883_v9, %v4884_v0  ;;  %v5145_v14 = vsel %vm5105_vm5, %v4859_v29, %v5144_v52  ;;  %v9825_v15 = vunpack.i.l.bf16 %v9824_v39  ;;  %v5437_v30 = vsel %vm1980_vm11, %v13107_v25, %v9815_v45 }
 0x4fa   : > { %v4866_v27 = vmax.f32 %v4864_v16, %v4865_v2  ;;  %v4872_v47 = vrot.slane %v4871_v34, 1  ;;  %v5413_v4 = vsel %vm1980_vm11, %v13012_v53, %v9816_v41  ;;  %v4880_v58 = vmax.f32 %v4878_v60, %v4879_v5  ;;  %v13460_v5 = vld [vmem:[%s14503_s4] ss:$0 sm:$0xff] }
 0x4fb   : > { %v4886_v7 = vrot.slane %v4885_v20, 1  ;;  %v5445_v59 = vsel %vm3405_vm13, %v5437_v30, %v9820_v57  ;;  %v5421_v28 = vsel %vm3405_vm13, %v5413_v4, %v9821_v40 }
 0x4fc   : > { %v4873_v37 = vmax.f32 %v4871_v34, %v4872_v47  ;;  %v5146_v48 = vsel %vm5107_vm6, %v4866_v27, %v5145_v14  ;;  %v3823_v23 = vpop.f32.mrb[80].mxu1  ;;  %v5453_v19 = vsel %vm3438_vm14, %v5445_v59, %v9825_v15  ;;  %v5429_v8 = vsel %vm3438_vm14, %v5421_v28, %v9826_v11 }
 0x4fd   : > { %v4887_v1 = vmax.f32 %v4885_v20, %v4886_v7  ;;  %v3824_v25 = vadd.f32 %v13124_v21, %v3823_v23  ;;  %v3825_v45 = vpop.f32.mrb[81].mxu1  ;;  %5555 = vmatprep.mubr.f32.mxu0 %v5453_v19 }
 0x4fe   : > { %5556 = vmatmul.mubr.f32.gmra.mrb[36].mxu0 %v5429_v8  ;;  %v5147_v53 = vsel %vm5109_vm7, %v4873_v37, %v5146_v48  ;;  %v13470_v48 = vpop.permute.xlu0 %9828 }
 0x4ff   : > { %v4049_v41 = vadd.f32 %v13278_v17, %v3824_v25  ;;  %v5148_v12 = vsel %vm5111_vm8, %v4880_v58, %v5147_v53 }
 0x500   : > { %v3828_v9 = vpop.f32.mrb[82].mxu1  ;;  %v5149_v39 = vsel %vm5113_vm9, %v4887_v1, %v5148_v12 }
 0x501   : > { %v4111_v61 = vmax.f32 %v4049_v41, 0.0  ;;  %v3829_v13 = vadd.f32 %v13124_v21, %v3828_v9  ;;  %v3830_v3 = vpop.f32.mrb[83].mxu1  ;;  %v5169_v40 = vrot.slane %v5149_v39, 7 }
 0x503   : > { %4143 = vst.msk [vmem:[%s12735_s24 + $0xc0] sm:$0xff] %vm1980_vm11, %v4111_v61  ;;  %v4054_v16 = vadd.f32 %v13275_v6, %v3829_v13  ;;  %v13435_v35 = vsel %vm641_vm0, 0.0, %v5169_v40  ;;  %v5193_v17 = vsel %vm641_vm0, %v5169_v40, 0.0  ;;  %v4187_v58 = vsel %vm1980_vm11, %v4111_v61, -inf }
 0x504   : > { %v9847_v60 = vpack.i.bf16 %v13286_v55, %v13435_v35  ;;  %v5226_v0 = vrot.slane %v13435_v35, 1  ;;  %v5227_v29 = vrot.slane %v5193_v17, 1  ;;  %v5272_v49 = vrot.slane %v13435_v35, 2 }
 0x505   : > { %v4112_v21 = vmax.f32 %v4054_v16, 0.0  ;;  %v5273_v57 = vrot.slane %v5193_v17, 2 }
 0x506   : > { %9848 = vrot.lane.b32.xlu0 %v9847_v60, %s14557_s18  ;;  %v13444_v11 = vsel %vm807_vm1, %v5226_v0, %v5227_v29  ;;  %v9830_v60 = vunpack.i.l.bf16 %v13470_v48 }
 0x507   : > { %4144 = vst.msk [vmem:[%s12735_s24 + $0xc8] sm:$0xff] %vm1980_vm11, %v4112_v21  ;;  %v9852_v6 = vpack.i.bf16 %v13350_v63, %v13444_v11  ;;  %v13451_v52 = vsel %vm984_vm2, %v5272_v49, %v5273_v57  ;;  %v4190_v19 = vsel %vm1980_vm11, %v4112_v21, -inf }
 0x508   : > { %v9857_v2 = vpack.i.bf16 %v13360_v22, %v13451_v52 }
 0x509   : > { %9853 = vrot.lane.b32.xlu1 %v9852_v6, %s10211_s14 }
 0x50a   : > { %9858 = vrot.lane.b32.xlu0 %v9857_v2, %s10208_s27 }
 0x51c   : > { %v3833_v34 = vpop.f32.mrb[84].mxu1 }
 0x51d   : > { %v3834_v20 = vadd.f32 %v13460_v5, %v3833_v34  ;;  %v3835_v14 = vpop.f32.mrb[85].mxu1 }
 0x51f   : > { %v4059_v15 = vadd.f32 %v13305_v38, %v3834_v20 }
 0x520   : > { %v3838_v27 = vpop.f32.mrb[86].mxu1 }
 0x521   : > { %v4113_v47 = vmax.f32 %v4059_v15, 0.0  ;;  %v3839_v30 = vadd.f32 %v13460_v5, %v3838_v27  ;;  %v3840_v4 = vpop.f32.mrb[87].mxu1 }
 0x523   : > { %4145 = vst.msk [vmem:[%s12735_s24 + $0xd0] sm:$0xff] %vm1980_vm11, %v4113_v47  ;;  %v4188_v7 = vsel %vm1980_vm11, %v4113_v47, -inf  ;;  %v4064_v59 = vadd.f32 %v13302_v46, %v3839_v30  ;;  %v9831_v46 = vunpack.i.h.bf16 %v13470_v48 }
 0x524   : > { %v4189_v28 = vmax.f32 %v4187_v58, %v4188_v7 }
 0x525   : > { %v4114_v37 = vmax.f32 %v4064_v59, 0.0 }
 0x526   : > { %v4419_v23 = vcombine.high %v4189_v28, %v4189_v28  ;;  %v4426_v38 = vrot.slane %v4189_v28, %v12768_v31 }
 0x527   : > { %4146 = vst.msk [vmem:[%s12735_s24 + $0xd8] sm:$0xff] %vm1980_vm11, %v4114_v37  ;;  %v4191_v8 = vsel %vm1980_vm11, %v4114_v37, -inf }
 0x528   : > { %v4433_v1 = vrot.slane %v4419_v23, %v12768_v31  ;;  %v4434_v25 = vcombine.high %v4426_v38, %v4426_v38  ;;  %v4888_v45 = vsel %vm4551_vm15, %v4426_v38, -inf  ;;  %v4192_v53 = vmax.f32 %v4190_v19, %v4191_v8 }
 0x529   : > { %v4889_v41 = vrot.slane %v4888_v45, 4 }
 0x52a   : > { %v4435_v12 = vcombine.high %v4433_v1, %v4433_v1  ;;  %v4895_v9 = vsel %vm4551_vm15, %v4434_v25, -inf  ;;  %v4902_v39 = vsel %vm4551_vm15, %v4433_v1, -inf  ;;  %v4436_v61 = vcombine.high %v4192_v53, %v4192_v53 }
 0x52b   : > { %v4890_v13 = vmax.f32 %v4888_v45, %v4889_v41  ;;  %v4896_v3 = vrot.slane %v4895_v9, 4  ;;  %v4903_v40 = vrot.slane %v4902_v39, 4  ;;  %v4443_v16 = vrot.slane %v4192_v53, %v12768_v31  ;;  %v3843_v17 = vpop.f32.mrb[88].mxu1 }
 0x52c   : > { %v4909_v0 = vsel %vm4551_vm15, %v4435_v12, -inf  ;;  %v4450_v29 = vrot.slane %v4436_v61, %v12768_v31  ;;  %v3844_v49 = vadd.f32 %v13460_v5, %v3843_v17  ;;  %v3845_v21 = vpop.f32.mrb[89].mxu1 }
 0x52d   : > { %v4891_v57 = vrot.slane %v4890_v13, 2  ;;  %v4897_v6 = vmax.f32 %v4895_v9, %v4896_v3  ;;  %v4904_v2 = vmax.f32 %v4902_v39, %v4903_v40  ;;  %v4910_v34 = vrot.slane %v4909_v0, 4  ;;  %v9834_v9 = vpop.permute.xlu1 %9833 }
 0x52e   : > { %v4451_v20 = vcombine.high %v4443_v16, %v4443_v16  ;;  %v4452_v14 = vcombine.high %v4450_v29, %v4450_v29  ;;  %v4916_v15 = vsel %vm4551_vm15, %v4443_v16, -inf  ;;  %v4930_v27 = vsel %vm4551_vm15, %v4450_v29, -inf }
 0x52f   : > { %v4892_v47 = vmax.f32 %v4890_v13, %v4891_v57  ;;  %v4898_v30 = vrot.slane %v4897_v6, 2  ;;  %v4905_v4 = vrot.slane %v4904_v2, 2  ;;  %v4911_v58 = vmax.f32 %v4909_v0, %v4910_v34 }
 0x530   : > { %v4917_v7 = vrot.slane %v4916_v15, 4  ;;  %v4923_v59 = vsel %vm4551_vm15, %v4451_v20, -inf  ;;  %v4931_v28 = vrot.slane %v4930_v27, 4  ;;  %v4937_v37 = vsel %vm4551_vm15, %v4452_v14, -inf  ;;  %v3848_v23 = vpop.f32.mrb[90].mxu1 }
 0x531   : > { %v4893_v38 = vrot.slane %v4892_v47, 1  ;;  %v4899_v19 = vmax.f32 %v4897_v6, %v4898_v30  ;;  %v4906_v8 = vmax.f32 %v4904_v2, %v4905_v4  ;;  %v4912_v1 = vrot.slane %v4911_v58, 2  ;;  %v3850_v25 = vpop.f32.mrb[91].mxu1 }
 0x532   : > { %v4918_v45 = vmax.f32 %v4916_v15, %v4917_v7  ;;  %v4924_v53 = vrot.slane %v4923_v59, 4  ;;  %v4932_v41 = vmax.f32 %v4930_v27, %v4931_v28  ;;  %v4938_v12 = vrot.slane %v4937_v37, 4  ;;  %v9839_v15 = vpop.permute.xlu0 %9838 }
 0x533   : > { %v4894_v39 = vmax.f32 %v4892_v47, %v4893_v38  ;;  %v4900_v61 = vrot.slane %v4899_v19, 1  ;;  %v4907_v13 = vrot.slane %v4906_v8, 1  ;;  %v4913_v3 = vmax.f32 %v4911_v58, %v4912_v1 }
 0x534   : > { %v4919_v40 = vrot.slane %v4918_v45, 2  ;;  %v4925_v16 = vmax.f32 %v4923_v59, %v4924_v53  ;;  %v4933_v17 = vrot.slane %v4932_v41, 2  ;;  %v4939_v0 = vmax.f32 %v4937_v37, %v4938_v12 }
 0x535   : > { %v4901_v29 = vmax.f32 %v4899_v19, %v4900_v61  ;;  %v4908_v21 = vmax.f32 %v4906_v8, %v4907_v13  ;;  %v4914_v57 = vrot.slane %v4913_v3, 1  ;;  %v9836_v6 = vunpack.i.h.bf16 %v9834_v9 }
 0x536   : > { %v4920_v2 = vmax.f32 %v4918_v45, %v4919_v40  ;;  %v4926_v34 = vrot.slane %v4925_v16, 2  ;;  %v4934_v20 = vmax.f32 %v4932_v41, %v4933_v17  ;;  %v4940_v14 = vrot.slane %v4939_v0, 2  ;;  %v5033_v17 = vld [vmem:[#allocation5 + $0x108] sm:$0xff] }
 0x537   : > { %v4915_v27 = vmax.f32 %v4913_v3, %v4914_v57  ;;  %v5150_v30 = vsel %vm5101_vm3, %v4901_v29, %v4894_v39  ;;  %v9835_v47 = vunpack.i.l.bf16 %v9834_v9  ;;  %v13493_v4 = vadd.f32 %v13337_v10, %v3844_v49 }
 0x538   : > { %v5151_v58 = vsel %vm5103_vm4, %v4908_v21, %v5150_v30  ;;  %v4921_v7 = vrot.slane %v4920_v2, 1  ;;  %v4927_v59 = vmax.f32 %v4925_v16, %v4926_v34  ;;  %v4935_v28 = vrot.slane %v4934_v20, 1  ;;  %v5032_v16 = vld [vmem:[#allocation5 + $0x100] sm:$0xff] }
 0x539   : > { %v4941_v37 = vmax.f32 %v4939_v0, %v4940_v14  ;;  %v5152_v38 = vsel %vm5105_vm5, %v4915_v27, %v5151_v58  ;;  %v4115_v19 = vmax.f32 %v13493_v4, 0.0  ;;  %v9841_v8 = vunpack.i.h.bf16 %v9839_v15 }
 0x53a   : > { %v4922_v1 = vmax.f32 %v4920_v2, %v4921_v7  ;;  %v4928_v25 = vrot.slane %v4927_v59, 1  ;;  %v9840_v45 = vunpack.i.l.bf16 %v9839_v15  ;;  %v5414_v10 = vsel %vm1980_vm11, %v13097_v24, %v9831_v46 }
 0x53b   : > { %v4936_v49 = vmax.f32 %v4934_v20, %v4935_v28  ;;  %v4942_v53 = vrot.slane %v4941_v37, 1  ;;  %4147 = vst.msk [vmem:[%s12735_s24 + $0xe0] sm:$0xff] %vm1980_vm11, %v4115_v19  ;;  %v3849_v41 = vadd.f32 %v13460_v5, %v3848_v23  ;;  %v5438_v12 = vsel %vm1980_vm11, %v13281_v26, %v9830_v60 }
 0x53c   : > { %v4929_v9 = vmax.f32 %v4927_v59, %v4928_v25  ;;  %v5153_v39 = vsel %vm5107_vm6, %v4922_v1, %v5152_v38  ;;  %v5446_v61 = vsel %vm3405_vm13, %v5438_v12, %v9835_v47  ;;  %v5422_v13 = vsel %vm3405_vm13, %v5414_v10, %v9836_v6 }
 0x53d   : > { %v4943_v24 = vmax.f32 %v4941_v37, %v4942_v53  ;;  %v4074_v46 = vadd.f32 %v13332_v62, %v3849_v41  ;;  %v5454_v3 = vsel %vm3438_vm14, %v5446_v61, %v9840_v45  ;;  %v5430_v23 = vsel %vm3438_vm14, %v5422_v13, %v9841_v8  ;;  %v5034_v61 = vld [vmem:[#allocation5 + $0x110] sm:$0xff] }
 0x53e   : > { %5560 = vmatprep.mubr.f32.mxu0 %v5454_v3  ;;  %v5154_v48 = vsel %vm5109_vm7, %v4929_v9, %v5153_v39  ;;  %v8843_v29 = vpack.c.bf16 %v5033_v17, %v5032_v16  ;;  %v4193_v8 = vsel %vm1980_vm11, %v4115_v19, -inf }
 0x53f   : > { %v4116_v40 = vmax.f32 %v4074_v46, 0.0  ;;  %5561 = vmatmul.mubr.f32.gmra.mrb[38].mxu0 %v5430_v23  ;;  %v5155_v26 = vsel %vm5111_vm8, %v4936_v49, %v5154_v48 }
 0x540   : > { %v5156_v60 = vsel %vm5113_vm9, %v4943_v24, %v5155_v26  ;;  %8844 = vmatprep.subr.bf16.mxu0 %v8843_v29 }
 0x541   : > { %4148 = vst.msk [vmem:[%s12735_s24 + $0xe8] sm:$0xff] %vm1980_vm11, %v4116_v40  ;;  %v5170_v0 = vrot.slane %v5156_v60, 7  ;;  %8846 = vmatpush3.bf16.msra.mxu0 %v8843_v29  ;;  %v4196_v53 = vsel %vm1980_vm11, %v4116_v40, -inf }
 0x543   : > { %v13521_v62 = vsel %vm641_vm0, 0.0, %v5170_v0  ;;  %v5194_v21 = vsel %vm641_vm0, %v5170_v0, 0.0 }
 0x544   : > { %v9862_v57 = vpack.i.bf16 %v13365_v54, %v13521_v62  ;;  %v5229_v6 = vrot.slane %v13521_v62, 1  ;;  %v5230_v2 = vrot.slane %v5194_v21, 1  ;;  %v5275_v34 = vrot.slane %v13521_v62, 2 }
 0x545   : > { %v5276_v20 = vrot.slane %v5194_v21, 2  ;;  %v3853_v14 = vpop.f32.mrb[92].mxu1 }
 0x546   : > { %9863 = vrot.lane.b32.xlu1 %v9862_v57, %s14557_s18  ;;  %v13530_v15 = vsel %vm807_vm1, %v5229_v6, %v5230_v2  ;;  %v3854_v27 = vadd.f32 %v13460_v5, %v3853_v14  ;;  %v3855_v30 = vpop.f32.mrb[93].mxu1 }
 0x547   : > { %v9867_v47 = vpack.i.bf16 %v13435_v35, %v13530_v15  ;;  %v13536_v4 = vsel %vm984_vm2, %v5275_v34, %v5276_v20 }
 0x548   : > { %v9872_v58 = vpack.i.bf16 %v13444_v11, %v13536_v4  ;;  %v4079_v7 = vadd.f32 %v13383_v50, %v3854_v27 }
 0x549   : > { %9868 = vrot.lane.b32.xlu0 %v9867_v47, %s10211_s14  ;;  %v3858_v59 = vpop.f32.mrb[94].mxu1 }
 0x54a   : > { %9873 = vrot.lane.b32.xlu1 %v9872_v58, %s10208_s27  ;;  %v4117_v28 = vmax.f32 %v4079_v7, 0.0  ;;  %v3859_v37 = vadd.f32 %v13460_v5, %v3858_v59  ;;  %v3860_v38 = vpop.f32.mrb[95].mxu1 }
 0x54c   : > { %4149 = vst.msk [vmem:[%s12735_s24 + $0xf0] sm:$0xff] %vm1980_vm11, %v4117_v28  ;;  %v4194_v1 = vsel %vm1980_vm11, %v4117_v28, -inf  ;;  %v4084_v25 = vadd.f32 %v13381_v36, %v3859_v37  ;;  %v5035_v36 = vld [vmem:[#allocation5 + $0x118] sm:$0xff] }
 0x54d   : > { %v4195_v45 = vmax.f32 %v4193_v8, %v4194_v1  ;;  %v8847_v17 = vpack.c.bf16 %v5035_v36, %v5034_v61 }
 0x54e   : > { %v4118_v50 = vmax.f32 %v4084_v25, 0.0 }
 0x54f   : > { %v4453_v10 = vcombine.high %v4195_v45, %v4195_v45  ;;  %v4460_v49 = vrot.slane %v4195_v45, %v12768_v31  ;;  %8848 = vmatprep.subr.bf16.mxu0 %v8847_v17 }
 0x550   : > { %4150 = vst.msk [vmem:[%s12735_s24 + $0xf8] sm:$0xff] %vm1980_vm11, %v4118_v50  ;;  %v4197_v5 = vsel %vm1980_vm11, %v4118_v50, -inf  ;;  %8850 = vmatpush3.bf16.msra.mxu0 %v8847_v17 }
 0x551   : > { %v4467_v41 = vrot.slane %v4453_v10, %v12768_v31  ;;  %v4468_v12 = vcombine.high %v4460_v49, %v4460_v49  ;;  %v4944_v19 = vsel %vm4551_vm15, %v4460_v49, -inf  ;;  %v4198_v9 = vmax.f32 %v4196_v53, %v4197_v5 }
 0x552   : > { %v4945_v39 = vrot.slane %v4944_v19, 4 }
 0x553   : > { %v4469_v13 = vcombine.high %v4467_v41, %v4467_v41  ;;  %v4951_v24 = vsel %vm4551_vm15, %v4468_v12, -inf  ;;  %v4958_v46 = vsel %vm4551_vm15, %v4467_v41, -inf  ;;  %v4470_v3 = vcombine.high %v4198_v9, %v4198_v9 }
 0x554   : > { %v4946_v23 = vmax.f32 %v4944_v19, %v4945_v39  ;;  %v4952_v48 = vrot.slane %v4951_v24, 4  ;;  %v4959_v40 = vrot.slane %v4958_v46, 4  ;;  %v4477_v26 = vrot.slane %v4198_v9, %v12768_v31 }
 0x555   : > { %v4965_v60 = vsel %vm4551_vm15, %v4469_v13, -inf  ;;  %v4484_v16 = vrot.slane %v4470_v3, %v12768_v31 }
 0x556   : > { %v4947_v0 = vrot.slane %v4946_v23, 2  ;;  %v4953_v29 = vmax.f32 %v4951_v24, %v4952_v48  ;;  %v4960_v21 = vmax.f32 %v4958_v46, %v4959_v40  ;;  %v4966_v57 = vrot.slane %v4965_v60, 4 }
 0x557   : > { %v4485_v6 = vcombine.high %v4477_v26, %v4477_v26  ;;  %v4486_v2 = vcombine.high %v4484_v16, %v4484_v16  ;;  %v4972_v34 = vsel %vm4551_vm15, %v4477_v26, -inf  ;;  %v4986_v20 = vsel %vm4551_vm15, %v4484_v16, -inf }
 0x558   : > { %v4948_v14 = vmax.f32 %v4946_v23, %v4947_v0  ;;  %v4954_v27 = vrot.slane %v4953_v29, 2  ;;  %v4961_v30 = vrot.slane %v4960_v21, 2  ;;  %v4967_v47 = vmax.f32 %v4965_v60, %v4966_v57 }
 0x559   : > { %v4973_v58 = vrot.slane %v4972_v34, 4  ;;  %v4979_v7 = vsel %vm4551_vm15, %v4485_v6, -inf  ;;  %v4987_v59 = vrot.slane %v4986_v20, 4  ;;  %v4993_v28 = vsel %vm4551_vm15, %v4486_v2, -inf }
 0x55a   : > { %v4949_v37 = vrot.slane %v4948_v14, 1  ;;  %v4955_v38 = vmax.f32 %v4953_v29, %v4954_v27  ;;  %v4962_v8 = vmax.f32 %v4960_v21, %v4961_v30  ;;  %v4968_v1 = vrot.slane %v4967_v47, 2 }
 0x55b   : > { %v4974_v25 = vmax.f32 %v4972_v34, %v4973_v58  ;;  %v4980_v45 = vrot.slane %v4979_v7, 4  ;;  %v4988_v50 = vmax.f32 %v4986_v20, %v4987_v59  ;;  %v4994_v10 = vrot.slane %v4993_v28, 4 }
 0x55c   : > { %v4956_v49 = vrot.slane %v4955_v38, 1  ;;  %v4963_v53 = vrot.slane %v4962_v8, 1  ;;  %v4969_v5 = vmax.f32 %v4967_v47, %v4968_v1  ;;  %v4950_v39 = vmax.f32 %v4948_v14, %v4949_v37 }
 0x55d   : > { %v4975_v41 = vrot.slane %v4974_v25, 2  ;;  %v4981_v12 = vmax.f32 %v4979_v7, %v4980_v45  ;;  %v4989_v19 = vrot.slane %v4988_v50, 2  ;;  %v4995_v9 = vmax.f32 %v4993_v28, %v4994_v10 }
 0x55e   : > { %v4957_v61 = vmax.f32 %v4955_v38, %v4956_v49  ;;  %v4964_v36 = vmax.f32 %v4962_v8, %v4963_v53  ;;  %v4970_v13 = vrot.slane %v4969_v5, 1  ;;  %v9844_v49 = vpop.permute.xlu1 %9843 }
 0x55f   : > { %v4976_v24 = vmax.f32 %v4974_v25, %v4975_v41  ;;  %v4982_v46 = vrot.slane %v4981_v12, 2  ;;  %v4990_v3 = vmax.f32 %v4988_v50, %v4989_v19  ;;  %v4996_v23 = vrot.slane %v4995_v9, 2 }
 0x560   : > { %v4971_v48 = vmax.f32 %v4969_v5, %v4970_v13  ;;  %v5157_v40 = vsel %vm5101_vm3, %v4957_v61, %v4950_v39  ;;  %v9846_v5 = vunpack.i.h.bf16 %v9844_v49  ;;  %v9845_v41 = vunpack.i.l.bf16 %v9844_v49 }
 0x561   : > { %v5158_v26 = vsel %vm5103_vm4, %v4964_v36, %v5157_v40  ;;  %v4977_v60 = vrot.slane %v4976_v24, 1  ;;  %v4983_v16 = vmax.f32 %v4981_v12, %v4982_v46  ;;  %v4991_v17 = vrot.slane %v4990_v3, 1 }
 0x562   : > { %v5159_v0 = vsel %vm5105_vm5, %v4971_v48, %v5158_v26  ;;  %v4997_v29 = vmax.f32 %v4995_v9, %v4996_v23  ;;  %v5439_v13 = vsel %vm1980_vm11, %v13360_v22, %v9845_v41 }
 0x563   : > { %v4978_v21 = vmax.f32 %v4976_v24, %v4977_v60  ;;  %v4984_v57 = vrot.slane %v4983_v16, 1  ;;  %v4992_v6 = vmax.f32 %v4990_v3, %v4991_v17  ;;  %v5415_v24 = vsel %vm1980_vm11, %v13267_v44, %v9846_v5 }
 0x564   : > { %v4998_v2 = vrot.slane %v4997_v29, 1 }
 0x565   : > { %v4985_v34 = vmax.f32 %v4983_v16, %v4984_v57  ;;  %v5160_v20 = vsel %vm5107_vm6, %v4978_v21, %v5159_v0 }
 0x566   : > { %v4999_v14 = vmax.f32 %v4997_v29, %v4998_v2 }
 0x567   : > { %v5161_v27 = vsel %vm5109_vm7, %v4985_v34, %v5160_v20 }
 0x568   : > { %v5162_v30 = vsel %vm5111_vm8, %v4992_v6, %v5161_v27 }
 0x569   : > { %v5163_v47 = vsel %vm5113_vm9, %v4999_v14, %v5162_v30 }
 0x56a   : > { %v5171_v58 = vrot.slane %v5163_v47, 7 }
 0x56c   : > { %v5187_v7 = vsel %vm641_vm0, 0.0, %v5171_v58  ;;  %v5195_v59 = vsel %vm641_vm0, %v5171_v58, 0.0 }
 0x56d   : > { %v9877_v28 = vpack.i.bf16 %v13451_v52, %v5187_v7  ;;  %v5328_v37 = vrot.slane %v5187_v7, 1  ;;  %v5329_v38 = vrot.slane %v5195_v59, 1  ;;  %v5339_v8 = vrot.slane %v5187_v7, 2 }
 0x56e   : > { %v5340_v1 = vrot.slane %v5195_v59, 2  ;;  %v9892_v53 = vpack.i.bf16 %v5187_v7, %v12802_v43 }
 0x56f   : > { %9878 = vrot.lane.b32.xlu0 %v9877_v28, %s14557_s18  ;;  %v13577_v25 = vsel %vm807_vm1, %v5328_v37, %v5329_v38 }
 0x570   : > { %v9882_v45 = vpack.i.bf16 %v13521_v62, %v13577_v25  ;;  %v13582_v50 = vsel %vm984_vm2, %v5339_v8, %v5340_v1 }
 0x571   : > { %v9887_v10 = vpack.i.bf16 %v13530_v15, %v13582_v50 }
 0x572   : > { %9883 = vrot.lane.b32.xlu1 %v9882_v45, %s10211_s14 }
 0x573   : > { %9888 = vrot.lane.b32.xlu0 %v9887_v10, %s10208_s27 }
 0x576   : > { %5292 = vrot.lane.b32.xlu1 %v13536_v4, %s14557_s18 }
 0x577   : > { %9893 = vrot.lane.b32.xlu0 %v9892_v53, %s10211_s14  ;;  %s14633_s14 = sld [smem:[#allocation44_spill]] }
 0x578   : > { %v9849_v12 = vpop.permute.xlu0 %9848 }
 0x579   : > { %v9851_v19 = vunpack.i.h.bf16 %v9849_v12  ;;  %v9850_v9 = vunpack.i.l.bf16 %v9849_v12 }
 0x57b   : > { %v9854_v39 = vpop.permute.xlu1 %9853  ;;  %v5447_v46 = vsel %vm3405_vm13, %v5439_v13, %v9850_v9  ;;  %v5423_v3 = vsel %vm3405_vm13, %v5415_v24, %v9851_v19 }
 0x57c   : > { %v9856_v61 = vunpack.i.h.bf16 %v9854_v39  ;;  %v9855_v36 = vunpack.i.l.bf16 %v9854_v39  ;;  %v9859_v0 = vpop.permute.xlu0 %9858 }
 0x57d   : > { %v9861_v44 = vunpack.i.h.bf16 %v9859_v0  ;;  %v9860_v29 = vunpack.i.l.bf16 %v9859_v0  ;;  %v5767_v0 = vld [vmem:[%s14506_s7 + $0x220] sm:$0xff]  ;;  %s14373_s16 = scalar_lea.hbm %s14633_s14, %s8004_s17 }
 0x57e   : > { %v5455_v23 = vsel %vm3438_vm14, %v5447_v46, %v9855_v36  ;;  %v5431_v48 = vsel %vm3438_vm14, %v5423_v3, %v9856_v61 }
 0x57f   : > { %5565 = vmatprep.mubr.f32.mxu0 %v5455_v23  ;;  %v5440_v14 = vsel %vm1980_vm11, %v13444_v11, %v9860_v29  ;;  %v5416_v27 = vsel %vm1980_vm11, %v13350_v63, %v9861_v44  ;;  %v5768_v44 = vld [vmem:[%s14506_s7 + $0x228] sm:$0xff] }
 0x580   : > { %5566 = vmatmul.mubr.f32.gmra.mrb[40].mxu0 %v5431_v48  ;;  %v8923_v29 = vpack.c.bf16 %v5768_v44, %v5767_v0 }
 0x58d   : > { %v8111_v40 = vpop.f32.mrb[32].mxu0 }
 0x58e   : > { %v8112_v26 = vpop.f32.mrb[33].mxu0 }
 0x58f   : > { %v13600_v60 = vadd.f32 %v8112_v26, %v8111_v40 }
 0x59b   : > { %v8114_v16 = vpop.f32.mrb[34].mxu0 }
 0x59c   : > { %v8115_v17 = vpop.f32.mrb[35].mxu0 }
 0x59d   : > { %v13602_v22 = vadd.f32 %v8115_v17, %v8114_v16 }
 0x5b8   : > { %v9864_v21 = vpop.permute.xlu1 %9863 }
 0x5b9   : > { %v9866_v57 = vunpack.i.h.bf16 %v9864_v21  ;;  %v9865_v6 = vunpack.i.l.bf16 %v9864_v21  ;;  %v5769_v21 = vld [vmem:[%s14506_s7 + $0x230] sm:$0xff] }
 0x5bb   : > { %v9869_v2 = vpop.permute.xlu0 %9868  ;;  %v5448_v30 = vsel %vm3405_vm13, %v5440_v14, %v9865_v6  ;;  %v5424_v47 = vsel %vm3405_vm13, %v5416_v27, %v9866_v57  ;;  %v5770_v57 = vld [vmem:[%s14506_s7 + $0x238] sm:$0xff]  ;;  %v5700_v27 = vld [vmem:[%s14506_s7 + $0x8] sm:$0xff] }
 0x5bc   : > { %v9871_v34 = vunpack.i.h.bf16 %v9869_v2  ;;  %v9870_v20 = vunpack.i.l.bf16 %v9869_v2  ;;  %v9874_v38 = vpop.permute.xlu1 %9873  ;;  %v8927_v6 = vpack.c.bf16 %v5770_v57, %v5769_v21  ;;  %v5715_v2 = vld [vmem:[%s14506_s7 + $0x80] sm:$0xff] }
 0x5bd   : > { %v9876_v8 = vunpack.i.h.bf16 %v9874_v38  ;;  %v9875_v11 = vunpack.i.l.bf16 %v9874_v38  ;;  %v5719_v38 = vld [vmem:[%s14506_s7 + $0xa0] sm:$0xff] }
 0x5be   : > { %v5456_v58 = vsel %vm3438_vm14, %v5448_v30, %v9870_v20  ;;  %v5432_v7 = vsel %vm3438_vm14, %v5424_v47, %v9871_v34  ;;  %v5716_v34 = vld [vmem:[%s14506_s7 + $0x88] sm:$0xff]  ;;  %v5699_v20 = vld [vmem:[%s14506_s7] sm:$0xff]  ;;  %v5717_v30 = vld [vmem:[%s14506_s7 + $0x90] sm:$0xff] }
 0x5bf   : > { %5570 = vmatprep.mubr.f32.mxu0 %v5456_v58  ;;  %v5441_v41 = vsel %vm1980_vm11, %v13530_v15, %v9875_v11  ;;  %v5417_v12 = vsel %vm1980_vm11, %v13435_v35, %v9876_v8  ;;  %v8851_v14 = vpack.c.bf16 %v5716_v34, %v5715_v2  ;;  %v5718_v47 = vld [vmem:[%s14506_s7 + $0x98] sm:$0xff]  ;;  %v8853_v58 = vpack.c.bf16 %v5700_v27, %v5699_v20  ;;  %v5720_v8 = vld [vmem:[%s14506_s7 + $0xa8] sm:$0xff]  ;;  %v7947_v57 = vld [vmem:[%s14505_s6] ss:$0 sm:$0xff] }
 0x5c0   : > { %5571 = vmatmul.mubr.f32.gmra.mrb[42].mxu0 %v5432_v7  ;;  %v8855_v7 = vpack.c.bf16 %v5718_v47, %v5717_v30  ;;  %v5553_v2 = vadd.f32 %v13602_v22, %v7947_v57  ;;  %v5548_v20 = vadd.f32 %v13600_v60, %v7947_v57  ;;  %v5714_v22 = vld [vmem:[%s14506_s7 + $0x78] sm:$0xff] }
 0x5c1   : > { %8852 = vmatprep.subr.bf16.mxu0 %v8851_v14 }
 0x5d1   : > { %v8117_v59 = vpop.f32.mrb[36].mxu0 }
 0x5d2   : > { %v8118_v28 = vpop.f32.mrb[37].mxu0 }
 0x5d3   : > { %v13612_v37 = vadd.f32 %v8118_v28, %v8117_v59  ;;  %v5701_v59 = vld [vmem:[%s14506_s7 + $0x10] sm:$0xff]  ;;  %v5702_v28 = vld [vmem:[%s14506_s7 + $0x18] sm:$0xff] }
 0x5d4   : > { %v8857_v11 = vpack.c.bf16 %v5702_v28, %v5701_v59 }
 0x5d5   : > { %v5558_v28 = vadd.f32 %v13612_v37, %v7947_v57  ;;  %v5747_v37 = vld [vmem:[%s14506_s7 + $0x180] sm:$0xff] }
 0x5e1   : > { %v9879_v1 = vpop.permute.xlu0 %9878 }
 0x5e2   : > { %v9881_v45 = vunpack.i.h.bf16 %v9879_v1  ;;  %v9880_v63 = vunpack.i.l.bf16 %v9879_v1  ;;  %v8859_v1 = vpack.c.bf16 %v5720_v8, %v5719_v38  ;;  %v5713_v38 = vld [vmem:[%s14506_s7 + $0x70] sm:$0xff] }
 0x5e4   : > { %v9884_v10 = vpop.permute.xlu1 %9883  ;;  %v5449_v39 = vsel %vm3405_vm13, %v5441_v41, %v9880_v63  ;;  %v5425_v61 = vsel %vm3405_vm13, %v5417_v12, %v9881_v45  ;;  %v5703_v45 = vld [vmem:[%s14506_s7 + $0x20] sm:$0xff]  ;;  %v5704_v63 = vld [vmem:[%s14506_s7 + $0x28] sm:$0xff]  ;;  %v5705_v41 = vld [vmem:[%s14506_s7 + $0x30] sm:$0xff] }
 0x5e5   : > { %v9886_v49 = vunpack.i.h.bf16 %v9884_v10  ;;  %v9885_v53 = vunpack.i.l.bf16 %v9884_v10  ;;  %v9889_v5 = vpop.permute.xlu0 %9888  ;;  %v5721_v10 = vld [vmem:[%s14506_s7 + $0xb0] sm:$0xff]  ;;  %v5706_v12 = vld [vmem:[%s14506_s7 + $0x38] sm:$0xff] }
 0x5e6   : > { %v9891_v19 = vunpack.i.h.bf16 %v9889_v5  ;;  %v9890_v9 = vunpack.i.l.bf16 %v9889_v5 }
 0x5e7   : > { %v5457_v36 = vsel %vm3438_vm14, %v5449_v39, %v9885_v53  ;;  %v5433_v13 = vsel %vm3438_vm14, %v5425_v61, %v9886_v49  ;;  %v5722_v49 = vld [vmem:[%s14506_s7 + $0xb8] sm:$0xff]  ;;  %v8861_v53 = vpack.c.bf16 %v5704_v63, %v5703_v45  ;;  %v8865_v39 = vpack.c.bf16 %v5706_v12, %v5705_v41 }
 0x5e8   : > { %v5418_v24 = vsel %vm1980_vm11, %v13521_v62, %v9891_v19  ;;  %v5293_v46 = vpop.permute.xlu1 %5292  ;;  %5575 = vmatprep.mubr.f32.mxu0 %v5457_v36  ;;  %v5442_v15 = vsel %vm1980_vm11, %v13577_v25, %v9890_v9  ;;  %v5766_v62 = vld [vmem:[%s14506_s7 + $0x218] sm:$0xff]  ;;  %v8863_v5 = vpack.c.bf16 %v5722_v49, %v5721_v10  ;;  %v5723_v19 = vld [vmem:[%s14506_s7 + $0xc0] sm:$0xff]  ;;  %v5724_v9 = vld [vmem:[%s14506_s7 + $0xc8] sm:$0xff] }
 0x5e9   : > { %v9894_v3 = vpop.permute.xlu0 %9893  ;;  %5576 = vmatmul.mubr.f32.gmra.mrb[44].mxu0 %v5433_v13  ;;  %v5426_v48 = vsel %vm3405_vm13, %v5418_v24, %v5293_v46  ;;  %v5450_v40 = vsel %vm3405_vm13, %v5442_v15, %v9760_v51  ;;  %v5763_v51 = vld [vmem:[%s14506_s7 + $0x200] sm:$0xff]  ;;  %v8867_v61 = vpack.c.bf16 %v5724_v9, %v5723_v19  ;;  %v5708_v13 = vld [vmem:[%s14506_s7 + $0x48] sm:$0xff]  ;;  %v5725_v24 = vld [vmem:[%s14506_s7 + $0xd0] sm:$0xff] }
 0x5ea   : > { %v9896_v35 = vunpack.i.h.bf16 %v9894_v3  ;;  %v9895_v23 = vunpack.i.l.bf16 %v9894_v3  ;;  %v5707_v36 = vld [vmem:[%s14506_s7 + $0x40] sm:$0xff]  ;;  %v5726_v46 = vld [vmem:[%s14506_s7 + $0xd8] sm:$0xff]  ;;  %v5748_v10 = vld [vmem:[%s14506_s7 + $0x188] sm:$0xff] }
 0x5eb   : > { %v8869_v15 = vpack.c.bf16 %v5708_v13, %v5707_v36  ;;  %v8871_v3 = vpack.c.bf16 %v5726_v46, %v5725_v24  ;;  %v8883_v41 = vpack.c.bf16 %v5748_v10, %v5747_v37 }
 0x5ec   : > { %v5458_v26 = vsel %vm3438_vm14, %v5450_v40, %v9895_v23  ;;  %v5434_v16 = vsel %vm3438_vm14, %v5426_v48, %v9896_v35  ;;  %v5709_v35 = vld [vmem:[%s14506_s7 + $0x50] sm:$0xff]  ;;  %v5710_v23 = vld [vmem:[%s14506_s7 + $0x58] sm:$0xff]  ;;  %v5727_v48 = vld [vmem:[%s14506_s7 + $0xe0] sm:$0xff] }
 0x5ed   : > { %5580 = vmatprep.mubr.f32.mxu0 %v5458_v26  ;;  %v5728_v40 = vld [vmem:[%s14506_s7 + $0xe8] sm:$0xff]  ;;  %v8873_v26 = vpack.c.bf16 %v5710_v23, %v5709_v35 }
 0x5ee   : > { %5581 = vmatmul.mubr.f32.gmra.mrb[46].mxu0 %v5434_v16  ;;  %v8875_v16 = vpack.c.bf16 %v5728_v40, %v5727_v48 }
 0x5ef   : > { %8653 = vmatprep.mubr.msk.f32.mxu0 %vm1980_vm11, %v13051_v42 }
 0x5f2   : > { %8654 = vmatmul.mubr.msk.f32.vlgmr.msra.gmra.mrb[48].mxu0 %vm1980_vm11, %v13112_v18 }
 0x5f3   : > { %8656 = vmatprep.mubr.msk.f32.mxu0 %vm1980_vm11, %v13286_v55  ;;  %v5764_v55 = vld [vmem:[%s14506_s7 + $0x208] sm:$0xff]  ;;  %8854 = vmatpush3.bf16.msra.mxu0 %v8853_v58 }
 0x5f4   : > { %8856 = vmatprep.subr.bf16.mxu0 %v8855_v7 }
 0x5f6   : > { %8657 = vmatmul.mubr.msk.f32.gmra.mrb[50].mxu0 %vm1980_vm11, %v13365_v54  ;;  %v8915_v54 = vpack.c.bf16 %v5764_v55, %v5763_v51  ;;  %v5729_v51 = vld [vmem:[%s14506_s7 + $0xf0] sm:$0xff]  ;;  %v5730_v55 = vld [vmem:[%s14506_s7 + $0xf8] sm:$0xff] }
 0x5f7   : > { %8659 = vmatprep.mubr.msk.f32.mxu0 %vm1980_vm11, %v13451_v52  ;;  %v5765_v52 = vld [vmem:[%s14506_s7 + $0x210] sm:$0xff]  ;;  %8858 = vmatpush3.bf16.msra.mxu0 %v8857_v11 }
 0x5f8   : > { %8916 = vmatprep.subr.bf16.mxu1 %v8915_v54  ;;  %v8919_v25 = vpack.c.bf16 %v5766_v62, %v5765_v52  ;;  %8860 = vmatprep.subr.bf16.mxu0 %v8859_v1  ;;  %v8879_v62 = vpack.c.bf16 %v5730_v55, %v5729_v51  ;;  %v8881_v1 = vpack.c.bf16 %v5714_v22, %v5713_v38 }
 0x5f9   : > { %8918 = vmatpush3.bf16.msra.mxu1 %v8915_v54 }
 0x5fa   : > { %8660 = vmatmul.mubr.msk.f32.gmra.mrb[52].mxu0 %vm1980_vm11, %v13536_v4  ;;  %8920 = vmatprep.subr.bf16.mxu1 %v8919_v25 }
 0x5fb   : > { %8662 = vmatprep.mubr.msk.f32.mxu0 %vm1980_vm11, %v13582_v50  ;;  %8862 = vmatpush3.bf16.msra.mxu0 %v8861_v53 }
 0x5fc   : > { %8864 = vmatprep.subr.bf16.mxu0 %v8863_v5 }
 0x5fd   : > { %8922 = vmatpush3.bf16.msra.mxu1 %v8919_v25 }
 0x5fe   : > { %8663 = vmatmul.mubr.msk.f32.gmra.mrb[54].mxu0 %vm1980_vm11, %v12812_v33  ;;  %8924 = vmatprep.subr.bf16.mxu1 %v8923_v29 }
 0x5ff   : > { %8866 = vmatpush3.bf16.msra.mxu0 %v8865_v39 }
 0x600   : > { %8868 = vmatprep.subr.bf16.mxu0 %v8867_v61 }
 0x601   : > { %8926 = vmatpush3.bf16.msra.mxu1 %v8923_v29 }
 0x602   : > { %8928 = vmatprep.subr.bf16.mxu1 %v8927_v6 }
 0x603   : > { %8870 = vmatpush3.bf16.msra.mxu0 %v8869_v15 }
 0x604   : > { %8872 = vmatprep.subr.bf16.mxu0 %v8871_v3 }
 0x605   : > { %8930 = vmatpush3.bf16.msra.mxu1 %v8927_v6 }
 0x607   : > { %8874 = vmatpush3.bf16.msra.mxu0 %v8873_v26 }
 0x608   : > { %8876 = vmatprep.subr.bf16.mxu0 %v8875_v16 }
 0x612   : > { %v8120_v42 = vpop.f32.mrb[38].mxu0 }
 0x613   : > { %v8121_v18 = vpop.f32.mrb[39].mxu0 }
 0x614   : > { %v13648_v32 = vadd.f32 %v8121_v18, %v8120_v42  ;;  %v5711_v42 = vld [vmem:[%s14506_s7 + $0x60] sm:$0xff]  ;;  %v5712_v18 = vld [vmem:[%s14506_s7 + $0x68] sm:$0xff] }
 0x615   : > { %v8877_v54 = vpack.c.bf16 %v5712_v18, %v5711_v42 }
 0x616   : > { %v5563_v58 = vadd.f32 %v13648_v32, %v7947_v57 }
 0x617   : > { %8878 = vmatpush3.bf16.msra.mxu0 %v8877_v54 }
 0x618   : > { %8880 = vmatprep.subr.bf16.mxu0 %v8879_v62 }
 0x61b   : > { %8882 = vmatpush3.bf16.msra.mxu0 %v8881_v1 }
 0x61c   : > { %8884 = vmatprep.subr.bf16.mxu0 %v8883_v41 }
 0x653   : > { %v8123_v4 = vpop.f32.mrb[40].mxu0 }
 0x654   : > { %v8124_v50 = vpop.f32.mrb[41].mxu0 }
 0x655   : > { %v13662_v17 = vadd.f32 %v8124_v50, %v8123_v4 }
 0x657   : > { %v5568_v32 = vadd.f32 %v13662_v17, %v7947_v57 }
 0x693   : > { %v8126_v52 = vpop.f32.mrb[42].mxu0 }
 0x694   : > { %v8127_v4 = vpop.f32.mrb[43].mxu0 }
 0x695   : > { %v8128_v25 = vadd.f32 %v8127_v4, %v8126_v52 }
 0x697   : > { %v5573_v19 = vadd.f32 %v8128_v25, %v7947_v57 }
 0x6bc   : > { %v8129_v50 = vpop.f32.mrb[44].mxu0 }
 0x6bd   : > { %v8130_v0 = vpop.f32.mrb[45].mxu0 }
 0x6be   : > { %v8131_v44 = vadd.f32 %v8130_v0, %v8129_v50 }
 0x6c0   : > { %v5578_v39 = vadd.f32 %v8131_v44, %v7947_v57 }
 0x6c1   : > { %v8132_v29 = vpop.f32.mrb[46].mxu0 }
 0x6c2   : > { %v8133_v21 = vpop.f32.mrb[47].mxu0 }
 0x6c3   : > { %v8134_v6 = vadd.f32 %v8133_v21, %v8132_v29 }
 0x6c5   : > { %v8655_v34 = vpop.f32.mrb[48].mxu0  ;;  %v5583_v9 = vadd.f32 %v8134_v6, %v7947_v57 }
 0x6c6   : > { %v5658_v14 = vadd.f32 %v8655_v34, %v5553_v2  ;;  %v5652_v27 = vpop.f32.mrb[49].mxu0 }
 0x6c7   : > { %v5653_v30 = vadd.f32 %v5652_v27, %v5548_v20 }
 0x6c8   : > { %v5692_v47 = vmax.f32 %v5658_v14, 0.0 }
 0x6c9   : > { %v5691_v7 = vmax.f32 %v5653_v30, 0.0  ;;  %v8658_v59 = vpop.f32.mrb[50].mxu0 }
 0x6ca   : > { %v5781_v8 = vrot.slane %v5692_v47, 7  ;;  %v5668_v60 = vadd.f32 %v8658_v59, %v5563_v58  ;;  %v5662_v11 = vpop.f32.mrb[51].mxu0 }
 0x6cb   : > { %v5780_v45 = vrot.slane %v5691_v7, 7  ;;  %v5663_v63 = vadd.f32 %v5662_v11, %v5558_v28 }
 0x6cc   : > { %v13787_v49 = vsel %vm641_vm0, 0.0, %v5781_v8  ;;  %v5805_v53 = vsel %vm641_vm0, %v5781_v8, 0.0  ;;  %v5694_v5 = vmax.f32 %v5668_v60, 0.0 }
 0x6cd   : > { %v5829_v12 = vrot.slane %v13787_v49, 1  ;;  %v8661_v17 = vpop.f32.mrb[52].mxu0  ;;  %v13792_v61 = vsel %vm641_vm0, 0.0, %v5780_v45  ;;  %v13795_v36 = vsel %vm641_vm0, %v5780_v45, 0.0  ;;  %v5693_v24 = vmax.f32 %v5663_v63, 0.0 }
 0x6ce   : > { %v5783_v13 = vrot.slane %v5694_v5, 7  ;;  %v5672_v46 = vpop.f32.mrb[53].mxu0  ;;  %v5830_v15 = vrot.slane %v5805_v53, 1  ;;  %v5874_v3 = vrot.slane %v13787_v49, 2  ;;  %v5875_v35 = vrot.slane %v5805_v53, 2 }
 0x6cf   : > { %v5826_v23 = vrot.slane %v13792_v61, 1  ;;  %v5782_v26 = vrot.slane %v5693_v24, 7  ;;  %v5678_v16 = vadd.f32 %v8661_v17, %v5573_v19  ;;  %v5827_v42 = vrot.slane %v13795_v36, 1 }
 0x6d0   : > { %v13800_v48 = vsel %vm641_vm0, 0.0, %v5783_v13  ;;  %v13803_v40 = vsel %vm641_vm0, %v5783_v13, 0.0  ;;  %v5673_v25 = vadd.f32 %v5672_v46, %v5568_v32  ;;  %v13817_v2 = vsel %vm984_vm2, %v5874_v3, %v5875_v35 }
 0x6d1   : > { %v5835_v18 = vrot.slane %v13800_v48, 1  ;;  %v5836_v51 = vrot.slane %v13803_v40, 1  ;;  %v5880_v55 = vrot.slane %v13800_v48, 2  ;;  %v8664_v54 = vpop.f32.mrb[54].mxu0  ;;  %v13810_v52 = vsel %vm641_vm0, 0.0, %v5782_v26  ;;  %8681 = vmatprep.mubr.msk.f32.mxu1 %vm3405_vm13, %v13817_v2 }
 0x6d2   : > { %v5806_v62 = vsel %vm641_vm0, %v5782_v26, 0.0  ;;  %v5696_v4 = vmax.f32 %v5678_v16, 0.0  ;;  %v5682_v50 = vpop.f32.mrb[55].mxu0  ;;  %v5881_v0 = vrot.slane %v13803_v40, 2  ;;  %v5832_v44 = vrot.slane %v13810_v52, 1 }
 0x6d3   : > { %v5833_v29 = vrot.slane %v5806_v62, 1  ;;  %v5877_v21 = vrot.slane %v13810_v52, 2  ;;  %v5695_v6 = vmax.f32 %v5673_v25, 0.0  ;;  %v9897_v34 = vpack.i.bf16 %v12802_v43, %v13792_v61 }
 0x6d4   : > { %v5785_v57 = vrot.slane %v5696_v4, 7  ;;  %v5878_v20 = vrot.slane %v5806_v62, 2  ;;  %v5688_v14 = vadd.f32 %v8664_v54, %v5583_v9  ;;  %v5683_v27 = vadd.f32 %v5682_v50, %v5578_v39 }
 0x6d5   : > { %v13824_v30 = vsel %vm807_vm1, %v5826_v23, %v5827_v42  ;;  %v5784_v7 = vrot.slane %v5695_v6, 7  ;;  %9898 = vrot.lane.b32.xlu1 %v9897_v34, %s14557_s18  ;;  %v13836_v22 = vsel %vm807_vm1, %v5829_v12, %v5830_v15  ;;  %v13853_v19 = vsel %vm984_vm2, %v5880_v55, %v5881_v0 }
 0x6d6   : > { %v13827_v47 = vsel %vm641_vm0, 0.0, %v5785_v57  ;;  %v5809_v58 = vsel %vm641_vm0, %v5785_v57, 0.0  ;;  %v9902_v43 = vpack.i.bf16 %v13824_v30, %v13787_v49  ;;  %v5698_v11 = vmax.f32 %v5688_v14, 0.0  ;;  %v5731_v14 = vld [vmem:[%s14506_s7 + $0x100] sm:$0xff] }
 0x6d7   : > { %v5841_v59 = vrot.slane %v13827_v47, 1  ;;  %v5842_v28 = vrot.slane %v5809_v58, 1  ;;  %v5886_v38 = vrot.slane %v13827_v47, 2  ;;  %v13839_v8 = vsel %vm641_vm0, 0.0, %v5784_v7 }
 0x6d8   : > { %v5808_v60 = vsel %vm641_vm0, %v5784_v7, 0.0  ;;  %v5697_v1 = vmax.f32 %v5683_v27, 0.0  ;;  %9903 = vrot.lane.b32.xlu0 %v9902_v43, %s14557_s18  ;;  %v5887_v45 = vrot.slane %v5809_v58, 2  ;;  %v5838_v63 = vrot.slane %v13839_v8, 1  ;;  %v5732_v27 = vld [vmem:[%s14506_s7 + $0x108] sm:$0xff]  ;;  %v5749_v7 = vld [vmem:[%s14506_s7 + $0x190] sm:$0xff] }
 0x6d9   : > { %v5883_v32 = vrot.slane %v13839_v8, 2  ;;  %v5884_v37 = vrot.slane %v5808_v60, 2  ;;  %v5787_v10 = vrot.slane %v5698_v11, 7  ;;  %v9907_v5 = vpack.i.bf16 %v13836_v22, %v13810_v52  ;;  %v5750_v43 = vld [vmem:[%s14506_s7 + $0x198] sm:$0xff] }
 0x6da   : > { %v5786_v53 = vrot.slane %v5697_v1, 7  ;;  %v13848_v41 = vsel %vm984_vm2, %v5877_v21, %v5878_v20  ;;  %v5839_v12 = vrot.slane %v5808_v60, 1  ;;  %v13856_v17 = vsel %vm807_vm1, %v5832_v44, %v5833_v29 }
 0x6db   : > { %8682 = vmatmul.mubr.msk.f32.vlgmr.msra.gmra.mrb[96].mxu1 %vm3405_vm13, %v13848_v41  ;;  %v13859_v9 = vsel %vm984_vm2, %v5883_v32, %v5884_v37  ;;  %v13862_v39 = vsel %vm641_vm0, 0.0, %v5787_v10  ;;  %v5811_v13 = vsel %vm641_vm0, %v5787_v10, 0.0  ;;  %9908 = vrot.lane.b32.xlu1 %v9907_v5, %s14557_s18  ;;  %v13874_v35 = vsel %vm807_vm1, %v5835_v18, %v5836_v51  ;;  %v5733_v32 = vld [vmem:[%s14506_s7 + $0x110] sm:$0xff]  ;;  %v5734_v37 = vld [vmem:[%s14506_s7 + $0x118] sm:$0xff] }
 0x6dc   : > { %v13866_v24 = vsel %vm641_vm0, 0.0, %v5786_v53  ;;  %v5810_v46 = vsel %vm641_vm0, %v5786_v53, 0.0  ;;  %8684 = vmatprep.mubr.msk.f32.mxu1 %vm3405_vm13, %v13853_v19  ;;  %v5937_v15 = vrot.slane %v13862_v39, 2  ;;  %v5938_v3 = vrot.slane %v5811_v13, 2  ;;  %v5751_v53 = vld [vmem:[%s14506_s7 + $0x1a0] sm:$0xff] }
 0x6dd   : > { %v5844_v23 = vrot.slane %v13866_v24, 1  ;;  %v5845_v40 = vrot.slane %v5810_v46, 1  ;;  %v5889_v26 = vrot.slane %v13866_v24, 2  ;;  %v5890_v16 = vrot.slane %v5810_v46, 2 }
 0x6de   : > { %v9912_v42 = vpack.i.bf16 %v13856_v17, %v13800_v48  ;;  %v9917_v55 = vpack.i.bf16 %v13874_v35, %v13839_v8  ;;  %v13885_v54 = vsel %vm984_vm2, %v5886_v38, %v5887_v45  ;;  %v13888_v18 = vsel %vm807_vm1, %v5838_v63, %v5839_v12 }
 0x6df   : > { %8685 = vmatmul.mubr.msk.f32.gmra.mrb[98].mxu1 %vm3405_vm13, %v13859_v9  ;;  %v13893_v51 = vsel %vm807_vm1, %v5841_v59, %v5842_v28  ;;  %v13896_v62 = vsel %vm984_vm2, %v5889_v26, %v5890_v16  ;;  %v9922_v4 = vpack.i.bf16 %v13888_v18, %v13827_v47  ;;  %v13905_v50 = vsel %vm807_vm1, %v5844_v23, %v5845_v40  ;;  %v5736_v23 = vld [vmem:[%s14506_s7 + $0x128] sm:$0xff]  ;;  %v5753_v16 = vld [vmem:[%s14506_s7 + $0x1b0] sm:$0xff] }
 0x6e0   : > { %8687 = vmatprep.mubr.msk.f32.mxu1 %vm3405_vm13, %v13885_v54  ;;  %9913 = vrot.lane.b32.xlu0 %v9912_v42, %s14557_s18  ;;  %v9927_v25 = vpack.i.bf16 %v13893_v51, %v13866_v24  ;;  %v5939_v0 = vsel %vm984_vm2, %v5937_v15, %v5938_v3  ;;  %v5871_v44 = vrot.slane %v13792_v61, 2  ;;  %v5872_v29 = vrot.slane %v13795_v36, 2  ;;  %v5735_v3 = vld [vmem:[%s14506_s7 + $0x120] sm:$0xff]  ;;  %v5754_v42 = vld [vmem:[%s14506_s7 + $0x1b8] sm:$0xff] }
 0x6e1   : > { %9918 = vrot.lane.b32.xlu1 %v9917_v55, %s14557_s18  ;;  %v9932_v21 = vpack.i.bf16 %v13905_v50, %v13862_v39  ;;  %v5926_v36 = vrot.slane %v13862_v39, 1  ;;  %v5927_v6 = vrot.slane %v5811_v13, 1  ;;  %v8885_v60 = vpack.c.bf16 %v5732_v27, %v5731_v14 }
 0x6e2   : > { %v5873_v57 = vsel %vm984_vm2, %v5871_v44, %v5872_v29  ;;  %v8887_v63 = vpack.c.bf16 %v5750_v43, %v5749_v7  ;;  %v8889_v13 = vpack.c.bf16 %v5734_v37, %v5733_v32  ;;  %v8895_v44 = vpack.c.bf16 %v5754_v42, %v5753_v16  ;;  %v5738_v29 = vld [vmem:[%s14506_s7 + $0x138] sm:$0xff]  ;;  %v5739_v7 = vld [vmem:[%s14506_s7 + $0x140] sm:$0xff]  ;;  %v5740_v43 = vld [vmem:[%s14506_s7 + $0x148] sm:$0xff] }
 0x6e3   : > { %8688 = vmatmul.mubr.msk.f32.gmra.mrb[100].mxu1 %vm3405_vm13, %v13896_v62  ;;  %v13928_v34 = vsel %vm807_vm1, %v5926_v36, %v5927_v6  ;;  %v5755_v36 = vld [vmem:[%s14506_s7 + $0x1c0] sm:$0xff]  ;;  %v5756_v6 = vld [vmem:[%s14506_s7 + $0x1c8] sm:$0xff]  ;;  %v5742_v37 = vld [vmem:[%s14506_s7 + $0x158] sm:$0xff]  ;;  %vm6671_vm1 = vcmask 1044480   ;;  %vm6445_vm2 = vcmask 517120  }
 0x6e4   : > { %8690 = vmatprep.mubr.msk.f32.mxu1 %vm3405_vm13, %v5939_v0  ;;  %9923 = vrot.lane.b32.xlu0 %v9922_v4, %s14557_s18  ;;  %v9937_v20 = vpack.i.bf16 %v13896_v62, %v13928_v34  ;;  %v8893_v4 = vpack.c.bf16 %v5736_v23, %v5735_v3  ;;  %v5744_v3 = vld [vmem:[%s14506_s7 + $0x168] sm:$0xff] }
 0x6e5   : > { %9928 = vrot.lane.b32.xlu1 %v9927_v25, %s14557_s18 }
 0x6e7   : > { %8691 = vmatmul.mubr.msk.f32.gmra.mrb[102].mxu1 %vm3405_vm13, %v12812_v33 }
 0x6e8   : > { %9933 = vrot.lane.b32.xlu0 %v9932_v21, %s14557_s18 }
 0x6e9   : > { %5940 = vrot.lane.b32.xlu1 %v5873_v57, %s14557_s18 }
 0x6ec   : > { %5942 = vrot.lane.b32.xlu0 %v13817_v2, %s14557_s18 }
 0x6ed   : > { %5944 = vrot.lane.b32.xlu1 %v13848_v41, %s14557_s18 }
 0x6f0   : > { %5946 = vrot.lane.b32.xlu0 %v13853_v19, %s14557_s18 }
 0x6f1   : > { %5948 = vrot.lane.b32.xlu1 %v13859_v9, %s14557_s18 }
 0x6f4   : > { %5950 = vrot.lane.b32.xlu0 %v13885_v54, %s14557_s18 }
 0x6f5   : > { %9938 = vrot.lane.b32.xlu1 %v9937_v20, %s14557_s18 }
 0x6f8   : > { %5954 = vrot.lane.b32.xlu0 %v5939_v0, %s14557_s18 }
 0x747   : > { %v9899_v58 = vpop.permute.xlu1 %9898 }
 0x748   : > { %v9901_v59 = vunpack.i.h.bf16 %v9899_v58  ;;  %v9900_v28 = vunpack.i.l.bf16 %v9899_v58 }
 0x74a   : > { %v9904_v38 = vpop.permute.xlu0 %9903  ;;  %v5975_v1 = vsel %vm3405_vm13, %v12812_v33, %v9900_v28  ;;  %v13956_v45 = vsel %vm3405_vm13, %v14631_v56, %v9901_v59  ;;  %v5752_v33 = vld [vmem:[%s14506_s7 + $0x1a8] sm:$0xff] }
 0x74b   : > { %v9905_v11 = vunpack.i.l.bf16 %v9904_v38  ;;  %v9906_v10 = vunpack.i.h.bf16 %v9904_v38  ;;  %6078 = vmatprep.mubr.f32.mxu0 %v5975_v1  ;;  %v8891_v15 = vpack.c.bf16 %v5752_v33, %v5751_v53  ;;  %v5758_v38 = vld [vmem:[%s14506_s7 + $0x1d8] sm:$0xff]  ;;  %v5760_v33 = vld [vmem:[%s14506_s7 + $0x1e8] sm:$0xff] }
 0x74c   : > { %6079 = vmatmul.mubr.f32.vlgmr.msra.gmra.mrb[56].mxu0 %v13956_v45 }
 0x74d   : > { %v5976_v5 = vsel %vm3405_vm13, %v5873_v57, %v9905_v11  ;;  %v9909_v12 = vpop.permute.xlu1 %9908  ;;  %8886 = vmatpush3.bf16.msra.mxu0 %v8885_v60  ;;  %v5968_v26 = vsel %vm3405_vm13, %v13792_v61, %v9906_v10  ;;  %v5737_v61 = vld [vmem:[%s14506_s7 + $0x130] sm:$0xff] }
 0x74e   : > { %6083 = vmatprep.mubr.f32.mxu0 %v5976_v5  ;;  %v9910_v46 = vunpack.i.l.bf16 %v9909_v12  ;;  %8888 = vmatprep.subr.bf16.mxu0 %v8887_v63  ;;  %v9911_v40 = vunpack.i.h.bf16 %v9909_v12  ;;  %v8897_v27 = vpack.c.bf16 %v5738_v29, %v5737_v61  ;;  %v8901_v63 = vpack.c.bf16 %v5740_v43, %v5739_v7 }
 0x750   : > { %6084 = vmatmul.mubr.f32.gmra.mrb[58].mxu0 %v5968_v26  ;;  %v5977_v55 = vsel %vm3405_vm13, %v13817_v2, %v9910_v46  ;;  %v13996_v2 = vsel %vm3405_vm13, %v13787_v49, %v9911_v40  ;;  %v8899_v49 = vpack.c.bf16 %v5756_v6, %v5755_v36  ;;  %v5762_v26 = vld [vmem:[%s14506_s7 + $0x1f8] sm:$0xff] }
 0x751   : > { %8890 = vmatpush3.bf16.msra.mxu0 %v8889_v13  ;;  %6088 = vmatprep.mubr.f32.mxu0 %v5977_v55 }
 0x752   : > { %v9914_v25 = vpop.permute.xlu0 %9913  ;;  %8892 = vmatprep.subr.bf16.mxu0 %v8891_v15 }
 0x753   : > { %v9919_v0 = vpop.permute.xlu1 %9918  ;;  %v9916_v21 = vunpack.i.h.bf16 %v9914_v25  ;;  %v9915_v57 = vunpack.i.l.bf16 %v9914_v25  ;;  %v5746_v25 = vld [vmem:[%s14506_s7 + $0x178] sm:$0xff] }
 0x754   : > { %v9920_v20 = vunpack.i.l.bf16 %v9919_v0  ;;  %6089 = vmatmul.mubr.f32.gmra.mrb[60].mxu0 %v13996_v2  ;;  %v9921_v59 = vunpack.i.h.bf16 %v9919_v0 }
 0x755   : > { %8894 = vmatpush3.bf16.msra.mxu0 %v8893_v4  ;;  %v5978_v14 = vsel %vm3405_vm13, %v13848_v41, %v9915_v57  ;;  %v5970_v28 = vsel %vm3405_vm13, %v13810_v52, %v9916_v21  ;;  %v5757_v41 = vld [vmem:[%s14506_s7 + $0x1d0] sm:$0xff] }
 0x756   : > { %v9924_v58 = vpop.permute.xlu0 %9923  ;;  %6093 = vmatprep.mubr.f32.mxu0 %v5978_v14  ;;  %8896 = vmatprep.subr.bf16.mxu0 %v8895_v44  ;;  %v5979_v11 = vsel %vm3405_vm13, %v13853_v19, %v9920_v20  ;;  %v8903_v32 = vpack.c.bf16 %v5758_v38, %v5757_v41  ;;  %v5741_v52 = vld [vmem:[%s14506_s7 + $0x150] sm:$0xff]  ;;  %v5971_v53 = vsel %vm3405_vm13, %v13800_v48, %v9921_v59  ;;  %v5759_v19 = vld [vmem:[%s14506_s7 + $0x1e0] sm:$0xff] }
 0x757   : > { %v9925_v60 = vunpack.i.l.bf16 %v9924_v58  ;;  %v9929_v1 = vpop.permute.xlu1 %9928  ;;  %v9926_v10 = vunpack.i.h.bf16 %v9924_v58  ;;  %v8905_v46 = vpack.c.bf16 %v5742_v37, %v5741_v52  ;;  %v8907_v15 = vpack.c.bf16 %v5760_v33, %v5759_v19  ;;  %v5743_v48 = vld [vmem:[%s14506_s7 + $0x160] sm:$0xff]  ;;  %v6576_v52 = vld [vmem:[#allocation7 + $0x90] sm:$0xff]  ;;  %v6577_v37 = vld [vmem:[#allocation7 + $0x98] sm:$0xff] }
 0x758   : > { %6094 = vmatmul.mubr.f32.gmra.mrb[62].mxu0 %v5970_v28  ;;  %v9930_v5 = vunpack.i.l.bf16 %v9929_v1  ;;  %v9931_v23 = vunpack.i.h.bf16 %v9929_v1  ;;  %v8909_v55 = vpack.c.bf16 %v5744_v3, %v5743_v48  ;;  %v6558_v1 = vld [vmem:[#allocation7] sm:$0xff]  ;;  %v6560_v19 = vld [vmem:[#allocation7 + $0x10] sm:$0xff]  ;;  %v6561_v33 = vld [vmem:[#allocation7 + $0x18] sm:$0xff] }
 0x759   : > { %8898 = vmatpush3.bf16.msra.mxu0 %v8897_v27  ;;  %6098 = vmatprep.mubr.f32.mxu0 %v5979_v11  ;;  %v5980_v12 = vsel %vm3405_vm13, %v13859_v9, %v9925_v60  ;;  %v5972_v40 = vsel %vm3405_vm13, %v13839_v8, %v9926_v10  ;;  %v5761_v9 = vld [vmem:[%s14506_s7 + $0x1f0] sm:$0xff]  ;;  %v6574_v60 = vld [vmem:[#allocation7 + $0x80] sm:$0xff]  ;;  %v6575_v11 = vld [vmem:[#allocation7 + $0x88] sm:$0xff] }
 0x75a   : > { %8900 = vmatprep.subr.bf16.mxu0 %v8899_v49  ;;  %v9934_v13 = vpop.permute.xlu0 %9933  ;;  %v5981_v42 = vsel %vm3405_vm13, %v13885_v54, %v9930_v5  ;;  %v8911_v4 = vpack.c.bf16 %v5762_v26, %v5761_v9  ;;  %v5745_v8 = vld [vmem:[%s14506_s7 + $0x170] sm:$0xff]  ;;  %v5973_v44 = vsel %vm3405_vm13, %v13827_v47, %v9931_v23  ;;  %v6578_v5 = vld [vmem:[#allocation7 + $0xa0] sm:$0xff]  ;;  %v6581_v3 = vld [vmem:[#allocation7 + $0xb8] sm:$0xff] }
 0x75b   : > { %v9935_v16 = vunpack.i.l.bf16 %v9934_v13  ;;  %v9936_v0 = vunpack.i.h.bf16 %v9934_v13  ;;  %v8913_v61 = vpack.c.bf16 %v5746_v25, %v5745_v8  ;;  %v5941_v29 = vpop.permute.xlu1 %5940  ;;  %v6580_v48 = vld [vmem:[#allocation7 + $0xb0] sm:$0xff]  ;;  %v6606_v23 = vld [vmem:[#allocation7 + $0x180] sm:$0xff]  ;;  %v6583_v25 = vld [vmem:[#allocation7 + $0xc8] sm:$0xff] }
 0x75c   : > { %6099 = vmatmul.mubr.f32.gmra.mrb[64].mxu0 %v5971_v53  ;;  %v5983_v57 = vsel %vm3405_vm13, %v13824_v30, %v5941_v29  ;;  %v6582_v8 = vld [vmem:[#allocation7 + $0xc0] sm:$0xff] }
 0x75d   : > { %8902 = vmatpush3.bf16.msra.mxu0 %v8901_v63  ;;  %6103 = vmatprep.mubr.f32.mxu0 %v5980_v12  ;;  %v5982_v54 = vsel %vm3405_vm13, %v13896_v62, %v9935_v16  ;;  %v5974_v21 = vsel %vm3405_vm13, %v13866_v24, %v9936_v0  ;;  %v8931_v63 = vpack.c.bf16 %v6575_v11, %v6574_v60  ;;  %v6566_v29 = vld [vmem:[#allocation7 + $0x40] sm:$0xff] }
 0x75e   : > { %8904 = vmatprep.subr.bf16.mxu0 %v8903_v32  ;;  %v5943_v47 = vpop.permute.xlu0 %5942  ;;  %v6559_v32 = vld [vmem:[#allocation7 + $0x8] sm:$0xff]  ;;  %v8937_v12 = vpack.c.bf16 %v6561_v33, %v6560_v19  ;;  %v8943_v16 = vpack.c.bf16 %v6581_v3, %v6580_v48 }
 0x75f   : > { %v5945_v36 = vpop.permute.xlu1 %5944  ;;  %v5984_v62 = vsel %vm3405_vm13, %v13836_v22, %v5943_v47  ;;  %v8933_v10 = vpack.c.bf16 %v6559_v32, %v6558_v1  ;;  %v7956_v32 = vld [vmem:[%s14507_s8] ss:$0 sm:$0xff] }
 0x760   : > { %6104 = vmatmul.mubr.f32.gmra.mrb[66].mxu0 %v5972_v40  ;;  %v5985_v24 = vsel %vm3405_vm13, %v13856_v17, %v5945_v36 }
 0x761   : > { %8906 = vmatpush3.bf16.msra.mxu0 %v8905_v46  ;;  %6108 = vmatprep.mubr.f32.mxu0 %v5981_v42  ;;  %v6562_v46 = vld [vmem:[#allocation7 + $0x20] sm:$0xff]  ;;  %v6564_v42 = vld [vmem:[#allocation7 + $0x30] sm:$0xff] }
 0x762   : > { %8908 = vmatprep.subr.bf16.mxu0 %v8907_v15  ;;  %v5947_v20 = vpop.permute.xlu0 %5946  ;;  %v6563_v15 = vld [vmem:[#allocation7 + $0x28] sm:$0xff] }
 0x763   : > { %v5949_v6 = vpop.permute.xlu1 %5948  ;;  %v8941_v9 = vpack.c.bf16 %v6563_v15, %v6562_v46 }
 0x764   : > { %6109 = vmatmul.mubr.f32.gmra.mrb[68].mxu0 %v5973_v44  ;;  %v5987_v14 = vsel %vm3405_vm13, %v13888_v18, %v5949_v6 }
 0x765   : > { %8910 = vmatpush3.bf16.msra.mxu0 %v8909_v55  ;;  %6113 = vmatprep.mubr.f32.mxu0 %v5982_v54  ;;  %v6565_v55 = vld [vmem:[#allocation7 + $0x38] sm:$0xff] }
 0x766   : > { %8912 = vmatprep.subr.bf16.mxu0 %v8911_v4  ;;  %v5951_v27 = vpop.permute.xlu0 %5950  ;;  %v8945_v54 = vpack.c.bf16 %v6565_v55, %v6564_v42 }
 0x767   : > { %v9939_v30 = vpop.permute.xlu1 %9938  ;;  %v5988_v17 = vsel %vm3405_vm13, %v13893_v51, %v5951_v27 }
 0x768   : > { %6114 = vmatmul.mubr.f32.gmra.mrb[70].mxu0 %v5974_v21  ;;  %v9940_v22 = vunpack.i.l.bf16 %v9939_v30  ;;  %v9941_v58 = vunpack.i.h.bf16 %v9939_v30 }
 0x769   : > { %8914 = vmatpush3.bf16.msra.mxu0 %v8913_v61  ;;  %6183 = vmatprep.mubr.f32.mxu0 %v13996_v2  ;;  %v5986_v2 = vsel %vm3405_vm13, %v13874_v35, %v5947_v20  ;;  %v8947_v61 = vpack.c.bf16 %v6583_v25, %v6582_v8 }
 0x76a   : > { %v5991_v49 = vsel %vm3405_vm13, %v13862_v39, %v9940_v22  ;;  %v5989_v35 = vsel %vm3405_vm13, %v13905_v50, %v9941_v58  ;;  %v5955_v7 = vpop.permute.xlu0 %5954  ;;  %8932 = vmatprep.subr.bf16.mxu0 %v8931_v63 }
 0x76b   : > { %v5990_v18 = vsel %vm3405_vm13, %v13928_v34, %v5955_v7  ;;  %v14105_v34 = vsel %vm6671_vm1, %v14631_v56, 0.0  ;;  %v6579_v56 = vld [vmem:[#allocation7 + $0xa8] sm:$0xff] }
 0x76c   : > { %6184 = vmatmul.mubr.f32.vlgmr.msra.gmra.mrb[72].mxu0 %v5983_v57  ;;  %v8939_v13 = vpack.c.bf16 %v6579_v56, %v6578_v5 }
 0x76d   : > { %6188 = vmatprep.mubr.f32.mxu0 %v5970_v28  ;;  %8934 = vmatpush3.bf16.msra.mxu0 %v8933_v10 }
 0x770   : > { %6189 = vmatmul.mubr.f32.gmra.mrb[74].mxu0 %v5984_v62 }
 0x771   : > { %6193 = vmatprep.mubr.f32.mxu0 %v5971_v53  ;;  %v8935_v53 = vpack.c.bf16 %v6577_v37, %v6576_v52 }
 0x773   : > { %8936 = vmatprep.subr.bf16.mxu0 %v8935_v53 }
 0x774   : > { %6194 = vmatmul.mubr.f32.gmra.mrb[76].mxu0 %v5985_v24 }
 0x775   : > { %6198 = vmatprep.mubr.f32.mxu0 %v5972_v40  ;;  %v6607_v40 = vld [vmem:[#allocation7 + $0x188] sm:$0xff]  ;;  %8938 = vmatpush3.bf16.msra.mxu0 %v8937_v12 }
 0x776   : > { %v8963_v26 = vpack.c.bf16 %v6607_v40, %v6606_v23  ;;  %8940 = vmatprep.subr.bf16.mxu0 %v8939_v13 }
 0x778   : > { %6199 = vmatmul.mubr.f32.gmra.mrb[78].mxu0 %v5986_v2  ;;  %8964 = vmatprep.subr.bf16.mxu1 %v8963_v26 }
 0x779   : > { %6203 = vmatprep.mubr.f32.mxu0 %v5973_v44  ;;  %8942 = vmatpush3.bf16.msra.mxu0 %v8941_v9 }
 0x77a   : > { %8944 = vmatprep.subr.bf16.mxu0 %v8943_v16 }
 0x77c   : > { %6204 = vmatmul.mubr.f32.gmra.mrb[80].mxu0 %v5987_v14 }
 0x77d   : > { %6208 = vmatprep.mubr.f32.mxu0 %v5974_v21  ;;  %v6567_v21 = vld [vmem:[#allocation7 + $0x48] sm:$0xff]  ;;  %8946 = vmatpush3.bf16.msra.mxu0 %v8945_v54 }
 0x77e   : > { %v8949_v62 = vpack.c.bf16 %v6567_v21, %v6566_v29  ;;  %8948 = vmatprep.subr.bf16.mxu0 %v8947_v61 }
 0x780   : > { %6209 = vmatmul.mubr.f32.gmra.mrb[82].mxu0 %v5988_v17 }
 0x781   : > { %6213 = vmatprep.mubr.f32.mxu0 %v5991_v49  ;;  %8950 = vmatpush3.bf16.msra.mxu0 %v8949_v62 }
 0x784   : > { %6214 = vmatmul.mubr.f32.gmra.mrb[84].mxu0 %v5989_v35 }
 0x785   : > { %6218 = vmatprep.mubr.f32.mxu0 %v13956_v45  ;;  %v14108_v45 = vrot.slane %v14105_v34, 1 }
 0x787   : > { %6685 = vrot.lane.b32.xlu1 %v14108_v45, %s14557_s18 }
 0x788   : > { %6219 = vmatmul.mubr.f32.gmra.mrb[86].mxu0 %v5990_v18 }
 0x7ae   : > { %v14087_v43 = vpop.f32.mrb[96].mxu1 }
 0x7af   : > { %v14089_v59 = vpop.f32.mrb[97].mxu1 }
 0x7b2   : > { %v14091_v51 = vpop.f32.mrb[98].mxu1 }
 0x7b3   : > { %v14093_v28 = vpop.f32.mrb[99].mxu1 }
 0x7b6   : > { %v14095_v39 = vpop.f32.mrb[100].mxu1 }
 0x7b7   : > { %v14097_v41 = vpop.f32.mrb[101].mxu1 }
 0x7ba   : > { %v14099_v50 = vpop.f32.mrb[102].mxu1 }
 0x7bb   : > { %v14101_v38 = vpop.f32.mrb[103].mxu1 }
 0x81f   : > { %v8179_v4 = vpop.f32.mrb[56].mxu0 }
 0x820   : > { %v8180_v0 = vpop.f32.mrb[57].mxu0 }
 0x821   : > { %v8181_v44 = vadd.f32 %v8180_v0, %v8179_v4 }
 0x823   : > { %v8182_v57 = vpop.f32.mrb[58].mxu0  ;;  %v6081_v10 = vadd.f32 %v8181_v44, %v7956_v32 }
 0x824   : > { %v8183_v47 = vpop.f32.mrb[59].mxu0 }
 0x825   : > { %v8184_v36 = vadd.f32 %v8183_v47, %v8182_v57 }
 0x827   : > { %v8185_v6 = vpop.f32.mrb[60].mxu0  ;;  %v6086_v56 = vadd.f32 %v8184_v36, %v7956_v32 }
 0x828   : > { %v8186_v24 = vpop.f32.mrb[61].mxu0 }
 0x829   : > { %v8187_v20 = vadd.f32 %v8186_v24, %v8185_v6 }
 0x82b   : > { %v8188_v2 = vpop.f32.mrb[62].mxu0  ;;  %v6091_v23 = vadd.f32 %v8187_v20, %v7956_v32 }
 0x82c   : > { %v8189_v30 = vpop.f32.mrb[63].mxu0 }
 0x82d   : > { %v8190_v14 = vadd.f32 %v8189_v30, %v8188_v2 }
 0x82f   : > { %v8191_v27 = vpop.f32.mrb[64].mxu0  ;;  %v6096_v55 = vadd.f32 %v8190_v14, %v7956_v32 }
 0x830   : > { %v8192_v22 = vpop.f32.mrb[65].mxu0 }
 0x831   : > { %v8193_v58 = vadd.f32 %v8192_v22, %v8191_v27 }
 0x833   : > { %v8194_v17 = vpop.f32.mrb[66].mxu0  ;;  %v6101_v47 = vadd.f32 %v8193_v58, %v7956_v32 }
 0x834   : > { %v8195_v49 = vpop.f32.mrb[67].mxu0 }
 0x835   : > { %v8196_v35 = vadd.f32 %v8195_v49, %v8194_v17 }
 0x837   : > { %v8197_v7 = vpop.f32.mrb[68].mxu0  ;;  %v6106_v36 = vadd.f32 %v8196_v35, %v7956_v32 }
 0x838   : > { %v8198_v18 = vpop.f32.mrb[69].mxu0 }
 0x839   : > { %v8199_v60 = vadd.f32 %v8198_v18, %v8197_v7 }
 0x83b   : > { %v8200_v11 = vpop.f32.mrb[70].mxu0  ;;  %v6111_v24 = vadd.f32 %v8199_v60, %v7956_v32 }
 0x83c   : > { %v8201_v1 = vpop.f32.mrb[71].mxu0 }
 0x83d   : > { %v8202_v63 = vadd.f32 %v8201_v1, %v8200_v11 }
 0x83f   : > { %v8235_v52 = vpop.f32.mrb[72].mxu0  ;;  %v6116_v30 = vadd.f32 %v8202_v63, %v7956_v32 }
 0x840   : > { %v8236_v37 = vpop.f32.mrb[73].mxu0 }
 0x841   : > { %v8237_v53 = vadd.f32 %v8236_v37, %v8235_v52 }
 0x843   : > { %v6186_v19 = vadd.f32 %v8237_v53, %v6081_v10  ;;  %v8238_v33 = vpop.f32.mrb[74].mxu0 }
 0x844   : > { %v8239_v5 = vpop.f32.mrb[75].mxu0 }
 0x845   : > { %v6291_v12 = vadd.f32 %v14089_v59, %v6186_v19  ;;  %v8240_v13 = vadd.f32 %v8239_v5, %v8238_v33 }
 0x847   : > { %v6329_v46 = vmax.f32 %v6291_v12, 0.0  ;;  %v6191_v15 = vadd.f32 %v8240_v13, %v6086_v56  ;;  %v8241_v48 = vpop.f32.mrb[76].mxu0 }
 0x848   : > { %v8242_v3 = vpop.f32.mrb[77].mxu0 }
 0x849   : > { %6337 = vst.msk [vmem:[%s14117_s15] sm:$0xff] %vm3405_vm13, %v6329_v46  ;;  %v6296_v40 = vadd.f32 %v14087_v43, %v6191_v15  ;;  %v8243_v9 = vadd.f32 %v8242_v3, %v8241_v48  ;;  %v6345_v4 = vsel %vm3405_vm13, %v6329_v46, -inf }
 0x84b   : > { %v6330_v26 = vmax.f32 %v6296_v40, 0.0  ;;  %v6196_v16 = vadd.f32 %v8243_v9, %v6091_v23  ;;  %v8244_v42 = vpop.f32.mrb[78].mxu0 }
 0x84c   : > { %v8245_v59 = vpop.f32.mrb[79].mxu0 }
 0x84d   : > { %6338 = vst.msk [vmem:[%s14117_s15 + $0x8] sm:$0xff] %vm3405_vm13, %v6330_v26  ;;  %v6346_v8 = vsel %vm3405_vm13, %v6330_v26, -inf  ;;  %v6301_v25 = vadd.f32 %v14093_v28, %v6196_v16  ;;  %v8246_v0 = vadd.f32 %v8245_v59, %v8244_v42 }
 0x84e   : > { %v6347_v44 = vmax.f32 %v6345_v4, %v6346_v8 }
 0x84f   : > { %v6331_v54 = vmax.f32 %v6301_v25, 0.0  ;;  %v6201_v43 = vadd.f32 %v8246_v0, %v6096_v55  ;;  %v8247_v61 = vpop.f32.mrb[80].mxu0 }
 0x850   : > { %v6361_v29 = vcombine.high %v6347_v44, %v6347_v44  ;;  %v6368_v21 = vrot.slane %v6347_v44, %v12768_v31  ;;  %v8248_v57 = vpop.f32.mrb[81].mxu0 }
 0x851   : > { %6339 = vst.msk [vmem:[%s14117_s15 + $0x10] sm:$0xff] %vm3405_vm13, %v6331_v54  ;;  %v6306_v62 = vadd.f32 %v14091_v51, %v6201_v43  ;;  %v8249_v6 = vadd.f32 %v8248_v57, %v8247_v61  ;;  %v6348_v51 = vsel %vm3405_vm13, %v6331_v54, -inf }
 0x852   : > { %v6375_v28 = vrot.slane %v6361_v29, %v12768_v31  ;;  %v6376_v20 = vcombine.high %v6368_v21, %v6368_v21  ;;  %v6446_v2 = vsel %vm6445_vm2, %v6368_v21, -inf }
 0x853   : > { %v6447_v14 = vrot.slane %v6446_v2, 4  ;;  %v6332_v27 = vmax.f32 %v6306_v62, 0.0  ;;  %v6206_v22 = vadd.f32 %v8249_v6, %v6101_v47  ;;  %v8250_v17 = vpop.f32.mrb[82].mxu0 }
 0x854   : > { %v6377_v49 = vcombine.high %v6375_v28, %v6375_v28  ;;  %v6453_v58 = vsel %vm6445_vm2, %v6376_v20, -inf  ;;  %v6460_v35 = vsel %vm6445_vm2, %v6375_v28, -inf  ;;  %v8251_v7 = vpop.f32.mrb[83].mxu0 }
 0x855   : > { %v6448_v18 = vmax.f32 %v6446_v2, %v6447_v14  ;;  %v6454_v60 = vrot.slane %v6453_v58, 4  ;;  %v6461_v11 = vrot.slane %v6460_v35, 4  ;;  %6340 = vst.msk [vmem:[%s14117_s15 + $0x18] sm:$0xff] %vm3405_vm13, %v6332_v27  ;;  %v6349_v1 = vsel %vm3405_vm13, %v6332_v27, -inf }
 0x856   : > { %v14140_v63 = vsel %vm6445_vm2, %v6377_v49, -inf  ;;  %v6350_v32 = vmax.f32 %v6348_v51, %v6349_v1  ;;  %v6311_v52 = vadd.f32 %v14097_v41, %v6206_v22  ;;  %v8252_v37 = vadd.f32 %v8251_v7, %v8250_v17 }
 0x857   : > { %v6449_v10 = vrot.slane %v6448_v18, 2  ;;  %v6455_v53 = vmax.f32 %v6453_v58, %v6454_v60  ;;  %v6462_v19 = vmax.f32 %v6460_v35, %v6461_v11  ;;  %v6468_v33 = vrot.slane %v14140_v63, 4  ;;  %v8253_v5 = vpop.f32.mrb[84].mxu0 }
 0x858   : > { %v6378_v56 = vcombine.high %v6350_v32, %v6350_v32  ;;  %v6385_v12 = vrot.slane %v6350_v32, %v12768_v31  ;;  %v6333_v13 = vmax.f32 %v6311_v52, 0.0  ;;  %v6211_v46 = vadd.f32 %v8252_v37, %v6106_v36  ;;  %v8254_v15 = vpop.f32.mrb[85].mxu0 }
 0x859   : > { %v6450_v48 = vmax.f32 %v6448_v18, %v6449_v10  ;;  %v6456_v3 = vrot.slane %v6455_v53, 2  ;;  %v6463_v23 = vrot.slane %v6462_v19, 2  ;;  %v8255_v40 = vadd.f32 %v8254_v15, %v8253_v5 }
 0x85a   : > { %v6392_v41 = vrot.slane %v6378_v56, %v12768_v31  ;;  %v6393_v9 = vcombine.high %v6385_v12, %v6385_v12  ;;  %v6474_v26 = vsel %vm6445_vm2, %v6385_v12, -inf  ;;  %6341 = vst.msk [vmem:[%s14117_s15 + $0x20] sm:$0xff] %vm3405_vm13, %v6333_v13  ;;  %v6351_v16 = vsel %vm3405_vm13, %v6333_v13, -inf }
 0x85b   : > { %v6451_v42 = vrot.slane %v6450_v48, 1  ;;  %v6457_v55 = vmax.f32 %v6455_v53, %v6456_v3  ;;  %v6475_v59 = vrot.slane %v6474_v26, 4  ;;  %v6316_v4 = vadd.f32 %v14095_v39, %v6211_v46  ;;  %v8256_v8 = vpop.f32.mrb[86].mxu0 }
 0x85c   : > { %v6394_v25 = vcombine.high %v6392_v41, %v6392_v41  ;;  %v6481_v0 = vsel %vm6445_vm2, %v6393_v9, -inf  ;;  %v6488_v44 = vsel %vm6445_vm2, %v6392_v41, -inf  ;;  %v8257_v54 = vpop.f32.mrb[87].mxu0  ;;  %v6216_v43 = vadd.f32 %v8255_v40, %v6111_v24 }
 0x85d   : > { %v6476_v61 = vmax.f32 %v6474_v26, %v6475_v59  ;;  %v6482_v29 = vrot.slane %v6481_v0, 4  ;;  %v6489_v21 = vrot.slane %v6488_v44, 4  ;;  %v6334_v57 = vmax.f32 %v6316_v4, 0.0 }
 0x85e   : > { %v14154_v47 = vsel %vm6445_vm2, %v6394_v25, -inf  ;;  %v8258_v36 = vadd.f32 %v8257_v54, %v8256_v8  ;;  %v6321_v62 = vadd.f32 %v14101_v38, %v6216_v43  ;;  %v6452_v39 = vmax.f32 %v6450_v48, %v6451_v42 }
 0x85f   : > { %v6477_v6 = vrot.slane %v6476_v61, 2  ;;  %v6483_v28 = vmax.f32 %v6481_v0, %v6482_v29  ;;  %v14157_v20 = vmax.f32 %v6488_v44, %v6489_v21  ;;  %v6496_v2 = vrot.slane %v14154_v47, 4  ;;  %6342 = vst.msk [vmem:[%s14117_s15 + $0x28] sm:$0xff] %vm3405_vm13, %v6334_v57 }
 0x860   : > { %v6352_v24 = vsel %vm3405_vm13, %v6334_v57, -inf  ;;  %v6221_v14 = vadd.f32 %v8258_v36, %v6116_v30  ;;  %v6335_v27 = vmax.f32 %v6321_v62, 0.0  ;;  %v6458_v22 = vrot.slane %v6457_v55, 1 }
 0x861   : > { %v6478_v17 = vmax.f32 %v6476_v61, %v6477_v6  ;;  %v6484_v49 = vrot.slane %v6483_v28, 2  ;;  %v6491_v58 = vrot.slane %v14157_v20, 2  ;;  %v6353_v38 = vmax.f32 %v6351_v16, %v6352_v24 }
 0x862   : > { %v6326_v35 = vadd.f32 %v14099_v50, %v6221_v14  ;;  %6343 = vst.msk [vmem:[%s14117_s15 + $0x30] sm:$0xff] %vm3405_vm13, %v6335_v27  ;;  %v6354_v51 = vsel %vm3405_vm13, %v6335_v27, -inf  ;;  %v6459_v7 = vmax.f32 %v6457_v55, %v6458_v22  ;;  %v6464_v18 = vmax.f32 %v6462_v19, %v6463_v23 }
 0x863   : > { %v6479_v60 = vrot.slane %v6478_v17, 1  ;;  %v6485_v11 = vmax.f32 %v6483_v28, %v6484_v49  ;;  %v6395_v1 = vcombine.high %v6353_v38, %v6353_v38  ;;  %v6402_v30 = vrot.slane %v6353_v38, %v12768_v31 }
 0x864   : > { %v6336_v32 = vmax.f32 %v6326_v35, 0.0  ;;  %v6465_v52 = vrot.slane %v6464_v18, 1  ;;  %v6469_v37 = vmax.f32 %v14140_v63, %v6468_v33  ;;  %v6647_v10 = vsel %vm5101_vm3, %v6459_v7, %v6452_v39 }
 0x865   : > { %v6409_v50 = vrot.slane %v6395_v1, %v12768_v31  ;;  %v6410_v53 = vcombine.high %v6402_v30, %v6402_v30  ;;  %v6502_v5 = vsel %vm6445_vm2, %v6402_v30, -inf  ;;  %v14173_v56 = vmax.f32 %v6478_v17, %v6479_v60 }
 0x866   : > { %v6503_v12 = vrot.slane %v6502_v5, 4  ;;  %6344 = vst.msk [vmem:[%s14117_s15 + $0x38] sm:$0xff] %vm3405_vm13, %v6336_v32  ;;  %v6355_v19 = vsel %vm3405_vm13, %v6336_v32, -inf  ;;  %v6466_v13 = vmax.f32 %v6464_v18, %v6465_v52  ;;  %v6470_v46 = vrot.slane %v6469_v37, 2 }
 0x867   : > { %v6411_v15 = vcombine.high %v6409_v50, %v6409_v50  ;;  %v6509_v48 = vsel %vm6445_vm2, %v6410_v53, -inf  ;;  %v6516_v63 = vsel %vm6445_vm2, %v6409_v50, -inf  ;;  %v6356_v33 = vmax.f32 %v6354_v51, %v6355_v19 }
 0x868   : > { %v6504_v3 = vmax.f32 %v6502_v5, %v6503_v12  ;;  %v6510_v23 = vrot.slane %v6509_v48, 4  ;;  %v6517_v40 = vrot.slane %v6516_v63, 4  ;;  %v6471_v41 = vmax.f32 %v6469_v37, %v6470_v46 }
 0x869   : > { %v14181_v9 = vsel %vm6445_vm2, %v6411_v15, -inf  ;;  %v6412_v26 = vcombine.high %v6356_v33, %v6356_v33  ;;  %v6419_v16 = vrot.slane %v6356_v33, %v12768_v31  ;;  %v6648_v42 = vsel %vm5103_vm4, %v6466_v13, %v6647_v10 }
 0x86a   : > { %v6505_v55 = vrot.slane %v6504_v3, 2  ;;  %v6511_v59 = vmax.f32 %v6509_v48, %v6510_v23  ;;  %v6518_v4 = vmax.f32 %v6516_v63, %v6517_v40  ;;  %v6524_v8 = vrot.slane %v14181_v9, 4  ;;  %v6584_v40 = vld [vmem:[#allocation7 + $0xd0] sm:$0xff] }
 0x86b   : > { %v6426_v25 = vrot.slane %v6412_v26, %v12768_v31  ;;  %v6427_v0 = vcombine.high %v6419_v16, %v6419_v16  ;;  %v6530_v44 = vsel %vm6445_vm2, %v6419_v16, -inf  ;;  %v6472_v54 = vrot.slane %v6471_v41, 1 }
 0x86c   : > { %v6506_v43 = vmax.f32 %v6504_v3, %v6505_v55  ;;  %v6512_v61 = vrot.slane %v6511_v59, 2  ;;  %v6519_v29 = vrot.slane %v6518_v4, 2  ;;  %v6531_v21 = vrot.slane %v6530_v44, 4  ;;  %v6585_v55 = vld [vmem:[#allocation7 + $0xd8] sm:$0xff] }
 0x86d   : > { %v6428_v57 = vcombine.high %v6426_v25, %v6426_v25  ;;  %v6537_v36 = vsel %vm6445_vm2, %v6427_v0, -inf  ;;  %v6544_v62 = vsel %vm6445_vm2, %v6426_v25, -inf  ;;  %v6473_v39 = vmax.f32 %v6471_v41, %v6472_v54 }
 0x86e   : > { %v6507_v6 = vrot.slane %v6506_v43, 1  ;;  %v6513_v28 = vmax.f32 %v6511_v59, %v6512_v61  ;;  %v6532_v24 = vmax.f32 %v6530_v44, %v6531_v21  ;;  %v6538_v14 = vrot.slane %v6537_v36, 4  ;;  %v6591_v59 = vld [vmem:[#allocation7 + $0x108] sm:$0xff]  ;;  %v6568_v61 = vld [vmem:[#allocation7 + $0x50] sm:$0xff]  ;;  %v6569_v21 = vld [vmem:[#allocation7 + $0x58] sm:$0xff] }
 0x86f   : > { %v6545_v27 = vrot.slane %v6544_v62, 4  ;;  %v6551_v31 = vsel %vm6445_vm2, %v6428_v57, -inf  ;;  %v6649_v22 = vsel %vm5105_vm5, %v6473_v39, %v6648_v42  ;;  %v6486_v17 = vrot.slane %v6485_v11, 1  ;;  %v6608_v57 = vld [vmem:[#allocation7 + $0x190] sm:$0xff]  ;;  %v6587_v39 = vld [vmem:[#allocation7 + $0xe8] sm:$0xff] }
 0x870   : > { %v6533_v49 = vrot.slane %v6532_v24, 2  ;;  %v6539_v38 = vmax.f32 %v6537_v36, %v6538_v14  ;;  %v6552_v35 = vrot.slane %v6551_v31, 4  ;;  %v6659_v51 = vrot.slane %v6649_v22, 7  ;;  %v6593_v14 = vld [vmem:[#allocation7 + $0x118] sm:$0xff] }
 0x871   : > { %v6546_v7 = vmax.f32 %v6544_v62, %v6545_v27  ;;  %v6487_v18 = vmax.f32 %v6485_v11, %v6486_v17  ;;  %v6492_v60 = vmax.f32 %v14157_v20, %v6491_v58  ;;  %v6497_v1 = vmax.f32 %v14154_v47, %v6496_v2  ;;  %v6586_v62 = vld [vmem:[#allocation7 + $0xe0] sm:$0xff] }
 0x872   : > { %v6534_v30 = vmax.f32 %v6532_v24, %v6533_v49  ;;  %v6540_v32 = vrot.slane %v6539_v38, 2  ;;  %v6553_v52 = vmax.f32 %v6551_v31, %v6552_v35  ;;  %v6667_v37 = vsel %vm641_vm0, 0.0, %v6659_v51  ;;  %v6592_v24 = vld [vmem:[#allocation7 + $0x110] sm:$0xff]  ;;  %v6570_v27 = vld [vmem:[#allocation7 + $0x60] sm:$0xff]  ;;  %v6611_v51 = vld [vmem:[#allocation7 + $0x1a8] sm:$0xff] }
 0x873   : > { %v6547_v10 = vrot.slane %v6546_v7, 2  ;;  %v14200_v50 = vsel %vm6671_vm1, %v6667_v37, 0.0  ;;  %v6493_v53 = vrot.slane %v6492_v60, 1  ;;  %v6498_v5 = vrot.slane %v6497_v1, 2  ;;  %v6610_v35 = vld [vmem:[#allocation7 + $0x1a0] sm:$0xff] }
 0x874   : > { %v6535_v11 = vrot.slane %v6534_v30, 1  ;;  %v6541_v12 = vmax.f32 %v6539_v38, %v6540_v32  ;;  %v6554_v19 = vrot.slane %v6553_v52, 2  ;;  %6706 = vrot.lane.b32.xlu1 %v14200_v50, %s14557_s18  ;;  %v6682_v20 = vrot.slane %v14200_v50, 1  ;;  %v6571_v38 = vld [vmem:[#allocation7 + $0x68] sm:$0xff] }
 0x875   : > { %v6548_v47 = vmax.f32 %v6546_v7, %v6547_v10  ;;  %v6494_v2 = vmax.f32 %v6492_v60, %v6493_v53  ;;  %v6499_v58 = vmax.f32 %v6497_v1, %v6498_v5  ;;  %v6650_v13 = vsel %vm5101_vm3, %v6487_v18, %v14173_v56  ;;  %v6590_v56 = vld [vmem:[#allocation7 + $0x100] sm:$0xff]  ;;  %v6588_v10 = vld [vmem:[#allocation7 + $0xf0] sm:$0xff]  ;;  %v6589_v53 = vld [vmem:[#allocation7 + $0xf8] sm:$0xff] }
 0x876   : > { %v6536_v46 = vmax.f32 %v6534_v30, %v6535_v11  ;;  %v6542_v15 = vrot.slane %v6541_v12, 1  ;;  %6687 = vrot.lane.b32.xlu0 %v6682_v20, %s14557_s18  ;;  %v6514_v48 = vrot.slane %v6513_v28, 1  ;;  %v6508_v3 = vmax.f32 %v6506_v43, %v6507_v6 }
 0x877   : > { %v6549_v63 = vrot.slane %v6548_v47, 1  ;;  %v6500_v33 = vrot.slane %v6499_v58, 1  ;;  %v6520_v23 = vmax.f32 %v6518_v4, %v6519_v29  ;;  %v6651_v26 = vsel %vm5103_vm4, %v6494_v2, %v6650_v13  ;;  %v6609_v29 = vld [vmem:[#allocation7 + $0x198] sm:$0xff]  ;;  %v6595_v2 = vld [vmem:[#allocation7 + $0x128] sm:$0xff] }
 0x878   : > { %v6543_v41 = vmax.f32 %v6541_v12, %v6542_v15  ;;  %v6515_v16 = vmax.f32 %v6513_v28, %v6514_v48  ;;  %v6525_v42 = vmax.f32 %v14181_v9, %v6524_v8  ;;  %v6555_v54 = vmax.f32 %v6553_v52, %v6554_v19  ;;  %v6573_v15 = vld [vmem:[#allocation7 + $0x78] sm:$0xff]  ;;  %v6612_v48 = vld [vmem:[#allocation7 + $0x1b0] sm:$0xff] }
 0x879   : > { %v6501_v25 = vmax.f32 %v6499_v58, %v6500_v33  ;;  %v6521_v0 = vrot.slane %v6520_v23, 1  ;;  %v6550_v44 = vmax.f32 %v6548_v47, %v6549_v63  ;;  %v8951_v17 = vpack.c.bf16 %v6585_v55, %v6584_v40  ;;  %v6594_v47 = vld [vmem:[#allocation7 + $0x120] sm:$0xff]  ;;  %v6623_v40 = vld [vmem:[#allocation7 + $0x208] sm:$0xff]  ;;  %v6596_v55 = vld [vmem:[#allocation7 + $0x130] sm:$0xff] }
 0x87a   : > { %v6526_v36 = vrot.slane %v6525_v42, 2  ;;  %v6653_v4 = vsel %vm5101_vm3, %v6515_v16, %v6508_v3  ;;  %v6656_v43 = vsel %vm5101_vm3, %v6543_v41, %v6536_v46  ;;  %v6556_v6 = vrot.slane %v6555_v54, 1  ;;  %v6572_v46 = vld [vmem:[#allocation7 + $0x70] sm:$0xff]  ;;  %v6613_v3 = vld [vmem:[#allocation7 + $0x1b8] sm:$0xff] }
 0x87b   : > { %v6652_v9 = vsel %vm5105_vm5, %v6501_v25, %v6651_v26  ;;  %v6522_v8 = vmax.f32 %v6520_v23, %v6521_v0  ;;  %v6657_v28 = vsel %vm5103_vm4, %v6550_v44, %v6656_v43  ;;  %v8965_v49 = vpack.c.bf16 %v6591_v59, %v6590_v56  ;;  %8952 = vmatprep.subr.bf16.mxu0 %v8951_v17  ;;  %v6622_v23 = vld [vmem:[#allocation7 + $0x200] sm:$0xff]  ;;  %v6597_v56 = vld [vmem:[#allocation7 + $0x138] sm:$0xff]  ;;  %v6615_v0 = vld [vmem:[#allocation7 + $0x1c8] sm:$0xff] }
 0x87c   : > { %v6660_v31 = vrot.slane %v6652_v9, 7  ;;  %v6527_v22 = vmax.f32 %v6525_v42, %v6526_v36  ;;  %v6557_v18 = vmax.f32 %v6555_v54, %v6556_v6  ;;  %v8953_v60 = vpack.c.bf16 %v6569_v21, %v6568_v61  ;;  %v6614_v25 = vld [vmem:[#allocation7 + $0x1c0] sm:$0xff]  ;;  %v6617_v9 = vld [vmem:[#allocation7 + $0x1d8] sm:$0xff] }
 0x87d   : > { %v6654_v7 = vsel %vm5103_vm4, %v6522_v8, %v6653_v4  ;;  %v8967_v1 = vpack.c.bf16 %v6609_v29, %v6608_v57  ;;  %8966 = vmatpush3.bf16.msra.mxu1 %v8965_v49  ;;  %v8955_v52 = vpack.c.bf16 %v6587_v39, %v6586_v62  ;;  %v8969_v37 = vpack.c.bf16 %v6593_v14, %v6592_v24  ;;  %v6598_v43 = vld [vmem:[#allocation7 + $0x140] sm:$0xff]  ;;  %v6599_v29 = vld [vmem:[#allocation7 + $0x148] sm:$0xff]  ;;  %v6616_v39 = vld [vmem:[#allocation7 + $0x1d0] sm:$0xff] }
 0x87e   : > { %v6668_v30 = vsel %vm641_vm0, 0.0, %v6660_v31  ;;  %v6528_v32 = vrot.slane %v6527_v22, 1  ;;  %v6658_v11 = vsel %vm5105_vm5, %v6557_v18, %v6657_v28  ;;  %8954 = vmatpush3.bf16.msra.mxu0 %v8953_v60  ;;  %v8957_v12 = vpack.c.bf16 %v6571_v38, %v6570_v27  ;;  %v6600_v14 = vld [vmem:[#allocation7 + $0x150] sm:$0xff]  ;;  %v6601_v27 = vld [vmem:[#allocation7 + $0x158] sm:$0xff]  ;;  %v6618_v31 = vld [vmem:[#allocation7 + $0x1e0] sm:$0xff] }
 0x87f   : > { %v14219_v5 = vsel %vm6671_vm1, %v6668_v30, 0.0  ;;  %8968 = vmatprep.subr.bf16.mxu1 %v8967_v1  ;;  %v8971_v19 = vpack.c.bf16 %v6611_v51, %v6610_v35  ;;  %8956 = vmatprep.subr.bf16.mxu0 %v8955_v52  ;;  %v6662_v63 = vrot.slane %v6658_v11, 7  ;;  %v8959_v33 = vpack.c.bf16 %v6589_v53, %v6588_v10  ;;  %v6602_v35 = vld [vmem:[#allocation7 + $0x160] sm:$0xff]  ;;  %v6603_v51 = vld [vmem:[#allocation7 + $0x168] sm:$0xff]  ;;  %v6621_v18 = vld [vmem:[#allocation7 + $0x1f8] sm:$0xff]  ;;  %v6686_v53 = vpop.permute.xlu1 %6685 }
 0x880   : > { %6708 = vrot.lane.b32.xlu0 %v14219_v5, %s14557_s18  ;;  %v6683_v58 = vrot.slane %v14219_v5, 1  ;;  %v6529_v13 = vmax.f32 %v6527_v22, %v6528_v32  ;;  %v8973_v26 = vpack.c.bf16 %v6595_v2, %v6594_v47  ;;  %v8961_v42 = vpack.c.bf16 %v6573_v15, %v6572_v46  ;;  %v6619_v22 = vld [vmem:[#allocation7 + $0x1e8] sm:$0xff]  ;;  %v6604_v52 = vld [vmem:[#allocation7 + $0x170] sm:$0xff]  ;;  %v6625_v15 = vld [vmem:[#allocation7 + $0x218] sm:$0xff] }
 0x881   : > { %8970 = vmatpush3.bf16.msra.mxu1 %v8969_v37  ;;  %v8975_v59 = vpack.c.bf16 %v6613_v3, %v6612_v48  ;;  %v14229_v44 = vpack.c.bf16 %v6623_v40, %v6622_v23  ;;  %v6670_v61 = vsel %vm641_vm0, 0.0, %v6662_v63  ;;  %v8977_v57 = vpack.c.bf16 %v6597_v56, %v6596_v55  ;;  %v6605_v37 = vld [vmem:[#allocation7 + $0x178] sm:$0xff]  ;;  %v6624_v46 = vld [vmem:[#allocation7 + $0x210] sm:$0xff] }
 0x882   : > { %6689 = vrot.lane.b32.xlu1 %v6683_v58, %s14557_s18  ;;  %v6655_v41 = vsel %vm5105_vm5, %v6529_v13, %v6654_v7  ;;  %8958 = vmatpush3.bf16.msra.mxu0 %v8957_v12  ;;  %v8979_v4 = vpack.c.bf16 %v6615_v0, %v6614_v25  ;;  %v14240_v62 = vsel %vm6671_vm1, %v6670_v61, 0.0  ;;  %v6698_v8 = vrot.slane %v14200_v50, 2  ;;  %v6620_v7 = vld [vmem:[#allocation7 + $0x1f0] sm:$0xff]  ;;  %v6629_v56 = vld [vmem:[#allocation7 + $0x238] sm:$0xff] }
 0x883   : > { %v6661_v16 = vrot.slane %v6655_v41, 7  ;;  %8972 = vmatprep.subr.bf16.mxu1 %v8971_v19  ;;  %8960 = vmatprep.subr.bf16.mxu0 %v8959_v33  ;;  %v8981_v6 = vpack.c.bf16 %v6599_v29, %v6598_v43  ;;  %v6718_v28 = vrot.slane %v14240_v62, 1  ;;  %v8983_v24 = vpack.c.bf16 %v6617_v9, %v6616_v39  ;;  %v6626_v41 = vld [vmem:[#allocation7 + $0x220] sm:$0xff]  ;;  %v6628_v55 = vld [vmem:[#allocation7 + $0x230] sm:$0xff] }
 0x884   : > { %v8985_v17 = vpack.c.bf16 %v6601_v27, %v6600_v14  ;;  %v14255_v49 = vrot.slane %v14219_v5, 2  ;;  %v8987_v38 = vpack.c.bf16 %v6619_v22, %v6618_v31  ;;  %v6723_v60 = vrot.slane %v14240_v62, 2 }
 0x885   : > { %v6669_v54 = vsel %vm641_vm0, 0.0, %v6661_v16  ;;  %8974 = vmatpush3.bf16.msra.mxu1 %v8973_v26  ;;  %v8989_v1 = vpack.c.bf16 %v6603_v51, %v6602_v35  ;;  %v8991_v32 = vpack.c.bf16 %v6621_v18, %v6620_v7  ;;  %v8993_v10 = vpack.c.bf16 %v6605_v37, %v6604_v52  ;;  %v6627_v26 = vld [vmem:[#allocation7 + $0x228] sm:$0xff]  ;;  %v7080_v35 = vld [vmem:[#allocation8 + $0x180] sm:$0xff]  ;;  %v7082_v52 = vld [vmem:[#allocation8 + $0x190] sm:$0xff] }
 0x886   : > { %v14234_v21 = vsel %vm6671_vm1, %v6669_v54, 0.0  ;;  %8962 = vmatpush3.bf16.msra.mxu0 %v8961_v42  ;;  %8976 = vmatprep.subr.bf16.mxu1 %v8975_v59  ;;  %v14266_v19 = vrot.slane %v14105_v34, 2  ;;  %v6739_v47 = vsel %vm3405_vm13, %v14105_v34, %v6686_v53  ;;  %v8999_v40 = vpack.c.bf16 %v6625_v15, %v6624_v46  ;;  %v7081_v7 = vld [vmem:[#allocation8 + $0x188] sm:$0xff]  ;;  %v7032_v18 = vld [vmem:[#allocation8] sm:$0xff]  ;;  %v7083_v37 = vld [vmem:[#allocation8 + $0x198] sm:$0xff] }
 0x887   : > { %6710 = vrot.lane.b32.xlu1 %v14234_v21, %s14557_s18  ;;  %v6684_v36 = vrot.slane %v14234_v21, 1  ;;  %8996 = vmatprep.subr.bf16.mxu0 %v14229_v44  ;;  %v6700_v30 = vrot.slane %v14234_v21, 2  ;;  %v9003_v42 = vpack.c.bf16 %v6627_v26, %v6626_v41  ;;  %v9047_v53 = vpack.c.bf16 %v7083_v37, %v7082_v52  ;;  %v7052_v46 = vld [vmem:[#allocation8 + $0xa0] sm:$0xff]  ;;  %v7053_v15 = vld [vmem:[#allocation8 + $0xa8] sm:$0xff] }
 0x888   : > { %v6788_v22 = vcombine.low %v6723_v60, %v14266_v19  ;;  %v7037_v41 = vld [vmem:[#allocation8 + $0x28] sm:$0xff]  ;;  %v7068_v26 = vld [vmem:[#allocation8 + $0x120] sm:$0xff] }
 0x889   : > { %6691 = vrot.lane.b32.xlu0 %v6684_v36, %s14557_s18  ;;  %8978 = vmatpush3.bf16.msra.mxu1 %v8977_v57  ;;  %v9007_v57 = vpack.c.bf16 %v6629_v56, %v6628_v55  ;;  %v7054_v56 = vld [vmem:[#allocation8 + $0xb0] sm:$0xff]  ;;  %v7093_v37 = vld [vmem:[#allocation8 + $0x1e8] sm:$0xff] }
 0x88a   : > { %8980 = vmatprep.subr.bf16.mxu1 %v8979_v4 }
 0x88b   : > { %6724 = vrot.lane.b32.xlu1 %v6698_v8, %s14557_s18 }
 0x88d   : > { %6712 = vrot.lane.b32.xlu0 %v14240_v62, %s14557_s18  ;;  %8982 = vmatpush3.bf16.msra.mxu1 %v8981_v6  ;;  %v6783_v6 = vcombine.low %v14255_v49, %v6700_v30 }
 0x88e   : > { %8984 = vmatprep.subr.bf16.mxu1 %v8983_v24 }
 0x88f   : > { %6736 = vrot.lane.b32.xlu1 %v6718_v28, %s14557_s18 }
 0x891   : > { %6726 = vrot.lane.b32.xlu0 %v14255_v49, %s14557_s18  ;;  %8986 = vmatpush3.bf16.msra.mxu1 %v8985_v17 }
 0x892   : > { %8988 = vmatprep.subr.bf16.mxu1 %v8987_v38  ;;  %v7049_v38 = vld [vmem:[#allocation8 + $0x88] sm:$0xff] }
 0x893   : > { %6730 = vrot.lane.b32.xlu1 %v6723_v60, %s14557_s18  ;;  %v7033_v60 = vld [vmem:[#allocation8 + $0x8] sm:$0xff] }
 0x895   : > { %6728 = vrot.lane.b32.xlu0 %v6700_v30, %s14557_s18  ;;  %8990 = vmatpush3.bf16.msra.mxu1 %v8989_v1  ;;  %v9043_v1 = vpack.c.bf16 %v7081_v7, %v7080_v35  ;;  %v7042_v7 = vld [vmem:[#allocation8 + $0x50] sm:$0xff]  ;;  %s10213_s18 = smov [#allocation11]  }
 0x896   : > { %8992 = vmatprep.subr.bf16.mxu1 %v8991_v32  ;;  %v7050_v32 = vld [vmem:[#allocation8 + $0x90] sm:$0xff]  ;;  %s10062_s13 = sshll.u32 %s10213_s18, 4  ;;  %s10063_s13 = int_to_ptr.vmem [resolvable:$false] %s10062_s13 }
 0x897   : > { %s10064_s29 = scalar_lea.vmem %s10063_s13, 2048  ;;  %p10065_p6 = scmp.lt.s32.totalorder %s14376_s20, %s10063_s13 }
 0x898   : > { %p10066_p9 = scmp.lt.s32.totalorder %s10064_s29, %s10058_s25 }
 0x899   : > { %8994 = vmatpush3.bf16.msra.mxu1 %v8993_v10 }
 0x89a   : > { %9044 = vmatprep.subr.bf16.mxu1 %v9043_v1  ;;  %p10067_p5 = por %p10066_p9, %p10065_p6 }
 0x89c   : > { %p10068_p0 = pnand %p10067_p5, %p10061_p1 }
 0x8e6   : > { %v6707_v12 = vpop.permute.xlu1 %6706 }
 0x8e7   : > { %v6743_v48 = vsel %vm3405_vm13, %v14266_v19, %v6707_v12  ;;  %v7035_v12 = vld [vmem:[#allocation8 + $0x18] sm:$0xff] }
 0x8e8   : > { %v6688_v11 = vpop.permute.xlu0 %6687 }
 0x8e9   : > { %v6740_v2 = vsel %vm3405_vm13, %v14200_v50, %v6688_v11  ;;  %v7034_v11 = vld [vmem:[#allocation8 + $0x10] sm:$0xff] }
 0x8ea   : > { %v7966_v3 = vcombine.low %v6739_v47, %v6740_v2  ;;  %v9017_v2 = vpack.c.bf16 %v7035_v12, %v7034_v11 }
 0x8f2   : > { %v6709_v13 = vpop.permute.xlu0 %6708 }
 0x8f3   : > { %v6744_v63 = vsel %vm3405_vm13, %v6698_v8, %v6709_v13  ;;  %v7067_v13 = vld [vmem:[#allocation8 + $0x118] sm:$0xff] }
 0x8f4   : > { %v7967_v33 = vcombine.low %v6743_v48, %v6744_v63  ;;  %v6690_v23 = vpop.permute.xlu1 %6689  ;;  %v9019_v63 = vpack.c.bf16 %v7053_v15, %v7052_v46  ;;  %v7062_v46 = vld [vmem:[#allocation8 + $0xf0] sm:$0xff]  ;;  %v7063_v15 = vld [vmem:[#allocation8 + $0xf8] sm:$0xff] }
 0x8f5   : > { %v6741_v25 = vsel %vm3405_vm13, %v14219_v5, %v6690_v23  ;;  %v7036_v23 = vld [vmem:[#allocation8 + $0x20] sm:$0xff] }
 0x8f6   : > { %6865 = vmatprep.mubr.f32.mxu0 %v7967_v33  ;;  %v7084_v33 = vld [vmem:[#allocation8 + $0x1a0] sm:$0xff] }
 0x8f7   : > { %6866 = vmatmul.mubr.f32.vlgmr.msra.gmra.mrb[88].mxu0 %v7966_v3  ;;  %v7085_v3 = vld [vmem:[#allocation8 + $0x1a8] sm:$0xff] }
 0x8f8   : > { %8998 = vmatpush3.bf16.msra.mxu0 %v14229_v44 }
 0x8f9   : > { %v6711_v16 = vpop.permute.xlu1 %6710  ;;  %9000 = vmatprep.subr.bf16.mxu0 %v8999_v40 }
 0x8fa   : > { %v6745_v44 = vsel %vm3405_vm13, %v14255_v49, %v6711_v16  ;;  %v7069_v16 = vld [vmem:[#allocation8 + $0x128] sm:$0xff] }
 0x8fb   : > { %v6692_v59 = vpop.permute.xlu0 %6691  ;;  %v9053_v55 = vpack.c.bf16 %v7069_v16, %v7068_v26  ;;  %v7078_v26 = vld [vmem:[#allocation8 + $0x170] sm:$0xff]  ;;  %v7079_v16 = vld [vmem:[#allocation8 + $0x178] sm:$0xff] }
 0x8fc   : > { %v6742_v0 = vsel %vm3405_vm13, %v14234_v21, %v6692_v59  ;;  %9002 = vmatpush3.bf16.msra.mxu0 %v8999_v40  ;;  %v9051_v40 = vpack.c.bf16 %v7085_v3, %v7084_v33  ;;  %v7055_v59 = vld [vmem:[#allocation8 + $0xb8] sm:$0xff]  ;;  %v7046_v3 = vld [vmem:[#allocation8 + $0x70] sm:$0xff] }
 0x8fd   : > { %v7969_v54 = vcombine.low %v6741_v25, %v6742_v0  ;;  %v6725_v61 = vpop.permute.xlu1 %6724  ;;  %9004 = vmatprep.subr.bf16.mxu0 %v9003_v42  ;;  %v7086_v25 = vld [vmem:[#allocation8 + $0x1b0] sm:$0xff]  ;;  %v9023_v0 = vpack.c.bf16 %v7055_v59, %v7054_v56  ;;  %v7095_v33 = vld [vmem:[#allocation8 + $0x1f8] sm:$0xff]  ;;  %v7113_v56 = vld [vmem:[#allocation8 + $0x288] sm:$0xff] }
 0x8fe   : > { %v6747_v24 = vsel %vm3405_vm13, %v6682_v20, %v6725_v61  ;;  %v7038_v61 = vld [vmem:[#allocation8 + $0x30] sm:$0xff]  ;;  %v7144_v59 = vld [vmem:[#allocation8 + $0x380] sm:$0xff] }
 0x8ff   : > { %6940 = vmatprep.mubr.f32.mxu1 %v7969_v54  ;;  %v6713_v4 = vpop.permute.xlu0 %6712 }
 0x900   : > { %v6746_v43 = vsel %vm3405_vm13, %v6700_v30, %v6713_v4  ;;  %9006 = vmatpush3.bf16.msra.mxu0 %v9003_v42  ;;  %v7064_v30 = vld [vmem:[#allocation8 + $0x100] sm:$0xff]  ;;  %v9021_v42 = vpack.c.bf16 %v7037_v41, %v7036_v23  ;;  %v7047_v23 = vld [vmem:[#allocation8 + $0x78] sm:$0xff] }
 0x901   : > { %v7971_v29 = vcombine.low %v6745_v44, %v6746_v43  ;;  %v6737_v39 = vpop.permute.xlu1 %6736  ;;  %9008 = vmatprep.subr.bf16.mxu0 %v9007_v57  ;;  %v7070_v43 = vld [vmem:[#allocation8 + $0x130] sm:$0xff]  ;;  %v9041_v41 = vpack.c.bf16 %v7047_v23, %v7046_v3  ;;  %v7115_v23 = vld [vmem:[#allocation8 + $0x298] sm:$0xff] }
 0x902   : > { %v6751_v9 = vsel %vm3405_vm13, %v14240_v62, %v6737_v39  ;;  %v9013_v62 = vpack.c.bf16 %v7033_v60, %v7032_v18  ;;  %v7043_v18 = vld [vmem:[#allocation8 + $0x58] sm:$0xff] }
 0x903   : > { %6870 = vmatprep.mubr.f32.mxu0 %v7971_v29  ;;  %v6727_v8 = vpop.permute.xlu0 %6726  ;;  %v7973_v17 = vcombine.low %v6751_v9, %v6739_v47  ;;  %v7066_v47 = vld [vmem:[#allocation8 + $0x110] sm:$0xff]  ;;  %v7071_v29 = vld [vmem:[#allocation8 + $0x138] sm:$0xff]  ;;  %v7056_v9 = vld [vmem:[#allocation8 + $0xc0] sm:$0xff]  ;;  %v9033_v1 = vpack.c.bf16 %v7043_v18, %v7042_v7 }
 0x904   : > { %v6748_v14 = vsel %vm3405_vm13, %v6683_v58, %v6727_v8  ;;  %6871 = vmatmul.mubr.f32.gmra.mrb[90].mxu0 %v7969_v54  ;;  %v7048_v58 = vld [vmem:[#allocation8 + $0x80] sm:$0xff]  ;;  %v9049_v48 = vpack.c.bf16 %v7067_v13, %v7066_v47  ;;  %v7087_v54 = vld [vmem:[#allocation8 + $0x1b8] sm:$0xff]  ;;  %v9057_v39 = vpack.c.bf16 %v7071_v29, %v7070_v43  ;;  %v7057_v8 = vld [vmem:[#allocation8 + $0xc8] sm:$0xff] }
 0x905   : > { %v7968_v27 = vcombine.low %v6747_v24, %v6748_v14  ;;  %9010 = vmatpush3.bf16.msra.mxu0 %v9007_v57  ;;  %8709 = vmatprep.mubr.msk.f32.mxu0 %vm3405_vm13, %v6783_v6  ;;  %v6731_v31 = vpop.permute.xlu1 %6730  ;;  %v9011_v51 = vpack.c.bf16 %v7049_v38, %v7048_v58  ;;  %v7039_v57 = vld [vmem:[#allocation8 + $0x38] sm:$0xff]  ;;  %v9055_v4 = vpack.c.bf16 %v7087_v54, %v7086_v25  ;;  %v7088_v6 = vld [vmem:[#allocation8 + $0x1c0] sm:$0xff]  ;;  %v7089_v14 = vld [vmem:[#allocation8 + $0x1c8] sm:$0xff] }
 0x906   : > { %v6750_v50 = vsel %vm3405_vm13, %v6718_v28, %v6731_v31  ;;  %v7065_v28 = vld [vmem:[#allocation8 + $0x108] sm:$0xff]  ;;  %v9025_v44 = vpack.c.bf16 %v7039_v57, %v7038_v61  ;;  %v9027_v24 = vpack.c.bf16 %v7057_v8, %v7056_v9  ;;  %v7059_v58 = vld [vmem:[#allocation8 + $0xd8] sm:$0xff]  ;;  %v7090_v38 = vld [vmem:[#allocation8 + $0x1d0] sm:$0xff] }
 0x907   : > { %6941 = vmatmul.mubr.f32.vlgmr.msra.gmra.mrb[104].mxu1 %v7968_v27  ;;  %v6729_v49 = vpop.permute.xlu0 %6728  ;;  %9012 = vmatprep.subr.bf16.mxu0 %v9011_v51  ;;  %v9045_v21 = vpack.c.bf16 %v7065_v28, %v7064_v30  ;;  %v7040_v27 = vld [vmem:[#allocation8 + $0x40] sm:$0xff]  ;;  %v7041_v31 = vld [vmem:[#allocation8 + $0x48] sm:$0xff]  ;;  %v7091_v51 = vld [vmem:[#allocation8 + $0x1d8] sm:$0xff] }
 0x908   : > { %v6749_v20 = vsel %vm3405_vm13, %v6684_v36, %v6729_v49  ;;  %6945 = vmatprep.mubr.f32.mxu1 %v7973_v17  ;;  %8710 = vmatmul.mubr.msk.f32.vlgmr.msra.gmra.mrb[92].mxu0 %vm3405_vm13, %v6788_v22  ;;  %v7051_v36 = vld [vmem:[#allocation8 + $0x98] sm:$0xff]  ;;  %v9059_v22 = vpack.c.bf16 %v7089_v14, %v7088_v6  ;;  %v9029_v17 = vpack.c.bf16 %v7041_v31, %v7040_v27  ;;  %v7072_v49 = vld [vmem:[#allocation8 + $0x140] sm:$0xff]  ;;  %v7097_v18 = vld [vmem:[#allocation8 + $0x208] sm:$0xff] }
 0x909   : > { %v7972_v5 = vcombine.low %v6749_v20, %v6750_v50  ;;  %9014 = vmatpush3.bf16.msra.mxu0 %v9013_v62  ;;  %v9015_v10 = vpack.c.bf16 %v7051_v36, %v7050_v32  ;;  %9046 = vmatpush3.bf16.msra.mxu1 %v9045_v21  ;;  %v7073_v50 = vld [vmem:[#allocation8 + $0x148] sm:$0xff]  ;;  %v9063_v60 = vpack.c.bf16 %v7091_v51, %v7090_v38  ;;  %v7074_v62 = vld [vmem:[#allocation8 + $0x150] sm:$0xff]  ;;  %v7075_v30 = vld [vmem:[#allocation8 + $0x158] sm:$0xff] }
 0x90a   : > { %9048 = vmatprep.subr.bf16.mxu1 %v9047_v53  ;;  %v9061_v20 = vpack.c.bf16 %v7073_v50, %v7072_v49  ;;  %v9065_v28 = vpack.c.bf16 %v7075_v30, %v7074_v62  ;;  %v7060_v32 = vld [vmem:[#allocation8 + $0xe0] sm:$0xff]  ;;  %v7061_v21 = vld [vmem:[#allocation8 + $0xe8] sm:$0xff] }
 0x90b   : > { %6946 = vmatmul.mubr.f32.gmra.mrb[106].mxu1 %v7972_v5  ;;  %9016 = vmatprep.subr.bf16.mxu0 %v9015_v10  ;;  %v7058_v5 = vld [vmem:[#allocation8 + $0xd0] sm:$0xff]  ;;  %v7092_v36 = vld [vmem:[#allocation8 + $0x1e0] sm:$0xff]  ;;  %v9035_v52 = vpack.c.bf16 %v7061_v21, %v7060_v32  ;;  %v7045_v53 = vld [vmem:[#allocation8 + $0x68] sm:$0xff] }
 0x90c   : > { %v9031_v35 = vpack.c.bf16 %v7059_v58, %v7058_v5  ;;  %v7044_v10 = vld [vmem:[#allocation8 + $0x60] sm:$0xff]  ;;  %v9067_v11 = vpack.c.bf16 %v7093_v37, %v7092_v36  ;;  %v7146_v32 = vld [vmem:[#allocation8 + $0x390] sm:$0xff]  ;;  %v7147_v21 = vld [vmem:[#allocation8 + $0x398] sm:$0xff] }
 0x90d   : > { %9018 = vmatpush3.bf16.msra.mxu0 %v9017_v2  ;;  %9050 = vmatpush3.bf16.msra.mxu1 %v9049_v48  ;;  %v9037_v12 = vpack.c.bf16 %v7045_v53, %v7044_v10  ;;  %v7076_v47 = vld [vmem:[#allocation8 + $0x160] sm:$0xff]  ;;  %v7077_v2 = vld [vmem:[#allocation8 + $0x168] sm:$0xff]  ;;  %v7094_v48 = vld [vmem:[#allocation8 + $0x1f0] sm:$0xff] }
 0x90e   : > { %9020 = vmatprep.subr.bf16.mxu0 %v9019_v63  ;;  %9052 = vmatprep.subr.bf16.mxu1 %v9051_v40  ;;  %v9069_v13 = vpack.c.bf16 %v7077_v2, %v7076_v47  ;;  %v9039_v63 = vpack.c.bf16 %v7063_v15, %v7062_v46  ;;  %v9071_v40 = vpack.c.bf16 %v7095_v33, %v7094_v48  ;;  %v7965_v29 = vld [vmem:[%s14509_s10] ss:$0 sm:$0xff]  ;;  %v7114_v46 = vld [vmem:[#allocation8 + $0x290] sm:$0xff] }
 0x90f   : > { %v7096_v38 = vld [vmem:[#allocation8 + $0x200] sm:$0xff]  ;;  %v9111_v15 = vpack.c.bf16 %v7147_v21, %v7146_v32  ;;  %v7153_v21 = vld [vmem:[#allocation8 + $0x3c8] sm:$0xff] }
 0x910   : > { %v7152_v32 = vld [vmem:[#allocation8 + $0x3c0] sm:$0xff] }
 0x911   : > { %9022 = vmatpush3.bf16.msra.mxu0 %v9021_v42  ;;  %9054 = vmatpush3.bf16.msra.mxu1 %v9053_v55  ;;  %v9073_v42 = vpack.c.bf16 %v7079_v16, %v7078_v26  ;;  %v7112_v55 = vld [vmem:[#allocation8 + $0x280] sm:$0xff] }
 0x912   : > { %9024 = vmatprep.subr.bf16.mxu0 %v9023_v0  ;;  %9056 = vmatprep.subr.bf16.mxu1 %v9055_v4  ;;  %v9075_v25 = vpack.c.bf16 %v7113_v56, %v7112_v55  ;;  %v7145_v0 = vld [vmem:[#allocation8 + $0x388] sm:$0xff] }
 0x913   : > { %v9107_v54 = vpack.c.bf16 %v7145_v0, %v7144_v59 }
 0x915   : > { %9026 = vmatpush3.bf16.msra.mxu0 %v9025_v44  ;;  %9058 = vmatpush3.bf16.msra.mxu1 %v9057_v39 }
 0x916   : > { %9028 = vmatprep.subr.bf16.mxu0 %v9027_v24  ;;  %9060 = vmatprep.subr.bf16.mxu1 %v9059_v22 }
 0x919   : > { %9030 = vmatpush3.bf16.msra.mxu0 %v9029_v17  ;;  %9062 = vmatpush3.bf16.msra.mxu1 %v9061_v20 }
 0x91a   : > { %9032 = vmatprep.subr.bf16.mxu0 %v9031_v35  ;;  %9064 = vmatprep.subr.bf16.mxu1 %v9063_v60  ;;  %v7128_v60 = vld [vmem:[#allocation8 + $0x300] sm:$0xff] }
 0x91d   : > { %9034 = vmatpush3.bf16.msra.mxu0 %v9033_v1  ;;  %9066 = vmatpush3.bf16.msra.mxu1 %v9065_v28  ;;  %v7129_v1 = vld [vmem:[#allocation8 + $0x308] sm:$0xff] }
 0x91e   : > { %9036 = vmatprep.subr.bf16.mxu0 %v9035_v52  ;;  %9068 = vmatprep.subr.bf16.mxu1 %v9067_v11  ;;  %v9077_v52 = vpack.c.bf16 %v7097_v18, %v7096_v38  ;;  %v9109_v37 = vpack.c.bf16 %v7129_v1, %v7128_v60  ;;  %v7118_v38 = vld [vmem:[#allocation8 + $0x2b0] sm:$0xff] }
 0x91f   : > { %v7102_v60 = vld [vmem:[#allocation8 + $0x230] sm:$0xff] }
 0x920   : > { %v7134_v1 = vld [vmem:[#allocation8 + $0x330] sm:$0xff] }
 0x921   : > { %9038 = vmatpush3.bf16.msra.mxu0 %v9037_v12  ;;  %9070 = vmatpush3.bf16.msra.mxu1 %v9069_v13 }
 0x922   : > { %9040 = vmatprep.subr.bf16.mxu0 %v9039_v63  ;;  %9072 = vmatprep.subr.bf16.mxu1 %v9071_v40  ;;  %v7130_v40 = vld [vmem:[#allocation8 + $0x310] sm:$0xff] }
 0x925   : > { %9042 = vmatpush3.bf16.msra.mxu0 %v9041_v41  ;;  %9074 = vmatpush3.bf16.msra.mxu1 %v9073_v42  ;;  %v7131_v41 = vld [vmem:[#allocation8 + $0x318] sm:$0xff] }
 0x926   : > { %9076 = vmatprep.subr.bf16.mxu0 %v9075_v25  ;;  %9108 = vmatprep.subr.bf16.mxu1 %v9107_v54  ;;  %v7098_v54 = vld [vmem:[#allocation8 + $0x210] sm:$0xff] }
 0x9ca   : > { %v8307_v61 = vpop.f32.mrb[88].mxu0 }
 0x9cb   : > { %v8308_v57 = vpop.f32.mrb[89].mxu0 }
 0x9cc   : > { %v8309_v4 = vadd.f32 %v8308_v57, %v8307_v61  ;;  %v7099_v61 = vld [vmem:[#allocation8 + $0x218] sm:$0xff] }
 0x9ce   : > { %v6868_v24 = vadd.f32 %v8309_v4, %v7965_v29  ;;  %v9079_v4 = vpack.c.bf16 %v7115_v23, %v7114_v46  ;;  %v7137_v46 = vld [vmem:[#allocation8 + $0x348] sm:$0xff]  ;;  %v7123_v23 = vld [vmem:[#allocation8 + $0x2d8] sm:$0xff] }
 0x9d7   : > { %v8310_v44 = vpop.f32.mrb[90].mxu0 }
 0x9d8   : > { %v8311_v43 = vpop.f32.mrb[91].mxu0 }
 0x9d9   : > { %v8312_v39 = vadd.f32 %v8311_v43, %v8310_v44  ;;  %v9113_v44 = vpack.c.bf16 %v7131_v41, %v7130_v40  ;;  %v7116_v43 = vld [vmem:[#allocation8 + $0x2a0] sm:$0xff] }
 0x9da   : > { %v8345_v9 = vpop.f32.mrb[104].mxu1 }
 0x9db   : > { %v8346_v8 = vpop.f32.mrb[105].mxu1  ;;  %v8711_v6 = vpop.f32.mrb[92].mxu0  ;;  %v6873_v49 = vadd.f32 %v8312_v39, %v7965_v29  ;;  %v7117_v29 = vld [vmem:[#allocation8 + $0x2a8] sm:$0xff] }
 0x9dc   : > { %v8347_v14 = vadd.f32 %v8346_v8, %v8345_v9  ;;  %v7017_v27 = vpop.f32.mrb[93].mxu0 }
 0x9de   : > { %v6943_v31 = vadd.f32 %v8347_v14, %v6868_v24  ;;  %v8348_v22 = vpop.f32.mrb[106].mxu1  ;;  %v7149_v24 = vld [vmem:[#allocation8 + $0x3a8] sm:$0xff]  ;;  %v9081_v14 = vpack.c.bf16 %v7099_v61, %v7098_v54  ;;  %v7139_v54 = vld [vmem:[#allocation8 + $0x358] sm:$0xff] }
 0x9df   : > { %v8349_v17 = vpop.f32.mrb[107].mxu1 }
 0x9e0   : > { %v7018_v50 = vadd.f32 %v7017_v27, %v6943_v31  ;;  %v8350_v20 = vadd.f32 %v8349_v17, %v8348_v22  ;;  %v7100_v27 = vld [vmem:[#allocation8 + $0x220] sm:$0xff]  ;;  %v7133_v22 = vld [vmem:[#allocation8 + $0x328] sm:$0xff]  ;;  %v9083_v17 = vpack.c.bf16 %v7117_v29, %v7116_v43 }
 0x9e1   : > { %v7132_v31 = vld [vmem:[#allocation8 + $0x320] sm:$0xff]  ;;  %v7157_v43 = vld [vmem:[#allocation8 + $0x3e8] sm:$0xff] }
 0x9e2   : > { %v7026_v5 = vmax.f32 %v7018_v50, 0.0  ;;  %v6948_v58 = vadd.f32 %v8350_v20, %v6873_v49  ;;  %v7101_v49 = vld [vmem:[#allocation8 + $0x228] sm:$0xff]  ;;  %v7150_v50 = vld [vmem:[#allocation8 + $0x3b0] sm:$0xff]  ;;  %v7151_v20 = vld [vmem:[#allocation8 + $0x3b8] sm:$0xff] }
 0x9e3   : > { %v9119_v18 = vpack.c.bf16 %v7151_v20, %v7150_v50  ;;  %v7124_v29 = vld [vmem:[#allocation8 + $0x2e0] sm:$0xff]  ;;  %v7159_v50 = vld [vmem:[#allocation8 + $0x3f8] sm:$0xff]  ;;  %v7126_v20 = vld [vmem:[#allocation8 + $0x2f0] sm:$0xff] }
 0x9e4   : > { %v7030_v35 = vcombine.high %v7026_v5, %v7026_v5  ;;  %v7177_v51 = vrot.slane %v7026_v5, 7  ;;  %v7023_v7 = vadd.f32 %v8711_v6, %v6948_v58  ;;  %v7148_v6 = vld [vmem:[#allocation8 + $0x3a0] sm:$0xff] }
 0x9e5   : > { %v9115_v58 = vpack.c.bf16 %v7149_v24, %v7148_v6 }
 0x9e6   : > { %v7178_v62 = vrot.slane %v7030_v35, 7  ;;  %v7185_v30 = vsel %vm641_vm0, 0.0, %v7177_v51  ;;  %v7027_v28 = vmax.f32 %v7023_v7, 0.0  ;;  %v7119_v35 = vld [vmem:[#allocation8 + $0x2b8] sm:$0xff]  ;;  %v9117_v51 = vpack.c.bf16 %v7133_v22, %v7132_v31  ;;  %v7141_v31 = vld [vmem:[#allocation8 + $0x368] sm:$0xff] }
 0x9e7   : > { %v14308_v36 = vsel %vm6671_vm1, %v7185_v30, 0.0  ;;  %v9085_v7 = vpack.c.bf16 %v7101_v49, %v7100_v27  ;;  %v9087_v30 = vpack.c.bf16 %v7119_v35, %v7118_v38  ;;  %v7140_v27 = vld [vmem:[#allocation8 + $0x360] sm:$0xff]  ;;  %v7158_v49 = vld [vmem:[#allocation8 + $0x3f0] sm:$0xff] }
 0x9e8   : > { %v7186_v10 = vsel %vm641_vm0, 0.0, %v7178_v62  ;;  %v7199_v53 = vrot.slane %v14308_v36, 2  ;;  %v7031_v11 = vcombine.high %v7027_v28, %v7027_v28  ;;  %v7179_v12 = vrot.slane %v7027_v28, 7  ;;  %v7135_v62 = vld [vmem:[#allocation8 + $0x338] sm:$0xff] }
 0x9e9   : > { %v14313_v47 = vsel %vm6671_vm1, %v7186_v10, 0.0  ;;  %v7196_v2 = vrot.slane %v14308_v36, 1  ;;  %v7977_v13 = vcombine.low %v14105_v34, %v14308_v36  ;;  %v7103_v28 = vld [vmem:[#allocation8 + $0x238] sm:$0xff]  ;;  %v9121_v10 = vpack.c.bf16 %v7135_v62, %v7134_v1  ;;  %v7160_v62 = vld [vmem:[#allocation8 + $0x400] sm:$0xff] }
 0x9ea   : > { %v7180_v48 = vrot.slane %v7031_v11, 7  ;;  %v7187_v63 = vsel %vm641_vm0, 0.0, %v7179_v12  ;;  %v7980_v33 = vcombine.low %v14308_v36, %v14313_v47  ;;  %v7979_v3 = vcombine.low %v14266_v19, %v7199_v53  ;;  %v7104_v12 = vld [vmem:[#allocation8 + $0x240] sm:$0xff]  ;;  %v7111_v1 = vld [vmem:[#allocation8 + $0x278] sm:$0xff] }
 0x9eb   : > { %v7978_v26 = vcombine.low %v14108_v45, %v7196_v2  ;;  %v14326_v16 = vsel %vm6671_vm1, %v7187_v63, 0.0  ;;  %v7197_v42 = vrot.slane %v14313_v47, 1  ;;  %v7200_v55 = vrot.slane %v14313_v47, 2  ;;  %v7154_v63 = vld [vmem:[#allocation8 + $0x3d0] sm:$0xff] }
 0x9ec   : > { %7395 = vmatprep.mubr.f32.mxu1 %v7980_v33  ;;  %v7198_v56 = vrot.slane %v14326_v16, 1  ;;  %v7188_v59 = vsel %vm641_vm0, 0.0, %v7180_v48  ;;  %v14334_v25 = vcombine.low %v14313_v47, %v14326_v16  ;;  %v7201_v0 = vrot.slane %v14326_v16, 2  ;;  %v7105_v48 = vld [vmem:[#allocation8 + $0x248] sm:$0xff]  ;;  %v7155_v33 = vld [vmem:[#allocation8 + $0x3d8] sm:$0xff] }
 0x9ed   : > { %7320 = vmatprep.mubr.f32.mxu0 %v7978_v26  ;;  %7396 = vmatmul.mubr.f32.vlgmr.msra.gmra.mrb[108].mxu1 %v7979_v3  ;;  %v14338_v57 = vsel %vm6671_vm1, %v7188_v59, 0.0  ;;  %v7982_v5 = vcombine.low %v7199_v53, %v7200_v55  ;;  %v9089_v53 = vpack.c.bf16 %v7103_v28, %v7102_v60  ;;  %v9123_v11 = vpack.c.bf16 %v7153_v21, %v7152_v32  ;;  %v7122_v3 = vld [vmem:[#allocation8 + $0x2d0] sm:$0xff] }
 0x9ee   : > { %7321 = vmatmul.mubr.f32.vlgmr.msra.gmra.mrb[94].mxu0 %v7977_v13  ;;  %9110 = vmatpush3.bf16.msra.mxu1 %v9109_v37  ;;  %v7984_v39 = vcombine.low %v7197_v42, %v7198_v56  ;;  %v7986_v9 = vcombine.low %v14326_v16, %v14338_v57  ;;  %v14348_v8 = vcombine.low %v7200_v55, %v7201_v0  ;;  %v7121_v37 = vld [vmem:[#allocation8 + $0x2c8] sm:$0xff]  ;;  %v7136_v13 = vld [vmem:[#allocation8 + $0x340] sm:$0xff]  ;;  %v7106_v55 = vld [vmem:[#allocation8 + $0x250] sm:$0xff] }
 0x9ef   : > { %9078 = vmatpush3.bf16.msra.mxu0 %v9077_v52  ;;  %9112 = vmatprep.subr.bf16.mxu1 %v9111_v15  ;;  %v7120_v52 = vld [vmem:[#allocation8 + $0x2c0] sm:$0xff]  ;;  %v9125_v40 = vpack.c.bf16 %v7137_v46, %v7136_v13  ;;  %v9093_v41 = vpack.c.bf16 %v7105_v48, %v7104_v12  ;;  %v9127_v26 = vpack.c.bf16 %v7155_v33, %v7154_v63  ;;  %v7138_v59 = vld [vmem:[#allocation8 + $0x350] sm:$0xff]  ;;  %v7165_v48 = vld [vmem:[#allocation8 + $0x428] sm:$0xff] }
 0x9f0   : > { %7325 = vmatprep.mubr.f32.mxu0 %v7984_v39  ;;  %7400 = vmatprep.mubr.f32.mxu1 %v7986_v9  ;;  %v9091_v15 = vpack.c.bf16 %v7121_v37, %v7120_v52  ;;  %v9095_v61 = vpack.c.bf16 %v7123_v23, %v7122_v3  ;;  %v9129_v9 = vpack.c.bf16 %v7139_v54, %v7138_v59  ;;  %v7110_v60 = vld [vmem:[#allocation8 + $0x270] sm:$0xff]  ;;  %v7203_v52 = vrot.slane %v14338_v57, 1  ;;  %v7169_v63 = vld [vmem:[#allocation8 + $0x448] sm:$0xff] }
 0x9f1   : > { %9080 = vmatprep.subr.bf16.mxu0 %v9079_v4  ;;  %7401 = vmatmul.mubr.f32.gmra.mrb[110].mxu1 %v14348_v8  ;;  %v7107_v4 = vld [vmem:[#allocation8 + $0x258] sm:$0xff]  ;;  %v9135_v35 = vpack.c.bf16 %v7159_v50, %v7158_v49  ;;  %v9105_v32 = vpack.c.bf16 %v7111_v1, %v7110_v60  ;;  %v7204_v37 = vrot.slane %v14338_v57, 2  ;;  %v7989_v47 = vcombine.low %v14338_v57, %v14105_v34  ;;  %v7170_v34 = vld [vmem:[#allocation8 + $0x450] sm:$0xff]  ;;  %v7173_v3 = vld [vmem:[#allocation8 + $0x468] sm:$0xff] }
 0x9f2   : > { %7326 = vmatmul.mubr.f32.gmra.mrb[96].mxu0 %v14334_v25  ;;  %9114 = vmatpush3.bf16.msra.mxu1 %v9113_v44  ;;  %v7156_v44 = vld [vmem:[#allocation8 + $0x3e0] sm:$0xff]  ;;  %v9097_v6 = vpack.c.bf16 %v7107_v4, %v7106_v55  ;;  %v7990_v12 = vcombine.low %v7203_v52, %v14108_v45  ;;  %v7987_v36 = vcombine.low %v7198_v56, %v7203_v52  ;;  %v7171_v57 = vld [vmem:[#allocation8 + $0x458] sm:$0xff]  ;;  %v7174_v23 = vld [vmem:[#allocation8 + $0x470] sm:$0xff] }
 0x9f3   : > { %9082 = vmatpush3.bf16.msra.mxu0 %v9081_v14  ;;  %7470 = vmatprep.mubr.f32.mxu0 %v7982_v5  ;;  %v9131_v24 = vpack.c.bf16 %v7157_v43, %v7156_v44  ;;  %v7108_v14 = vld [vmem:[#allocation8 + $0x260] sm:$0xff]  ;;  %v7127_v5 = vld [vmem:[#allocation8 + $0x2f8] sm:$0xff]  ;;  %v7988_v46 = vcombine.low %v7201_v0, %v7204_v37  ;;  %v9159_v16 = vpack.c.bf16 %v7171_v57, %v7170_v34 }
 0x9f4   : > { %7545 = vmatprep.mubr.f32.mxu1 %v7984_v39  ;;  %9084 = vmatprep.subr.bf16.mxu0 %v9083_v17  ;;  %v7125_v39 = vld [vmem:[#allocation8 + $0x2e8] sm:$0xff]  ;;  %v7168_v0 = vld [vmem:[#allocation8 + $0x440] sm:$0xff] }
 0x9f5   : > { %9116 = vmatprep.subr.bf16.mxu1 %v9115_v58  ;;  %v9099_v22 = vpack.c.bf16 %v7125_v39, %v7124_v29  ;;  %v7109_v17 = vld [vmem:[#allocation8 + $0x268] sm:$0xff]  ;;  %v9133_v58 = vpack.c.bf16 %v7141_v31, %v7140_v27  ;;  %v9155_v33 = vpack.c.bf16 %v7169_v63, %v7168_v0  ;;  %v7172_v56 = vld [vmem:[#allocation8 + $0x460] sm:$0xff] }
 0x9f6   : > { %9118 = vmatpush3.bf16.msra.mxu1 %v9117_v51  ;;  %v9101_v38 = vpack.c.bf16 %v7109_v17, %v7108_v14  ;;  %v7142_v51 = vld [vmem:[#allocation8 + $0x370] sm:$0xff] }
 0x9f7   : > { %9086 = vmatpush3.bf16.msra.mxu0 %v9085_v7  ;;  %9120 = vmatprep.subr.bf16.mxu1 %v9119_v18  ;;  %v7143_v7 = vld [vmem:[#allocation8 + $0x378] sm:$0xff]  ;;  %v9103_v18 = vpack.c.bf16 %v7127_v5, %v7126_v20 }
 0x9f8   : > { %9088 = vmatprep.subr.bf16.mxu0 %v9087_v30  ;;  %v7161_v30 = vld [vmem:[#allocation8 + $0x408] sm:$0xff]  ;;  %v9137_v28 = vpack.c.bf16 %v7143_v7, %v7142_v51 }
 0x9f9   : > { %v9139_v21 = vpack.c.bf16 %v7161_v30, %v7160_v62 }
 0x9fa   : > { %9122 = vmatpush3.bf16.msra.mxu1 %v9121_v10  ;;  %v7162_v10 = vld [vmem:[#allocation8 + $0x410] sm:$0xff] }
 0x9fb   : > { %9090 = vmatpush3.bf16.msra.mxu0 %v9089_v53  ;;  %9124 = vmatprep.subr.bf16.mxu1 %v9123_v11  ;;  %v7163_v53 = vld [vmem:[#allocation8 + $0x418] sm:$0xff]  ;;  %v7981_v11 = vcombine.low %v7196_v2, %v7197_v42  ;;  %v7166_v2 = vld [vmem:[#allocation8 + $0x430] sm:$0xff] }
 0x9fc   : > { %9092 = vmatprep.subr.bf16.mxu0 %v9091_v15  ;;  %v9143_v13 = vpack.c.bf16 %v7163_v53, %v7162_v10  ;;  %v7164_v15 = vld [vmem:[#allocation8 + $0x420] sm:$0xff]  ;;  %v7167_v42 = vld [vmem:[#allocation8 + $0x438] sm:$0xff] }
 0x9fd   : > { %v9147_v45 = vpack.c.bf16 %v7165_v48, %v7164_v15 }
 0x9fe   : > { %9126 = vmatpush3.bf16.msra.mxu1 %v9125_v40  ;;  %v7175_v40 = vld [vmem:[#allocation8 + $0x478] sm:$0xff] }
 0x9ff   : > { %9094 = vmatpush3.bf16.msra.mxu0 %v9093_v41  ;;  %9128 = vmatprep.subr.bf16.mxu1 %v9127_v26  ;;  %v9167_v41 = vpack.c.bf16 %v7175_v40, %v7174_v23  ;;  %v7239_v26 = vcombine.low %v7204_v37, %v14266_v19 }
 0xa00   : > { %9096 = vmatprep.subr.bf16.mxu0 %v9095_v61 }
 0xa02   : > { %9130 = vmatpush3.bf16.msra.mxu1 %v9129_v9 }
 0xa03   : > { %9098 = vmatpush3.bf16.msra.mxu0 %v9097_v6  ;;  %9132 = vmatprep.subr.bf16.mxu1 %v9131_v24 }
 0xa04   : > { %9100 = vmatprep.subr.bf16.mxu0 %v9099_v22 }
 0xa06   : > { %9134 = vmatpush3.bf16.msra.mxu1 %v9133_v58 }
 0xa07   : > { %9102 = vmatpush3.bf16.msra.mxu0 %v9101_v38  ;;  %9136 = vmatprep.subr.bf16.mxu1 %v9135_v35 }
 0xa08   : > { %9104 = vmatprep.subr.bf16.mxu0 %v9103_v18 }
 0xa0a   : > { %9138 = vmatpush3.bf16.msra.mxu1 %v9137_v28 }
 0xa0b   : > { %9106 = vmatpush3.bf16.msra.mxu0 %v9105_v32 }
 0xa0c   : > { %9140 = vmatprep.subr.bf16.mxu0 %v9139_v21 }
 0xa0d   : > { %7546 = vmatmul.mubr.f32.vlgmr.msra.gmra.mrb[112].mxu1 %v14334_v25  ;;  %v9151_v25 = vpack.c.bf16 %v7167_v42, %v7166_v2 }
 0xa0e   : > { %7471 = vmatmul.mubr.f32.vlgmr.msra.gmra.mrb[98].mxu0 %v7981_v11  ;;  %7550 = vmatprep.mubr.f32.mxu1 %v7990_v12 }
 0xa0f   : > { %7475 = vmatprep.mubr.f32.mxu0 %v7988_v46  ;;  %9142 = vmatpush3.bf16.msra.mxu0 %v9139_v21 }
 0xa10   : > { %9144 = vmatprep.subr.bf16.mxu0 %v9143_v13 }
 0xa11   : > { %7551 = vmatmul.mubr.f32.gmra.mrb[114].mxu1 %v7989_v47 }
 0xa12   : > { %7476 = vmatmul.mubr.f32.gmra.mrb[100].mxu0 %v7987_v36 }
 0xa13   : > { %9146 = vmatpush3.bf16.msra.mxu0 %v9143_v13  ;;  %8744 = vmatprep.mubr.f32.mxu0 %v14348_v8  ;;  %v9163_v8 = vpack.c.bf16 %v7173_v3, %v7172_v56 }
 0xa14   : > { %9148 = vmatprep.subr.bf16.mxu0 %v9147_v45 }
 0xa17   : > { %9150 = vmatpush3.bf16.msra.mxu0 %v9147_v45 }
 0xa18   : > { %9152 = vmatprep.subr.bf16.mxu0 %v9151_v25 }
 0xa1b   : > { %9154 = vmatpush3.bf16.msra.mxu0 %v9151_v25 }
 0xa1c   : > { %9156 = vmatprep.subr.bf16.mxu0 %v9155_v33 }
 0xa1f   : > { %9158 = vmatpush3.bf16.msra.mxu0 %v9155_v33 }
 0xa20   : > { %9160 = vmatprep.subr.bf16.mxu0 %v9159_v16 }
 0xa23   : > { %9162 = vmatpush3.bf16.msra.mxu0 %v9159_v16 }
 0xa24   : > { %9164 = vmatprep.subr.bf16.mxu0 %v9163_v8 }
 0xa27   : > { %9166 = vmatpush3.bf16.msra.mxu0 %v9163_v8 }
 0xa28   : > { %9168 = vmatprep.subr.bf16.mxu0 %v9167_v41 }
 0xa2b   : > { %9170 = vmatpush3.bf16.msra.mxu0 %v9167_v41 }
 0xa2e   : > { %8745 = vmatmul.mubr.f32.vlgmr.msra.gmra.mrb[102].mxu0 %v7239_v26 }
 0xa2f   : > { %10071 = shalt.err (!%p10068_p0)
}
 0xa30   : > { %s10072_s15 = scalar_lea.hbm %s14373_s16, 1024  ;;  %s10076_s18 = scalar_lea.hbm %s14633_s14, 2048 }
 0xa31   : > { %p10073_p10 = scmp.ne.s32.totalorder %s14373_s16, %s10072_s15  ;;  %p10077_p4 = scmp.lt.u32.totalorder %s14373_s16, %s14633_s14 }
 0xa32   : > { %p10078_p12 = scmp.lt.u32.totalorder %s10076_s18, %s10072_s15  ;;  %p10080_p8 = scmp.lt.u32.totalorder %s10072_s15, %s14373_s16 }
 0xa33   : > { %p10074_p2 = pnand %p10073_p10, %p14634_p11 }
 0xa34   : > { %p10079_p7 = por %p10078_p12, %p10077_p4 }
 0xa35   : > { %p10075_p3 = pneg %p10074_p2 }
 0xa36   : > { %p10081_p13 = por %p10080_p8, %p10079_p7 }
 0xa38   : > { %p10082_p1 = pnand %p10081_p13, %p10075_p3 }
 0xa3a   : > { %10085 = shalt.err (!%p10082_p1)
}
 0xa3b   : > { %s10214_s25 = smov 128   ;;  %s14635_s21 = sld [smem:[#allocation43_spill]] }
 0xa3c   : > { %9188 = dma.vmem_to_hbm [thread:$0]  (%p14634_p11), %s14376_s20, 1024, %s14373_s16, %s14379_s30, %s10214_s25, %s10214_s25, %s10203_s28  }
 0xa3d   : > { %s7667_s27 = sshll.u32 %s12735_s24, 4  ;;  %s7644_s13 = scalar_lea.sflag [#allocation4], %s12687_s12  ;;  %s14414_s27 = int_to_ptr.vmem [resolvable:$true] %s7667_s27 }
 0xa3e   : > { %s10086_s0 = scalar_lea.vmem %s14414_s27, 4096  ;;  %s10215_s1 = smov [#allocation10]  }
 0xa3f   : > { %p10087_p6 = scmp.ne.s32.totalorder %s14414_s27, %s10086_s0  ;;  %s10090_s16 = sshll.u32 %s10215_s1, 4  ;;  %s10091_s16 = int_to_ptr.vmem [resolvable:$false] %s10090_s16 }
 0xa40   : > { %s10092_s20 = scalar_lea.vmem %s10091_s16, 8192  ;;  %p10093_p0 = scmp.lt.s32.totalorder %s14414_s27, %s10091_s16 }
 0xa41   : > { %s14636_s17 = smov %s14635_s21  ;;  %s14411_s18 = scalar_lea.hbm %s14635_s21, %s8003_s23 }
 0xa42   : > { %p10088_p9 = pnand %p10087_p6, %p14634_p11  ;;  %p10094_p10 = scmp.lt.s32.totalorder %s10092_s20, %s10086_s0 }
 0xa44   : > { %p10089_p5 = pneg %p10088_p9  ;;  %p10095_p2 = por %p10094_p10, %p10093_p0 }
 0xa46   : > { %p10096_p3 = pnand %p10095_p2, %p10089_p5 }
 0xa48   : > { %10099 = shalt.err (!%p10096_p3)
}
 0xa49   : > { %s10100_s24 = scalar_lea.hbm %s14411_s18, 4096  ;;  %s10104_s1 = scalar_lea.hbm %s14636_s17, 8192 }
 0xa4a   : > { %p10101_p4 = scmp.ne.s32.totalorder %s14411_s18, %s10100_s24  ;;  %p10105_p8 = scmp.lt.u32.totalorder %s14411_s18, %s14636_s17 }
 0xa4b   : > { %p10106_p13 = scmp.lt.u32.totalorder %s10104_s1, %s10100_s24  ;;  %p10108_p6 = scmp.lt.u32.totalorder %s10100_s24, %s14411_s18 }
 0xa4c   : > { %p10102_p12 = pnand %p10101_p4, %p14634_p11 }
 0xa4d   : > { %p10107_p1 = por %p10106_p13, %p10105_p8 }
 0xa4e   : > { %p10103_p7 = pneg %p10102_p12 }
 0xa4f   : > { %p10109_p9 = por %p10108_p6, %p10107_p1 }
 0xa51   : > { %p10110_p5 = pnand %p10109_p9, %p10103_p7 }
 0xa53   : > { %10113 = shalt.err (!%p10110_p5)
}
 0xa54   : > { %9187 = dma.vmem_to_hbm [thread:$0]  (%p14634_p11), %s14414_s27, 4096, %s14411_s18, %s7644_s13, %s10214_s25, %s10214_s25, %s10203_s28  }
 0xa55   : > { %s14637_s20 = sld [smem:[#allocation42_spill]]  ;;  %s7877_s28 = sshll.u32 %s12687_s12, 4 }
 0xa56   : > { %s564_s25 = scalar_lea.vmem [#allocation13], %s7877_s28  ;;  %s8005_s27 = sshll.u32 %s10318_s22, 8 }
 0xa57   : > { %s7699_s18 = sshll.u32 %s564_s25, 4  ;;  %s14638_s24 = sld [smem:[#allocation45_spill]]  ;;  %s14448_s18 = int_to_ptr.vmem [resolvable:$true] %s7699_s18 }
 0xa58   : > { %s10114_s29 = scalar_lea.vmem %s14448_s18, 256  ;;  %s10216_s22 = smov [#allocation13]  }
 0xa59   : > { %p10115_p0 = scmp.ne.s32.totalorder %s14448_s18, %s10114_s29  ;;  %s10118_s1 = sshll.u32 %s10216_s22, 4  ;;  %s10119_s1 = int_to_ptr.vmem [resolvable:$false] %s10118_s1 }
 0xa5a   : > { %s10120_s15 = scalar_lea.vmem %s10119_s1, 512  ;;  %p10121_p3 = scmp.lt.s32.totalorder %s14448_s18, %s10119_s1 }
 0xa5b   : > { %v7976_v54 = vld [vmem:[%s14637_s20] ss:$0 sm:$0xff]  ;;  %p10116_p10 = pnand %p10115_p0, %p14634_p11  ;;  %p10122_p4 = scmp.lt.s32.totalorder %s10120_s15, %s10114_s29 }
 0xa5d   : > { %s14453_s23 = scalar_lea.hbm %s14638_s24, %s8005_s27  ;;  %p10117_p2 = pneg %p10116_p10 }
 0xa5e   : > { %p10123_p12 = por %p10122_p4, %p10121_p3 }
 0xa60   : > { %p10124_p7 = pnand %p10123_p12, %p10117_p2 }
 0xac0   : > { %v8431_v19 = vpop.f32.mrb[108].mxu1 }
 0xac1   : > { %v8393_v55 = vpop.f32.mrb[94].mxu0  ;;  %v8432_v59 = vpop.f32.mrb[109].mxu1 }
 0xac2   : > { %v8394_v61 = vpop.f32.mrb[95].mxu0  ;;  %v8433_v4 = vadd.f32 %v8432_v59, %v8431_v19 }
 0xac3   : > { %v8395_v44 = vadd.f32 %v8394_v61, %v8393_v55 }
 0xac4   : > { %v8434_v43 = vpop.f32.mrb[110].mxu1 }
 0xac5   : > { %v7323_v29 = vadd.f32 %v8395_v44, %v7976_v54  ;;  %v8396_v39 = vpop.f32.mrb[96].mxu0  ;;  %v8435_v9 = vpop.f32.mrb[111].mxu1 }
 0xac6   : > { %v8397_v6 = vpop.f32.mrb[97].mxu0  ;;  %v8436_v24 = vadd.f32 %v8435_v9, %v8434_v43 }
 0xac7   : > { %v7398_v14 = vadd.f32 %v8433_v4, %v7323_v29  ;;  %v8398_v27 = vadd.f32 %v8397_v6, %v8396_v39 }
 0xac9   : > { %v7328_v31 = vadd.f32 %v8398_v27, %v7976_v54 }
 0xacb   : > { %v7403_v22 = vadd.f32 %v8436_v24, %v7328_v31 }
 0xae0   : > { %v8507_v17 = vpop.f32.mrb[112].mxu1 }
 0xae1   : > { %v8469_v49 = vpop.f32.mrb[98].mxu0  ;;  %v8508_v50 = vpop.f32.mrb[113].mxu1 }
 0xae2   : > { %v8470_v20 = vpop.f32.mrb[99].mxu0  ;;  %v8509_v5 = vadd.f32 %v8508_v50, %v8507_v17 }
 0xae3   : > { %v8471_v58 = vadd.f32 %v8470_v20, %v8469_v49 }
 0xae4   : > { %v8510_v38 = vpop.f32.mrb[114].mxu1 }
 0xae5   : > { %v7473_v35 = vadd.f32 %v8471_v58, %v7398_v14  ;;  %v8472_v51 = vpop.f32.mrb[100].mxu0  ;;  %v8511_v7 = vpop.f32.mrb[115].mxu1 }
 0xae6   : > { %v8473_v18 = vpop.f32.mrb[101].mxu0  ;;  %v8512_v60 = vadd.f32 %v8511_v7, %v8510_v38 }
 0xae7   : > { %v8474_v1 = vadd.f32 %v8473_v18, %v8472_v51  ;;  %v7548_v62 = vadd.f32 %v8509_v5, %v7473_v35 }
 0xae9   : > { %v7478_v30 = vadd.f32 %v8474_v1, %v7403_v22 }
 0xaeb   : > { %v7553_v28 = vadd.f32 %v8512_v60, %v7478_v30 }
 0xb01   : > { %v8746_v32 = vpop.f32.mrb[102].mxu0 }
 0xb02   : > { %v7628_v21 = vadd.f32 %v8746_v32, %v7553_v28  ;;  %v7622_v52 = vpop.f32.mrb[103].mxu0 }
 0xb03   : > { %v7623_v37 = vadd.f32 %v7622_v52, %v7548_v62 }
 0xb04   : > { %v7632_v10 = vmax.f32 %v7628_v21, 0.0 }
 0xb05   : > { %v7631_v53 = vmax.f32 %v7623_v37, 0.0 }
 0xb06   : > { %v7636_v11 = vcombine.high %v7632_v10, %v7632_v10  ;;  %7641 = vst [vmem:[%s564_s25 + $0x8] sm:$0xf] %v7632_v10 }
 0xb07   : > { %v7635_v12 = vcombine.high %v7631_v53, %v7631_v53  ;;  %7639 = vst [vmem:[%s564_s25] sm:$0xf] %v7631_v53 }
 0xb08   : > { %7642 = vst [vmem:[%s564_s25 + $0xc] sm:$0xf] %v7636_v11 }
 0xb09   : > { %7640 = vst [vmem:[%s564_s25 + $0x4] sm:$0xf] %v7635_v12 }
 0xb0a   : > { %10127 = shalt.err (!%p10124_p7)
}
 0xb0b   : > { %s10128_s21 = scalar_lea.hbm %s14453_s23, 256  ;;  %s10132_s20 = scalar_lea.hbm %s14638_s24, 512 }
 0xb0c   : > { %p10129_p8 = scmp.ne.s32.totalorder %s14453_s23, %s10128_s21  ;;  %p10133_p6 = scmp.lt.u32.totalorder %s14453_s23, %s14638_s24 }
 0xb0d   : > { %p10134_p9 = scmp.lt.u32.totalorder %s10132_s20, %s10128_s21  ;;  %p10136_p0 = scmp.lt.u32.totalorder %s10128_s21, %s14453_s23 }
 0xb0e   : > { %p10130_p13 = pnand %p10129_p8, %p14634_p11 }
 0xb0f   : > { %p10135_p5 = por %p10134_p9, %p10133_p6 }
 0xb10   : > { %p10131_p1 = pneg %p10130_p13 }
 0xb11   : > { %p10137_p10 = por %p10136_p0, %p10135_p5 }
 0xb13   : > { %p10138_p2 = pnand %p10137_p10, %p10131_p1 }
 0xb15   : > { %10141 = shalt.err (!%p10138_p2)
}
 0xb16   : > { %s14639_s27 = smov 4   ;;  %s14640_s12 = smov 64  }
 0xb17   : > { %9189 = dma.vmem_to_hbm [thread:$0]  (%p14634_p11), %s14448_s18, 256, %s14453_s23, %s14379_s30, %s14640_s12, %s14640_s12, %s14639_s27  }
 0xb18 PF: > { %s14641_s13 = sld [smem:[#allocation21_spill]]  ;;  %s14642_s29 = sld [smem:[#allocation19_spill]] }
 0xb19   : > { %s14643_s22 = sld [smem:[#allocation25_spill]] }
 0xb1e   : > { %p9224_p3 = scmp.ge.s32.totalorder %s14641_s13, 2  ;;  %s7714_s1 = sand.u32 1, %s14642_s29  }
 0xb1f   : > { %p14644_p4 = scmp.ne.s32.totalorder %s14643_s22, 0  ;;  %s7715_s15 = scalar_lea.sflag [#allocation4], %s7714_s1 }
 0xb21   : > { %p9207_p12 = pnand %p9224_p3, %p14644_p4 }
 0xb23   : > { %10171 = dma.done.wait (!%p9207_p12), %s7715_s15, 4096  }
 0xb24   : > { %10173 = vsyncadd (!%p9207_p12), %s7715_s15, 4294963200  ;;  %s14645_s26 = sadd.s32 4294967294, %s14641_s13  }
 0xb25   : > { %s7723_s21 = sand.u32 1, %s14645_s26  }
 0xb26   : > { %s7724_s0 = scalar_lea.sflag [#allocation12], %s7723_s21 }
 0xb27   : > { %10175 = dma.done.wait (!%p9207_p12), %s7724_s0, 1280  }
 0xb28   : > { %10177 = vsyncadd (!%p9207_p12), %s7724_s0, 4294966016  ;;  %s14646_s21 = sld [smem:[#allocation22_spill]]  ;;  %s14647_s30 = sld [smem:[#allocation20_spill]] }
 0xb29   : > { %s14648_s20 = sld [smem:[#allocation23_spill]]  ;;  %s14649_s18 = smov %s10184_s19 }
 0xb2e   : > { %p32_p11 = scmp.ge.s32.totalorder %s14646_s21, 4   ;;  %s14650_s19 = smov %s14647_s30 }
 0xb30   :  { %34 = sbr.rel (!%p32_p11) target bundleno = 15 (0xf), region = 156 }
 0xb37   :  { %7738 = vsyncpa [#allocation3], 1 }
 0xb38   :  { %7740 = vsyncpa [#allocation3 + $0x1], 1 }
 0xb39   :  { %7741 = vsyncpa [#allocation6], 1 }
 0xb3a   :  { %7742 = vsyncpa [#allocation9], 1 }
 0xb3b   :  { %7743 = vsyncpa [#allocation4], 1 }
 0xb3c   :  { %7745 = vsyncpa [#allocation4 + $0x1], 1 }
 0xb3d   :  { %7746 = vsyncpa [#allocation12], 1 }
 0xb3e   :  { %7748 = vsyncpa [#allocation12 + $0x1], 1 }

</bundles_post_ra>
